<compile_context>
chip_gen: v5e
topology: v5e:2x2
jax: 0.10.0
libtpu: 0.0.40
codegen_flags: <defaults>
</compile_context>

<pallas_src>
import functools

import jax
import jax.numpy as jnp
from jax import lax
from jax.experimental import pallas as pl
from jax.experimental.pallas import tpu as pltpu

C_IN = 256     # latent feature width (MLP output 256; MLP input 256 + 1 pixel)
H = 784        # torch hidden width
H_PAD = 896    # 784 padded up to 7*128 -> lane-dense hidden activations / weights
BN_EPS = 1e-5


def _drnet_kernel(lat_ref, gy_ref, gexp_ref, eps_ref, scal_ref, L_in_ref,
                  w1a_ref, vecs_ref, w2_hbm, w3_hbm,
                  out_ref, L_ref,
                  w2_vmem, w3_vmem, dma_sem):
    """All T diffusion timesteps batched through one set of MXU matmuls.

    Every (T*B, .) array is laid out t-major / b-minor: row r corresponds to
    diffusion step t = r // B + 1 and batch sample b = r % B.
    """
    TB, C = gy_ref.shape
    HP = w1a_ref.shape[1]
    B = out_ref.shape[0]
    T = TB // B
    inv_b = 1.0 / float(B)

    # ---- kick off the big weight fetches; they overlap prologue + L1 + BN1 ----
    w2_cp = pltpu.make_async_copy(w2_hbm, w2_vmem, dma_sem.at[0])
    w3_cp = pltpu.make_async_copy(w3_hbm, w3_vmem, dma_sem.at[1])
    w2_cp.start()
    w3_cp.start()

    # ---- packed per-row scalars (columns of one (TB,128) array) ----
    sc = scal_ref[...]
    a_t = sc[:, 0:1]     # a_t
    a_tm = sc[:, 1:2]    # a_{t-1}
    sig = sc[:, 2:3]     # sigma_t
    lam = sc[:, 3:4]     # lambda_t
    pix = sc[:, 4:5]     # flat_img[:, t'-1]

    # ---- y_t and regression target, vectorized over all timesteps ----
    g_scaled = a_t * gy_ref[...]                    # a_t * g_cumsum[:, :, t'-1]
    eps_scaled = sig * eps_ref[...]                 # sigma_t * epsilon
    y = lat_ref[...] - g_scaled + eps_scaled        # (TB, C)
    # expected_y_t_minus - y_t  (latent_y_0 cancels)
    target = g_scaled - a_tm * gexp_ref[...] - eps_scaled

    # ---- packed (1, HP) vectors (rows of one (8, HP) array) ----
    vecs = vecs_ref[...]
    w1b = vecs[0:1, :]   # pixel row of W1
    b1 = vecs[1:2, :]
    g1 = vecs[2:3, :]
    be1 = vecs[3:4, :]
    b2 = vecs[4:5, :]
    g2 = vecs[5:6, :]
    be2 = vecs[6:7, :]
    b3 = vecs[7:8, :C]

    # ---- 0/1 group-sum / row-broadcast matrices, built in-kernel (VPU iota) ----
    t_i = lax.broadcasted_iota(jnp.int32, (T, TB), 0)
    r_i = lax.broadcasted_iota(jnp.int32, (T, TB), 1)
    gsum = ((r_i >= t_i * B) & (r_i < t_i * B + B)).astype(jnp.float32)   # (T, TB)
    r_j = lax.broadcasted_iota(jnp.int32, (TB, T), 0)
    t_j = lax.broadcasted_iota(jnp.int32, (TB, T), 1)
    gbc = ((r_j >= t_j * B) & (r_j < t_j * B + B)).astype(jnp.float32)    # (TB, T)

    def bn_relu(h, gamma, beta):
        # Per-timestep BatchNorm1d in train mode (biased batch statistics over
        # the B samples of each diffusion step) followed by ReLU.  Two fused
        # matmuls: one for [sum, sum-of-squares], one for the [scale, shift]
        # row-broadcast.  HIGHEST precision on the stats dot avoids the
        # E[x^2]-E[x]^2 cancellation being swamped by bf16 rounding.
        stats = jnp.dot(gsum, jnp.concatenate([h, h * h], axis=-1),
                        preferred_element_type=jnp.float32,
                        precision=lax.Precision.HIGHEST)                  # (T, 2*HP)
        mu = stats[:, :HP] * inv_b
        var = jnp.maximum(stats[:, HP:] * inv_b - mu * mu, 0.0)
        scale = gamma * lax.rsqrt(var + BN_EPS)                           # (T, HP)
        shift = beta - mu * scale                                         # (T, HP)
        bc = jnp.dot(gbc, jnp.concatenate([scale, shift], axis=-1),
                     preferred_element_type=jnp.float32)                  # (TB, 2*HP)
        return jnp.maximum(h * bc[:, :HP] + bc[:, HP:], 0.0)

    # ---- Linear(257, 784): cat((y, pixel), 1) @ W1 == y @ W1[:256] + pixel*W1[256] ----
    h = jnp.dot(y.astype(w1a_ref.dtype), w1a_ref[...],
                preferred_element_type=jnp.float32)
    h = h + pix * w1b + b1
    h = bn_relu(h, g1, be1)

    # ---- Linear(784, 784) + BN + ReLU  (wait only now for the w2 DMA) ----
    w2_cp.wait()
    h = jnp.dot(h.astype(w2_vmem.dtype), w2_vmem[...],
                preferred_element_type=jnp.float32) + b2
    h = bn_relu(h, g2, be2)

    # ---- Linear(784, 256)  (wait only now for the w3 DMA) ----
    w3_cp.wait()
    out = jnp.dot(h.astype(w3_vmem.dtype), w3_vmem[...],
                  preferred_element_type=jnp.float32) + b3                # (TB, C)

    # Only the last diffusion step's MLP output is returned by the module.
    out_ref[...] = out[TB - B:, :]

    # ---- lambda_t-weighted sum of per-step MSE losses, single reduce ----
    diff = out - target
    L_ref[...] = L_in_ref[...] + jnp.sum(lam * diff * diff, axis=(0, 1),
                                         keepdims=True) * (1.0 / (B * C))


def init_params(key):
    ks = jax.random.split(key, 3)
    p = {}
    # torch Linear stores [out, in]; we store [in, out] and compute x @ W.
    p["w1"] = jax.random.normal(ks[0], (C_IN + 1, H), jnp.float32) / jnp.sqrt(C_IN + 1.0)
    p["b1"] = jnp.zeros((1, H), jnp.float32)
    p["g1"] = jnp.ones((1, H), jnp.float32)
    p["be1"] = jnp.zeros((1, H), jnp.float32)
    p["w2"] = jax.random.normal(ks[1], (H, H), jnp.float32) / jnp.sqrt(float(H))
    p["b2"] = jnp.zeros((1, H), jnp.float32)
    p["g2"] = jnp.ones((1, H), jnp.float32)
    p["be2"] = jnp.zeros((1, H), jnp.float32)
    p["w3"] = jax.random.normal(ks[2], (H, C_IN), jnp.float32) / jnp.sqrt(float(H))
    p["b3"] = jnp.zeros((1, C_IN), jnp.float32)
    return p


def prepare_params(params):
    """One-time weight prep: pad hidden 784 -> 896 (lane-dense, exactly neutral:
    padded activation columns stay 0 through BN/ReLU and padded weight rows are
    0), cast matrices to bf16, and pack the small per-feature vectors into one
    (8, H_PAD) slab.  Hoisted out of the per-call path."""
    def padw(w):
        return jnp.pad(w, ((0, 0), (0, H_PAD - w.shape[1])))

    w1 = params["w1"]
    w1a = padw(w1[:C_IN, :]).astype(jnp.bfloat16)          # (256, 896) bf16
    w1b = padw(w1[C_IN:, :])                               # (1, 896) f32  (pixel row)
    vecs = jnp.concatenate(
        [w1b,
         padw(params["b1"]), padw(params["g1"]), padw(params["be1"]),
         padw(params["b2"]), padw(params["g2"]), padw(params["be2"]),
         padw(params["b3"])],                              # b3 padded; kernel uses [:256]
        axis=0)                                            # (8, 896) f32
    w2 = jnp.pad(params["w2"],
                 ((0, H_PAD - H), (0, H_PAD - H))).astype(jnp.bfloat16)   # (896, 896)
    w3 = jnp.pad(params["w3"], ((0, H_PAD - H), (0, 0))).astype(jnp.bfloat16)  # (896, 256)
    return {"w1a": w1a, "vecs": vecs, "w2": w2, "w3": w3}


@functools.partial(jax.jit, static_argnums=(0,))
def drnet_forward(T, g_cumsum, flat_img, L, prep, eps_noise):
    """T: python int (static); g_cumsum: [B, 256, T]; flat_img: [B, T]; L: scalar;
    prep: prepare_params(...) output; eps_noise: [T, B, 256] pre-drawn epsilon
    (already scaled by 0.1).  Returns (out, L) matching DRNet.forward with
    loss_fn = MSE(reduction='mean')."""
    B, C, Tg = g_cumsum.shape
    assert C == C_IN and Tg == T and eps_noise.shape == (T, B, C)
    TB = T * B

    # ---- host-side layout plumbing (pure indexing / transposes / tiling) ----
    g_t = jnp.transpose(g_cumsum, (2, 0, 1)).astype(jnp.float32)          # (T, B, C)
    idx = jnp.arange(T)
    # torch negative-index semantics: g_cumsum[:, :, t'-1] with t' = 0 (i.e.
    # t = T) wraps to index T-1; same for flat_img[:, t'-1].
    idx_y = (T - 2 - idx) % T          # t' - 1
    idx_exp = (T - 1) - idx            # t'

    lat2 = jnp.tile(g_t[T - 1], (T, 1))                                   # (TB, C)
    gy2 = g_t[idx_y].reshape(TB, C)
    gexp2 = g_t[idx_exp].reshape(TB, C)
    eps2 = eps_noise.astype(jnp.float32).reshape(TB, C)
    pix_flat = jnp.transpose(flat_img.astype(jnp.float32))[idx_y].reshape(TB)

    # per-timestep scalar schedule, one value per (t, b) row; packed into one
    # (TB, 128) array: cols = [a_t, a_{t-1}, sigma_t, lambda_t, pixel]
    tv = jnp.arange(1, T + 1, dtype=jnp.float32)
    a_t = (tv + 1.0) / (T + 1.0)
    a_tm = tv / (T + 1.0)
    sig = jnp.sqrt(a_t * (1.0 - a_t))
    lam = 1.0 / a_tm - 1.0 / a_t
    col = lambda v: jnp.repeat(v, B)
    scal = jnp.pad(jnp.stack([col(a_t), col(a_tm), col(sig), col(lam), pix_flat],
                             axis=1),
                   ((0, 0), (0, 128 - 5)))                                # (TB, 128)

    L_in = jnp.asarray(L, jnp.float32).reshape(1, 1)

    vmem = pl.BlockSpec(memory_space=pltpu.MemorySpace.VMEM)
    hbm = pl.BlockSpec(memory_space=pl.ANY)     # manual DMA inside the kernel

    out, L_out = pl.pallas_call(
        _drnet_kernel,
        out_shape=(jax.ShapeDtypeStruct((B, C_IN), jnp.float32),
                   jax.ShapeDtypeStruct((1, 1), jnp.float32)),
        in_specs=[vmem] * 8 + [hbm, hbm],
        out_specs=(vmem, vmem),
        scratch_shapes=[pltpu.VMEM((H_PAD, H_PAD), jnp.bfloat16),   # w2 landing buf
                        pltpu.VMEM((H_PAD, C_IN), jnp.bfloat16),    # w3 landing buf
                        pltpu.SemaphoreType.DMA((2,))],
    )(lat2, gy2, gexp2, eps2, scal, L_in,
      prep["w1a"], prep["vecs"], prep["w2"], prep["w3"])

    return out, L_out[0, 0]


if __name__ == "__main__":
    key = jax.random.PRNGKey(0)
    k_param, k_g, k_img, k_eps = jax.random.split(key, 4)

    T = 8
    B = 2
    params = init_params(k_param)
    prep = prepare_params(params)          # one-time pad/cast, outside the hot path
    g_cumsum = jax.random.normal(k_g, (B, C_IN, T), jnp.float32)
    flat_img = jax.random.normal(k_img, (B, T), jnp.float32)
    eps_noise = 0.1 * jax.random.normal(k_eps, (T, B, C_IN), jnp.float32)
    L0 = 0.0

    out, L = drnet_forward(T, g_cumsum, flat_img, L0, prep, eps_noise)
    out = jax.block_until_ready(out)
    L = jax.block_until_ready(L)

    assert out.shape == (B, C_IN) and out.dtype == jnp.float32
    assert bool(jnp.isfinite(out).all()) and bool(jnp.isfinite(L))
    print("KERNEL_OK")
</pallas_src>

<mosaic_0001>
module attributes {stable_mosaic.version = 11 : i64} {
  func.func @_drnet_kernel(%arg0: memref<16x256xf32, #tpu.memory_space<vmem>>, %arg1: memref<16x256xf32, #tpu.memory_space<vmem>>, %arg2: memref<16x256xf32, #tpu.memory_space<vmem>>, %arg3: memref<16x256xf32, #tpu.memory_space<vmem>>, %arg4: memref<16x128xf32, #tpu.memory_space<vmem>>, %arg5: memref<1x1xf32, #tpu.memory_space<vmem>>, %arg6: memref<256x896xbf16, #tpu.memory_space<vmem>>, %arg7: memref<8x896xf32, #tpu.memory_space<vmem>>, %arg8: memref<896x896xbf16, #tpu.memory_space<any>>, %arg9: memref<896x256xbf16, #tpu.memory_space<any>>, %arg10: memref<2x256xf32, #tpu.memory_space<vmem>>, %arg11: memref<1x1xf32, #tpu.memory_space<vmem>>, %arg12: memref<896x896xbf16, #tpu.memory_space<vmem>>, %arg13: memref<896x256xbf16, #tpu.memory_space<vmem>>, %arg14: memref<2x!tpu.dma_semaphore, #tpu.memory_space<semaphore_mem>>) attributes {dimension_semantics = [], scalar_prefetch = 0 : i64, scratch_operands = 3 : i64, tpu.core_type = #tpu.core_type<tc>} {
    %c0_i32 = arith.constant 0 : i32
    %0 = tpu.memref_slice %arg14[%c0_i32] : memref<2x!tpu.dma_semaphore, #tpu.memory_space<semaphore_mem>> -> memref<1x!tpu.dma_semaphore, #tpu.memory_space<semaphore_mem>>
    %1 = tpu.memref_squeeze %0 : memref<1x!tpu.dma_semaphore, #tpu.memory_space<semaphore_mem>> -> memref<!tpu.dma_semaphore, #tpu.memory_space<semaphore_mem>>
    tpu.enqueue_dma source(%arg8 : memref<896x896xbf16, #tpu.memory_space<any>>) target(%arg12 : memref<896x896xbf16, #tpu.memory_space<vmem>>) target_semaphore(%1 : memref<!tpu.dma_semaphore, #tpu.memory_space<semaphore_mem>>)
    %c1_i32 = arith.constant 1 : i32
    %2 = tpu.memref_slice %arg14[%c1_i32] : memref<2x!tpu.dma_semaphore, #tpu.memory_space<semaphore_mem>> -> memref<1x!tpu.dma_semaphore, #tpu.memory_space<semaphore_mem>>
    %3 = tpu.memref_squeeze %2 : memref<1x!tpu.dma_semaphore, #tpu.memory_space<semaphore_mem>> -> memref<!tpu.dma_semaphore, #tpu.memory_space<semaphore_mem>>
    tpu.enqueue_dma source(%arg9 : memref<896x256xbf16, #tpu.memory_space<any>>) target(%arg13 : memref<896x256xbf16, #tpu.memory_space<vmem>>) target_semaphore(%3 : memref<!tpu.dma_semaphore, #tpu.memory_space<semaphore_mem>>)
    %c0 = arith.constant 0 : index
    %c0_0 = arith.constant 0 : index
    %4 = vector.load %arg4[%c0, %c0_0] : memref<16x128xf32, #tpu.memory_space<vmem>>, vector<16x128xf32>
    %5 = vector.extract_strided_slice %4 {offsets = [0, 0], sizes = [16, 1], strides = [1, 1]} : vector<16x128xf32> to vector<16x1xf32>
    %6 = vector.extract_strided_slice %4 {offsets = [0, 1], sizes = [16, 1], strides = [1, 1]} : vector<16x128xf32> to vector<16x1xf32>
    %7 = vector.extract_strided_slice %4 {offsets = [0, 2], sizes = [16, 1], strides = [1, 1]} : vector<16x128xf32> to vector<16x1xf32>
    %8 = vector.extract_strided_slice %4 {offsets = [0, 3], sizes = [16, 1], strides = [1, 1]} : vector<16x128xf32> to vector<16x1xf32>
    %9 = vector.extract_strided_slice %4 {offsets = [0, 4], sizes = [16, 1], strides = [1, 1]} : vector<16x128xf32> to vector<16x1xf32>
    %c0_1 = arith.constant 0 : index
    %c0_2 = arith.constant 0 : index
    %10 = vector.load %arg1[%c0_1, %c0_2] : memref<16x256xf32, #tpu.memory_space<vmem>>, vector<16x256xf32>
    %11 = vector.broadcast %5 : vector<16x1xf32> to vector<16x256xf32>
    %12 = arith.mulf %11, %10 : vector<16x256xf32>
    %c0_3 = arith.constant 0 : index
    %c0_4 = arith.constant 0 : index
    %13 = vector.load %arg3[%c0_3, %c0_4] : memref<16x256xf32, #tpu.memory_space<vmem>>, vector<16x256xf32>
    %14 = vector.broadcast %7 : vector<16x1xf32> to vector<16x256xf32>
    %15 = arith.mulf %14, %13 : vector<16x256xf32>
    %c0_5 = arith.constant 0 : index
    %c0_6 = arith.constant 0 : index
    %16 = vector.load %arg0[%c0_5, %c0_6] : memref<16x256xf32, #tpu.memory_space<vmem>>, vector<16x256xf32>
    %17 = arith.subf %16, %12 : vector<16x256xf32>
    %18 = arith.addf %17, %15 : vector<16x256xf32>
    %c0_7 = arith.constant 0 : index
    %c0_8 = arith.constant 0 : index
    %19 = vector.load %arg2[%c0_7, %c0_8] : memref<16x256xf32, #tpu.memory_space<vmem>>, vector<16x256xf32>
    %20 = vector.broadcast %6 : vector<16x1xf32> to vector<16x256xf32>
    %21 = arith.mulf %20, %19 : vector<16x256xf32>
    %22 = arith.subf %12, %21 : vector<16x256xf32>
    %23 = arith.subf %22, %15 : vector<16x256xf32>
    %c0_9 = arith.constant 0 : index
    %c0_10 = arith.constant 0 : index
    %24 = vector.load %arg7[%c0_9, %c0_10] : memref<8x896xf32, #tpu.memory_space<vmem>>, vector<8x896xf32>
    %25 = vector.extract_strided_slice %24 {offsets = [0, 0], sizes = [1, 896], strides = [1, 1]} : vector<8x896xf32> to vector<1x896xf32>
    %26 = vector.extract_strided_slice %24 {offsets = [1, 0], sizes = [1, 896], strides = [1, 1]} : vector<8x896xf32> to vector<1x896xf32>
    %27 = vector.extract_strided_slice %24 {offsets = [2, 0], sizes = [1, 896], strides = [1, 1]} : vector<8x896xf32> to vector<1x896xf32>
    %28 = vector.extract_strided_slice %24 {offsets = [3, 0], sizes = [1, 896], strides = [1, 1]} : vector<8x896xf32> to vector<1x896xf32>
    %29 = vector.extract_strided_slice %24 {offsets = [4, 0], sizes = [1, 896], strides = [1, 1]} : vector<8x896xf32> to vector<1x896xf32>
    %30 = vector.extract_strided_slice %24 {offsets = [5, 0], sizes = [1, 896], strides = [1, 1]} : vector<8x896xf32> to vector<1x896xf32>
    %31 = vector.extract_strided_slice %24 {offsets = [6, 0], sizes = [1, 896], strides = [1, 1]} : vector<8x896xf32> to vector<1x896xf32>
    %32 = vector.extract_strided_slice %24 {offsets = [7, 0], sizes = [1, 256], strides = [1, 1]} : vector<8x896xf32> to vector<1x256xf32>
    %33 = tpu.iota {dimensions = array<i32: 0>} : vector<8x16xi32>
    %34 = tpu.iota {dimensions = array<i32: 1>} : vector<8x16xi32>
    %c2_i32 = arith.constant 2 : i32
    %35 = vector.broadcast %c2_i32 : i32 to vector<8x16xi32>
    %36 = arith.muli %33, %35 : vector<8x16xi32>
    %37 = arith.cmpi sge, %34, %36 : vector<8x16xi32>
    %c2_i32_11 = arith.constant 2 : i32
    %38 = vector.broadcast %c2_i32_11 : i32 to vector<8x16xi32>
    %39 = arith.muli %33, %38 : vector<8x16xi32>
    %c2_i32_12 = arith.constant 2 : i32
    %40 = vector.broadcast %c2_i32_12 : i32 to vector<8x16xi32>
    %41 = arith.addi %39, %40 : vector<8x16xi32>
    %42 = arith.cmpi slt, %34, %41 : vector<8x16xi32>
    %43 = arith.andi %37, %42 : vector<8x16xi1>
    %44 = arith.extui %43 : vector<8x16xi1> to vector<8x16xi32>
    %45 = arith.sitofp %44 : vector<8x16xi32> to vector<8x16xf32>
    %46 = tpu.iota {dimensions = array<i32: 0>} : vector<16x8xi32>
    %47 = tpu.iota {dimensions = array<i32: 1>} : vector<16x8xi32>
    %c2_i32_13 = arith.constant 2 : i32
    %48 = vector.broadcast %c2_i32_13 : i32 to vector<16x8xi32>
    %49 = arith.muli %47, %48 : vector<16x8xi32>
    %50 = arith.cmpi sge, %46, %49 : vector<16x8xi32>
    %c2_i32_14 = arith.constant 2 : i32
    %51 = vector.broadcast %c2_i32_14 : i32 to vector<16x8xi32>
    %52 = arith.muli %47, %51 : vector<16x8xi32>
    %c2_i32_15 = arith.constant 2 : i32
    %53 = vector.broadcast %c2_i32_15 : i32 to vector<16x8xi32>
    %54 = arith.addi %52, %53 : vector<16x8xi32>
    %55 = arith.cmpi slt, %46, %54 : vector<16x8xi32>
    %56 = arith.andi %50, %55 : vector<16x8xi1>
    %57 = arith.extui %56 : vector<16x8xi1> to vector<16x8xi32>
    %58 = arith.sitofp %57 : vector<16x8xi32> to vector<16x8xf32>
    %59 = arith.truncf %18 : vector<16x256xf32> to vector<16x256xbf16>
    %c0_16 = arith.constant 0 : index
    %c0_17 = arith.constant 0 : index
    %60 = vector.load %arg6[%c0_16, %c0_17] : memref<256x896xbf16, #tpu.memory_space<vmem>>, vector<256x896xbf16>
    %cst = arith.constant dense<0.000000e+00> : vector<16x896xf32>
    %61 = tpu.matmul %59, %60, %cst {dimension_numbers = #tpu.dot_dimension_numbers<[1], [0], [0], [1], [0, 0, 1, 1], [], []>} : vector<16x256xbf16>, vector<256x896xbf16>, vector<16x896xf32> -> vector<16x896xf32>
    %62 = vector.broadcast %9 : vector<16x1xf32> to vector<16x896xf32>
    %63 = vector.broadcast %25 : vector<1x896xf32> to vector<16x896xf32>
    %64 = arith.mulf %62, %63 : vector<16x896xf32>
    %65 = arith.addf %61, %64 : vector<16x896xf32>
    %66 = vector.broadcast %26 : vector<1x896xf32> to vector<16x896xf32>
    %67 = arith.addf %65, %66 : vector<16x896xf32>
    %68 = arith.mulf %67, %67 : vector<16x896xf32>
    %69 = tpu.concatenate %67, %68 in 1 : vector<16x896xf32>, vector<16x896xf32> -> vector<16x1792xf32>
    %cst_18 = arith.constant dense<0.000000e+00> : vector<8x1792xf32>
    %70 = tpu.matmul %45, %69, %cst_18 {dimension_numbers = #tpu.dot_dimension_numbers<[1], [0], [0], [1], [0, 0, 1, 1], [], []>, precision = #tpu.contract_precision<fp32>} : vector<8x16xf32>, vector<16x1792xf32>, vector<8x1792xf32> -> vector<8x1792xf32>
    %71 = vector.extract_strided_slice %70 {offsets = [0, 0], sizes = [8, 896], strides = [1, 1]} : vector<8x1792xf32> to vector<8x896xf32>
    %cst_19 = arith.constant 5.000000e-01 : f32
    %72 = vector.broadcast %cst_19 : f32 to vector<8x896xf32>
    %73 = arith.mulf %71, %72 : vector<8x896xf32>
    %74 = vector.extract_strided_slice %70 {offsets = [0, 896], sizes = [8, 896], strides = [1, 1]} : vector<8x1792xf32> to vector<8x896xf32>
    %cst_20 = arith.constant 5.000000e-01 : f32
    %75 = vector.broadcast %cst_20 : f32 to vector<8x896xf32>
    %76 = arith.mulf %74, %75 : vector<8x896xf32>
    %77 = arith.mulf %73, %73 : vector<8x896xf32>
    %78 = arith.subf %76, %77 : vector<8x896xf32>
    %cst_21 = arith.constant 0.000000e+00 : f32
    %79 = vector.broadcast %cst_21 : f32 to vector<8x896xf32>
    %80 = arith.maximumf %78, %79 : vector<8x896xf32>
    %cst_22 = arith.constant 9.99999974E-6 : f32
    %81 = vector.broadcast %cst_22 : f32 to vector<8x896xf32>
    %82 = arith.addf %80, %81 : vector<8x896xf32>
    %83 = math.rsqrt %82 : vector<8x896xf32>
    %84 = vector.broadcast %27 : vector<1x896xf32> to vector<8x896xf32>
    %85 = arith.mulf %84, %83 : vector<8x896xf32>
    %86 = arith.mulf %73, %85 : vector<8x896xf32>
    %87 = vector.broadcast %28 : vector<1x896xf32> to vector<8x896xf32>
    %88 = arith.subf %87, %86 : vector<8x896xf32>
    %89 = tpu.concatenate %85, %88 in 1 : vector<8x896xf32>, vector<8x896xf32> -> vector<8x1792xf32>
    %cst_23 = arith.constant dense<0.000000e+00> : vector<16x1792xf32>
    %90 = tpu.matmul %58, %89, %cst_23 {dimension_numbers = #tpu.dot_dimension_numbers<[1], [0], [0], [1], [0, 0, 1, 1], [], []>} : vector<16x8xf32>, vector<8x1792xf32>, vector<16x1792xf32> -> vector<16x1792xf32>
    %91 = vector.extract_strided_slice %90 {offsets = [0, 0], sizes = [16, 896], strides = [1, 1]} : vector<16x1792xf32> to vector<16x896xf32>
    %92 = arith.mulf %67, %91 : vector<16x896xf32>
    %93 = vector.extract_strided_slice %90 {offsets = [0, 896], sizes = [16, 896], strides = [1, 1]} : vector<16x1792xf32> to vector<16x896xf32>
    %94 = arith.addf %92, %93 : vector<16x896xf32>
    %cst_24 = arith.constant 0.000000e+00 : f32
    %95 = vector.broadcast %cst_24 : f32 to vector<16x896xf32>
    %96 = arith.maximumf %94, %95 : vector<16x896xf32>
    %c0_i32_25 = arith.constant 0 : i32
    %97 = tpu.memref_slice %arg14[%c0_i32_25] : memref<2x!tpu.dma_semaphore, #tpu.memory_space<semaphore_mem>> -> memref<1x!tpu.dma_semaphore, #tpu.memory_space<semaphore_mem>>
    %98 = tpu.memref_squeeze %97 : memref<1x!tpu.dma_semaphore, #tpu.memory_space<semaphore_mem>> -> memref<!tpu.dma_semaphore, #tpu.memory_space<semaphore_mem>>
    tpu.wait_dma2 semaphore(%98 : memref<!tpu.dma_semaphore, #tpu.memory_space<semaphore_mem>>) src(%arg8 : memref<896x896xbf16, #tpu.memory_space<any>>) dst(%arg12 : memref<896x896xbf16, #tpu.memory_space<vmem>>)
    %99 = arith.truncf %96 : vector<16x896xf32> to vector<16x896xbf16>
    %c0_26 = arith.constant 0 : index
    %c0_27 = arith.constant 0 : index
    %100 = vector.load %arg12[%c0_26, %c0_27] : memref<896x896xbf16, #tpu.memory_space<vmem>>, vector<896x896xbf16>
    %cst_28 = arith.constant dense<0.000000e+00> : vector<16x896xf32>
    %101 = tpu.matmul %99, %100, %cst_28 {dimension_numbers = #tpu.dot_dimension_numbers<[1], [0], [0], [1], [0, 0, 1, 1], [], []>} : vector<16x896xbf16>, vector<896x896xbf16>, vector<16x896xf32> -> vector<16x896xf32>
    %102 = vector.broadcast %29 : vector<1x896xf32> to vector<16x896xf32>
    %103 = arith.addf %101, %102 : vector<16x896xf32>
    %104 = arith.mulf %103, %103 : vector<16x896xf32>
    %105 = tpu.concatenate %103, %104 in 1 : vector<16x896xf32>, vector<16x896xf32> -> vector<16x1792xf32>
    %cst_29 = arith.constant dense<0.000000e+00> : vector<8x1792xf32>
    %106 = tpu.matmul %45, %105, %cst_29 {dimension_numbers = #tpu.dot_dimension_numbers<[1], [0], [0], [1], [0, 0, 1, 1], [], []>, precision = #tpu.contract_precision<fp32>} : vector<8x16xf32>, vector<16x1792xf32>, vector<8x1792xf32> -> vector<8x1792xf32>
    %107 = vector.extract_strided_slice %106 {offsets = [0, 0], sizes = [8, 896], strides = [1, 1]} : vector<8x1792xf32> to vector<8x896xf32>
    %cst_30 = arith.constant 5.000000e-01 : f32
    %108 = vector.broadcast %cst_30 : f32 to vector<8x896xf32>
    %109 = arith.mulf %107, %108 : vector<8x896xf32>
    %110 = vector.extract_strided_slice %106 {offsets = [0, 896], sizes = [8, 896], strides = [1, 1]} : vector<8x1792xf32> to vector<8x896xf32>
    %cst_31 = arith.constant 5.000000e-01 : f32
    %111 = vector.broadcast %cst_31 : f32 to vector<8x896xf32>
    %112 = arith.mulf %110, %111 : vector<8x896xf32>
    %113 = arith.mulf %109, %109 : vector<8x896xf32>
    %114 = arith.subf %112, %113 : vector<8x896xf32>
    %cst_32 = arith.constant 0.000000e+00 : f32
    %115 = vector.broadcast %cst_32 : f32 to vector<8x896xf32>
    %116 = arith.maximumf %114, %115 : vector<8x896xf32>
    %cst_33 = arith.constant 9.99999974E-6 : f32
    %117 = vector.broadcast %cst_33 : f32 to vector<8x896xf32>
    %118 = arith.addf %116, %117 : vector<8x896xf32>
    %119 = math.rsqrt %118 : vector<8x896xf32>
    %120 = vector.broadcast %30 : vector<1x896xf32> to vector<8x896xf32>
    %121 = arith.mulf %120, %119 : vector<8x896xf32>
    %122 = arith.mulf %109, %121 : vector<8x896xf32>
    %123 = vector.broadcast %31 : vector<1x896xf32> to vector<8x896xf32>
    %124 = arith.subf %123, %122 : vector<8x896xf32>
    %125 = tpu.concatenate %121, %124 in 1 : vector<8x896xf32>, vector<8x896xf32> -> vector<8x1792xf32>
    %cst_34 = arith.constant dense<0.000000e+00> : vector<16x1792xf32>
    %126 = tpu.matmul %58, %125, %cst_34 {dimension_numbers = #tpu.dot_dimension_numbers<[1], [0], [0], [1], [0, 0, 1, 1], [], []>} : vector<16x8xf32>, vector<8x1792xf32>, vector<16x1792xf32> -> vector<16x1792xf32>
    %127 = vector.extract_strided_slice %126 {offsets = [0, 0], sizes = [16, 896], strides = [1, 1]} : vector<16x1792xf32> to vector<16x896xf32>
    %128 = arith.mulf %103, %127 : vector<16x896xf32>
    %129 = vector.extract_strided_slice %126 {offsets = [0, 896], sizes = [16, 896], strides = [1, 1]} : vector<16x1792xf32> to vector<16x896xf32>
    %130 = arith.addf %128, %129 : vector<16x896xf32>
    %cst_35 = arith.constant 0.000000e+00 : f32
    %131 = vector.broadcast %cst_35 : f32 to vector<16x896xf32>
    %132 = arith.maximumf %130, %131 : vector<16x896xf32>
    %c1_i32_36 = arith.constant 1 : i32
    %133 = tpu.memref_slice %arg14[%c1_i32_36] : memref<2x!tpu.dma_semaphore, #tpu.memory_space<semaphore_mem>> -> memref<1x!tpu.dma_semaphore, #tpu.memory_space<semaphore_mem>>
    %134 = tpu.memref_squeeze %133 : memref<1x!tpu.dma_semaphore, #tpu.memory_space<semaphore_mem>> -> memref<!tpu.dma_semaphore, #tpu.memory_space<semaphore_mem>>
    tpu.wait_dma2 semaphore(%134 : memref<!tpu.dma_semaphore, #tpu.memory_space<semaphore_mem>>) src(%arg9 : memref<896x256xbf16, #tpu.memory_space<any>>) dst(%arg13 : memref<896x256xbf16, #tpu.memory_space<vmem>>)
    %135 = arith.truncf %132 : vector<16x896xf32> to vector<16x896xbf16>
    %c0_37 = arith.constant 0 : index
    %c0_38 = arith.constant 0 : index
    %136 = vector.load %arg13[%c0_37, %c0_38] : memref<896x256xbf16, #tpu.memory_space<vmem>>, vector<896x256xbf16>
    %cst_39 = arith.constant dense<0.000000e+00> : vector<16x256xf32>
    %137 = tpu.matmul %135, %136, %cst_39 {dimension_numbers = #tpu.dot_dimension_numbers<[1], [0], [0], [1], [0, 0, 1, 1], [], []>} : vector<16x896xbf16>, vector<896x256xbf16>, vector<16x256xf32> -> vector<16x256xf32>
    %138 = vector.broadcast %32 : vector<1x256xf32> to vector<16x256xf32>
    %139 = arith.addf %137, %138 : vector<16x256xf32>
    %140 = vector.extract_strided_slice %139 {offsets = [14, 0], sizes = [2, 256], strides = [1, 1]} : vector<16x256xf32> to vector<2x256xf32>
    %c0_40 = arith.constant 0 : index
    %c0_41 = arith.constant 0 : index
    %141 = vector.load %arg10[%c0_40, %c0_41] : memref<2x256xf32, #tpu.memory_space<vmem>>, vector<2x256xf32>
    tpu.vector_store %arg10[%c0_40, %c0_41], %140 {strides = array<i32>} : memref<2x256xf32, #tpu.memory_space<vmem>>, vector<2x256xf32>,
    %142 = arith.subf %139, %23 : vector<16x256xf32>
    %c0_42 = arith.constant 0 : index
    %c0_43 = arith.constant 0 : index
    %143 = vector.load %arg5[%c0_42, %c0_43] : memref<1x1xf32, #tpu.memory_space<vmem>>, vector<1x1xf32>
    %144 = vector.broadcast %8 : vector<16x1xf32> to vector<16x256xf32>
    %145 = arith.mulf %144, %142 : vector<16x256xf32>
    %146 = arith.mulf %145, %142 : vector<16x256xf32>
    %147 = vector.shape_cast %146 : vector<16x256xf32> to vector<1x16x256xf32>
    %cst_44 = arith.constant dense<0.000000e+00> : vector<1xf32>
    %148 = vector.multi_reduction <add>, %147, %cst_44 [1, 2] : vector<1x16x256xf32> to vector<1xf32>
    %149 = vector.shape_cast %148 : vector<1xf32> to vector<1x1x1xf32>
    %150 = vector.extract %149[0, 0, 0] : f32 from vector<1x1x1xf32>
    %151 = vector.broadcast %150 : f32 to vector<1x1xf32>
    %cst_45 = arith.constant 0.001953125 : f32
    %152 = vector.broadcast %cst_45 : f32 to vector<1x1xf32>
    %153 = arith.mulf %151, %152 : vector<1x1xf32>
    %154 = arith.addf %143, %153 : vector<1x1xf32>
    %c0_46 = arith.constant 0 : index
    %c0_47 = arith.constant 0 : index
    %155 = vector.load %arg11[%c0_46, %c0_47] : memref<1x1xf32, #tpu.memory_space<vmem>>, vector<1x1xf32>
    tpu.vector_store %arg11[%c0_46, %c0_47], %154 {strides = array<i32>} : memref<1x1xf32, #tpu.memory_space<vmem>>, vector<1x1xf32>,
    return
  }
}

</mosaic_0001>

<bundles_post_ra>
// kernel: drnet_forward.1
= control target key start
LH: loop header
LB: loop body
LE: loop exit
PB: predicated region body
PF: predicated region fallthrough
CT: control target
= control target key end

     0   :  { %s16096_s0 = inlined_call_operand.vmem [shape: f32[16,256], index: 0, kind: input, shape index: {}]   ;;  %s16097_s1 = inlined_call_operand.vmem [shape: f32[16,256], index: 1, kind: input, shape index: {}]   ;;  %s16098_s2 = inlined_call_operand.vmem [shape: f32[16,256], index: 2, kind: input, shape index: {}]   ;;  %s16099_s3 = inlined_call_operand.vmem [shape: f32[16,256], index: 3, kind: input, shape index: {}]   ;;  %s16100_s4 = inlined_call_operand.vmem [shape: f32[16,128], index: 4, kind: input, shape index: {}]   ;;  %s16101_s5 = inlined_call_operand.<no memory space> [shape: f32[1,1], index: 5, kind: input, shape index: {}]   ;;  %s16102_s6 = inlined_call_operand.hbm [shape: bf16[256,896], index: 6, kind: input, shape index: {}]   ;;  %s16103_s7 = inlined_call_operand.hbm [shape: f32[8,896], index: 7, kind: input, shape index: {}]   ;;  %s16104_s8 = inlined_call_operand.hbm [shape: bf16[896,896], index: 8, kind: input, shape index: {}]   ;;  %s16105_s9 = inlined_call_operand.hbm [shape: bf16[896,256], index: 9, kind: input, shape index: {}]   ;;  %s16106_s10 = inlined_call_operand.hbm [shape: f32[2,256], index: 10, kind: output, shape index: {0}]   ;;  %s16107_s11 = inlined_call_operand.hbm [shape: f32[1,1], index: 11, kind: output, shape index: {1}]  }
   0x1   :  { %v17_v0 = vstv %s16101_s5 }
   0x2   :  { %18 = vst [vmem:[#allocation5] sm:$0x1] %v17_v0 }
   0x3   :  { %19 = vsyncpa [#allocation7], 0 }
   0x4   :  { %20 = vsyncpa [#allocation10], 0 }
   0x5   :  { %21 = vsyncpa [#allocation8], 0 }
   0x6   :  { %22 = vsyncpa [#allocation13], 0  ;;  %s39_s21 = sshll.u32 %s16102_s6, 4  ;;  %s14242_s22 = smov [#allocation6]   ;;  %s40_s21 = int_to_ptr.hbm [resolvable:$true] %s39_s21 }
   0x7   :  { %s41_s23 = sshll.u32 %s14242_s22, 4  ;;  %s53_s26 = sshll.u32 %s16103_s7, 4  ;;  %s42_s23 = int_to_ptr.vmem [resolvable:$true] %s41_s23  ;;  %s54_s26 = int_to_ptr.hbm [resolvable:$true] %s53_s26 }
   0x8   :  { %s14243_s27 = smov 448   ;;  %s14244_s28 = smov 28  }
   0x9   :  { %47 = dma.hbm_to_vmem [thread:$0]  %s40_s21, 14336, %s42_s23, [#allocation7], %s14243_s27, %s14243_s27, %s14244_s28  }
   0xa   :  { %s14245_s5 = smov [#allocation9]  }
   0xb   :  { %s55_s29 = sshll.u32 %s14245_s5, 4  ;;  %s56_s29 = int_to_ptr.vmem [resolvable:$true] %s55_s29 }
   0xc   :  { %58 = dma.hbm_to_vmem [thread:$0]  %s54_s26, 896, %s56_s29, [#allocation10]  }
   0xd   :  { %14230 = dma.done.wait [#allocation7], 14336  }
   0xe   :  { %14231 = vsyncadd [#allocation7], 4294952960 }
   0xf   :  { %14232 = dma.done.wait [#allocation10], 896  }
  0x10   :  { %14233 = vsyncadd [#allocation10], 4294966400  ;;  %v14246_v1 = vmov 2   ;;  %v14247_v2 = vmov 0   ;;  %v14328_v3 = vld [vmem:[%s16100_s4] sm:$0xff]  ;;  %v14335_v17 = vld [vmem:[%s16100_s4 + $0x8] sm:$0xff] }
  0x11   :  { %14045 = vset.pattern.permute.xlu1 %v14246_v1  ;;  %14044 = vset.pattern.permute.xlu0 %v14247_v2  ;;  %16137 = vst [vmem:[#allocation26_spill] sm:$0xff] %v14328_v3  ;;  %v11004_v4 = vld [vmem:[#allocation6 + $0x188] sm:$0xf]  ;;  %v13464_v5 = vld [vmem:[#allocation6 + $0x1a0] sm:$0xf0]  ;;  %v14248_v0 = vmov 1  }
  0x12   :  { %119 = vperm.xlu1 %14045, %v14328_v3   ;;  %102 = vperm.xlu0 %14044, %v14328_v3   ;;  %v11228_v6 = vld [vmem:[#allocation6 + $0x348] sm:$0xf]  ;;  %v13520_v7 = vld [vmem:[#allocation6 + $0x360] sm:$0xf0]  ;;  %v11005_v8 = vor.u32 %v13464_v5, %v11004_v4  ;;  %v13461_v10 = vld [vmem:[#allocation6 + $0x18c] sm:$0xf] }
  0x13   :  { %v11229_v9 = vor.u32 %v13520_v7, %v11228_v6  ;;  %v11006_v11 = vld [vmem:[#allocation6 + $0x1a4] sm:$0xf0]  ;;  %v13517_v12 = vld [vmem:[#allocation6 + $0x34c] sm:$0xf]  ;;  %v10976_v15 = vld [vmem:[#allocation6 + $0x150] sm:$0xf] }
  0x14   :  { %v11009_v13 = vor.u32 %v13461_v10, %v11006_v11  ;;  %v11230_v14 = vld [vmem:[#allocation6 + $0x364] sm:$0xf0]  ;;  %v13457_v16 = vld [vmem:[#allocation6 + $0x168] sm:$0xf0]  ;;  %16138 = vst [vmem:[#allocation27_spill] sm:$0xff] %v14335_v17  ;;  %932 = vmatpush.bf16.msra.mxu0 %v11005_v8  ;;  %vm1163_vm3 = vcmask 130048  }
  0x15   :  { %946 = vmatpush.bf16.msra.mxu1 %v11229_v9  ;;  %v11233_v18 = vor.u32 %v13517_v12, %v11230_v14  ;;  %v10977_v19 = vor.u32 %v13457_v16, %v10976_v15  ;;  %v11200_v20 = vld [vmem:[#allocation6 + $0x310] sm:$0xf]  ;;  %v13513_v21 = vld [vmem:[#allocation6 + $0x328] sm:$0xf0]  ;;  %v13454_v22 = vld [vmem:[#allocation6 + $0x154] sm:$0xf] }
  0x16   :  { %960 = vmatpush.bf16.msra.mxu2 %v11009_v13  ;;  %v11201_v23 = vor.u32 %v13513_v21, %v11200_v20  ;;  %v10978_v24 = vld [vmem:[#allocation6 + $0x16c] sm:$0xf0]  ;;  %v13510_v25 = vld [vmem:[#allocation6 + $0x314] sm:$0xf]  ;;  %v10948_v29 = vld [vmem:[#allocation6 + $0x118] sm:$0xf] }
  0x17   :  { %v11202_v26 = vld [vmem:[#allocation6 + $0x32c] sm:$0xf0]  ;;  %974 = vmatpush.bf16.msra.mxu3 %v11233_v18  ;;  %v10981_v27 = vor.u32 %v13454_v22, %v10978_v24  ;;  %v13450_v30 = vld [vmem:[#allocation6 + $0x130] sm:$0xf0]  ;;  %v11172_v31 = vld [vmem:[#allocation6 + $0x2d8] sm:$0xf] }
  0x18   :  { %v11205_v28 = vor.u32 %v13510_v25, %v11202_v26  ;;  %v13506_v32 = vld [vmem:[#allocation6 + $0x2f0] sm:$0xf0]  ;;  %v13447_v33 = vld [vmem:[#allocation6 + $0x11c] sm:$0xf]  ;;  %v10950_v34 = vld [vmem:[#allocation6 + $0x134] sm:$0xf0]  ;;  %933 = vmatpush.bf16.msra.mxu0 %v10977_v19  ;;  %v10949_v35 = vor.u32 %v13450_v30, %v10948_v29 }
  0x19   :  { %947 = vmatpush.bf16.msra.mxu1 %v11201_v23  ;;  %v11173_v36 = vor.u32 %v13506_v32, %v11172_v31  ;;  %v13503_v37 = vld [vmem:[#allocation6 + $0x2dc] sm:$0xf]  ;;  %v11174_v38 = vld [vmem:[#allocation6 + $0x2f4] sm:$0xf0]  ;;  %v10920_v39 = vld [vmem:[#allocation6 + $0xe0] sm:$0xf]  ;;  %v10953_v43 = vor.u32 %v13447_v33, %v10950_v34 }
  0x1a   :  { %123 = vperm.xlu1 %14045, %v14335_v17   ;;  %107 = vperm.xlu0 %14044, %v14335_v17   ;;  %v13443_v40 = vld [vmem:[#allocation6 + $0xf8] sm:$0xf0]  ;;  %v11144_v41 = vld [vmem:[#allocation6 + $0x2a0] sm:$0xf]  ;;  %v11177_v44 = vor.u32 %v13503_v37, %v11174_v38  ;;  %v13440_v45 = vld [vmem:[#allocation6 + $0xe4] sm:$0xf] }
  0x1b   :  { %v13499_v42 = vld [vmem:[#allocation6 + $0x2b8] sm:$0xf0]  ;;  %961 = vmatpush.bf16.msra.mxu2 %v10981_v27  ;;  %975 = vmatpush.bf16.msra.mxu3 %v11205_v28  ;;  %v10922_v46 = vld [vmem:[#allocation6 + $0xfc] sm:$0xf0]  ;;  %v10921_v47 = vor.u32 %v13443_v40, %v10920_v39  ;;  %v13496_v49 = vld [vmem:[#allocation6 + $0x2a4] sm:$0xf] }
  0x1c   :  { %934 = vmatpush.bf16.msra.mxu0 %v10949_v35  ;;  %v11145_v48 = vor.u32 %v13499_v42, %v11144_v41  ;;  %v11146_v50 = vld [vmem:[#allocation6 + $0x2bc] sm:$0xf0]  ;;  %v10892_v51 = vld [vmem:[#allocation6 + $0xa8] sm:$0xf]  ;;  %v13436_v52 = vld [vmem:[#allocation6 + $0xc0] sm:$0xf0]  ;;  %v10925_v55 = vor.u32 %v13440_v45, %v10922_v46 }
  0x1d   :  { %948 = vmatpush.bf16.msra.mxu1 %v11173_v36  ;;  %v11116_v53 = vld [vmem:[#allocation6 + $0x268] sm:$0xf]  ;;  %v13492_v54 = vld [vmem:[#allocation6 + $0x280] sm:$0xf0]  ;;  %v11149_v56 = vor.u32 %v13496_v49, %v11146_v50  ;;  %v13433_v57 = vld [vmem:[#allocation6 + $0xac] sm:$0xf]  ;;  %v10893_v59 = vor.u32 %v13436_v52, %v10892_v51 }
  0x1e   :  { %v10894_v58 = vld [vmem:[#allocation6 + $0xc4] sm:$0xf0]  ;;  %v11117_v60 = vor.u32 %v13492_v54, %v11116_v53  ;;  %v13489_v61 = vld [vmem:[#allocation6 + $0x26c] sm:$0xf]  ;;  %v10864_v63 = vld [vmem:[#allocation6 + $0x70] sm:$0xf] }
  0x1f   :  { %962 = vmatpush.bf16.msra.mxu2 %v10953_v43  ;;  %976 = vmatpush.bf16.msra.mxu3 %v11177_v44  ;;  %v11118_v62 = vld [vmem:[#allocation6 + $0x284] sm:$0xf0]  ;;  %v13429_v1 = vld [vmem:[#allocation6 + $0x88] sm:$0xf0]  ;;  %v11088_v2 = vld [vmem:[#allocation6 + $0x230] sm:$0xf]  ;;  %v10897_v5 = vor.u32 %v13433_v57, %v10894_v58 }
  0x20   :  { %935 = vmatpush.bf16.msra.mxu0 %v10921_v47  ;;  %v13485_v4 = vld [vmem:[#allocation6 + $0x248] sm:$0xf0]  ;;  %v11121_v6 = vor.u32 %v13489_v61, %v11118_v62  ;;  %v13426_v7 = vld [vmem:[#allocation6 + $0x74] sm:$0xf]  ;;  %v10866_v8 = vld [vmem:[#allocation6 + $0x8c] sm:$0xf0]  ;;  %v10865_v9 = vor.u32 %v13429_v1, %v10864_v63 }
  0x21   :  { %949 = vmatpush.bf16.msra.mxu1 %v11145_v48  ;;  %v11089_v10 = vor.u32 %v13485_v4, %v11088_v2  ;;  %v13482_v11 = vld [vmem:[#allocation6 + $0x234] sm:$0xf]  ;;  %v11090_v12 = vld [vmem:[#allocation6 + $0x24c] sm:$0xf0]  ;;  %v10836_v13 = vld [vmem:[#allocation6 + $0x38] sm:$0xf]  ;;  %v10869_v18 = vor.u32 %v13426_v7, %v10866_v8 }
  0x22   :  { %14048 = vset.pattern.permute.xlu1 %v14248_v0  ;;  %14047 = vset.pattern.permute.xlu0 %v14248_v0  ;;  %v13422_v14 = vld [vmem:[#allocation6 + $0x50] sm:$0xf0]  ;;  %v11060_v15 = vld [vmem:[#allocation6 + $0x1f8] sm:$0xf]  ;;  %v11093_v19 = vor.u32 %v13482_v11, %v11090_v12  ;;  %v13419_v20 = vld [vmem:[#allocation6 + $0x3c] sm:$0xf] }
  0x23   :  { %151 = vperm.xlu1 %14048, %v14335_v17   ;;  %147 = vperm.xlu0 %14047, %v14328_v3   ;;  %v13478_v16 = vld [vmem:[#allocation6 + $0x210] sm:$0xf0]  ;;  %v10838_v21 = vld [vmem:[#allocation6 + $0x54] sm:$0xf0]  ;;  %v13475_v22 = vld [vmem:[#allocation6 + $0x1fc] sm:$0xf]  ;;  %v10837_v23 = vor.u32 %v13422_v14, %v10836_v13 }
  0x24   :  { %963 = vmatpush.bf16.msra.mxu2 %v10925_v55  ;;  %977 = vmatpush.bf16.msra.mxu3 %v11149_v56  ;;  %v11061_v24 = vor.u32 %v13478_v16, %v11060_v15  ;;  %v11062_v25 = vld [vmem:[#allocation6 + $0x214] sm:$0xf0]  ;;  %v10808_v26 = vld [vmem:[#allocation6] sm:$0xf]  ;;  %v13415_v27 = vld [vmem:[#allocation6 + $0x18] sm:$0xf0]  ;;  %v10841_v34 = vor.u32 %v13419_v20, %v10838_v21 }
  0x25   :  { %936 = vmatpush.bf16.msra.mxu0 %v10893_v59  ;;  %950 = vmatpush.bf16.msra.mxu1 %v11117_v60  ;;  %v11032_v28 = vld [vmem:[#allocation6 + $0x1c0] sm:$0xf]  ;;  %v13471_v29 = vld [vmem:[#allocation6 + $0x1d8] sm:$0xf0]  ;;  %v11012_v30 = vld [vmem:[#allocation6 + $0x190] sm:$0xf]  ;;  %v11065_v35 = vor.u32 %v13475_v22, %v11062_v25  ;;  %v10809_v39 = vor.u32 %v13415_v27, %v10808_v26 }
  0x26   :  { %v13465_v31 = vld [vmem:[#allocation6 + $0x1a8] sm:$0xf0]  ;;  %v11236_v32 = vld [vmem:[#allocation6 + $0x350] sm:$0xf]  ;;  %v13412_v36 = vld [vmem:[#allocation6 + $0x4] sm:$0xf]  ;;  %v11033_v40 = vor.u32 %v13471_v29, %v11032_v28 }
  0x27   :  { %v13521_v33 = vld [vmem:[#allocation6 + $0x368] sm:$0xf0]  ;;  %v10810_v37 = vld [vmem:[#allocation6 + $0x1c] sm:$0xf0]  ;;  %v13468_v38 = vld [vmem:[#allocation6 + $0x1c4] sm:$0xf]  ;;  %v11013_v44 = vor.u32 %v13465_v31, %v11012_v30 }
  0x28   :  { %964 = vmatpush.bf16.msra.mxu2 %v10897_v5  ;;  %978 = vmatpush.bf16.msra.mxu3 %v11121_v6  ;;  %v11034_v41 = vld [vmem:[#allocation6 + $0x1dc] sm:$0xf0]  ;;  %v13462_v42 = vld [vmem:[#allocation6 + $0x194] sm:$0xf]  ;;  %v11014_v43 = vld [vmem:[#allocation6 + $0x1ac] sm:$0xf0]  ;;  %v11237_v45 = vor.u32 %v13521_v33, %v11236_v32  ;;  %v10813_v52 = vor.u32 %v13412_v36, %v10810_v37 }
  0x29   :  { %937 = vmatpush.bf16.msra.mxu0 %v10865_v9  ;;  %951 = vmatpush.bf16.msra.mxu1 %v11089_v10  ;;  %v13518_v46 = vld [vmem:[#allocation6 + $0x354] sm:$0xf]  ;;  %v11238_v47 = vld [vmem:[#allocation6 + $0x36c] sm:$0xf0]  ;;  %v10984_v48 = vld [vmem:[#allocation6 + $0x158] sm:$0xf]  ;;  %v11037_v53 = vor.u32 %v13468_v38, %v11034_v41  ;;  %v11017_v54 = vor.u32 %v13462_v42, %v11014_v43 }
  0x2a   :  { %v13458_v49 = vld [vmem:[#allocation6 + $0x170] sm:$0xf0]  ;;  %v11208_v50 = vld [vmem:[#allocation6 + $0x318] sm:$0xf]  ;;  %v11241_v55 = vor.u32 %v13518_v46, %v11238_v47  ;;  %v13455_v56 = vld [vmem:[#allocation6 + $0x15c] sm:$0xf] }
  0x2b   :  { %v13514_v51 = vld [vmem:[#allocation6 + $0x330] sm:$0xf0]  ;;  %v10986_v57 = vld [vmem:[#allocation6 + $0x174] sm:$0xf0]  ;;  %v10985_v58 = vor.u32 %v13458_v49, %v10984_v48  ;;  %v13511_v60 = vld [vmem:[#allocation6 + $0x31c] sm:$0xf] }
  0x2c   :  { %965 = vmatpush.bf16.msra.mxu2 %v10869_v18  ;;  %979 = vmatpush.bf16.msra.mxu3 %v11093_v19  ;;  %v11209_v59 = vor.u32 %v13514_v51, %v11208_v50  ;;  %v11210_v61 = vld [vmem:[#allocation6 + $0x334] sm:$0xf0]  ;;  %v10956_v62 = vld [vmem:[#allocation6 + $0x120] sm:$0xf]  ;;  %v13451_v63 = vld [vmem:[#allocation6 + $0x138] sm:$0xf0]  ;;  %v10989_v2 = vor.u32 %v13455_v56, %v10986_v57 }
  0x2d   :  { %938 = vmatpush.bf16.msra.mxu0 %v10837_v23  ;;  %952 = vmatpush.bf16.msra.mxu1 %v11061_v24  ;;  %v11180_v0 = vld [vmem:[#allocation6 + $0x2e0] sm:$0xf]  ;;  %v13507_v1 = vld [vmem:[#allocation6 + $0x2f8] sm:$0xf0]  ;;  %v11213_v4 = vor.u32 %v13511_v60, %v11210_v61  ;;  %v13448_v5 = vld [vmem:[#allocation6 + $0x124] sm:$0xf]  ;;  %v10957_v7 = vor.u32 %v13451_v63, %v10956_v62 }
  0x2e   :  { %v10958_v6 = vld [vmem:[#allocation6 + $0x13c] sm:$0xf0]  ;;  %v11181_v8 = vor.u32 %v13507_v1, %v11180_v0  ;;  %v13504_v9 = vld [vmem:[#allocation6 + $0x2e4] sm:$0xf]  ;;  %v10928_v11 = vld [vmem:[#allocation6 + $0xe8] sm:$0xf] }
  0x2f   :  { %v11182_v10 = vld [vmem:[#allocation6 + $0x2fc] sm:$0xf0]  ;;  %v13444_v12 = vld [vmem:[#allocation6 + $0x100] sm:$0xf0]  ;;  %v11152_v13 = vld [vmem:[#allocation6 + $0x2a8] sm:$0xf]  ;;  %v10961_v15 = vor.u32 %v13448_v5, %v10958_v6 }
  0x30   :  { %966 = vmatpush.bf16.msra.mxu2 %v10841_v34  ;;  %980 = vmatpush.bf16.msra.mxu3 %v11065_v35  ;;  %v13500_v14 = vld [vmem:[#allocation6 + $0x2c0] sm:$0xf0]  ;;  %v11185_v16 = vor.u32 %v13504_v9, %v11182_v10  ;;  %v10929_v18 = vor.u32 %v13444_v12, %v10928_v11  ;;  %v13441_v20 = vld [vmem:[#allocation6 + $0xec] sm:$0xf]  ;;  %v10930_v21 = vld [vmem:[#allocation6 + $0x104] sm:$0xf0] }
  0x31   :  { %939 = vmatpush.bf16.msra.mxu0 %v10809_v39  ;;  %953 = vmatpush.bf16.msra.mxu1 %v11033_v40  ;;  %v11153_v19 = vor.u32 %v13500_v14, %v11152_v13  ;;  %v13497_v22 = vld [vmem:[#allocation6 + $0x2ac] sm:$0xf]  ;;  %v10933_v23 = vor.u32 %v13441_v20, %v10930_v21  ;;  %v11154_v24 = vld [vmem:[#allocation6 + $0x2c4] sm:$0xf0]  ;;  %v10900_v26 = vld [vmem:[#allocation6 + $0xb0] sm:$0xf] }
  0x32   :  { %v11157_v25 = vor.u32 %v13497_v22, %v11154_v24  ;;  %v13437_v27 = vld [vmem:[#allocation6 + $0xc8] sm:$0xf0]  ;;  %v11124_v28 = vld [vmem:[#allocation6 + $0x270] sm:$0xf]  ;;  %v13434_v32 = vld [vmem:[#allocation6 + $0xb4] sm:$0xf] }
  0x33   :  { %v13493_v29 = vld [vmem:[#allocation6 + $0x288] sm:$0xf0]  ;;  %v10901_v30 = vor.u32 %v13437_v27, %v10900_v26  ;;  %v10902_v33 = vld [vmem:[#allocation6 + $0xcc] sm:$0xf0]  ;;  %v13490_v34 = vld [vmem:[#allocation6 + $0x274] sm:$0xf] }
  0x34   :  { %967 = vmatpush.bf16.msra.mxu2 %v10813_v52  ;;  %981 = vmatpush.bf16.msra.mxu3 %v11037_v53  ;;  %v11125_v31 = vor.u32 %v13493_v29, %v11124_v28  ;;  %v10905_v35 = vor.u32 %v13434_v32, %v10902_v33  ;;  %v11126_v36 = vld [vmem:[#allocation6 + $0x28c] sm:$0xf0]  ;;  %v10872_v38 = vld [vmem:[#allocation6 + $0x78] sm:$0xf]  ;;  %v13430_v39 = vld [vmem:[#allocation6 + $0x90] sm:$0xf0] }
  0x35   :  { %988 = vmatpush.bf16.msrb.mxu0 %v11013_v44  ;;  %1002 = vmatpush.bf16.msrb.mxu1 %v11237_v45  ;;  %v11129_v37 = vor.u32 %v13490_v34, %v11126_v36  ;;  %v11096_v40 = vld [vmem:[#allocation6 + $0x238] sm:$0xf]  ;;  %v10873_v41 = vor.u32 %v13430_v39, %v10872_v38  ;;  %v13486_v42 = vld [vmem:[#allocation6 + $0x250] sm:$0xf0]  ;;  %v13427_v44 = vld [vmem:[#allocation6 + $0x7c] sm:$0xf] }
  0x36   :  { %v11097_v43 = vor.u32 %v13486_v42, %v11096_v40  ;;  %v10874_v45 = vld [vmem:[#allocation6 + $0x94] sm:$0xf0]  ;;  %v13483_v46 = vld [vmem:[#allocation6 + $0x23c] sm:$0xf]  ;;  %v10844_v50 = vld [vmem:[#allocation6 + $0x40] sm:$0xf] }
  0x37   :  { %v10877_v47 = vor.u32 %v13427_v44, %v10874_v45  ;;  %v11098_v48 = vld [vmem:[#allocation6 + $0x254] sm:$0xf0]  ;;  %v13423_v51 = vld [vmem:[#allocation6 + $0x58] sm:$0xf0]  ;;  %v11068_v52 = vld [vmem:[#allocation6 + $0x200] sm:$0xf] }
  0x38   :  { %1016 = vmatpush.bf16.msrb.mxu2 %v11017_v54  ;;  %1030 = vmatpush.bf16.msrb.mxu3 %v11241_v55  ;;  %v11101_v49 = vor.u32 %v13483_v46, %v11098_v48  ;;  %v13479_v53 = vld [vmem:[#allocation6 + $0x218] sm:$0xf0]  ;;  %v10845_v54 = vor.u32 %v13423_v51, %v10844_v50  ;;  %v13420_v56 = vld [vmem:[#allocation6 + $0x44] sm:$0xf]  ;;  %v10846_v57 = vld [vmem:[#allocation6 + $0x5c] sm:$0xf0] }
  0x39   :  { %989 = vmatpush.bf16.msrb.mxu0 %v10985_v58  ;;  %1003 = vmatpush.bf16.msrb.mxu1 %v11209_v59  ;;  %v11069_v55 = vor.u32 %v13479_v53, %v11068_v52  ;;  %v13476_v58 = vld [vmem:[#allocation6 + $0x204] sm:$0xf]  ;;  %v10849_v59 = vor.u32 %v13420_v56, %v10846_v57  ;;  %v11070_v60 = vld [vmem:[#allocation6 + $0x21c] sm:$0xf0]  ;;  %v10816_v62 = vld [vmem:[#allocation6 + $0x8] sm:$0xf] }
  0x3a   :  { %v11073_v61 = vor.u32 %v13476_v58, %v11070_v60  ;;  %v13416_v63 = vld [vmem:[#allocation6 + $0x20] sm:$0xf0]  ;;  %v11040_v0 = vld [vmem:[#allocation6 + $0x1c8] sm:$0xf]  ;;  %v96_v13 = vld [vmem:[%s16097_s1] sm:$0xff]  ;;  %v14249_v36 = vmov 4  }
  0x3b   :  { %v10817_v1 = vor.u32 %v13416_v63, %v10816_v62  ;;  %v10818_v5 = vld [vmem:[#allocation6 + $0x24] sm:$0xf0]  ;;  %v97_v14 = vld [vmem:[%s16097_s1 + $0x8] sm:$0xff]  ;;  %v117_v27 = vld [vmem:[%s16099_s3 + $0x18] sm:$0xff]  ;;  %14046 = vset.pattern.permute.xlu2 %v14249_v36  ;;  %14049 = vset.pattern.permute.xlu0 %v14249_v36  ;;  %vm3540_vm10 = vcmask 64512   ;;  %s74_s19 = sshll.u32 %s16104_s8, 4  ;;  %s75_s19 = int_to_ptr.hbm [resolvable:$true] %s74_s19 }
  0x3c   :  { %1017 = vmatpush.bf16.msrb.mxu2 %v10989_v2  ;;  %1031 = vmatpush.bf16.msrb.mxu3 %v11213_v4  ;;  %v13472_v2 = vld [vmem:[#allocation6 + $0x1e0] sm:$0xf0]  ;;  %v13413_v4 = vld [vmem:[#allocation6 + $0xc] sm:$0xf]  ;;  %v11042_v9 = vld [vmem:[#allocation6 + $0x1e4] sm:$0xf0] }
  0x3d   :  { %990 = vmatpush.bf16.msrb.mxu0 %v10957_v7  ;;  %1004 = vmatpush.bf16.msrb.mxu1 %v11181_v8  ;;  %v11041_v6 = vor.u32 %v13472_v2, %v11040_v0  ;;  %v10821_v7 = vor.u32 %v13413_v4, %v10818_v5  ;;  %v13469_v8 = vld [vmem:[#allocation6 + $0x1cc] sm:$0xf]  ;;  %v131_v21 = vld [vmem:[%s16096_s0 + $0x8] sm:$0xff]  ;;  %v13466_v42 = vld [vmem:[#allocation6 + $0x1b0] sm:$0xf0]  ;;  %s14251_s20 = smov [#allocation2]  }
  0x3e   :  { %v11045_v10 = vor.u32 %v13469_v8, %v11042_v9  ;;  %v98_v22 = vld [vmem:[%s16097_s1 + $0x10] sm:$0xff]  ;;  %332 = vperm.xlu2 %14046, %v14335_v17   ;;  %v13522_v44 = vld [vmem:[#allocation6 + $0x370] sm:$0xf0]  ;;  %v13463_v45 = vld [vmem:[#allocation6 + $0x19c] sm:$0xf]  ;;  %s76_s21 = sshll.u32 %s14251_s20, 4  ;;  %s77_s21 = int_to_ptr.vmem [resolvable:$true] %s76_s21 }
  0x3f   :  { %v116_v24 = vld [vmem:[%s16099_s3 + $0x10] sm:$0xff]  ;;  %v11022_v46 = vld [vmem:[#allocation6 + $0x1b4] sm:$0xf0]  ;;  %v145_v52 = vld [vmem:[%s16098_s2 + $0x18] sm:$0xff]  ;;  %79 = dma.hbm_to_vmem [thread:$0]  %s75_s19, 50176, %s77_s21, [#allocation4] }
  0x40   :  { %1018 = vmatpush.bf16.msrb.mxu2 %v10961_v15  ;;  %1032 = vmatpush.bf16.msrb.mxu3 %v11185_v16  ;;  %v114_v15 = vld [vmem:[%s16099_s3] sm:$0xff]  ;;  %v115_v16 = vld [vmem:[%s16099_s3 + $0x8] sm:$0xff]  ;;  %v132_v29 = vld [vmem:[%s16096_s0 + $0x10] sm:$0xff]  ;;  %v11025_v2 = vor.u32 %v13463_v45, %v11022_v46  ;;  %s88_s24 = sshll.u32 %s16105_s9, 4  ;;  %s14252_s25 = smov [#allocation3]   ;;  %s89_s24 = int_to_ptr.hbm [resolvable:$true] %s88_s24 }
  0x41   :  { %991 = vmatpush.bf16.msrb.mxu0 %v10929_v18  ;;  %1005 = vmatpush.bf16.msrb.mxu1 %v11153_v19  ;;  %v130_v18 = vld [vmem:[%s16096_s0] sm:$0xff]  ;;  %v144_v51 = vld [vmem:[%s16098_s2 + $0x10] sm:$0xff]  ;;  %v11216_v57 = vld [vmem:[#allocation6 + $0x320] sm:$0xf]  ;;  %s90_s26 = sshll.u32 %s14252_s25, 4  ;;  %s91_s26 = int_to_ptr.vmem [resolvable:$true] %s90_s26 }
  0x42   :  { %v13519_v53 = vld [vmem:[#allocation6 + $0x35c] sm:$0xf]  ;;  %v10994_v5 = vld [vmem:[#allocation6 + $0x17c] sm:$0xf0]  ;;  %v11190_v36 = vld [vmem:[#allocation6 + $0x304] sm:$0xf0] }
  0x43   :  { %v13459_v56 = vld [vmem:[#allocation6 + $0x178] sm:$0xf0]  ;;  %v13501_v45 = vld [vmem:[#allocation6 + $0x2c8] sm:$0xf0]  ;;  %v10938_v46 = vld [vmem:[#allocation6 + $0x10c] sm:$0xf0] }
  0x44   :  { %1019 = vmatpush.bf16.msrb.mxu2 %v10933_v23  ;;  %1033 = vmatpush.bf16.msrb.mxu3 %v11157_v25  ;;  %v99_v23 = vld [vmem:[%s16097_s1 + $0x18] sm:$0xff]  ;;  %v13515_v58 = vld [vmem:[#allocation6 + $0x338] sm:$0xf0]  ;;  %93 = dma.hbm_to_vmem [thread:$0]  %s89_s24, 14336, %s91_s26, [#allocation4 + $0x1] }
  0x45   :  { %992 = vmatpush.bf16.msrb.mxu0 %v10901_v30  ;;  %1006 = vmatpush.bf16.msrb.mxu1 %v11125_v31  ;;  %v133_v30 = vld [vmem:[%s16096_s0 + $0x18] sm:$0xff]  ;;  %v142_v63 = vld [vmem:[%s16098_s2] sm:$0xff]  ;;  %v143_v0 = vld [vmem:[%s16098_s2 + $0x8] sm:$0xff] }
  0x46   :  { %328 = vperm.xlu2 %14046, %v14328_v3  }
  0x48   :  { %1020 = vmatpush.bf16.msrb.mxu2 %v10905_v35  ;;  %1034 = vmatpush.bf16.msrb.mxu3 %v11129_v37 }
  0x49   :  { %993 = vmatpush.bf16.msrb.mxu0 %v10873_v41  ;;  %1007 = vmatpush.bf16.msrb.mxu1 %v11097_v43  ;;  %v11020_v41 = vld [vmem:[#allocation6 + $0x198] sm:$0xf] }
  0x4a   :  { %v11244_v43 = vld [vmem:[#allocation6 + $0x358] sm:$0xf] }
  0x4b   :  { %v11245_v62 = vor.u32 %v13522_v44, %v11244_v43  ;;  %v11160_v44 = vld [vmem:[#allocation6 + $0x2b0] sm:$0xf] }
  0x4c   :  { %1021 = vmatpush.bf16.msrb.mxu2 %v10877_v47  ;;  %1035 = vmatpush.bf16.msrb.mxu3 %v11101_v49 }
  0x4d   :  { %994 = vmatpush.bf16.msrb.mxu0 %v10845_v54  ;;  %1008 = vmatpush.bf16.msrb.mxu1 %v11069_v55  ;;  %v11246_v54 = vld [vmem:[#allocation6 + $0x374] sm:$0xf0]  ;;  %v10992_v55 = vld [vmem:[#allocation6 + $0x160] sm:$0xf] }
  0x4e   :  { %v11249_v4 = vor.u32 %v13519_v53, %v11246_v54  ;;  %v11132_v53 = vld [vmem:[#allocation6 + $0x278] sm:$0xf]  ;;  %v13494_v54 = vld [vmem:[#allocation6 + $0x290] sm:$0xf0] }
  0x50   :  { %1022 = vmatpush.bf16.msrb.mxu2 %v10849_v59  ;;  %1036 = vmatpush.bf16.msrb.mxu3 %v11073_v61  ;;  %v11021_v61 = vor.u32 %v13466_v42, %v11020_v41  ;;  %v10936_v41 = vld [vmem:[#allocation6 + $0xf0] sm:$0xf]  ;;  %v13445_v42 = vld [vmem:[#allocation6 + $0x108] sm:$0xf0] }
  0x51   :  { %995 = vmatpush.bf16.msrb.mxu0 %v10817_v1  ;;  %1009 = vmatpush.bf16.msrb.mxu1 %v11041_v6  ;;  %v13456_v1 = vld [vmem:[#allocation6 + $0x164] sm:$0xf] }
  0x52   :  { %v13512_v6 = vld [vmem:[#allocation6 + $0x324] sm:$0xf] }
  0x54   :  { %1023 = vmatpush.bf16.msrb.mxu2 %v10821_v7  ;;  %1037 = vmatpush.bf16.msrb.mxu3 %v11045_v10  ;;  %v11218_v7 = vld [vmem:[#allocation6 + $0x33c] sm:$0xf0]  ;;  %v10993_v10 = vor.u32 %v13459_v56, %v10992_v55  ;;  %v13435_v55 = vld [vmem:[#allocation6 + $0xbc] sm:$0xf]  ;;  %v10910_v56 = vld [vmem:[#allocation6 + $0xd4] sm:$0xf0] }
  0x84   :  { %v120_v11 = vpop.permute.xlu1 %119  ;;  %v103_v12 = vpop.permute.xlu0 %102 }
  0x85   :  { %v14356_v19 = vmul.f32 %v103_v12, %v96_v13  ;;  %v14358_v20 = vmul.f32 %v103_v12, %v97_v14  ;;  %v14372_v25 = vmul.f32 %v120_v11, %v114_v15  ;;  %v14374_v26 = vmul.f32 %v120_v11, %v115_v16 }
  0x86   :  { %v11217_v11 = vor.u32 %v13515_v58, %v11216_v57  ;;  %v10997_v16 = vor.u32 %v13456_v1, %v10994_v5  ;;  %v13491_v57 = vld [vmem:[#allocation6 + $0x27c] sm:$0xf]  ;;  %v11134_v58 = vld [vmem:[#allocation6 + $0x294] sm:$0xf0]  ;;  %v10913_v1 = vor.u32 %v13435_v55, %v10910_v56  ;;  %v10972_v55 = vld [vmem:[#allocation6 + $0x130] sm:$0xf] }
  0x87   :  { %v134_v32 = vsub.f32 %v130_v18, %v14356_v19  ;;  %v135_v33 = vsub.f32 %v131_v21, %v14358_v20  ;;  %v11221_v18 = vor.u32 %v13512_v6, %v11218_v7  ;;  %v10964_v21 = vld [vmem:[#allocation6 + $0x128] sm:$0xf]  ;;  %v13487_v5 = vld [vmem:[#allocation6 + $0x258] sm:$0xf0]  ;;  %v13428_v6 = vld [vmem:[#allocation6 + $0x84] sm:$0xf] }
  0x88   :  { %v10882_v7 = vld [vmem:[#allocation6 + $0x9c] sm:$0xf0]  ;;  %v13453_v56 = vld [vmem:[#allocation6 + $0x148] sm:$0xf0] }
  0x89   :  { %v138_v47 = vadd.f32 %v134_v32, %v14372_v25  ;;  %v139_v48 = vadd.f32 %v135_v33, %v14374_v26  ;;  %v10966_v32 = vld [vmem:[#allocation6 + $0x144] sm:$0xf0]  ;;  %v13505_v33 = vld [vmem:[#allocation6 + $0x2ec] sm:$0xf] }
  0x8c   :  { %v124_v28 = vpop.permute.xlu1 %123  ;;  %v108_v31 = vpop.permute.xlu0 %107 }
  0x8d   :  { %v14387_v34 = vmul.f32 %v108_v31, %v98_v22  ;;  %v14389_v35 = vmul.f32 %v108_v31, %v99_v23  ;;  %v14392_v37 = vmul.f32 %v124_v28, %v116_v24  ;;  %v14394_v38 = vmul.f32 %v124_v28, %v117_v27  ;;  %v13452_v22 = vld [vmem:[#allocation6 + $0x140] sm:$0xf0]  ;;  %v11188_v28 = vld [vmem:[#allocation6 + $0x2e8] sm:$0xf] }
  0x8f   :  { %v136_v39 = vsub.f32 %v132_v29, %v14387_v34  ;;  %v137_v40 = vsub.f32 %v133_v30, %v14389_v35  ;;  %v13508_v29 = vld [vmem:[#allocation6 + $0x300] sm:$0xf0]  ;;  %v13449_v30 = vld [vmem:[#allocation6 + $0x12c] sm:$0xf] }
  0x90   :  { %v10969_v43 = vor.u32 %v13449_v30, %v10966_v32  ;;  %v13417_v30 = vld [vmem:[#allocation6 + $0x28] sm:$0xf0] }
  0x91   :  { %v140_v49 = vadd.f32 %v136_v39, %v14392_v37  ;;  %v141_v50 = vadd.f32 %v137_v40, %v14394_v38  ;;  %v11189_v40 = vor.u32 %v13508_v29, %v11188_v28  ;;  %v10824_v29 = vld [vmem:[#allocation6 + $0x10] sm:$0xf] }
  0x93   :  { %v14408_v59 = vpack.c.bf16 %v140_v49, %v138_v47  ;;  %v14410_v60 = vpack.c.bf16 %v141_v50, %v139_v48  ;;  %v13498_v47 = vld [vmem:[#allocation6 + $0x2b4] sm:$0xf]  ;;  %v11161_v48 = vor.u32 %v13501_v45, %v11160_v44  ;;  %v10908_v49 = vld [vmem:[#allocation6 + $0xb8] sm:$0xf]  ;;  %v11252_v44 = vld [vmem:[#allocation6 + $0x360] sm:$0xf] }
  0x94   :  { %v13438_v50 = vld [vmem:[#allocation6 + $0xd0] sm:$0xf0]  ;;  %v13523_v45 = vld [vmem:[#allocation6 + $0x378] sm:$0xf0] }
  0x95   :  { %v152_v8 = vpop.permute.xlu1 %151  ;;  %940 = vmatmul.bf16.vlgmr.msra.gmra.mxu0 %v14408_v59  ;;  %954 = vmatmul.bf16.vlgmr.msra.gmra.mxu1 %v14410_v60  ;;  %v148_v9 = vpop.permute.xlu0 %147 }
  0x96   :  { %v156_v12 = vmul.f32 %v152_v8, %v144_v51  ;;  %v157_v13 = vmul.f32 %v152_v8, %v145_v52  ;;  %968 = vmatmul.bf16.vlgmr.msra.gmra.mxu2 %v14408_v59  ;;  %982 = vmatmul.bf16.vlgmr.msra.gmra.mxu3 %v14410_v60  ;;  %v154_v14 = vmul.f32 %v148_v9, %v142_v63  ;;  %v10880_v63 = vld [vmem:[#allocation6 + $0x80] sm:$0xf]  ;;  %v13484_v8 = vld [vmem:[#allocation6 + $0x244] sm:$0xf] }
  0x97   :  { %1044 = vmatpush.bf16.msra.mxu0 %v11021_v61  ;;  %1058 = vmatpush.bf16.msra.mxu1 %v11245_v62  ;;  %v155_v15 = vmul.f32 %v148_v9, %v143_v0  ;;  %v10909_v61 = vor.u32 %v13438_v50, %v10908_v49  ;;  %v11133_v62 = vor.u32 %v13494_v54, %v11132_v53  ;;  %v13431_v0 = vld [vmem:[#allocation6 + $0x98] sm:$0xf0]  ;;  %v11106_v9 = vld [vmem:[#allocation6 + $0x25c] sm:$0xf0]  ;;  %v11000_v49 = vld [vmem:[#allocation6 + $0x168] sm:$0xf] }
  0x98   :  { %v160_v23 = vsub.f32 %v14387_v34, %v156_v12  ;;  %v161_v24 = vsub.f32 %v14389_v35, %v157_v13  ;;  %v158_v27 = vsub.f32 %v14356_v19, %v154_v14  ;;  %1072 = vmatpush.bf16.msra.mxu2 %v11025_v2  ;;  %1086 = vmatpush.bf16.msra.mxu3 %v11249_v4  ;;  %v11104_v4 = vld [vmem:[#allocation6 + $0x240] sm:$0xf]  ;;  %v10852_v12 = vld [vmem:[#allocation6 + $0x48] sm:$0xf]  ;;  %v13424_v13 = vld [vmem:[#allocation6 + $0x60] sm:$0xf0] }
  0x99   :  { %v159_v31 = vsub.f32 %v14358_v20, %v155_v15  ;;  %v10965_v20 = vor.u32 %v13452_v22, %v10964_v21  ;;  %v11137_v2 = vor.u32 %v13491_v57, %v11134_v58  ;;  %v10885_v14 = vor.u32 %v13428_v6, %v10882_v7  ;;  %v13421_v21 = vld [vmem:[#allocation6 + $0x4c] sm:$0xf]  ;;  %v10854_v22 = vld [vmem:[#allocation6 + $0x64] sm:$0xf0]  ;;  %v13460_v50 = vld [vmem:[#allocation6 + $0x180] sm:$0xf0] }
  0x9a   :  { %v14428_v39 = vsub.f32 %v160_v23, %v14392_v37  ;;  %v14431_v34 = vsub.f32 %v161_v24, %v14394_v38  ;;  %v14434_v19 = vsub.f32 %v158_v27, %v14372_v25  ;;  %v11193_v37 = vor.u32 %v13505_v33, %v11190_v36  ;;  %v13442_v38 = vld [vmem:[#allocation6 + $0xf4] sm:$0xf]  ;;  %v11162_v25 = vld [vmem:[#allocation6 + $0x2cc] sm:$0xf0]  ;;  %v13477_v23 = vld [vmem:[#allocation6 + $0x20c] sm:$0xf] }
  0x9b   :  { %v14437_v35 = vsub.f32 %v159_v31, %v14374_v26  ;;  %1045 = vmatpush.bf16.msra.mxu0 %v10993_v10  ;;  %1059 = vmatpush.bf16.msra.mxu1 %v11217_v11  ;;  %v10937_v26 = vor.u32 %v13445_v42, %v10936_v41  ;;  %v10941_v51 = vor.u32 %v13442_v38, %v10938_v46  ;;  %v11078_v24 = vld [vmem:[#allocation6 + $0x224] sm:$0xf0]  ;;  %v11048_v31 = vld [vmem:[#allocation6 + $0x1d0] sm:$0xf]  ;;  %v13473_v36 = vld [vmem:[#allocation6 + $0x1e8] sm:$0xf0] }
  0x9c   :  { %16139 = vst [vmem:[#allocation28_spill] sm:$0xff] %v14428_v39  ;;  %1073 = vmatpush.bf16.msra.mxu2 %v10997_v16  ;;  %1087 = vmatpush.bf16.msra.mxu3 %v11221_v18  ;;  %v11165_v52 = vor.u32 %v13498_v47, %v11162_v25  ;;  %v10881_v10 = vor.u32 %v13431_v0, %v10880_v63  ;;  %v11076_v16 = vld [vmem:[#allocation6 + $0x208] sm:$0xf]  ;;  %v13480_v18 = vld [vmem:[#allocation6 + $0x220] sm:$0xf0] }
  0x9d   :  { %16140 = vst [vmem:[#allocation29_spill] sm:$0xff] %v14431_v34  ;;  %v11105_v11 = vor.u32 %v13487_v5, %v11104_v4  ;;  %v11109_v15 = vor.u32 %v13484_v8, %v11106_v9  ;;  %v10853_v27 = vor.u32 %v13424_v13, %v10852_v12  ;;  %v11077_v28 = vor.u32 %v13480_v18, %v11076_v16  ;;  %v13470_v41 = vld [vmem:[#allocation6 + $0x1d4] sm:$0xf]  ;;  %v11050_v42 = vld [vmem:[#allocation6 + $0x1ec] sm:$0xf0] }
  0x9e   :  { %16141 = vst [vmem:[#allocation30_spill] sm:$0xff] %v14434_v19  ;;  %v10857_v32 = vor.u32 %v13421_v21, %v10854_v22  ;;  %v11081_v33 = vor.u32 %v13477_v23, %v11078_v24  ;;  %v10825_v38 = vor.u32 %v13417_v30, %v10824_v29  ;;  %v11049_v46 = vor.u32 %v13473_v36, %v11048_v31  ;;  %v11196_v57 = vld [vmem:[#allocation6 + $0x2f0] sm:$0xf]  ;;  %v13509_v58 = vld [vmem:[#allocation6 + $0x308] sm:$0xf0] }
  0x9f   :  { %16142 = vst [vmem:[#allocation31_spill] sm:$0xff] %v14437_v35  ;;  %1046 = vmatpush.bf16.msra.mxu0 %v10965_v20  ;;  %1060 = vmatpush.bf16.msra.mxu1 %v11189_v40  ;;  %v13414_v20 = vld [vmem:[#allocation6 + $0x14] sm:$0xf]  ;;  %v10826_v40 = vld [vmem:[#allocation6 + $0x2c] sm:$0xf0]  ;;  %v11053_v25 = vor.u32 %v13470_v41, %v11050_v42  ;;  %v11001_v53 = vor.u32 %v13460_v50, %v11000_v49  ;;  %v14451_v41 = vpop.permute.xlu2 %332 }
  0xa0   :  { %1074 = vmatpush.bf16.msra.mxu2 %v10969_v43  ;;  %1088 = vmatpush.bf16.msra.mxu3 %v11193_v37  ;;  %v11028_v43 = vld [vmem:[#allocation6 + $0x1a0] sm:$0xf]  ;;  %v13467_v37 = vld [vmem:[#allocation6 + $0x1b8] sm:$0xf0]  ;;  %v10829_v47 = vor.u32 %v13414_v20, %v10826_v40  ;;  %v10944_v63 = vld [vmem:[#allocation6 + $0xf8] sm:$0xf]  ;;  %v173_v20 = vlaneseq }
  0xa1   :  { %v13446_v0 = vld [vmem:[#allocation6 + $0x110] sm:$0xf0]  ;;  %v10916_v6 = vld [vmem:[#allocation6 + $0xc0] sm:$0xf]  ;;  %v13439_v7 = vld [vmem:[#allocation6 + $0xd8] sm:$0xf0] }
  0xa2   :  { %v10945_v4 = vor.u32 %v13446_v0, %v10944_v63  ;;  %v11140_v8 = vld [vmem:[#allocation6 + $0x280] sm:$0xf]  ;;  %v13495_v9 = vld [vmem:[#allocation6 + $0x298] sm:$0xf0]  ;;  %v10888_v12 = vld [vmem:[#allocation6 + $0x88] sm:$0xf] }
  0xa3   :  { %1047 = vmatpush.bf16.msra.mxu0 %v10937_v26  ;;  %1061 = vmatpush.bf16.msra.mxu1 %v11161_v48  ;;  %v11029_v26 = vor.u32 %v13467_v37, %v11028_v43  ;;  %v11253_v48 = vor.u32 %v13523_v45, %v11252_v44  ;;  %v13432_v13 = vld [vmem:[#allocation6 + $0xa0] sm:$0xf0]  ;;  %v10860_v21 = vld [vmem:[#allocation6 + $0x50] sm:$0xf]  ;;  %v13425_v22 = vld [vmem:[#allocation6 + $0x68] sm:$0xf0] }
  0xa4   :  { %1075 = vmatpush.bf16.msra.mxu2 %v10941_v51  ;;  %1089 = vmatpush.bf16.msra.mxu3 %v11165_v52  ;;  %v11224_v51 = vld [vmem:[#allocation6 + $0x328] sm:$0xf]  ;;  %v13516_v52 = vld [vmem:[#allocation6 + $0x340] sm:$0xf0]  ;;  %v10889_v16 = vor.u32 %v13432_v13, %v10888_v12  ;;  %v11084_v23 = vld [vmem:[#allocation6 + $0x210] sm:$0xf] }
  0xa5   :  { %996 = vmatmul.bf16.vlgmr.msrb.gmra.mxu0 %v14408_v59  ;;  %1010 = vmatmul.bf16.vlgmr.msrb.gmra.mxu1 %v14410_v60  ;;  %v11225_v54 = vor.u32 %v13516_v52, %v11224_v51  ;;  %v13481_v24 = vld [vmem:[#allocation6 + $0x228] sm:$0xf0]  ;;  %v10832_v29 = vld [vmem:[#allocation6 + $0x18] sm:$0xf]  ;;  %v13418_v30 = vld [vmem:[#allocation6 + $0x30] sm:$0xf0] }
  0xa6   :  { %1024 = vmatmul.bf16.vlgmr.msrb.gmra.mxu2 %v14408_v59  ;;  %1038 = vmatmul.bf16.vlgmr.msrb.gmra.mxu3 %v14410_v60  ;;  %v11056_v31 = vld [vmem:[#allocation6 + $0x1d8] sm:$0xf]  ;;  %v14449_v40 = vshrl.u32 %v173_v20, 7  ;;  %v14454_v43 = vand.u32 127, %v173_v20  ;;  %v14456_v44 = vld [vmem:[#allocation9] sm:$0xff]  ;;  %v14479_v0 = vld [vmem:[#allocation9 + $0x10] sm:$0xff] }
  0xa7   :  { %1048 = vmatpush.bf16.msra.mxu0 %v10909_v61  ;;  %1062 = vmatpush.bf16.msra.mxu1 %v11133_v62  ;;  %v10973_v61 = vor.u32 %v13453_v56, %v10972_v55  ;;  %v11197_v62 = vor.u32 %v13509_v58, %v11196_v57  ;;  %16143 = vst [vmem:[#allocation32_spill] sm:$0xff] %v14456_v44  ;;  %v14461_v45 = vpop.permute.xlu2 %328  ;;  %v1128_v49 = vperm.slane %v14456_v44, 1 }
  0xa8   :  { %1076 = vmatpush.bf16.msra.mxu2 %v10913_v1  ;;  %1090 = vmatpush.bf16.msra.mxu3 %v11137_v2  ;;  %v11168_v1 = vld [vmem:[#allocation6 + $0x2b8] sm:$0xf]  ;;  %v13502_v2 = vld [vmem:[#allocation6 + $0x2d0] sm:$0xf0]  ;;  %v177_v42 = vmul.u32 2, %v14449_v40 }
  0xa9   :  { %v11169_v5 = vor.u32 %v13502_v2, %v11168_v1 }
  0xaa   :  { %v179_v37 = vadd.s32 2, %v177_v42  ;;  %vm178_vm0 = vcmp.ge.s32.totalorder %v14454_v43, %v177_v42 }
  0xab   :  { %1049 = vmatpush.bf16.msra.mxu0 %v10881_v10  ;;  %1063 = vmatpush.bf16.msra.mxu1 %v11105_v11  ;;  %v10917_v10 = vor.u32 %v13439_v7, %v10916_v6  ;;  %v11141_v11 = vor.u32 %v13495_v9, %v11140_v8  ;;  %v337_v8 = vperm.slane %v14479_v0, 0 }
  0xac   :  { %1077 = vmatpush.bf16.msra.mxu2 %v10885_v14  ;;  %1091 = vmatpush.bf16.msra.mxu3 %v11109_v15  ;;  %v11112_v14 = vld [vmem:[#allocation6 + $0x248] sm:$0xf]  ;;  %v13488_v15 = vld [vmem:[#allocation6 + $0x260] sm:$0xf0]  ;;  %vm180_vm1 = vcmp.lt.s32.totalorder %v14454_v43, %v179_v37 }
  0xad   :  { %v11113_v18 = vor.u32 %v13488_v15, %v11112_v14  ;;  %vm181_vm2 = vmand %vm178_vm0, %vm180_vm1 }
  0xaf   :  { %1050 = vmatpush.bf16.msra.mxu0 %v10853_v27  ;;  %1064 = vmatpush.bf16.msra.mxu1 %v11077_v28  ;;  %v10861_v27 = vor.u32 %v13425_v22, %v10860_v21  ;;  %v11085_v28 = vor.u32 %v13481_v24, %v11084_v23  ;;  %v14497_v21 = vld [vmem:[#allocation9 + $0x18] sm:$0xff] }
  0xb0   :  { %1078 = vmatpush.bf16.msra.mxu2 %v10857_v32  ;;  %1092 = vmatpush.bf16.msra.mxu3 %v11081_v33  ;;  %v13474_v32 = vld [vmem:[#allocation6 + $0x1f0] sm:$0xf0]  ;;  %v10833_v33 = vor.u32 %v13418_v30, %v10832_v29  ;;  %16147 = vst [vmem:[#allocation36_spill] sm:$0xff] %v14497_v21 }
  0xb1   :  { %v11057_v36 = vor.u32 %v13474_v32, %v11056_v31 }
  0xb3   :  { %1051 = vmatpush.bf16.msra.mxu0 %v10825_v38  ;;  %1065 = vmatpush.bf16.msra.mxu1 %v11049_v46  ;;  %v16108_v38 = vmov 0.0  }
  0xb4   :  { %1079 = vmatpush.bf16.msra.mxu2 %v10829_v47  ;;  %1093 = vmatpush.bf16.msra.mxu3 %v11053_v25  ;;  %v14465_v46 = vsel %vm181_vm2, 1.0, %v16108_v38  ;;  %v14467_v47 = vld [vmem:[#allocation9 + $0x8] sm:$0xff] }
  0xb5   :  { %16144 = vst [vmem:[#allocation33_spill] sm:$0xff] %v14465_v46  ;;  %v1165_v50 = vsel %vm1163_vm3, %v14465_v46, 0  ;;  %v336_v51 = vperm.slane %v14467_v47, 0  ;;  %v1129_v2 = vperm.slane %v14467_v47, 1 }
  0xb6   :  { %1052 = vmatmul.bf16.vlgmr.msra.gmra.mxu0 %v14408_v59  ;;  %1066 = vmatmul.bf16.vlgmr.msra.gmra.mxu1 %v14410_v60 }
  0xb7   :  { %1100 = vmatpush.bf16.msrb.mxu0 %v11029_v26  ;;  %1114 = vmatpush.bf16.msrb.mxu1 %v11253_v48  ;;  %v343_v55 = vmul.f32 %v336_v51, %v14461_v45  ;;  %v350_v13 = vmul.f32 %v336_v51, %v14451_v41 }
  0xb8   :  { %1080 = vmatmul.bf16.vlgmr.msra.gmra.mxu2 %v14408_v59  ;;  %1094 = vmatmul.bf16.vlgmr.msra.gmra.mxu3 %v14410_v60 }
  0xbb   :  { %1101 = vmatpush.bf16.msrb.mxu0 %v11001_v53  ;;  %1115 = vmatpush.bf16.msrb.mxu1 %v11225_v54  ;;  %v14473_v53 = vsub.f32 %v1165_v50, %v1165_v50 }
  0xbd   :  { %16145 = vst [vmem:[#allocation34_spill] sm:$0xff] %v14473_v53  ;;  %v14482_v1 = vand.u32 4294901760, %v14473_v53 }
  0xbf   :  { %1102 = vmatpush.bf16.msrb.mxu0 %v10973_v61  ;;  %1116 = vmatpush.bf16.msrb.mxu1 %v11197_v62  ;;  %16146 = vst [vmem:[#allocation35_spill] sm:$0xff] %v14482_v1  ;;  %v1188_v9 = vsub.f32 %v14473_v53, %v14482_v1 }
  0xc3   :  { %1103 = vmatpush.bf16.msrb.mxu0 %v10945_v4  ;;  %1117 = vmatpush.bf16.msrb.mxu1 %v11169_v5 }
  0xc7   :  { %1104 = vmatpush.bf16.msrb.mxu0 %v10917_v10  ;;  %1118 = vmatpush.bf16.msrb.mxu1 %v11141_v11 }
  0xcb   :  { %1105 = vmatpush.bf16.msrb.mxu0 %v10889_v16  ;;  %1119 = vmatpush.bf16.msrb.mxu1 %v11113_v18  ;;  %v344_v16 = vmul.f32 %v337_v8, %v14461_v45 }
  0xcf   :  { %1106 = vmatpush.bf16.msrb.mxu0 %v10861_v27  ;;  %1120 = vmatpush.bf16.msrb.mxu1 %v11085_v28  ;;  %v14499_v27 = vand.u32 4294901760, %v1188_v9 }
  0xd1   :  { %16148 = vst [vmem:[#allocation37_spill] sm:$0xff] %v14499_v27 }
  0xd3   :  { %1107 = vmatpush.bf16.msrb.mxu0 %v10833_v33  ;;  %1121 = vmatpush.bf16.msrb.mxu1 %v11057_v36  ;;  %v1130_v33 = vperm.slane %v14479_v0, 1  ;;  %v338_v36 = vperm.slane %v14497_v21, 0 }
  0xd6   :  { %1108 = vmatmul.bf16.vlgmr.msrb.gmra.mxu0 %v14408_v59  ;;  %1122 = vmatmul.bf16.vlgmr.msrb.gmra.mxu1 %v14410_v60  ;;  %v335_v59 = vperm.slane %v14456_v44, 0 }
  0xd8   :  { %v342_v60 = vmul.f32 %v335_v59, %v14461_v45  ;;  %v349_v58 = vmul.f32 %v335_v59, %v14451_v41 }
 0x112   :  { %v941_v25 = vpop.f32.mrf.mxu0  ;;  %v955_v26 = vpop.f32.mrf.mxu1 }
 0x113   :  { %v942_v48 = vadd.f32 %v941_v25, %v342_v60 }
 0x115   :  { %v956_v52 = vadd.f32 %v955_v26, %v942_v48  ;;  %v345_v48 = vmul.f32 %v338_v36, %v14461_v45 }
 0x117   :  { %v14475_v54 = vadd.f32 %v1128_v49, %v956_v52  ;;  %v351_v52 = vmul.f32 %v337_v8, %v14451_v41 }
 0x119   :  { %v969_v56 = vpop.f32.mrf.mxu2  ;;  %v983_v57 = vpop.f32.mrf.mxu3  ;;  %v1183_v5 = vand.u32 4294901760, %v14475_v54 }
 0x11a   :  { %v970_v61 = vadd.f32 %v969_v56, %v343_v55  ;;  %v943_v62 = vpop.f32.mrf.mxu0  ;;  %v957_v63 = vpop.f32.mrf.mxu1 }
 0x11b   :  { %v944_v4 = vadd.f32 %v943_v62, %v349_v58  ;;  %v1215_v12 = vsub.f32 %v14475_v54, %v1183_v5 }
 0x11c   :  { %v984_v6 = vadd.f32 %v983_v57, %v970_v61  ;;  %v1131_v57 = vperm.slane %v14497_v21, 1 }
 0x11d   :  { %v958_v7 = vadd.f32 %v957_v63, %v944_v4  ;;  %v1216_v30 = vand.u32 4294901760, %v1215_v12  ;;  %v14524_v4 = vld [vmem:[#allocation9 + $0x20] sm:$0xff] }
 0x11e   :  { %v14489_v10 = vadd.f32 %v1129_v2, %v984_v6  ;;  %16149 = vst [vmem:[#allocation38_spill] sm:$0xff] %v14524_v4 }
 0x11f   :  { %v14491_v11 = vadd.f32 %v1128_v49, %v958_v7  ;;  %v1217_v60 = vsub.f32 %v1215_v12, %v1216_v30 }
 0x120   :  { %v14503_v31 = vand.u32 4294901760, %v14489_v10 }
 0x121   :  { %v971_v14 = vpop.f32.mrf.mxu2  ;;  %v985_v15 = vpop.f32.mrf.mxu3  ;;  %v1181_v18 = vand.u32 4294901760, %v14491_v11 }
 0x122   :  { %v972_v22 = vadd.f32 %v971_v14, %v350_v13  ;;  %v997_v23 = vpop.f32.mrf.mxu0  ;;  %v1011_v24 = vpop.f32.mrf.mxu1  ;;  %v1374_v25 = vsub.f32 %v14489_v10, %v14503_v31  ;;  %v339_v14 = vperm.slane %v14524_v4, 0 }
 0x123   :  { %v998_v28 = vadd.f32 %v997_v23, %v344_v16  ;;  %1182 = vmatpush.msra.mxu0 %v1181_v18  ;;  %1266 = vmatpush.msrb.mxu3 %v1181_v18  ;;  %v1209_v29 = vsub.f32 %v14491_v11, %v1181_v18 }
 0x124   :  { %v986_v32 = vadd.f32 %v985_v15, %v972_v22  ;;  %v1375_v6 = vand.u32 4294901760, %v1374_v25 }
 0x125   :  { %v1012_v20 = vadd.f32 %v1011_v24, %v998_v28  ;;  %1184 = vmatpush.msra.mxu0 %v1183_v5  ;;  %1241 = vmatpush.msrb.mxu2 %v1209_v29  ;;  %v1210_v42 = vand.u32 4294901760, %v1209_v29 }
 0x126   :  { %v14507_v37 = vadd.f32 %v1129_v2, %v986_v32  ;;  %1268 = vmatpush.msrb.mxu3 %v1183_v5  ;;  %1190 = vmatmul.f32.vlgmr.msra.gmra.mxu0 %v14499_v27  ;;  %v1218_v2 = vand.u32 4294901760, %v1217_v60  ;;  %v1376_v16 = vsub.f32 %v1374_v25, %v1375_v6 }
 0x127   :  { %1272 = vmatmul.f32.vlgmr.msrb.gmra.mxu3 %v14482_v1  ;;  %1244 = vmatpush.msrb.mxu2 %v1215_v12  ;;  %v1211_v59 = vsub.f32 %v1209_v29, %v1210_v42  ;;  %v14513_v26 = vadd.f32 %v1130_v33, %v1012_v20 }
 0x128   :  { %1318 = vmatpush.msra.mxu3 %v1181_v18  ;;  %1247 = vmatmul.f32.vlgmr.msrb.gmra.mxu2 %v14473_v53  ;;  %v14518_v49 = vand.u32 4294901760, %v14507_v37  ;;  %v352_v18 = vmul.f32 %v338_v36, %v14451_v41 }
 0x129   :  { %v1025_v50 = vpop.f32.mrf.mxu2  ;;  %v1039_v51 = vpop.f32.mrf.mxu3  ;;  %1293 = vmatpush.msra.mxu2 %v1210_v42  ;;  %v1212_v55 = vand.u32 4294901760, %v1211_v59  ;;  %v14528_v9 = vand.u32 4294901760, %v14513_v26  ;;  %v1377_v42 = vand.u32 4294901760, %v1376_v16 }
 0x12a   :  { %v1026_v56 = vadd.f32 %v1025_v50, %v345_v48  ;;  %1320 = vmatpush.msra.mxu3 %v1183_v5  ;;  %v999_v58 = vpop.f32.mrf.mxu0  ;;  %v1013_v61 = vpop.f32.mrf.mxu1  ;;  %v1368_v62 = vsub.f32 %v14507_v37, %v14518_v49  ;;  %v1132_v48 = vperm.slane %v14524_v4, 1  ;;  %v14559_v50 = vld [vmem:[#allocation9 + $0x28] sm:$0xff] }
 0x12b   :  { %v1000_v63 = vadd.f32 %v999_v58, %v351_v52  ;;  %1297 = vmatpush.msra.mxu2 %v1216_v30  ;;  %1213 = vmatpush.msra.mxu1 %v1212_v55  ;;  %v1533_v23 = vsub.f32 %v14513_v26, %v14528_v9  ;;  %16150 = vst [vmem:[#allocation39_spill] sm:$0xff] %v14559_v50 }
 0x12c   :  { %v1040_v7 = vadd.f32 %v1039_v51, %v1026_v56  ;;  %1400 = vmatpush.msrb.mxu0 %v1368_v62  ;;  %v1369_v8 = vand.u32 4294901760, %v1368_v62 }
 0x12d   :  { %1341 = vmatpush.msrb.mxu2 %v14518_v49  ;;  %v1014_v5 = vadd.f32 %v1013_v61, %v1000_v63  ;;  %1219 = vmatpush.msra.mxu1 %v1218_v2  ;;  %v1534_v51 = vand.u32 4294901760, %v1533_v23  ;;  %v340_v61 = vperm.slane %v14559_v50, 0 }
 0x12e   :  { %v14530_v12 = vadd.f32 %v1131_v57, %v1040_v7  ;;  %1403 = vmatpush.msrb.mxu0 %v1374_v25  ;;  %v1370_v13 = vsub.f32 %v1368_v62, %v1369_v8  ;;  %11254 = vmatmul.msk.f32.vlgmr.msra.gmra.mxu1 %vm1163_vm3, %v14465_v46 }
 0x12f   :  { %1343 = vmatpush.msrb.mxu2 %v14503_v31  ;;  %v14534_v15 = vadd.f32 %v1130_v33, %v1014_v5  ;;  %11256 = vmatmul.msk.f32.vlgmr.msra.gmra.mxu3 %vm1163_vm3, %v14465_v46  ;;  %v346_v33 = vmul.f32 %v339_v14, %v14461_v45 }
 0x130   :  { %1406 = vmatmul.f32.vlgmr.msrb.gmra.mxu0 %v14473_v53  ;;  %1425 = vmatpush.msrb.mxu1 %v14518_v49  ;;  %v1371_v22 = vand.u32 4294901760, %v1370_v13  ;;  %v14551_v30 = vand.u32 4294901760, %v14530_v12 }
 0x131   :  { %v1027_v24 = vpop.f32.mrf.mxu2  ;;  %v1041_v28 = vpop.f32.mrf.mxu3  ;;  %11255 = vmatmul.msk.f32.vlgmr.msra.gmra.mxu2 %vm1163_vm3, %v14465_v46  ;;  %v14548_v29 = vand.u32 4294901760, %v14534_v15 }
 0x132   :  { %v1028_v32 = vadd.f32 %v1027_v24, %v352_v18  ;;  %1427 = vmatpush.msrb.mxu1 %v14503_v31  ;;  %1452 = vmatpush.msra.mxu2 %v1369_v8  ;;  %v14567_v58 = vsub.f32 %v14530_v12, %v14551_v30  ;;  %v353_v8 = vmul.f32 %v339_v14, %v14451_v41 }
 0x133   :  { %1372 = vmatpush.msrb.mxu3 %v1371_v22  ;;  %v1053_v36 = vpop.f32.mrf.mxu0  ;;  %v1067_v20 = vpop.f32.mrf.mxu1  ;;  %1500 = vmatpush.msra.mxu0 %v14548_v29  ;;  %v1527_v59 = vsub.f32 %v14534_v15, %v14548_v29 }
 0x134   :  { %v1042_v60 = vadd.f32 %v1041_v28, %v1028_v32  ;;  %v1054_v25 = vadd.f32 %v1053_v36, %v346_v33  ;;  %1456 = vmatpush.msra.mxu2 %v1375_v6  ;;  %v1693_v13 = vand.u32 4294901760, %v14567_v58 }
 0x135   :  { %1378 = vmatpush.msrb.mxu3 %v1377_v42  ;;  %1502 = vmatpush.msra.mxu0 %v14528_v9  ;;  %v1528_v52 = vand.u32 4294901760, %v1527_v59 }
 0x136   :  { %v14562_v55 = vadd.f32 %v1131_v57, %v1042_v60  ;;  %v1068_v56 = vadd.f32 %v1067_v20, %v1054_v25  ;;  %1431 = vmatmul.f32.vlgmr.msrb.gmra.mxu1 %v14482_v1  ;;  %v1694_v20 = vsub.f32 %v14567_v58, %v1693_v13  ;;  %v1133_v25 = vperm.slane %v14559_v50, 1 }
 0x137   :  { %1477 = vmatpush.msra.mxu3 %v14518_v49  ;;  %v1529_v62 = vsub.f32 %v1527_v59, %v1528_v52  ;;  %v1535_v49 = vsub.f32 %v1533_v23, %v1534_v51  ;;  %1611 = vmatpush.msrb.mxu0 %v1528_v52 }
 0x138   :  { %11257 = vmatmul.msk.f32.vlgmr.msrb.gmra.mxu3 %vm1163_vm3, %v14465_v46  ;;  %v14574_v63 = vand.u32 4294901760, %v14562_v55  ;;  %v14576_v57 = vadd.f32 %v1132_v48, %v1068_v56  ;;  %1508 = vmatmul.f32.vlgmr.msra.gmra.mxu0 %v14499_v27  ;;  %v1695_v52 = vand.u32 4294901760, %v1694_v20 }
 0x139   :  { %1479 = vmatpush.msra.mxu3 %v14503_v31  ;;  %v1530_v2 = vand.u32 4294901760, %v1529_v62  ;;  %1349 = vmatmul.f32.vlgmr.msrb.gmra.mxu2 %v14499_v27  ;;  %v347_v31 = vmul.f32 %v340_v61, %v14461_v45  ;;  %v1536_v22 = vand.u32 4294901760, %v1535_v49 }
 0x13a   :  { %v14585_v5 = vsub.f32 %v14562_v55, %v14574_v63  ;;  %1559 = vmatpush.msrb.mxu2 %v1527_v59  ;;  %1615 = vmatpush.msrb.mxu0 %v1534_v51  ;;  %v14592_v14 = vand.u32 4294901760, %v14576_v57  ;;  %v354_v51 = vmul.f32 %v340_v61, %v14451_v41 }
 0x13b   :  { %1584 = vmatpush.msrb.mxu3 %v14548_v29  ;;  %v1081_v6 = vpop.f32.mrf.mxu2  ;;  %v1095_v7 = vpop.f32.mrf.mxu3  ;;  %1531 = vmatpush.msra.mxu1 %v1530_v2 }
 0x13c   :  { %v1055_v16 = vpop.f32.mrf.mxu0  ;;  %v1687_v24 = vand.u32 4294901760, %v14585_v5  ;;  %v1082_v28 = vadd.f32 %v1081_v6, %v347_v31  ;;  %v1069_v32 = vpop.f32.mrf.mxu1  ;;  %1562 = vmatpush.msrb.mxu2 %v1533_v23  ;;  %1718 = vmatpush.msra.mxu0 %v14585_v5  ;;  %v14610_v59 = vsub.f32 %v14576_v57, %v14592_v14 }
 0x13d   :  { %1586 = vmatpush.msrb.mxu3 %v14528_v9  ;;  %v1056_v18 = vadd.f32 %v1055_v16, %v353_v8  ;;  %1537 = vmatpush.msra.mxu1 %v1536_v22 }
 0x13e   :  { %v1688_v36 = vsub.f32 %v14585_v5, %v1687_v24  ;;  %1721 = vmatpush.msra.mxu0 %v14567_v58  ;;  %11260 = vmatmul.msk.f32.vlgmr.msra.gmra.mxu1 %vm1163_vm3, %v14465_v46  ;;  %v1096_v60 = vadd.f32 %v1095_v7, %v1082_v28  ;;  %v1852_v61 = vand.u32 4294901760, %v14610_v59 }
 0x13f   :  { %v1070_v33 = vadd.f32 %v1069_v32, %v1056_v18  ;;  %1636 = vmatpush.msrb.mxu1 %v14548_v29  ;;  %v14642_v18 = vld [vmem:[#allocation9 + $0x30] sm:$0xff] }
 0x140   :  { %11259 = vmatmul.msk.f32.vlgmr.msra.gmra.mxu3 %vm1163_vm3, %v14465_v46  ;;  %11261 = vmatmul.msk.f32.vlgmr.msrb.gmra.mxu0 %vm1163_vm3, %v14465_v46  ;;  %v1689_v23 = vand.u32 4294901760, %v1688_v36  ;;  %v14623_v2 = vadd.f32 %v1133_v25, %v1096_v60  ;;  %v1853_v5 = vsub.f32 %v14610_v59, %v1852_v61  ;;  %16151 = vst [vmem:[#allocation40_spill] sm:$0xff] %v14642_v18 }
 0x141   :  { %v14602_v42 = vadd.f32 %v1132_v48, %v1070_v33  ;;  %11258 = vmatmul.msk.f32.vlgmr.msra.gmra.mxu2 %vm1163_vm3, %v14465_v46  ;;  %1638 = vmatpush.msrb.mxu1 %v14528_v9  ;;  %v341_v33 = vperm.slane %v14642_v18, 0 }
 0x142   :  { %1690 = vmatpush.msra.mxu3 %v1689_v23  ;;  %1659 = vmatpush.msra.mxu2 %v14574_v63  ;;  %v14636_v31 = vand.u32 4294901760, %v14623_v2  ;;  %v1854_v32 = vand.u32 4294901760, %v1853_v5  ;;  %v1134_v23 = vperm.slane %v14642_v18, 1 }
 0x143   :  { %v1083_v48 = vpop.f32.mrf.mxu2  ;;  %v1817_v56 = vand.u32 4294901760, %v14602_v42  ;;  %v1097_v49 = vpop.f32.mrf.mxu3  ;;  %1743 = vmatpush.msra.mxu1 %v14574_v63 }
 0x144   :  { %v1084_v62 = vadd.f32 %v1083_v48, %v354_v51  ;;  %1696 = vmatpush.msra.mxu3 %v1695_v52  ;;  %1661 = vmatpush.msra.mxu2 %v14551_v30  ;;  %v355_v52 = vmul.f32 %v341_v33, %v14451_v41 }
 0x145   :  { %v1845_v29 = vsub.f32 %v14602_v42, %v1817_v56  ;;  %1818 = vmatpush.msrb.mxu0 %v1817_v56  ;;  %1745 = vmatpush.msra.mxu1 %v14551_v30 }
 0x146   :  { %v1098_v6 = vadd.f32 %v1097_v49, %v1084_v62  ;;  %11262 = vmatmul.msk.f32.vlgmr.msrb.gmra.mxu1 %vm1163_vm3, %v14465_v46  ;;  %v1156_v62 = vmul.f32 %v14491_v11, %v14491_v11 }
 0x147   :  { %v1846_v7 = vand.u32 4294901760, %v1845_v29  ;;  %1820 = vmatpush.msrb.mxu0 %v14592_v14 }
 0x148   :  { %v14627_v9 = vadd.f32 %v1133_v25, %v1098_v6  ;;  %1590 = vmatmul.f32.vlgmr.msrb.gmra.mxu3 %v14482_v1  ;;  %1724 = vmatmul.f32.vlgmr.msra.gmra.mxu0 %v14473_v53 }
 0x149   :  { %v1847_v8 = vsub.f32 %v1845_v29, %v1846_v7  ;;  %1795 = vmatpush.msrb.mxu3 %v14574_v63  ;;  %1929 = vmatpush.msra.mxu0 %v1846_v7  ;;  %v14655_v63 = vsub.f32 %v14623_v2, %v14636_v31  ;;  %v14695_v7 = vand.u32 4294901760, %v1156_v62 }
 0x14a   :  { %v14639_v16 = vand.u32 4294901760, %v14627_v9  ;;  %1565 = vmatmul.f32.vlgmr.msrb.gmra.mxu2 %v14473_v53 }
 0x14b   :  { %v1848_v22 = vand.u32 4294901760, %v1847_v8  ;;  %1770 = vmatpush.msrb.mxu2 %v1687_v24  ;;  %1797 = vmatpush.msrb.mxu3 %v14551_v30  ;;  %v348_v24 = vmul.f32 %v341_v33, %v14461_v45  ;;  %v2011_v58 = vand.u32 4294901760, %v14655_v63 }
 0x14c   :  { %v14648_v28 = vsub.f32 %v14627_v9, %v14639_v16  ;;  %1933 = vmatpush.msra.mxu0 %v1852_v61  ;;  %v1149_v61 = vmul.f32 %v14475_v54, %v14475_v54 }
 0x14d   :  { %1849 = vmatpush.msrb.mxu1 %v1848_v22  ;;  %1774 = vmatpush.msrb.mxu2 %v1693_v13  ;;  %v2012_v25 = vsub.f32 %v14655_v63, %v2011_v58 }
 0x14e   :  { %v2005_v30 = vand.u32 4294901760, %v14648_v28  ;;  %1749 = vmatmul.f32.vlgmr.msra.gmra.mxu1 %v14482_v1  ;;  %v14704_v22 = vand.u32 4294901760, %v1149_v61 }
 0x14f   :  { %1855 = vmatpush.msrb.mxu1 %v1854_v32  ;;  %v14709_v32 = vsub.f32 %v1156_v62, %v14695_v7 }
 0x150   :  { %11263 = vmatmul.msk.f32.vlgmr.msra.gmra.mxu3 %vm1163_vm3, %v14465_v46  ;;  %1826 = vmatmul.f32.vlgmr.msrb.gmra.mxu0 %v14499_v27  ;;  %v2006_v45 = vsub.f32 %v14648_v28, %v2005_v30 }
 0x151   :  { %1902 = vmatpush.msra.mxu3 %v1817_v56  ;;  %1954 = vmatpush.msra.mxu1 %v1817_v56 }
 0x152   :  { %2036 = vmatpush.msrb.mxu0 %v14648_v28  ;;  %1667 = vmatmul.f32.vlgmr.msra.gmra.mxu2 %v14499_v27  ;;  %v2007_v48 = vand.u32 4294901760, %v2006_v45 }
 0x153   :  { %v1109_v36 = vpop.f32.mrf.mxu0  ;;  %v1123_v20 = vpop.f32.mrf.mxu1  ;;  %1877 = vmatpush.msra.mxu2 %v1845_v29  ;;  %1904 = vmatpush.msra.mxu3 %v14592_v14 }
 0x154   :  { %v1110_v13 = vadd.f32 %v1109_v36, %v348_v24  ;;  %1956 = vmatpush.msra.mxu1 %v14592_v14  ;;  %2039 = vmatpush.msrb.mxu0 %v14655_v63  ;;  %v1157_v24 = vmul.f32 %v14507_v37, %v14507_v37 }
 0x155   :  { %1880 = vmatpush.msra.mxu2 %v14610_v59  ;;  %v2013_v59 = vand.u32 4294901760, %v2012_v25 }
 0x156   :  { %v1124_v60 = vadd.f32 %v1123_v20, %v1110_v13  ;;  %11266 = vmatmul.msk.f32.vlgmr.msrb.gmra.mxu1 %vm1163_vm3, %v14465_v46  ;;  %v2323_v20 = vand.u32 4294901760, %v14709_v32  ;;  %v1150_v13 = vmul.f32 %v14489_v10, %v14489_v10 }
 0x157   :  { %2061 = vmatpush.msrb.mxu1 %v14639_v16 }
 0x158   :  { %v14673_v51 = vadd.f32 %v1134_v23, %v1124_v60  ;;  %11265 = vmatmul.msk.f32.vlgmr.msrb.gmra.mxu3 %vm1163_vm3, %v14465_v46  ;;  %11267 = vmatmul.msk.f32.vlgmr.msra.gmra.mxu0 %vm1163_vm3, %v14465_v46  ;;  %v2324_v45 = vsub.f32 %v14709_v32, %v2323_v20  ;;  %v14729_v60 = vand.u32 4294901760, %v1150_v13 }
 0x159   :  { %2008 = vmatpush.msrb.mxu3 %v2007_v48  ;;  %2063 = vmatpush.msrb.mxu1 %v14636_v31 }
 0x15a   :  { %11264 = vmatmul.msk.f32.vlgmr.msrb.gmra.mxu2 %vm1163_vm3, %v14465_v46  ;;  %v2137_v41 = vand.u32 4294901760, %v14673_v51 }
 0x15b   :  { %v1111_v14 = vpop.f32.mrf.mxu0  ;;  %v1125_v49 = vpop.f32.mrf.mxu1  ;;  %1977 = vmatpush.msrb.mxu2 %v14639_v16  ;;  %2014 = vmatpush.msrb.mxu3 %v2013_v59  ;;  %v2487_v59 = vsub.f32 %v1150_v13, %v14729_v60 }
 0x15c   :  { %v1112_v56 = vadd.f32 %v1111_v14, %v355_v52  ;;  %v2169_v8 = vsub.f32 %v14673_v51, %v2137_v41  ;;  %v2325_v14 = vand.u32 4294901760, %v2324_v45 }
 0x15d   :  { %1979 = vmatpush.msrb.mxu2 %v14636_v31 }
 0x15e   :  { %v1126_v29 = vadd.f32 %v1125_v49, %v1112_v56  ;;  %11268 = vmatmul.msk.f32.vlgmr.msra.gmra.mxu1 %vm1163_vm3, %v14465_v46  ;;  %v2170_v33 = vand.u32 4294901760, %v2169_v8  ;;  %v2488_v49 = vand.u32 4294901760, %v2487_v59 }
 0x160   :  { %v14693_v6 = vadd.f32 %v1134_v23, %v1126_v29  ;;  %1908 = vmatmul.f32.vlgmr.msra.gmra.mxu3 %v14482_v1  ;;  %2042 = vmatmul.f32.vlgmr.msrb.gmra.mxu0 %v14473_v53  ;;  %v14723_v23 = vand.u32 4294901760, %v1157_v24  ;;  %v1158_v29 = vmul.f32 %v14534_v15, %v14534_v15 }
 0x161   :  { %2113 = vmatpush.msra.mxu3 %v14639_v16  ;;  %v14715_v16 = vsub.f32 %v1149_v61, %v14704_v22  ;;  %v1151_v61 = vmul.f32 %v14513_v26, %v14513_v26 }
 0x162   :  { %v2135_v5 = vand.u32 4294901760, %v14693_v6  ;;  %1883 = vmatmul.f32.vlgmr.msra.gmra.mxu2 %v14473_v53  ;;  %v2481_v48 = vsub.f32 %v1157_v24, %v14723_v23 }
 0x163   :  { %2088 = vmatpush.msra.mxu2 %v2005_v30  ;;  %2115 = vmatpush.msra.mxu3 %v14636_v31  ;;  %v2171_v31 = vsub.f32 %v2169_v8, %v2170_v33 }
 0x164   :  { %2136 = vmatpush.msra.mxu0 %v2135_v5  ;;  %v2163_v28 = vsub.f32 %v14693_v6, %v2135_v5  ;;  %v2482_v56 = vand.u32 4294901760, %v2481_v48 }
 0x165   :  { %2092 = vmatpush.msra.mxu2 %v2011_v58  ;;  %v2329_v58 = vand.u32 4294901760, %v14715_v16  ;;  %v2172_v25 = vand.u32 4294901760, %v2171_v31 }
 0x166   :  { %2138 = vmatpush.msra.mxu0 %v2137_v41  ;;  %v2164_v63 = vand.u32 4294901760, %v2163_v28  ;;  %2067 = vmatmul.f32.vlgmr.msrb.gmra.mxu1 %v14482_v1 }
 0x167   :  { %v2330_v52 = vsub.f32 %v14715_v16, %v2329_v58 }
 0x168   :  { %2247 = vmatpush.msrb.mxu0 %v2164_v63  ;;  %v2165_v36 = vsub.f32 %v2163_v28, %v2164_v63  ;;  %11269 = vmatmul.msk.f32.vlgmr.msrb.gmra.mxu3 %vm1163_vm3, %v14465_v46 }
 0x169   :  { %2144 = vmatmul.f32.vlgmr.msra.gmra.mxu0 %v14499_v27  ;;  %2220 = vmatpush.msrb.mxu3 %v2135_v5  ;;  %v2331_v62 = vand.u32 4294901760, %v2330_v52  ;;  %v1160_v52 = vmul.f32 %v14602_v42, %v14602_v42 }
 0x16a   :  { %2251 = vmatpush.msrb.mxu0 %v2170_v33  ;;  %v2166_v30 = vand.u32 4294901760, %v2165_v36  ;;  %1985 = vmatmul.f32.vlgmr.msrb.gmra.mxu2 %v14499_v27  ;;  %v1152_v36 = vmul.f32 %v14530_v12, %v14530_v12 }
 0x16b   :  { %2222 = vmatpush.msrb.mxu3 %v2137_v41  ;;  %2195 = vmatpush.msrb.mxu2 %v2163_v28 }
 0x16c   :  { %2354 = vmatpush.msra.mxu0 %v14709_v32  ;;  %2167 = vmatpush.msra.mxu1 %v2166_v30  ;;  %v14759_v32 = vand.u32 4294901760, %v1151_v61  ;;  %v14781_v31 = vand.u32 4294901760, %v1152_v36 }
 0x16d   :  { %2198 = vmatpush.msrb.mxu2 %v2169_v8  ;;  %v2489_v8 = vsub.f32 %v2487_v59, %v2488_v49 }
 0x16e   :  { %2357 = vmatpush.msra.mxu0 %v14715_v16  ;;  %2173 = vmatpush.msra.mxu1 %v2172_v25  ;;  %v2646_v24 = vsub.f32 %v1151_v61, %v14759_v32 }
 0x16f   :  { %11272 = vmatmul.msk.f32.vlgmr.msra.gmra.mxu1 %vm1163_vm3, %v14465_v46  ;;  %v2490_v33 = vand.u32 4294901760, %v2489_v8  ;;  %v1161_v8 = vmul.f32 %v14627_v9, %v14627_v9 }
 0x170   :  { %2272 = vmatpush.msrb.mxu1 %v2135_v5  ;;  %11271 = vmatmul.msk.f32.vlgmr.msra.gmra.mxu3 %vm1163_vm3, %v14465_v46  ;;  %v2612_v5 = vand.u32 4294901760, %v1158_v29 }
 0x171   :  { %2326 = vmatpush.msra.mxu3 %v2325_v14  ;;  %11273 = vmatmul.msk.f32.vlgmr.msrb.gmra.mxu0 %vm1163_vm3, %v14465_v46 }
 0x172   :  { %2274 = vmatpush.msrb.mxu1 %v2137_v41  ;;  %2454 = vmatpush.msrb.mxu0 %v14723_v23  ;;  %v2483_v41 = vsub.f32 %v2481_v48, %v2482_v56  ;;  %v14761_v63 = vsub.f32 %v1158_v29, %v2612_v5 }
 0x173   :  { %11270 = vmatmul.msk.f32.vlgmr.msra.gmra.mxu2 %vm1163_vm3, %v14465_v46  ;;  %2332 = vmatpush.msra.mxu3 %v2331_v62  ;;  %v2930_v62 = vand.u32 4294901760, %v1160_v52 }
 0x174   :  { %2379 = vmatpush.msra.mxu1 %v14695_v7  ;;  %2295 = vmatpush.msra.mxu2 %v14695_v7  ;;  %v2484_v28 = vand.u32 4294901760, %v2483_v41  ;;  %v2641_v16 = vand.u32 4294901760, %v14761_v63 }
 0x175   :  { %2456 = vmatpush.msrb.mxu0 %v14729_v60  ;;  %v14810_v61 = vsub.f32 %v1160_v52, %v2930_v62 }
 0x176   :  { %2381 = vmatpush.msra.mxu1 %v14704_v22  ;;  %2297 = vmatpush.msra.mxu2 %v14704_v22  ;;  %v2642_v13 = vsub.f32 %v14761_v63, %v2641_v16 }
 0x177   :  { %11274 = vmatmul.msk.f32.vlgmr.msrb.gmra.mxu1 %vm1163_vm3, %v14465_v46 }
 0x178   :  { %2226 = vmatmul.f32.vlgmr.msrb.gmra.mxu3 %v14482_v1  ;;  %2485 = vmatpush.msrb.mxu1 %v2484_v28  ;;  %v2643_v45 = vand.u32 4294901760, %v2642_v13  ;;  %v2959_v28 = vand.u32 4294901760, %v14810_v61 }
 0x179   :  { %2431 = vmatpush.msrb.mxu3 %v14695_v7  ;;  %2360 = vmatmul.f32.vlgmr.msra.gmra.mxu0 %v14473_v53  ;;  %v1159_v7 = vmul.f32 %v14562_v55, %v14562_v55 }
 0x17a   :  { %2565 = vmatpush.msra.mxu0 %v2482_v56  ;;  %2491 = vmatpush.msrb.mxu1 %v2490_v33  ;;  %v1154_v33 = vmul.f32 %v14623_v2, %v14623_v2 }
 0x17b   :  { %2201 = vmatmul.f32.vlgmr.msrb.gmra.mxu2 %v14473_v53  ;;  %2433 = vmatpush.msrb.mxu3 %v14704_v22  ;;  %v14774_v22 = vand.u32 4294901760, %v1159_v7 }
 0x17c   :  { %2406 = vmatpush.msrb.mxu2 %v2323_v20  ;;  %2569 = vmatpush.msra.mxu0 %v2488_v49  ;;  %v2647_v20 = vand.u32 4294901760, %v2646_v24 }
 0x17d   :  { %v2799_v30 = vsub.f32 %v1159_v7, %v14774_v22  ;;  %v2960_v7 = vsub.f32 %v14810_v61, %v2959_v28 }
 0x17e   :  { %2410 = vmatpush.msrb.mxu2 %v2329_v58  ;;  %v2648_v58 = vsub.f32 %v2646_v24, %v2647_v20 }
 0x17f   :  { %2385 = vmatmul.f32.vlgmr.msra.gmra.mxu1 %v14482_v1  ;;  %v2800_v25 = vand.u32 4294901760, %v2799_v30 }
 0x180   :  { %11275 = vmatmul.msk.f32.vlgmr.msra.gmra.mxu3 %vm1163_vm3, %v14465_v46  ;;  %2590 = vmatpush.msra.mxu1 %v14723_v23 }
 0x181   :  { %2538 = vmatpush.msra.mxu3 %v14723_v23  ;;  %2462 = vmatmul.f32.vlgmr.msrb.gmra.mxu0 %v14499_v27  ;;  %v2805_v23 = vsub.f32 %v1152_v36, %v14781_v31  ;;  %v2801_v14 = vsub.f32 %v2799_v30, %v2800_v25 }
 0x182   :  { %2672 = vmatpush.msrb.mxu0 %v14761_v63  ;;  %2592 = vmatpush.msra.mxu1 %v14729_v60 }
 0x183   :  { %2303 = vmatmul.f32.vlgmr.msra.gmra.mxu2 %v14499_v27  ;;  %2540 = vmatpush.msra.mxu3 %v14729_v60  ;;  %v2649_v60 = vand.u32 4294901760, %v2648_v58  ;;  %v2802_v49 = vand.u32 4294901760, %v2801_v14  ;;  %v1162_v58 = vmul.f32 %v14693_v6, %v14693_v6 }
 0x184   :  { %2513 = vmatpush.msra.mxu2 %v2481_v48  ;;  %2675 = vmatpush.msrb.mxu0 %v2646_v24  ;;  %v2806_v48 = vand.u32 4294901760, %v2805_v23  ;;  %v14833_v24 = vand.u32 4294901760, %v1154_v33 }
 0x186   :  { %2516 = vmatpush.msra.mxu2 %v2487_v59  ;;  %v1153_v59 = vmul.f32 %v14576_v57, %v14576_v57  ;;  %v2807_v56 = vsub.f32 %v2805_v23, %v2806_v48 }
 0x187   :  { %11278 = vmatmul.msk.f32.vlgmr.msrb.gmra.mxu1 %vm1163_vm3, %v14465_v46 }
 0x188   :  { %11277 = vmatmul.msk.f32.vlgmr.msrb.gmra.mxu3 %vm1163_vm3, %v14465_v46  ;;  %2697 = vmatpush.msrb.mxu1 %v2612_v5  ;;  %v14808_v29 = vand.u32 4294901760, %v1153_v59  ;;  %v2808_v41 = vand.u32 4294901760, %v2807_v56 }
 0x189   :  { %2644 = vmatpush.msrb.mxu3 %v2643_v45  ;;  %11279 = vmatmul.msk.f32.vlgmr.msra.gmra.mxu0 %vm1163_vm3, %v14465_v46 }
 0x18a   :  { %2772 = vmatpush.msra.mxu0 %v14774_v22  ;;  %2699 = vmatpush.msrb.mxu1 %v14759_v32 }
 0x18b   :  { %11276 = vmatmul.msk.f32.vlgmr.msrb.gmra.mxu2 %vm1163_vm3, %v14465_v46  ;;  %2650 = vmatpush.msrb.mxu3 %v2649_v60 }
 0x18c   :  { %2613 = vmatpush.msrb.mxu2 %v2612_v5  ;;  %2774 = vmatpush.msra.mxu0 %v14781_v31 }
 0x18e   :  { %2615 = vmatpush.msrb.mxu2 %v14759_v32 }
 0x18f   :  { %11280 = vmatmul.msk.f32.vlgmr.msra.gmra.mxu1 %vm1163_vm3, %v14465_v46 }
 0x190   :  { %2544 = vmatmul.f32.vlgmr.msra.gmra.mxu3 %v14482_v1  ;;  %2803 = vmatpush.msra.mxu1 %v2802_v49 }
 0x191   :  { %2749 = vmatpush.msra.mxu3 %v2612_v5  ;;  %2678 = vmatmul.f32.vlgmr.msrb.gmra.mxu0 %v14473_v53  ;;  %v14817_v5 = vsub.f32 %v1153_v59, %v14808_v29 }
 0x192   :  { %2883 = vmatpush.msrb.mxu0 %v2800_v25  ;;  %2809 = vmatpush.msra.mxu1 %v2808_v41 }
 0x193   :  { %2519 = vmatmul.f32.vlgmr.msra.gmra.mxu2 %v14473_v53  ;;  %2751 = vmatpush.msra.mxu3 %v14759_v32  ;;  %v14825_v32 = vand.u32 4294901760, %v1161_v8  ;;  %v2965_v63 = vand.u32 4294901760, %v14817_v5 }
 0x194   :  { %2724 = vmatpush.msra.mxu2 %v2641_v16  ;;  %2887 = vmatpush.msrb.mxu0 %v2806_v48  ;;  %v3248_v48 = vand.u32 4294901760, %v1162_v58 }
 0x195   :  { %v3117_v16 = vsub.f32 %v1161_v8, %v14825_v32  ;;  %v2966_v36 = vsub.f32 %v14817_v5, %v2965_v63 }
 0x196   :  { %2728 = vmatpush.msra.mxu2 %v2647_v20  ;;  %v3123_v20 = vsub.f32 %v1154_v33, %v14833_v24  ;;  %v3276_v49 = vsub.f32 %v1162_v58, %v3248_v48 }
 0x197   :  { %2703 = vmatmul.f32.vlgmr.msrb.gmra.mxu1 %v14482_v1  ;;  %v3118_v13 = vand.u32 4294901760, %v3117_v16 }
 0x198   :  { %11281 = vmatmul.msk.f32.vlgmr.msrb.gmra.mxu3 %vm1163_vm3, %v14465_v46  ;;  %2908 = vmatpush.msrb.mxu1 %v14774_v22 }
 0x199   :  { %2856 = vmatpush.msrb.mxu3 %v14774_v22  ;;  %2780 = vmatmul.f32.vlgmr.msra.gmra.mxu0 %v14499_v27  ;;  %v2961_v22 = vand.u32 4294901760, %v2960_v7  ;;  %v3119_v45 = vsub.f32 %v3117_v16, %v3118_v13 }
 0x19a   :  { %2990 = vmatpush.msra.mxu0 %v14810_v61  ;;  %2910 = vmatpush.msrb.mxu1 %v14781_v31 }
 0x19b   :  { %2621 = vmatmul.f32.vlgmr.msrb.gmra.mxu2 %v14499_v27  ;;  %2858 = vmatpush.msrb.mxu3 %v14781_v31  ;;  %v2967_v31 = vand.u32 4294901760, %v2966_v36  ;;  %v3120_v52 = vand.u32 4294901760, %v3119_v45 }
 0x19c   :  { %2831 = vmatpush.msrb.mxu2 %v2799_v30  ;;  %2993 = vmatpush.msra.mxu0 %v14817_v5  ;;  %v3124_v30 = vand.u32 4294901760, %v3123_v20  ;;  %v3277_v5 = vand.u32 4294901760, %v3276_v49 }
 0x19e   :  { %2834 = vmatpush.msrb.mxu2 %v2805_v23  ;;  %v1155_v23 = vmul.f32 %v14673_v51, %v14673_v51  ;;  %v3125_v60 = vsub.f32 %v3123_v20, %v3124_v30 }
 0x19f   :  { %11284 = vmatmul.msk.f32.vlgmr.msra.gmra.mxu1 %vm1163_vm3, %v14465_v46 }
 0x1a0   :  { %11283 = vmatmul.msk.f32.vlgmr.msra.gmra.mxu3 %vm1163_vm3, %v14465_v46  ;;  %3015 = vmatpush.msra.mxu1 %v2930_v62  ;;  %v3250_v14 = vand.u32 4294901760, %v1155_v23  ;;  %v3126_v59 = vand.u32 4294901760, %v3125_v60 }
 0x1a1   :  { %2962 = vmatpush.msra.mxu3 %v2961_v22  ;;  %11285 = vmatmul.msk.f32.vlgmr.msrb.gmra.mxu0 %vm1163_vm3, %v14465_v46 }
 0x1a2   :  { %3090 = vmatpush.msrb.mxu0 %v14825_v32  ;;  %3017 = vmatpush.msra.mxu1 %v14808_v29  ;;  %v3282_v61 = vsub.f32 %v1155_v23, %v3250_v14 }
 0x1a3   :  { %11282 = vmatmul.msk.f32.vlgmr.msra.gmra.mxu2 %vm1163_vm3, %v14465_v46  ;;  %2968 = vmatpush.msra.mxu3 %v2967_v31  ;;  %v14857_v25 = vpop.f32.mrf.mxu0 }
 0x1a4   :  { %2931 = vmatpush.msra.mxu2 %v2930_v62  ;;  %3092 = vmatpush.msrb.mxu0 %v14833_v24  ;;  %v3283_v33 = vand.u32 4294901760, %v3282_v61 }
 0x1a6   :  { %2933 = vmatpush.msra.mxu2 %v14808_v29  ;;  %v3284_v7 = vsub.f32 %v3282_v61, %v3283_v33 }
 0x1a7   :  { %11286 = vmatmul.msk.f32.vlgmr.msrb.gmra.mxu1 %vm1163_vm3, %v14465_v46 }
 0x1a8   :  { %2862 = vmatmul.f32.vlgmr.msrb.gmra.mxu3 %v14482_v1  ;;  %3121 = vmatpush.msrb.mxu1 %v3120_v52 }
 0x1a9   :  { %3067 = vmatpush.msrb.mxu3 %v2930_v62  ;;  %2996 = vmatmul.f32.vlgmr.msra.gmra.mxu0 %v14473_v53 }
 0x1aa   :  { %3201 = vmatpush.msra.mxu0 %v3118_v13  ;;  %v14864_v56 = vpop.f32.mrf.mxu3  ;;  %3127 = vmatpush.msrb.mxu1 %v3126_v59  ;;  %v3285_v13 = vand.u32 4294901760, %v3284_v7 }
 0x1ab   :  { %2837 = vmatmul.f32.vlgmr.msrb.gmra.mxu2 %v14473_v53  ;;  %3069 = vmatpush.msrb.mxu3 %v14808_v29  ;;  %v14868_v41 = vpop.f32.mrf.mxu2  ;;  %v14870_v62 = vpop.f32.mrf.mxu1 }
 0x1ac   :  { %3042 = vmatpush.msrb.mxu2 %v2959_v28  ;;  %3205 = vmatpush.msra.mxu0 %v3124_v30  ;;  %v3278_v28 = vsub.f32 %v3276_v49, %v3277_v5 }
 0x1ad   :  { %v14872_v8 = vpop.f32.mrf.mxu0 }
 0x1ae   :  { %3046 = vmatpush.msrb.mxu2 %v2965_v63 }
 0x1af   :  { %3021 = vmatmul.f32.vlgmr.msra.gmra.mxu1 %v14482_v1 }
 0x1b0   :  { %11287 = vmatmul.msk.f32.vlgmr.msra.gmra.mxu3 %vm1163_vm3, %v14465_v46  ;;  %3226 = vmatpush.msra.mxu1 %v14825_v32 }
 0x1b1   :  { %3174 = vmatpush.msra.mxu3 %v14825_v32  ;;  %3098 = vmatmul.f32.vlgmr.msrb.gmra.mxu0 %v14499_v27  ;;  %v3279_v32 = vand.u32 4294901760, %v3278_v28 }
 0x1b2   :  { %3308 = vmatpush.msrb.mxu0 %v3276_v49  ;;  %v14880_v29 = vpop.f32.mrf.mxu3  ;;  %3228 = vmatpush.msra.mxu1 %v14833_v24 }
 0x1b3   :  { %2939 = vmatmul.f32.vlgmr.msra.gmra.mxu2 %v14499_v27  ;;  %3176 = vmatpush.msra.mxu3 %v14833_v24  ;;  %v14887_v36 = vpop.f32.mrf.mxu1 }
 0x1b4   :  { %3149 = vmatpush.msra.mxu2 %v3117_v16  ;;  %v14885_v63 = vpop.f32.mrf.mxu2  ;;  %3311 = vmatpush.msrb.mxu0 %v3282_v61 }
 0x1b5   :  { %v1509_v22 = vpop.f32.mrf.mxu0 }
 0x1b6   :  { %3152 = vmatpush.msra.mxu2 %v3123_v20 }
 0x1b7   :  { %11290 = vmatmul.msk.f32.vlgmr.msrb.gmra.mxu1 %vm1163_vm3, %v14465_v46 }
 0x1b8   :  { %11289 = vmatmul.msk.f32.vlgmr.msrb.gmra.mxu3 %vm1163_vm3, %v14465_v46  ;;  %3333 = vmatpush.msrb.mxu1 %v3248_v48 }
 0x1b9   :  { %3280 = vmatpush.msrb.mxu3 %v3279_v32  ;;  %11291 = vmatmul.msk.f32.vlgmr.msra.gmra.mxu0 %vm1163_vm3, %v14465_v46 }
 0x1ba   :  { %3335 = vmatpush.msrb.mxu1 %v3250_v14 }
 0x1bb   :  { %3286 = vmatpush.msrb.mxu3 %v3285_v13  ;;  %v14895_v24 = vpop.f32.mrf.mxu3  ;;  %11288 = vmatmul.msk.f32.vlgmr.msrb.gmra.mxu2 %vm1163_vm3, %v14465_v46  ;;  %v1540_v20 = vpop.f32.mrf.mxu1 }
 0x1bc   :  { %3249 = vmatpush.msrb.mxu2 %v3248_v48  ;;  %v14899_v16 = vpop.f32.mrf.mxu2 }
 0x1bd   :  { %v14901_v31 = vpop.f32.mrf.mxu0 }
 0x1be   :  { %3251 = vmatpush.msrb.mxu2 %v3250_v14 }
 0x1bf   :  { %11292 = vmatmul.msk.f32.vlgmr.msra.gmra.mxu1 %vm1163_vm3, %v14465_v46 }
 0x1c0   :  { %3180 = vmatmul.f32.vlgmr.msra.gmra.mxu3 %v14482_v1 }
 0x1c1   :  { %3385 = vmatpush.msra.mxu3 %v3248_v48  ;;  %3314 = vmatmul.f32.vlgmr.msrb.gmra.mxu0 %v14473_v53  ;;  %v1541_v48 = vadd.f32 %v1540_v20, %v1509_v22 }
 0x1c3   :  { %3387 = vmatpush.msra.mxu3 %v3250_v14  ;;  %v14907_v30 = vpop.f32.mrf.mxu3  ;;  %3155 = vmatmul.f32.vlgmr.msra.gmra.mxu2 %v14473_v53  ;;  %v14912_v45 = vpop.f32.mrf.mxu1 }
 0x1c4   :  { %3360 = vmatpush.msra.mxu2 %v3277_v5  ;;  %v14910_v58 = vpop.f32.mrf.mxu2 }
 0x1c5   :  { %v1725_v23 = vpop.f32.mrf.mxu0 }
 0x1c6   :  { %3364 = vmatpush.msra.mxu2 %v3283_v33 }
 0x1c7   :  { %3339 = vmatmul.f32.vlgmr.msrb.gmra.mxu1 %v14482_v1 }
 0x1c8   :  { %11293 = vmatmul.msk.f32.vlgmr.msrb.gmra.mxu3 %vm1163_vm3, %v14465_v46 }
 0x1cb   :  { %v1591_v60 = vpop.f32.mrf.mxu3  ;;  %3257 = vmatmul.f32.vlgmr.msrb.gmra.mxu2 %v14499_v27  ;;  %v1750_v14 = vpop.f32.mrf.mxu1 }
 0x1cd   :  { %v1566_v52 = vpop.f32.mrf.mxu2  ;;  %v1827_v49 = vpop.f32.mrf.mxu0 }
 0x1ce   :  { %v1567_v59 = vadd.f32 %v1566_v52, %v1541_v48 }
 0x1d0   :  { %11295 = vmatmul.msk.f32.vlgmr.msra.gmra.mxu3 %vm1163_vm3, %v14465_v46  ;;  %v14920_v61 = vadd.f32 %v1591_v60, %v1567_v59 }
 0x1d3   :  { %v1699_v5 = vpop.f32.mrf.mxu3  ;;  %11294 = vmatmul.msk.f32.vlgmr.msra.gmra.mxu2 %vm1163_vm3, %v14465_v46  ;;  %v1858_v28 = vpop.f32.mrf.mxu1 }
 0x1d4   :  { %v1859_v32 = vadd.f32 %v1858_v28, %v1827_v49 }
 0x1d5   :  { %v1668_v33 = vpop.f32.mrf.mxu2  ;;  %v1936_v13 = vpop.f32.mrf.mxu0 }
 0x1d6   :  { %v1700_v7 = vadd.f32 %v1699_v5, %v1668_v33 }
 0x1d8   :  { %v1726_v38 = vadd.f32 %v1725_v23, %v1700_v7 }
 0x1da   :  { %v1751_v22 = vadd.f32 %v1750_v14, %v1726_v38 }
 0x1db   :  { %v1800_v20 = vpop.f32.mrf.mxu3  ;;  %v1959_v48 = vpop.f32.mrf.mxu1 }
 0x1dd   :  { %v1777_v34 = vpop.f32.mrf.mxu2  ;;  %v2043_v39 = vpop.f32.mrf.mxu0 }
 0x1de   :  { %v1778_v52 = vadd.f32 %v1777_v34, %v1751_v22 }
 0x1e0   :  { %v14924_v35 = vadd.f32 %v1800_v20, %v1778_v52 }
 0x1e3   :  { %v1909_v60 = vpop.f32.mrf.mxu3  ;;  %v2068_v19 = vpop.f32.mrf.mxu1 }
 0x1e5   :  { %v1884_v59 = vpop.f32.mrf.mxu2 }
 0x1e6   :  { %v1885_v17 = vadd.f32 %v1884_v59, %v1859_v32  ;;  %v2145_v3 = vpop.f32.mrf.mxu0 }
 0x1e8   :  { %v1910_v18 = vadd.f32 %v1909_v60, %v1885_v17  ;;  %v1223_v17 = vadd.f32 %v14870_v62, %v14857_v25  ;;  %v1382_v25 = vadd.f32 %v14895_v24, %v14899_v16 }
 0x1ea   :  { %v1937_v50 = vadd.f32 %v1936_v13, %v1910_v18 }
 0x1eb   :  { %v2017_v46 = vpop.f32.mrf.mxu3 }
 0x1ec   :  { %v14926_v5 = vadd.f32 %v1959_v48, %v1937_v50  ;;  %v2176_v23 = vpop.f32.mrf.mxu1 }
 0x1ed   :  { %v1986_v49 = vpop.f32.mrf.mxu2  ;;  %v2177_v14 = vadd.f32 %v2176_v23, %v2145_v3  ;;  %v1249_v3 = vadd.f32 %v14868_v41, %v1223_v17 }
 0x1ee   :  { %v2018_v38 = vadd.f32 %v2017_v46, %v1986_v49  ;;  %v2254_v33 = vpop.f32.mrf.mxu0 }
 0x1f0   :  { %v2044_v28 = vadd.f32 %v2043_v39, %v2018_v38 }
 0x1f2   :  { %v2069_v7 = vadd.f32 %v2068_v19, %v2044_v28  ;;  %v1274_v19 = vadd.f32 %v14864_v56, %v1249_v3 }
 0x1f3   :  { %v2118_v34 = vpop.f32.mrf.mxu3 }
 0x1f4   :  { %v2277_v20 = vpop.f32.mrf.mxu1  ;;  %v1301_v38 = vadd.f32 %v14885_v63, %v1274_v19 }
 0x1f6   :  { %v2095_v22 = vpop.f32.mrf.mxu2  ;;  %v2361_v4 = vpop.f32.mrf.mxu0  ;;  %v1324_v41 = vadd.f32 %v14880_v29, %v1301_v38 }
 0x1f7   :  { %v2096_v52 = vadd.f32 %v2095_v22, %v2069_v7  ;;  %v1408_v7 = vadd.f32 %v14872_v8, %v1382_v25 }
 0x1f9   :  { %v14928_v1 = vadd.f32 %v2118_v34, %v2096_v52 }
 0x1fb   :  { %v2227_v32 = vpop.f32.mrf.mxu3 }
 0x1fc   :  { %v2386_v18 = vpop.f32.mrf.mxu1 }
 0x1fe   :  { %v2202_v50 = vpop.f32.mrf.mxu2  ;;  %v2463_v48 = vpop.f32.mrf.mxu0 }
 0x1ff   :  { %v2203_v13 = vadd.f32 %v2202_v50, %v2177_v14 }
 0x201   :  { %v2228_v46 = vadd.f32 %v2227_v32, %v2203_v13  ;;  %v1433_v32 = vadd.f32 %v14887_v36, %v1408_v7 }
 0x203   :  { %v2335_v39 = vpop.f32.mrf.mxu3  ;;  %v2255_v60 = vadd.f32 %v2254_v33, %v2228_v46 }
 0x204   :  { %v2494_v23 = vpop.f32.mrf.mxu1 }
 0x205   :  { %v14934_v59 = vadd.f32 %v2277_v20, %v2255_v60  ;;  %v14941_v20 = vmul.f32 0.5, %v1324_v41  ;;  %v2495_v13 = vadd.f32 %v2494_v23, %v2463_v48 }
 0x206   :  { %v2304_v49 = vpop.f32.mrf.mxu2  ;;  %v2572_v34 = vpop.f32.mrf.mxu0 }
 0x207   :  { %v2336_v28 = vadd.f32 %v2335_v39, %v2304_v49  ;;  %v3407_v24 = vmul.f32 %v14941_v20, %v14941_v20 }
 0x209   :  { %v2362_v62 = vadd.f32 %v2361_v4, %v2336_v28  ;;  %v1460_v4 = vadd.f32 %v14910_v58, %v1433_v32  ;;  %v185_v58 = vmul.u32 2, %v14454_v43 }
 0x20b   :  { %v2436_v14 = vpop.f32.mrf.mxu3  ;;  %v2387_v33 = vadd.f32 %v2386_v18, %v2362_v62  ;;  %v1483_v3 = vadd.f32 %v14907_v30, %v1460_v4  ;;  %v1619_v30 = vadd.f32 %v14901_v31, %v14920_v61  ;;  %vm186_vm4 = vcmp.ge.s32.totalorder %v14449_v40, %v185_v58 }
 0x20c   :  { %v2595_v56 = vpop.f32.mrf.mxu1 }
 0x20d   :  { %v14948_v49 = vmul.f32 0.5, %v1483_v3 }
 0x20e   :  { %v2413_v22 = vpop.f32.mrf.mxu2  ;;  %v2679_v50 = vpop.f32.mrf.mxu0 }
 0x20f   :  { %v2414_v52 = vadd.f32 %v2413_v22, %v2387_v33  ;;  %v3408_v48 = vmul.f32 %v14948_v49, %v14948_v49 }
 0x211   :  { %v2437_v63 = vadd.f32 %v2436_v14, %v2414_v52 }
 0x213   :  { %v2545_v17 = vpop.f32.mrf.mxu3  ;;  %v3400_v16 = vmul.f32 0.5, %v2437_v63 }
 0x214   :  { %v2704_v18 = vpop.f32.mrf.mxu1 }
 0x215   :  { %v3414_v29 = vsub.f32 %v3400_v16, %v3407_v24 }
 0x216   :  { %v2520_v8 = vpop.f32.mrf.mxu2  ;;  %v2781_v28 = vpop.f32.mrf.mxu0 }
 0x217   :  { %v3421_v46 = vmax.f32 %v3414_v29, 0.0  ;;  %v2521_v39 = vadd.f32 %v2520_v8, %v2495_v13  ;;  %v14960_v8 = vld [vmem:[#allocation9] sm:$0xff] }
 0x219   :  { %v3428_v60 = vadd.f32 1e-05, %v3421_v46  ;;  %v2546_v19 = vadd.f32 %v2545_v17, %v2521_v39 }
 0x21b   :  { %v2653_v36 = vpop.f32.mrf.mxu3  ;;  %14050 = vrsqrt.f32 %v3428_v60  ;;  %v2573_v38 = vadd.f32 %v2572_v34, %v2546_v19  ;;  %v188_v34 = vadd.s32 2, %v185_v58  ;;  %vm3441_vm8 = vweird.f32 %v3428_v60 }
 0x21c   :  { %v2812_v41 = vpop.f32.mrf.mxu1 }
 0x21d   :  { %v2596_v25 = vadd.f32 %v2595_v56, %v2573_v38  ;;  %v1642_v56 = vadd.f32 %v14912_v45, %v1619_v30  ;;  %vm189_vm5 = vcmp.lt.s32.totalorder %v14449_v40, %v188_v34  ;;  %v3505_v45 = vperm.slane %v14960_v8, 2 }
 0x21e   :  { %v2622_v62 = vpop.f32.mrf.mxu2  ;;  %v2890_v29 = vpop.f32.mrf.mxu0  ;;  %vm191_vm7 = vmand %vm186_vm4, %vm189_vm5 }
 0x21f   :  { %v3401_v23 = vmul.f32 0.5, %v2596_v25  ;;  %v2654_v14 = vadd.f32 %v2653_v36, %v2622_v62  ;;  %v14958_v31 = vmul.f32 0.5, %v1642_v56  ;;  %v184_v36 = vadd.s32 8, %v14449_v40 }
 0x220   :  { %v16152_v25 = vmov 0.0  }
 0x221   :  { %v14051_v7 = vpop.eup %14050  ;;  %v3415_v33 = vsub.f32 %v3401_v23, %v3408_v48  ;;  %v2680_v22 = vadd.f32 %v2679_v50, %v2654_v14  ;;  %v3409_v39 = vmul.f32 %v14958_v31, %v14958_v31  ;;  %v14967_v62 = vsel %vm191_vm7, 1.0, %v16152_v25 }
 0x222   :  { %v3436_v52 = vmul.f32 %v14051_v7, %v3428_v60  ;;  %vm3442_vm6 = vweird.f32 %v14051_v7  ;;  %16153 = vst [vmem:[#allocation41_spill] sm:$0xff] %v14967_v62  ;;  %v2813_v23 = vadd.f32 %v2812_v41, %v2781_v28  ;;  %vm187_vm11 = vcmp.ge.s32.totalorder %v184_v36, %v185_v58 }
 0x223   :  { %v2754_v32 = vpop.f32.mrf.mxu3  ;;  %v3422_v63 = vmax.f32 %v3415_v33, 0.0  ;;  %v2705_v24 = vadd.f32 %v2704_v18, %v2680_v22  ;;  %vm3443_vm9 = vmor %vm3441_vm8, %vm3442_vm6  ;;  %vm190_vm12 = vcmp.lt.s32.totalorder %v184_v36, %v188_v34  ;;  %v14975_v41 = vmul.f32 0.5, %v14924_v35 }
 0x224   :  { %v3437_v17 = vmul.f32 %v14051_v7, %v3436_v52  ;;  %v2913_v46 = vpop.f32.mrf.mxu1  ;;  %vm192_vm13 = vmand %vm187_vm11, %vm190_vm12 }
 0x225   :  { %v3429_v43 = vadd.f32 1e-05, %v3422_v63  ;;  %v14978_v34 = vsel %vm192_vm13, 1.0, %v16152_v25  ;;  %v3410_v35 = vmul.f32 %v14975_v41, %v14975_v41 }
 0x226   :  { %v3438_v4 = vmul.f32 0.5, %v3437_v17  ;;  %v2731_v16 = vpop.f32.mrf.mxu2  ;;  %v2997_v40 = vpop.f32.mrf.mxu0  ;;  %16154 = vst [vmem:[#allocation42_spill] sm:$0xff] %v14978_v34 }
 0x227   :  { %14052 = vrsqrt.f32 %v3429_v43  ;;  %v2732_v61 = vadd.f32 %v2731_v16, %v2705_v24  ;;  %v14980_v16 = vld [vmem:[#allocation9 + $0x8] sm:$0xff]  ;;  %vm3451_vm15 = vweird.f32 %v3429_v43 }
 0x228   :  { %v3439_v50 = vsub.f32 1.5, %v3438_v4 }
 0x229   :  { %v2755_v13 = vadd.f32 %v2754_v32, %v2732_v61  ;;  %v3506_v61 = vperm.slane %v14980_v16, 2 }
 0x22a   :  { %v3440_v3 = vmul.f32 %v14051_v7, %v3439_v50 }
 0x22b   :  { %v2863_v18 = vpop.f32.mrf.mxu3  ;;  %v3402_v19 = vmul.f32 0.5, %v2755_v13 }
 0x22c   :  { %v3444_v38 = vsel %vm3443_vm9, %v14051_v7, %v3440_v3  ;;  %v3022_v4 = vpop.f32.mrf.mxu1 }
 0x22d   :  { %v14053_v48 = vpop.eup %14052  ;;  %v3416_v30 = vsub.f32 %v3402_v19, %v3409_v39  ;;  %v14969_v14 = vmul.f32 %v3505_v45, %v3444_v38 }
 0x22e   :  { %v3446_v60 = vmul.f32 %v14053_v48, %v3429_v43  ;;  %v2838_v33 = vpop.f32.mrf.mxu2  ;;  %vm3452_vm14 = vweird.f32 %v14053_v48  ;;  %v3099_v43 = vpop.f32.mrf.mxu0 }
 0x22f   :  { %v3423_v22 = vmax.f32 %v3416_v30, 0.0  ;;  %v2839_v52 = vadd.f32 %v2838_v33, %v2813_v23  ;;  %3562 = vmatpush.msra.mxu0 %v14969_v14  ;;  %vm3453_vm0 = vmor %vm3451_vm15, %vm3452_vm14 }
 0x230   :  { %v3447_v32 = vmul.f32 %v14053_v48, %v3446_v60  ;;  %11296 = vmatmul.msk.f32.vlgmr.msra.gmra.mxu0 %vm3540_vm10, %v14967_v62 }
 0x231   :  { %v3430_v7 = vadd.f32 1e-05, %v3423_v22  ;;  %v2864_v56 = vadd.f32 %v2863_v18, %v2839_v52  ;;  %v14993_v52 = vmul.f32 0.5, %v14926_v5 }
 0x232   :  { %v3448_v63 = vmul.f32 0.5, %v3447_v32 }
 0x233   :  { %v2971_v28 = vpop.f32.mrf.mxu3  ;;  %14054 = vrsqrt.f32 %v3430_v7  ;;  %v2891_v17 = vadd.f32 %v2890_v29, %v2864_v56  ;;  %vm3461_vm2 = vweird.f32 %v3430_v7 }
 0x234   :  { %v3449_v24 = vsub.f32 1.5, %v3448_v63  ;;  %v14995_v63 = vld [vmem:[#allocation9 + $0x10] sm:$0xff] }
 0x235   :  { %v2914_v58 = vadd.f32 %v2913_v46, %v2891_v17 }
 0x236   :  { %v2940_v50 = vpop.f32.mrf.mxu2  ;;  %v3450_v13 = vmul.f32 %v14053_v48, %v3449_v24 }
 0x237   :  { %v3403_v45 = vmul.f32 0.5, %v2914_v58  ;;  %v2972_v29 = vadd.f32 %v2971_v28, %v2940_v50  ;;  %v3507_v28 = vperm.slane %v14995_v63, 2 }
 0x238   :  { %11297 = vmatmul.msk.f32.gmra.mxu0 %vm3540_vm10, %v14978_v34  ;;  %v3454_v18 = vsel %vm3453_vm0, %v14053_v48, %v3450_v13  ;;  %v3130_v48 = vpop.f32.mrf.mxu1 }
 0x239   :  { %v14055_v3 = vpop.eup %14054  ;;  %v3417_v46 = vsub.f32 %v3403_v45, %v3410_v35  ;;  %v2998_v39 = vadd.f32 %v2997_v40, %v2972_v29  ;;  %v14987_v19 = vmul.f32 %v3506_v61, %v3454_v18  ;;  %v3208_v61 = vpop.f32.mrf.mxu0  ;;  %v3131_v35 = vadd.f32 %v3130_v48, %v3099_v43  ;;  %v15010_v48 = vld [vmem:[#allocation9 + $0x18] sm:$0xff] }
 0x23a   :  { %v3456_v36 = vmul.f32 %v14055_v3, %v3430_v7  ;;  %vm3462_vm1 = vweird.f32 %v14055_v3 }
 0x23b   :  { %v3072_v38 = vpop.f32.mrf.mxu3  ;;  %v3424_v25 = vmax.f32 %v3417_v46, 0.0  ;;  %3585 = vmatpush.msra.mxu1 %v14987_v19  ;;  %v3023_v60 = vadd.f32 %v3022_v4, %v2998_v39  ;;  %v3411_v4 = vmul.f32 %v14993_v52, %v14993_v52  ;;  %vm3463_vm4 = vmor %vm3461_vm2, %vm3462_vm1 }
 0x23c   :  { %v3457_v30 = vmul.f32 %v14055_v3, %v3456_v36  ;;  %11298 = vmatmul.msk.f32.vlgmr.msra.gmra.mxu1 %vm3540_vm10, %v14967_v62 }
 0x23d   :  { %v3431_v23 = vadd.f32 1e-05, %v3424_v25 }
 0x23e   :  { %v3458_v33 = vmul.f32 0.5, %v3457_v30  ;;  %v3049_v22 = vpop.f32.mrf.mxu2 }
 0x23f   :  { %14056 = vrsqrt.f32 %v3431_v23  ;;  %v3050_v32 = vadd.f32 %v3049_v22, %v3023_v60  ;;  %vm3471_vm6 = vweird.f32 %v3431_v23 }
 0x240   :  { %v3459_v40 = vsub.f32 1.5, %v3458_v33  ;;  %v3231_v36 = vpop.f32.mrf.mxu1 }
 0x241   :  { %v3073_v56 = vadd.f32 %v3072_v38, %v3050_v32  ;;  %v3508_v32 = vperm.slane %v15010_v48, 2 }
 0x242   :  { %v3460_v24 = vmul.f32 %v14055_v3, %v3459_v40 }
 0x243   :  { %v3181_v17 = vpop.f32.mrf.mxu3  ;;  %v3404_v58 = vmul.f32 0.5, %v3073_v56 }
 0x244   :  { %11299 = vmatmul.msk.f32.gmra.mxu1 %vm3540_vm10, %v14978_v34  ;;  %v3464_v5 = vsel %vm3463_vm4, %v14055_v3, %v3460_v24  ;;  %v15008_v3 = vmul.f32 0.5, %v14928_v1 }
 0x245   :  { %v14057_v50 = vpop.eup %14056  ;;  %v3418_v13 = vsub.f32 %v3404_v58, %v3411_v4  ;;  %v15002_v45 = vmul.f32 %v3507_v28, %v3464_v5  ;;  %v3315_v28 = vpop.f32.mrf.mxu0  ;;  %v3519_v4 = vmul.f32 %v14969_v14, %v14941_v20  ;;  %v3526_v58 = vperm.slane %v14960_v8, 3 }
 0x246   :  { %v3466_v29 = vmul.f32 %v14057_v50, %v3431_v23  ;;  %v3156_v18 = vpop.f32.mrf.mxu2  ;;  %vm3472_vm5 = vweird.f32 %v14057_v50  ;;  %v3412_v40 = vmul.f32 %v15008_v3, %v15008_v3 }
 0x247   :  { %v3425_v7 = vmax.f32 %v3418_v13, 0.0  ;;  %v3157_v46 = vadd.f32 %v3156_v18, %v3131_v35  ;;  %3608 = vmatpush.msrb.mxu2 %v15002_v45  ;;  %vm3473_vm7 = vmor %vm3471_vm6, %vm3472_vm5 }
 0x248   :  { %v3467_v39 = vmul.f32 %v14057_v50, %v3466_v29  ;;  %11300 = vmatmul.msk.f32.vlgmr.msrb.gmra.mxu2 %vm3540_vm10, %v14967_v62  ;;  %v3340_v18 = vpop.f32.mrf.mxu1 }
 0x249   :  { %v3432_v38 = vadd.f32 1e-05, %v3425_v7  ;;  %v3182_v25 = vadd.f32 %v3181_v17, %v3157_v46  ;;  %v3533_v46 = vsub.f32 %v3526_v58, %v3519_v4 }
 0x24a   :  { %v3468_v30 = vmul.f32 0.5, %v3467_v39 }
 0x24b   :  { %14058 = vrsqrt.f32 %v3432_v38  ;;  %v3209_v43 = vadd.f32 %v3208_v61, %v3182_v25  ;;  %v3289_v33 = vpop.f32.mrf.mxu3  ;;  %v15026_v25 = vmul.f32 0.5, %v14934_v59  ;;  %vm3481_vm9 = vweird.f32 %v3432_v38 }
 0x24c   :  { %v3469_v60 = vsub.f32 1.5, %v3468_v30  ;;  %v3527_v59 = vperm.slane %v14980_v16, 3 }
 0x24d   :  { %v3232_v22 = vadd.f32 %v3231_v36, %v3209_v43 }
 0x24e   :  { %v3258_v56 = vpop.f32.mrf.mxu2  ;;  %v3470_v17 = vmul.f32 %v14057_v50, %v3469_v60 }
 0x24f   :  { %v3405_v1 = vmul.f32 0.5, %v3232_v22  ;;  %v3290_v24 = vadd.f32 %v3289_v33, %v3258_v56  ;;  %v14068_v33 = vld [vmem:[#allocation9 + $0x20] sm:$0xff] }
 0x250   :  { %11301 = vmatmul.msk.f32.gmra.mxu2 %vm3540_vm10, %v14978_v34  ;;  %v3474_v5 = vsel %vm3473_vm7, %v14057_v50, %v3470_v17  ;;  %v3509_v22 = vperm.slane %v14068_v33, 2  ;;  %v3530_v58 = vperm.slane %v14068_v33, 3  ;;  %v14070_v33 = vld [vmem:[#allocation9 + $0x30] sm:$0xff] }
 0x251   :  { %v14059_v61 = vpop.eup %14058  ;;  %v3419_v13 = vsub.f32 %v3405_v1, %v3412_v40  ;;  %v3316_v35 = vadd.f32 %v3315_v28, %v3290_v24  ;;  %v15020_v29 = vmul.f32 %v3508_v32, %v3474_v5  ;;  %v3413_v40 = vmul.f32 %v15026_v25, %v15026_v25 }
 0x252   :  { %v3476_v23 = vmul.f32 %v14059_v61, %v3432_v38  ;;  %vm3482_vm8 = vweird.f32 %v14059_v61  ;;  %v3520_v28 = vmul.f32 %v14987_v19, %v14948_v49 }
 0x253   :  { %v3426_v7 = vmax.f32 %v3419_v13, 0.0  ;;  %3631 = vmatpush.msrb.mxu3 %v15020_v29  ;;  %v3341_v8 = vadd.f32 %v3340_v18, %v3316_v35  ;;  %v3390_v36 = vpop.f32.mrf.mxu3  ;;  %vm3483_vm11 = vmor %vm3481_vm9, %vm3482_vm8  ;;  %v14069_v18 = vld [vmem:[#allocation9 + $0x28] sm:$0xff] }
 0x254   :  { %v3477_v39 = vmul.f32 %v14059_v61, %v3476_v23  ;;  %11302 = vmatmul.msk.f32.vlgmr.msrb.gmra.mxu3 %vm3540_vm10, %v14967_v62  ;;  %v3534_v13 = vsub.f32 %v3527_v59, %v3520_v28  ;;  %v3532_v59 = vperm.slane %v14070_v33, 3 }
 0x255   :  { %v3433_v20 = vadd.f32 1e-05, %v3426_v7  ;;  %3723 = vmatpush.msra.mxu3 %v3533_v46  ;;  %v3510_v7 = vperm.slane %v14069_v18, 2 }
 0x256   :  { %v3478_v14 = vmul.f32 0.5, %v3477_v39  ;;  %v3367_v50 = vpop.f32.mrf.mxu2  ;;  %v3528_v39 = vperm.slane %v14995_v63, 3 }
 0x257   :  { %14060 = vrsqrt.f32 %v3433_v20  ;;  %v3368_v30 = vadd.f32 %v3367_v50, %v3341_v8  ;;  %vm3491_vm13 = vweird.f32 %v3433_v20 }
 0x258   :  { %v3479_v43 = vsub.f32 1.5, %v3478_v14 }
 0x259   :  { %v3391_v60 = vadd.f32 %v3390_v36, %v3368_v30  ;;  %v3531_v36 = vperm.slane %v14069_v18, 3 }
 0x25a   :  { %v3480_v32 = vmul.f32 %v14059_v61, %v3479_v43 }
 0x25b   :  { %v3406_v56 = vmul.f32 0.5, %v3391_v60 }
 0x25c   :  { %11303 = vmatmul.msk.f32.gmra.mxu3 %vm3540_vm10, %v14978_v34  ;;  %v3484_v17 = vsel %vm3483_vm11, %v14059_v61, %v3480_v32  ;;  %v3522_v32 = vmul.f32 %v15020_v29, %v14975_v41 }
 0x25d   :  { %v14061_v1 = vpop.eup %14060  ;;  %v3420_v24 = vsub.f32 %v3406_v56, %v3413_v40  ;;  %v3516_v4 = vmul.f32 %v3509_v22, %v3484_v17  ;;  %v3511_v22 = vperm.slane %v14070_v33, 2  ;;  %v3529_v40 = vperm.slane %v15010_v48, 3 }
 0x25e   :  { %v3486_v38 = vmul.f32 %v14061_v1, %v3433_v20  ;;  %vm3492_vm12 = vweird.f32 %v14061_v1 }
 0x25f   :  { %v3427_v5 = vmax.f32 %v3420_v24, 0.0  ;;  %3654 = vmatpush.msrb.mxu0 %v3516_v4  ;;  %v3523_v35 = vmul.f32 %v3516_v4, %v14993_v52  ;;  %vm3493_vm14 = vmor %vm3491_vm13, %vm3492_vm12  ;;  %v3521_v52 = vmul.f32 %v15002_v45, %v14958_v31  ;;  %v3536_v17 = vsub.f32 %v3529_v40, %v3522_v32 }
 0x260   :  { %v3487_v23 = vmul.f32 %v14061_v1, %v3486_v38  ;;  %11304 = vmatmul.msk.f32.vlgmr.msrb.gmra.mxu0 %vm3540_vm10, %v14967_v62 }
 0x261   :  { %v3434_v49 = vadd.f32 1e-05, %v3427_v5  ;;  %3746 = vmatpush.msra.mxu0 %v3534_v13  ;;  %v3537_v16 = vsub.f32 %v3530_v58, %v3523_v35  ;;  %v3535_v43 = vsub.f32 %v3528_v39, %v3521_v52 }
 0x262   :  { %v3488_v19 = vmul.f32 0.5, %v3487_v23 }
 0x263   :  { %14062 = vrsqrt.f32 %v3434_v49  ;;  %3815 = vmatpush.msrb.mxu3 %v3537_v16  ;;  %vm3501_vm0 = vweird.f32 %v3434_v49 }
 0x264   :  { %v3489_v61 = vsub.f32 1.5, %v3488_v19  ;;  %11310 = vmatmul.msk.f32.vlgmr.msra.gmra.mxu3 %vm3540_vm10, %v14967_v62 }
 0x266   :  { %v3490_v46 = vmul.f32 %v14061_v1, %v3489_v61 }
 0x268   :  { %11305 = vmatmul.msk.f32.gmra.mxu0 %vm3540_vm10, %v14978_v34  ;;  %v3494_v8 = vsel %vm3493_vm14, %v14061_v1, %v3490_v46 }
 0x269   :  { %v14063_v14 = vpop.eup %14062  ;;  %v3517_v50 = vmul.f32 %v3510_v7, %v3494_v8 }
 0x26a   :  { %v3496_v30 = vmul.f32 %v14063_v14, %v3434_v49  ;;  %vm3502_vm15 = vweird.f32 %v14063_v14 }
 0x26b   :  { %3677 = vmatpush.msrb.mxu1 %v3517_v50  ;;  %v3524_v60 = vmul.f32 %v3517_v50, %v15008_v3  ;;  %vm3503_vm1 = vmor %vm3501_vm0, %vm3502_vm15 }
 0x26c   :  { %v3497_v20 = vmul.f32 %v14063_v14, %v3496_v30  ;;  %11306 = vmatmul.msk.f32.vlgmr.msrb.gmra.mxu1 %vm3540_vm10, %v14967_v62  ;;  %11311 = vmatmul.msk.f32.gmra.mxu3 %vm3540_vm10, %v14978_v34 }
 0x26d   :  { %3769 = vmatpush.msra.mxu1 %v3535_v43  ;;  %v3538_v31 = vsub.f32 %v3531_v36, %v3524_v60 }
 0x26e   :  { %v3498_v63 = vmul.f32 0.5, %v3497_v20 }
 0x26f   :  { %3838 = vmatpush.msrb.mxu0 %v3538_v31 }
 0x270   :  { %v3499_v45 = vsub.f32 1.5, %v3498_v63  ;;  %11312 = vmatmul.msk.f32.vlgmr.msra.gmra.mxu0 %vm3540_vm10, %v14967_v62 }
 0x272   :  { %v3500_v3 = vmul.f32 %v14063_v14, %v3499_v45 }
 0x274   :  { %11307 = vmatmul.msk.f32.gmra.mxu1 %vm3540_vm10, %v14978_v34  ;;  %11318 = vmatmul.msk.f32.vlgmr.msrb.gmra.mxu3 %vm3540_vm10, %v14967_v62  ;;  %v3504_v56 = vsel %vm3503_vm1, %v14063_v14, %v3500_v3 }
 0x275   :  { %v3518_v28 = vmul.f32 %v3511_v22, %v3504_v56 }
 0x277   :  { %3700 = vmatpush.msra.mxu2 %v3518_v28  ;;  %v3525_v1 = vmul.f32 %v3518_v28, %v15026_v25 }
 0x278   :  { %11308 = vmatmul.msk.f32.vlgmr.msra.gmra.mxu2 %vm3540_vm10, %v14967_v62  ;;  %11313 = vmatmul.msk.f32.gmra.mxu0 %vm3540_vm10, %v14978_v34 }
 0x279   :  { %3792 = vmatpush.msrb.mxu2 %v3536_v17  ;;  %v3539_v41 = vsub.f32 %v3532_v59, %v3525_v1 }
 0x27b   :  { %3861 = vmatpush.msrb.mxu1 %v3539_v41 }
 0x27c   :  { %11314 = vmatmul.msk.f32.vlgmr.msra.gmra.mxu1 %vm3540_vm10, %v14967_v62  ;;  %11319 = vmatmul.msk.f32.gmra.mxu3 %vm3540_vm10, %v14978_v34 }
 0x280   :  { %11309 = vmatmul.msk.f32.gmra.mxu2 %vm3540_vm10, %v14978_v34  ;;  %11320 = vmatmul.msk.f32.vlgmr.msrb.gmra.mxu0 %vm3540_vm10, %v14967_v62 }
 0x284   :  { %11315 = vmatmul.msk.f32.gmra.mxu1 %vm3540_vm10, %v14978_v34 }
 0x288   :  { %11316 = vmatmul.msk.f32.vlgmr.msrb.gmra.mxu2 %vm3540_vm10, %v14967_v62  ;;  %11321 = vmatmul.msk.f32.gmra.mxu0 %vm3540_vm10, %v14978_v34 }
 0x28c   :  { %11322 = vmatmul.msk.f32.vlgmr.msrb.gmra.mxu1 %vm3540_vm10, %v14967_v62 }
 0x290   :  { %11317 = vmatmul.msk.f32.gmra.mxu2 %vm3540_vm10, %v14978_v34 }
 0x294   :  { %11323 = vmatmul.msk.f32.gmra.mxu1 %vm3540_vm10, %v14978_v34 }
 0x2ad   :  { %v3564_v48 = vpop.f32.mrf.mxu0 }
 0x2ae   :  { %v3869_v13 = vmul.f32 %v3564_v48, %v14475_v54 }
 0x2b5   :  { %v3567_v29 = vpop.f32.mrf.mxu0 }
 0x2b6   :  { %v3876_v7 = vmul.f32 %v3567_v29, %v14491_v11 }
 0x2b9   :  { %v3587_v25 = vpop.f32.mrf.mxu1 }
 0x2ba   :  { %v3870_v61 = vmul.f32 %v3587_v25, %v14489_v10 }
 0x2c1   :  { %v3590_v38 = vpop.f32.mrf.mxu1 }
 0x2c2   :  { %v3877_v36 = vmul.f32 %v3590_v38, %v14507_v37 }
 0x2cb   :  { %v3610_v49 = vpop.f32.mrf.mxu2 }
 0x2cc   :  { %v3871_v11 = vmul.f32 %v3610_v49, %v14513_v26 }
 0x2d3   :  { %v3613_v50 = vpop.f32.mrf.mxu2 }
 0x2d4   :  { %v3878_v56 = vmul.f32 %v3613_v50, %v14534_v15 }
 0x2d7   :  { %v3633_v24 = vpop.f32.mrf.mxu3 }
 0x2dd   :  { %v3656_v4 = vpop.f32.mrf.mxu0 }
 0x2de   :  { %v3873_v43 = vmul.f32 %v3656_v4, %v14576_v57 }
 0x2df   :  { %v3636_v58 = vpop.f32.mrf.mxu3 }
 0x2e5   :  { %v3659_v5 = vpop.f32.mrf.mxu0 }
 0x2e6   :  { %v3880_v32 = vmul.f32 %v3659_v5, %v14602_v42  ;;  %v3872_v5 = vmul.f32 %v3633_v24, %v14530_v12 }
 0x2e7   :  { %v3725_v35 = vpop.f32.mrf.mxu3 }
 0x2e8   :  { %v15091_v23 = vadd.f32 %v3869_v13, %v3725_v35 }
 0x2e9   :  { %v3679_v16 = vpop.f32.mrf.mxu1 }
 0x2ea   :  { %v3897_v19 = vmax.f32 %v15091_v23, 0.0  ;;  %v3874_v37 = vmul.f32 %v3679_v16, %v14623_v2 }
 0x2ed   :  { %v3748_v18 = vpop.f32.mrf.mxu0 }
 0x2ee   :  { %v15096_v46 = vadd.f32 %v3870_v61, %v3748_v18 }
 0x2ef   :  { %v3728_v52 = vpop.f32.mrf.mxu3 }
 0x2f0   :  { %v3898_v39 = vmax.f32 %v15096_v46, 0.0  ;;  %v15099_v8 = vadd.f32 %v3876_v7, %v3728_v52  ;;  %v3879_v7 = vmul.f32 %v3636_v58, %v14562_v55 }
 0x2f1   :  { %v3682_v54 = vpop.f32.mrf.mxu1 }
 0x2f2   :  { %v3904_v14 = vmax.f32 %v15099_v8, 0.0  ;;  %v3881_v48 = vmul.f32 %v3682_v54, %v14627_v9 }
 0x2f5   :  { %v3751_v30 = vpop.f32.mrf.mxu0 }
 0x2f6   :  { %v15104_v10 = vadd.f32 %v3877_v36, %v3751_v30 }
 0x2f7   :  { %v3817_v60 = vpop.f32.mrf.mxu3 }
 0x2f8   :  { %v3905_v20 = vmax.f32 %v15104_v10, 0.0  ;;  %v15108_v31 = vadd.f32 %v3873_v43, %v3817_v60 }
 0x2f9   :  { %v3771_v63 = vpop.f32.mrf.mxu1 }
 0x2fa   :  { %v3901_v45 = vmax.f32 %v15108_v31, 0.0  ;;  %v15111_v33 = vadd.f32 %v3871_v11, %v3771_v63 }
 0x2fb   :  { %v3702_v22 = vpop.f32.mrf.mxu2 }
 0x2fc   :  { %v3899_v3 = vmax.f32 %v15111_v33, 0.0  ;;  %v3875_v4 = vmul.f32 %v3702_v22, %v14673_v51 }
 0x2fd   :  { %v3840_v57 = vpop.f32.mrf.mxu0 }
 0x2fe   :  { %v15116_v40 = vadd.f32 %v3874_v37, %v3840_v57 }
 0x2ff   :  { %v3820_v26 = vpop.f32.mrf.mxu3 }
 0x300   :  { %v3902_v28 = vmax.f32 %v15116_v40, 0.0  ;;  %v15120_v59 = vadd.f32 %v3880_v32, %v3820_v26 }
 0x301   :  { %v3774_v17 = vpop.f32.mrf.mxu1 }
 0x302   :  { %v3908_v1 = vmax.f32 %v15120_v59, 0.0  ;;  %v15123_v41 = vadd.f32 %v3878_v56, %v3774_v17 }
 0x303   :  { %v3705_v2 = vpop.f32.mrf.mxu2 }
 0x304   :  { %v3906_v29 = vmax.f32 %v15123_v41, 0.0  ;;  %v3882_v61 = vmul.f32 %v3705_v2, %v14693_v6 }
 0x305   :  { %v3843_v42 = vpop.f32.mrf.mxu0 }
 0x306   :  { %v15127_v25 = vadd.f32 %v3881_v48, %v3843_v42 }
 0x309   :  { %v3863_v38 = vpop.f32.mrf.mxu1 }
 0x30a   :  { %v15132_v13 = vadd.f32 %v3875_v4, %v3863_v38 }
 0x30b   :  { %v3794_v35 = vpop.f32.mrf.mxu2 }
 0x30c   :  { %v15135_v16 = vadd.f32 %v3872_v5, %v3794_v35 }
 0x30e   :  { %v3900_v9 = vmax.f32 %v15135_v16, 0.0 }
 0x311   :  { %v3866_v18 = vpop.f32.mrf.mxu1 }
 0x312   :  { %v15140_v51 = vadd.f32 %v3882_v61, %v3866_v18 }
 0x313   :  { %v3797_v52 = vpop.f32.mrf.mxu2 }
 0x314   :  { %v15143_v12 = vadd.f32 %v3879_v7, %v3797_v52 }
 0x316   :  { %v3907_v24 = vmax.f32 %v15143_v12, 0.0 }
 0x317   :  { %14234 = dma.done.wait [#allocation4], 50176 }
 0x318   :  { %14235 = vsyncadd [#allocation4], 4294917120  ;;  %v11522_v50 = vld [vmem:[#allocation2 + $0x188] sm:$0xf]  ;;  %v13576_v36 = vld [vmem:[#allocation2 + $0x1a0] sm:$0xf0] }
 0x319   :  { %v11746_v30 = vld [vmem:[#allocation2 + $0x348] sm:$0xf]  ;;  %v11523_v43 = vor.u32 %v13576_v36, %v11522_v50  ;;  %v13632_v60 = vld [vmem:[#allocation2 + $0x360] sm:$0xf0]  ;;  %v11494_v37 = vld [vmem:[#allocation2 + $0x150] sm:$0xf] }
 0x31a   :  { %v11970_v6 = vld [vmem:[#allocation2 + $0x508] sm:$0xf]  ;;  %v13688_v11 = vld [vmem:[#allocation2 + $0x520] sm:$0xf0]  ;;  %v11747_v63 = vor.u32 %v13632_v60, %v11746_v30  ;;  %v13569_v32 = vld [vmem:[#allocation2 + $0x168] sm:$0xf0] }
 0x31b   :  { %v11971_v55 = vor.u32 %v13688_v11, %v11970_v6  ;;  %v12194_v58 = vld [vmem:[#allocation2 + $0x6c8] sm:$0xf]  ;;  %v13744_v22 = vld [vmem:[#allocation2 + $0x6e0] sm:$0xf0]  ;;  %6393 = vmatpush.bf16.msra.mxu2 %v11523_v43  ;;  %v11718_v26 = vld [vmem:[#allocation2 + $0x310] sm:$0xf]  ;;  %v11495_v17 = vor.u32 %v13569_v32, %v11494_v37 }
 0x31c   :  { %v12195_v57 = vor.u32 %v13744_v22, %v12194_v58  ;;  %v13625_v56 = vld [vmem:[#allocation2 + $0x328] sm:$0xf0]  ;;  %6407 = vmatpush.bf16.msra.mxu3 %v11747_v63  ;;  %v11942_v48 = vld [vmem:[#allocation2 + $0x4d0] sm:$0xf]  ;;  %v11466_v35 = vld [vmem:[#allocation2 + $0x118] sm:$0xf] }
 0x31d   :  { %6421 = vmatpush.bf16.msra.mxu0 %v11971_v55  ;;  %v11719_v2 = vor.u32 %v13625_v56, %v11718_v26  ;;  %v13681_v42 = vld [vmem:[#allocation2 + $0x4e8] sm:$0xf0]  ;;  %v12166_v4 = vld [vmem:[#allocation2 + $0x690] sm:$0xf]  ;;  %v13562_v61 = vld [vmem:[#allocation2 + $0x130] sm:$0xf0] }
 0x31e   :  { %6435 = vmatpush.bf16.msra.mxu1 %v12195_v57  ;;  %v11943_v38 = vor.u32 %v13681_v42, %v11942_v48  ;;  %v13737_v5 = vld [vmem:[#allocation2 + $0x6a8] sm:$0xf0]  ;;  %v11690_v7 = vld [vmem:[#allocation2 + $0x2d8] sm:$0xf]  ;;  %v13618_v52 = vld [vmem:[#allocation2 + $0x2f0] sm:$0xf0]  ;;  %v11467_v36 = vor.u32 %v13562_v61, %v11466_v35 }
 0x31f   :  { %v12167_v18 = vor.u32 %v13737_v5, %v12166_v4  ;;  %v11914_v50 = vld [vmem:[#allocation2 + $0x498] sm:$0xf]  ;;  %6394 = vmatpush.bf16.msra.mxu2 %v11495_v17  ;;  %v13674_v30 = vld [vmem:[#allocation2 + $0x4b0] sm:$0xf0]  ;;  %v11691_v6 = vor.u32 %v13618_v52, %v11690_v7  ;;  %v11438_v63 = vld [vmem:[#allocation2 + $0xe0] sm:$0xf] }
 0x320   :  { %v12138_v43 = vld [vmem:[#allocation2 + $0x658] sm:$0xf]  ;;  %v13730_v60 = vld [vmem:[#allocation2 + $0x670] sm:$0xf0]  ;;  %6408 = vmatpush.bf16.msra.mxu3 %v11719_v2  ;;  %v11915_v11 = vor.u32 %v13674_v30, %v11914_v50  ;;  %v13555_v55 = vld [vmem:[#allocation2 + $0xf8] sm:$0xf0] }
 0x321   :  { %6422 = vmatpush.bf16.msra.mxu0 %v11943_v38  ;;  %v11662_v58 = vld [vmem:[#allocation2 + $0x2a0] sm:$0xf]  ;;  %v12139_v22 = vor.u32 %v13730_v60, %v12138_v43  ;;  %v13611_v37 = vld [vmem:[#allocation2 + $0x2b8] sm:$0xf0]  ;;  %v11439_v17 = vor.u32 %v13555_v55, %v11438_v63  ;;  %v11410_v2 = vld [vmem:[#allocation2 + $0xa8] sm:$0xf] }
 0x322   :  { %6436 = vmatpush.bf16.msra.mxu1 %v12167_v18  ;;  %v11886_v57 = vld [vmem:[#allocation2 + $0x460] sm:$0xf]  ;;  %v13667_v32 = vld [vmem:[#allocation2 + $0x478] sm:$0xf0]  ;;  %v11663_v48 = vor.u32 %v13611_v37, %v11662_v58  ;;  %v13548_v4 = vld [vmem:[#allocation2 + $0xc0] sm:$0xf0] }
 0x323   :  { %v12110_v26 = vld [vmem:[#allocation2 + $0x620] sm:$0xf]  ;;  %v13723_v56 = vld [vmem:[#allocation2 + $0x638] sm:$0xf0]  ;;  %6395 = vmatpush.bf16.msra.mxu2 %v11467_v36  ;;  %v11887_v42 = vor.u32 %v13667_v32, %v11886_v57  ;;  %v11634_v38 = vld [vmem:[#allocation2 + $0x268] sm:$0xf]  ;;  %v11411_v50 = vor.u32 %v13548_v4, %v11410_v2 }
 0x324   :  { %6409 = vmatpush.bf16.msra.mxu3 %v11691_v6  ;;  %v12111_v5 = vor.u32 %v13723_v56, %v12110_v26  ;;  %v13604_v35 = vld [vmem:[#allocation2 + $0x280] sm:$0xf0]  ;;  %v11858_v61 = vld [vmem:[#allocation2 + $0x428] sm:$0xf]  ;;  %v11382_v43 = vld [vmem:[#allocation2 + $0x70] sm:$0xf] }
 0x325   :  { %6423 = vmatpush.bf16.msra.mxu0 %v11915_v11  ;;  %v13660_v18 = vld [vmem:[#allocation2 + $0x440] sm:$0xf0]  ;;  %v12082_v7 = vld [vmem:[#allocation2 + $0x5e8] sm:$0xf]  ;;  %v11635_v36 = vor.u32 %v13604_v35, %v11634_v38  ;;  %v13541_v60 = vld [vmem:[#allocation2 + $0x88] sm:$0xf0] }
 0x326   :  { %6437 = vmatpush.bf16.msra.mxu1 %v12139_v22  ;;  %v13716_v52 = vld [vmem:[#allocation2 + $0x600] sm:$0xf0]  ;;  %v11859_v30 = vor.u32 %v13660_v18, %v11858_v61  ;;  %v11606_v6 = vld [vmem:[#allocation2 + $0x230] sm:$0xf]  ;;  %v13597_v63 = vld [vmem:[#allocation2 + $0x248] sm:$0xf0]  ;;  %v11383_v57 = vor.u32 %v13541_v60, %v11382_v43 }
 0x327   :  { %6396 = vmatpush.bf16.msra.mxu2 %v11439_v17  ;;  %v12083_v11 = vor.u32 %v13716_v52, %v12082_v7  ;;  %v11830_v55 = vld [vmem:[#allocation2 + $0x3f0] sm:$0xf]  ;;  %v13653_v58 = vld [vmem:[#allocation2 + $0x408] sm:$0xf0]  ;;  %v11607_v32 = vor.u32 %v13597_v63, %v11606_v6  ;;  %v11354_v56 = vld [vmem:[#allocation2 + $0x38] sm:$0xf] }
 0x328   :  { %6410 = vmatpush.bf16.msra.mxu3 %v11663_v48  ;;  %v12054_v22 = vld [vmem:[#allocation2 + $0x5b0] sm:$0xf]  ;;  %v13709_v37 = vld [vmem:[#allocation2 + $0x5c8] sm:$0xf0]  ;;  %v11831_v26 = vor.u32 %v13653_v58, %v11830_v55  ;;  %v13534_v17 = vld [vmem:[#allocation2 + $0x50] sm:$0xf0] }
 0x329   :  { %6424 = vmatpush.bf16.msra.mxu0 %v11887_v42  ;;  %v11578_v48 = vld [vmem:[#allocation2 + $0x1f8] sm:$0xf]  ;;  %v12055_v42 = vor.u32 %v13709_v37, %v12054_v22  ;;  %v13590_v2 = vld [vmem:[#allocation2 + $0x210] sm:$0xf0]  ;;  %v11355_v61 = vor.u32 %v13534_v17, %v11354_v56  ;;  %v11326_v18 = vld [vmem:[#allocation2] sm:$0xf] }
 0x32a   :  { %6438 = vmatpush.bf16.msra.mxu1 %v12111_v5  ;;  %v11802_v4 = vld [vmem:[#allocation2 + $0x3b8] sm:$0xf]  ;;  %v13646_v38 = vld [vmem:[#allocation2 + $0x3d0] sm:$0xf0]  ;;  %v13527_v7 = vld [vmem:[#allocation2 + $0x18] sm:$0xf0]  ;;  %v11579_v52 = vor.u32 %v13590_v2, %v11578_v48 }
 0x32b   :  { %6397 = vmatpush.bf16.msra.mxu2 %v11411_v50  ;;  %v12026_v5 = vld [vmem:[#allocation2 + $0x578] sm:$0xf]  ;;  %v13702_v35 = vld [vmem:[#allocation2 + $0x590] sm:$0xf0]  ;;  %v11803_v50 = vor.u32 %v13646_v38, %v11802_v4  ;;  %v11774_v43 = vld [vmem:[#allocation2 + $0x380] sm:$0xf]  ;;  %v11327_v37 = vor.u32 %v13527_v7, %v11326_v18 }
 0x32c   :  { %6411 = vmatpush.bf16.msra.mxu3 %v11635_v36  ;;  %v11550_v36 = vld [vmem:[#allocation2 + $0x1c0] sm:$0xf]  ;;  %v12027_v60 = vor.u32 %v13702_v35, %v12026_v5  ;;  %v13639_v6 = vld [vmem:[#allocation2 + $0x398] sm:$0xf0]  ;;  %v12418_v55 = vld [vmem:[#allocation2 + $0x888] sm:$0xf] }
 0x32d   :  { %6425 = vmatpush.bf16.msra.mxu0 %v11859_v30  ;;  %v13583_v30 = vld [vmem:[#allocation2 + $0x1d8] sm:$0xf0]  ;;  %v13800_v58 = vld [vmem:[#allocation2 + $0x8a0] sm:$0xf0]  ;;  %v12642_v22 = vld [vmem:[#allocation2 + $0xa48] sm:$0xf] }
 0x32e   :  { %6439 = vmatpush.bf16.msra.mxu1 %v12083_v11  ;;  %v11998_v11 = vld [vmem:[#allocation2 + $0x540] sm:$0xf]  ;;  %v13695_v63 = vld [vmem:[#allocation2 + $0x558] sm:$0xf0]  ;;  %v12866_v56 = vld [vmem:[#allocation2 + $0xc08] sm:$0xf]  ;;  %v12419_v4 = vor.u32 %v13800_v58, %v12418_v55 }
 0x32f   :  { %6398 = vmatpush.bf16.msra.mxu2 %v11383_v57  ;;  %v13856_v57 = vld [vmem:[#allocation2 + $0xa60] sm:$0xf0]  ;;  %v13573_v48 = vld [vmem:[#allocation2 + $0x18c] sm:$0xf]  ;;  %v11524_v2 = vld [vmem:[#allocation2 + $0x1a4] sm:$0xf0] }
 0x330   :  { %6412 = vmatpush.bf16.msra.mxu3 %v11607_v32  ;;  %v13912_v17 = vld [vmem:[#allocation2 + $0xc20] sm:$0xf0]  ;;  %v11551_v32 = vor.u32 %v13583_v30, %v11550_v36  ;;  %v12643_v38 = vor.u32 %v13856_v57, %v12642_v22  ;;  %v12390_v35 = vld [vmem:[#allocation2 + $0x850] sm:$0xf]  ;;  %v13793_v54 = vld [vmem:[#allocation2 + $0x868] sm:$0xf0]  ;;  %v15156_v30 = vpack.c.bf16 %v3905_v20, %v3898_v39 }
 0x331   :  { %6426 = vmatpush.bf16.msra.mxu0 %v11831_v26  ;;  %v11775_v26 = vor.u32 %v13639_v6, %v11774_v43  ;;  %v12867_v5 = vor.u32 %v13912_v17, %v12866_v56  ;;  %v12614_v49 = vld [vmem:[#allocation2 + $0xa10] sm:$0xf]  ;;  %v13849_v18 = vld [vmem:[#allocation2 + $0xa28] sm:$0xf0]  ;;  %v15162_v43 = vpack.c.bf16 %v3906_v29, %v3899_v3  ;;  %v12391_v23 = vor.u32 %v13793_v54, %v12390_v35  ;;  %v12362_v8 = vld [vmem:[#allocation2 + $0x818] sm:$0xf] }
 0x332   :  { %6440 = vmatpush.bf16.msra.mxu1 %v12055_v42  ;;  %v11999_v42 = vor.u32 %v13695_v63, %v11998_v11  ;;  %v12838_v7 = vld [vmem:[#allocation2 + $0xbd0] sm:$0xf]  ;;  %v13905_v15 = vld [vmem:[#allocation2 + $0xbe8] sm:$0xf0]  ;;  %v12615_v46 = vor.u32 %v13849_v18, %v12614_v49  ;;  %v12586_v10 = vld [vmem:[#allocation2 + $0x9d8] sm:$0xf] }
 0x333   :  { %6399 = vmatpush.bf16.msra.mxu2 %v11355_v61  ;;  %v11527_v61 = vor.u32 %v13573_v48, %v11524_v2  ;;  %v11496_v36 = vld [vmem:[#allocation2 + $0x16c] sm:$0xf0]  ;;  %16155 = vst [vmem:[#allocation43_spill] sm:$0xff] %v15162_v43  ;;  %v12839_v39 = vor.u32 %v13905_v15, %v12838_v7  ;;  %v13842_v33 = vld [vmem:[#allocation2 + $0x9f0] sm:$0xf0]  ;;  %v16160_v31 = vmax.f32 %v15140_v51, 0.0 }
 0x334   :  { %6413 = vmatpush.bf16.msra.mxu3 %v11579_v52  ;;  %v15150_v52 = vpack.c.bf16 %v3904_v14, %v3897_v19  ;;  %v15168_v19 = vpack.c.bf16 %v3907_v24, %v3900_v9  ;;  %v13786_v14 = vld [vmem:[#allocation2 + $0x830] sm:$0xf0]  ;;  %v12810_v3 = vld [vmem:[#allocation2 + $0xb98] sm:$0xf]  ;;  %v13559_v29 = vld [vmem:[#allocation2 + $0x11c] sm:$0xf]  ;;  %v12587_v15 = vor.u32 %v13842_v33, %v12586_v10 }
 0x335   :  { %6427 = vmatpush.bf16.msra.mxu0 %v11803_v50  ;;  %v13566_v50 = vld [vmem:[#allocation2 + $0x154] sm:$0xf]  ;;  %v11468_v16 = vld [vmem:[#allocation2 + $0x134] sm:$0xf0]  ;;  %v12363_v9 = vor.u32 %v13786_v14, %v12362_v8  ;;  %v12334_v54 = vld [vmem:[#allocation2 + $0x7e0] sm:$0xf] }
 0x336   :  { %6441 = vmatpush.bf16.msra.mxu1 %v12027_v60  ;;  %16156 = vst [vmem:[#allocation44_spill] sm:$0xff] %v15168_v19  ;;  %v11499_v20 = vor.u32 %v13566_v50, %v11496_v36  ;;  %v13898_v41 = vld [vmem:[#allocation2 + $0xbb0] sm:$0xf0]  ;;  %v13779_v12 = vld [vmem:[#allocation2 + $0x7f8] sm:$0xf0]  ;;  %v11471_v60 = vor.u32 %v13559_v29, %v11468_v16  ;;  %v4370_v53 = vperm.slane %v14456_v44, 4 }
 0x337   :  { %6400 = vmatpush.bf16.msra.mxu2 %v11327_v37  ;;  %v12811_v49 = vor.u32 %v13898_v41, %v12810_v3  ;;  %v12558_v24 = vld [vmem:[#allocation2 + $0x9a0] sm:$0xf]  ;;  %v13835_v6 = vld [vmem:[#allocation2 + $0x9b8] sm:$0xf0]  ;;  %v13552_v55 = vld [vmem:[#allocation2 + $0xe4] sm:$0xf]  ;;  %v12335_v22 = vor.u32 %v13779_v12, %v12334_v54 }
 0x338   :  { %6414 = vmatpush.bf16.msra.mxu3 %v11551_v32  ;;  %v12782_v11 = vld [vmem:[#allocation2 + $0xb60] sm:$0xf]  ;;  %v13891_v63 = vld [vmem:[#allocation2 + $0xb78] sm:$0xf0]  ;;  %v12559_v37 = vor.u32 %v13835_v6, %v12558_v24  ;;  %v12306_v56 = vld [vmem:[#allocation2 + $0x7a8] sm:$0xf] }
 0x339   :  { %6428 = vmatpush.bf16.msra.mxu0 %v11775_v26  ;;  %v11440_v58 = vld [vmem:[#allocation2 + $0xfc] sm:$0xf0]  ;;  %v12783_v57 = vor.u32 %v13891_v63, %v12782_v11  ;;  %v13772_v17 = vld [vmem:[#allocation2 + $0x7c0] sm:$0xf0]  ;;  %v12530_v32 = vld [vmem:[#allocation2 + $0x968] sm:$0xf] }
 0x33a   :  { %6442 = vmatpush.bf16.msra.mxu1 %v11999_v42  ;;  %6401 = vmatmul.bf16.vlgmr.msra.gmra.mxu2 %v15150_v52  ;;  %v11443_v26 = vor.u32 %v13552_v55, %v11440_v58  ;;  %v13828_v48 = vld [vmem:[#allocation2 + $0x980] sm:$0xf0]  ;;  %v12754_v2 = vld [vmem:[#allocation2 + $0xb28] sm:$0xf]  ;;  %v12278_v18 = vld [vmem:[#allocation2 + $0x770] sm:$0xf] }
 0x33b   :  { %6449 = vmatpush.bf16.msrb.mxu2 %v12419_v4  ;;  %6415 = vmatmul.bf16.vlgmr.msra.gmra.mxu3 %v15156_v30  ;;  %v13884_v42 = vld [vmem:[#allocation2 + $0xb40] sm:$0xf0]  ;;  %v13545_v4 = vld [vmem:[#allocation2 + $0xac] sm:$0xf]  ;;  %v12531_v35 = vor.u32 %v13828_v48, %v12530_v32  ;;  %v12502_v50 = vld [vmem:[#allocation2 + $0x930] sm:$0xf] }
 0x33c   :  { %6463 = vmatpush.bf16.msrb.mxu3 %v12643_v38  ;;  %6429 = vmatmul.bf16.vlgmr.msra.gmra.mxu0 %v15162_v43  ;;  %v11412_v38 = vld [vmem:[#allocation2 + $0xc4] sm:$0xf0]  ;;  %v13765_v7 = vld [vmem:[#allocation2 + $0x788] sm:$0xf0]  ;;  %v13538_v8 = vld [vmem:[#allocation2 + $0x74] sm:$0xf] }
 0x33d   :  { %6477 = vmatpush.bf16.msrb.mxu0 %v12867_v5  ;;  %6443 = vmatmul.bf16.vlgmr.msra.gmra.mxu1 %v15168_v19  ;;  %v12307_v5 = vor.u32 %v13772_v17, %v12306_v56  ;;  %v11415_v36 = vor.u32 %v13545_v4, %v11412_v38  ;;  %v11384_v14 = vld [vmem:[#allocation2 + $0x8c] sm:$0xf0]  ;;  %v12279_v10 = vor.u32 %v13765_v7, %v12278_v18  ;;  %v12250_v3 = vld [vmem:[#allocation2 + $0x738] sm:$0xf]  ;;  %v13758_v41 = vld [vmem:[#allocation2 + $0x750] sm:$0xf0] }
 0x33e   :  { %6491 = vmatpush.bf16.msrb.mxu1 %v11527_v61  ;;  %v12755_v61 = vor.u32 %v13884_v42, %v12754_v2  ;;  %v12474_v29 = vld [vmem:[#allocation2 + $0x8f8] sm:$0xf]  ;;  %v11387_v16 = vor.u32 %v13538_v8, %v11384_v14  ;;  %v13531_v54 = vld [vmem:[#allocation2 + $0x3c] sm:$0xf]  ;;  %v12251_v24 = vor.u32 %v13758_v41, %v12250_v3  ;;  %v12446_v55 = vld [vmem:[#allocation2 + $0x8c0] sm:$0xf] }
 0x33f   :  { %6450 = vmatpush.bf16.msrb.mxu2 %v12391_v23  ;;  %v13821_v23 = vld [vmem:[#allocation2 + $0x948] sm:$0xf0]  ;;  %v11356_v12 = vld [vmem:[#allocation2 + $0x54] sm:$0xf0]  ;;  %v13751_v6 = vld [vmem:[#allocation2 + $0x718] sm:$0xf0] }
 0x340   :  { %6464 = vmatpush.bf16.msrb.mxu3 %v12615_v46  ;;  %v12726_v46 = vld [vmem:[#allocation2 + $0xaf0] sm:$0xf]  ;;  %v13807_v58 = vld [vmem:[#allocation2 + $0x8d8] sm:$0xf0]  ;;  %v13524_v56 = vld [vmem:[#allocation2 + $0x4] sm:$0xf] }
 0x341   :  { %6478 = vmatpush.bf16.msrb.mxu0 %v12839_v39  ;;  %v13877_v39 = vld [vmem:[#allocation2 + $0xb08] sm:$0xf0]  ;;  %v11328_v17 = vld [vmem:[#allocation2 + $0x1c] sm:$0xf0]  ;;  %v11972_v42 = vld [vmem:[#allocation2 + $0x524] sm:$0xf0] }
 0x342   :  { %6492 = vmatpush.bf16.msrb.mxu1 %v11499_v20  ;;  %v12503_v20 = vor.u32 %v13821_v23, %v12502_v50  ;;  %v12727_v33 = vor.u32 %v13877_v39, %v12726_v46  ;;  %v13629_v32 = vld [vmem:[#allocation2 + $0x34c] sm:$0xf]  ;;  %v12196_v38 = vld [vmem:[#allocation2 + $0x6e4] sm:$0xf0]  ;;  %v11331_v7 = vor.u32 %v13524_v56, %v11328_v17  ;;  %v13622_v46 = vld [vmem:[#allocation2 + $0x314] sm:$0xf] }
 0x343   :  { %6451 = vmatpush.bf16.msrb.mxu2 %v12363_v9  ;;  %v13814_v9 = vld [vmem:[#allocation2 + $0x910] sm:$0xf0]  ;;  %v13685_v48 = vld [vmem:[#allocation2 + $0x50c] sm:$0xf]  ;;  %v12420_v18 = vld [vmem:[#allocation2 + $0x8a4] sm:$0xf0] }
 0x344   :  { %6465 = vmatpush.bf16.msrb.mxu3 %v12587_v15  ;;  %v12698_v15 = vld [vmem:[#allocation2 + $0xab8] sm:$0xf]  ;;  %v12475_v11 = vor.u32 %v13814_v9, %v12474_v29  ;;  %v13741_v4 = vld [vmem:[#allocation2 + $0x6cc] sm:$0xf]  ;;  %v11720_v39 = vld [vmem:[#allocation2 + $0x32c] sm:$0xf0] }
 0x345   :  { %6479 = vmatpush.bf16.msrb.mxu0 %v12811_v49  ;;  %v13870_v49 = vld [vmem:[#allocation2 + $0xad0] sm:$0xf0]  ;;  %v12199_v23 = vor.u32 %v13741_v4, %v12196_v38  ;;  %v12168_v3 = vld [vmem:[#allocation2 + $0x6ac] sm:$0xf0]  ;;  %v16158_v41 = vmax.f32 %v15127_v25, 0.0 }
 0x346   :  { %6493 = vmatpush.bf16.msrb.mxu1 %v11471_v60  ;;  %v12222_v60 = vld [vmem:[#allocation2 + $0x700] sm:$0xf]  ;;  %v12699_v63 = vor.u32 %v13870_v49, %v12698_v15  ;;  %v13678_v8 = vld [vmem:[#allocation2 + $0x4d4] sm:$0xf]  ;;  %v12392_v9 = vld [vmem:[#allocation2 + $0x86c] sm:$0xf0] }
 0x347   :  { %6452 = vmatpush.bf16.msrb.mxu2 %v12335_v22  ;;  %v12670_v22 = vld [vmem:[#allocation2 + $0xa80] sm:$0xf]  ;;  %v12223_v2 = vor.u32 %v13751_v6, %v12222_v60  ;;  %v15184_v29 = vpack.c.bf16 %v16158_v41, %v3902_v28  ;;  %v16159_v15 = vmax.f32 %v15132_v13, 0.0  ;;  %v13615_v40 = vld [vmem:[#allocation2 + $0x2dc] sm:$0xf] }
 0x348   :  { %6466 = vmatpush.bf16.msrb.mxu3 %v12559_v37  ;;  %v11359_v37 = vor.u32 %v13531_v54, %v11356_v12  ;;  %v11692_v54 = vld [vmem:[#allocation2 + $0x2f4] sm:$0xf0]  ;;  %v13671_v25 = vld [vmem:[#allocation2 + $0x49c] sm:$0xf]  ;;  %v13720_v56 = vld [vmem:[#allocation2 + $0x624] sm:$0xf] }
 0x349   :  { %6480 = vmatpush.bf16.msrb.mxu0 %v12783_v57  ;;  %v13863_v57 = vld [vmem:[#allocation2 + $0xa98] sm:$0xf0]  ;;  %v15190_v59 = vpack.c.bf16 %v16160_v31, %v16159_v15  ;;  %v11916_v12 = vld [vmem:[#allocation2 + $0x4b4] sm:$0xf0]  ;;  %v11695_v6 = vor.u32 %v13615_v40, %v11692_v54  ;;  %v12112_v17 = vld [vmem:[#allocation2 + $0x63c] sm:$0xf0] }
 0x34a   :  { %6494 = vmatpush.bf16.msrb.mxu1 %v11443_v26  ;;  %v11748_v26 = vld [vmem:[#allocation2 + $0x364] sm:$0xf0]  ;;  %v13727_v13 = vld [vmem:[#allocation2 + $0x65c] sm:$0xf]  ;;  %v12364_v60 = vld [vmem:[#allocation2 + $0x834] sm:$0xf0] }
 0x34b   :  { %6453 = vmatpush.bf16.msrb.mxu2 %v12307_v5  ;;  %v12447_v5 = vor.u32 %v13807_v58, %v12446_v55  ;;  %v11751_v50 = vor.u32 %v13629_v32, %v11748_v26  ;;  %v13783_v51 = vld [vmem:[#allocation2 + $0x81c] sm:$0xf]  ;;  %v13608_v55 = vld [vmem:[#allocation2 + $0x2a4] sm:$0xf]  ;;  %v11664_v58 = vld [vmem:[#allocation2 + $0x2bc] sm:$0xf0] }
 0x34c   :  { %6467 = vmatpush.bf16.msrb.mxu3 %v12531_v35  ;;  %v12671_v35 = vor.u32 %v13863_v57, %v12670_v22  ;;  %v13664_v22 = vld [vmem:[#allocation2 + $0x464] sm:$0xf]  ;;  %v11888_v57 = vld [vmem:[#allocation2 + $0x47c] sm:$0xf0]  ;;  %v13601_v4 = vld [vmem:[#allocation2 + $0x26c] sm:$0xf] }
 0x34d   :  { %6481 = vmatpush.bf16.msrb.mxu0 %v12755_v61  ;;  %v13797_v61 = vld [vmem:[#allocation2 + $0x88c] sm:$0xf]  ;;  %v13776_v32 = vld [vmem:[#allocation2 + $0x7e4] sm:$0xf]  ;;  %v12336_v26 = vld [vmem:[#allocation2 + $0x7fc] sm:$0xf0] }
 0x34e   :  { %6495 = vmatpush.bf16.msrb.mxu1 %v11415_v36  ;;  %v11975_v36 = vor.u32 %v13685_v48, %v11972_v42  ;;  %v12423_v14 = vor.u32 %v13797_v61, %v12420_v18  ;;  %v11667_v48 = vor.u32 %v13608_v55, %v11664_v58  ;;  %v12115_v42 = vor.u32 %v13720_v56, %v12112_v17  ;;  %v11636_v38 = vld [vmem:[#allocation2 + $0x284] sm:$0xf0]  ;;  %v13713_v18 = vld [vmem:[#allocation2 + $0x5ec] sm:$0xf]  ;;  %v13706_v41 = vld [vmem:[#allocation2 + $0x5b4] sm:$0xf] }
 0x34f   :  { %6454 = vmatpush.bf16.msrb.mxu2 %v12279_v10  ;;  %v15178_v10 = vpack.c.bf16 %v3908_v1, %v3901_v45  ;;  %v11723_v45 = vor.u32 %v13622_v46, %v11720_v39  ;;  %v11860_v61 = vld [vmem:[#allocation2 + $0x444] sm:$0xf0]  ;;  %v12280_v15 = vld [vmem:[#allocation2 + $0x78c] sm:$0xf0]  ;;  %v11580_v40 = vld [vmem:[#allocation2 + $0x214] sm:$0xf0] }
 0x350   :  { %6468 = vmatpush.bf16.msrb.mxu3 %v12503_v20  ;;  %v11944_v20 = vld [vmem:[#allocation2 + $0x4ec] sm:$0xf0]  ;;  %v13643_v54 = vld [vmem:[#allocation2 + $0x3bc] sm:$0xf]  ;;  %v13636_v58 = vld [vmem:[#allocation2 + $0x384] sm:$0xf] }
 0x351   :  { %6482 = vmatpush.bf16.msrb.mxu0 %v12727_v33  ;;  %16157 = vst [vmem:[#allocation45_spill] sm:$0xff] %v15178_v10  ;;  %v13734_v33 = vld [vmem:[#allocation2 + $0x694] sm:$0xf]  ;;  %v11947_v1 = vor.u32 %v13678_v8, %v11944_v20  ;;  %v12000_v56 = vld [vmem:[#allocation2 + $0x55c] sm:$0xf0] }
 0x352   :  { %6496 = vmatpush.bf16.msrb.mxu1 %v11387_v16  ;;  %v13790_v16 = vld [vmem:[#allocation2 + $0x854] sm:$0xf]  ;;  %v12171_v49 = vor.u32 %v13734_v33, %v12168_v3  ;;  %v11832_v3 = vld [vmem:[#allocation2 + $0x40c] sm:$0xf0]  ;;  %v13748_v17 = vld [vmem:[#allocation2 + $0x704] sm:$0xf] }
 0x353   :  { %6455 = vmatpush.bf16.msrb.mxu2 %v12251_v24  ;;  %v12395_v28 = vor.u32 %v13790_v16, %v12392_v9  ;;  %v12140_v24 = vld [vmem:[#allocation2 + $0x674] sm:$0xf0]  ;;  %v13594_v8 = vld [vmem:[#allocation2 + $0x234] sm:$0xf]  ;;  %v12056_v16 = vld [vmem:[#allocation2 + $0x5cc] sm:$0xf0] }
 0x354   :  { %6469 = vmatpush.bf16.msrb.mxu3 %v12475_v11  ;;  %v11919_v11 = vor.u32 %v13671_v25, %v11916_v12  ;;  %v13650_v20 = vld [vmem:[#allocation2 + $0x3f4] sm:$0xf]  ;;  %v13699_v12 = vld [vmem:[#allocation2 + $0x57c] sm:$0xf] }
 0x355   :  { %6483 = vmatpush.bf16.msrb.mxu0 %v12699_v63  ;;  %v12143_v63 = vor.u32 %v13727_v13, %v12140_v24  ;;  %v13762_v9 = vld [vmem:[#allocation2 + $0x774] sm:$0xf]  ;;  %v12028_v13 = vld [vmem:[#allocation2 + $0x594] sm:$0xf0]  ;;  %v13755_v24 = vld [vmem:[#allocation2 + $0x73c] sm:$0xf] }
 0x356   :  { %6497 = vmatpush.bf16.msrb.mxu1 %v11359_v37  ;;  %v12367_v37 = vor.u32 %v13783_v51, %v12364_v60  ;;  %v12283_v25 = vor.u32 %v13762_v9, %v12280_v15  ;;  %v12252_v51 = vld [vmem:[#allocation2 + $0x754] sm:$0xf0]  ;;  %v12031_v55 = vor.u32 %v13699_v12, %v12028_v13  ;;  %v13626_v9 = vld [vmem:[#allocation2 + $0x330] sm:$0xf0]  ;;  %v13563_v12 = vld [vmem:[#allocation2 + $0x138] sm:$0xf0] }
 0x357   :  { %6456 = vmatpush.bf16.msrb.mxu2 %v12223_v2  ;;  %v11891_v2 = vor.u32 %v13664_v22, %v11888_v57  ;;  %v11776_v22 = vld [vmem:[#allocation2 + $0x39c] sm:$0xf0]  ;;  %v12255_v57 = vor.u32 %v13755_v24, %v12252_v51  ;;  %v13619_v24 = vld [vmem:[#allocation2 + $0x2f8] sm:$0xf0] }
 0x358   :  { %6470 = vmatpush.bf16.msrb.mxu3 %v12447_v5  ;;  %v13657_v5 = vld [vmem:[#allocation2 + $0x42c] sm:$0xf]  ;;  %v11698_v13 = vld [vmem:[#allocation2 + $0x2e0] sm:$0xf]  ;;  %v13607_v62 = vld [vmem:[#allocation2 + $0x298] sm:$0xf0] }
 0x359   :  { %6484 = vmatpush.bf16.msrb.mxu0 %v12671_v35  ;;  %v12339_v35 = vor.u32 %v13776_v32, %v12336_v26  ;;  %v11863_v46 = vor.u32 %v13657_v5, %v11860_v61  ;;  %v12224_v32 = vld [vmem:[#allocation2 + $0x71c] sm:$0xf0]  ;;  %v13853_v26 = vld [vmem:[#allocation2 + $0xa4c] sm:$0xf] }
 0x35a   :  { %6498 = vmatpush.bf16.msrb.mxu1 %v11331_v7  ;;  %6457 = vmatmul.bf16.vlgmr.msrb.gmra.mxu2 %v15178_v10  ;;  %v12084_v7 = vld [vmem:[#allocation2 + $0x604] sm:$0xf0]  ;;  %v13577_v5 = vld [vmem:[#allocation2 + $0x1a8] sm:$0xf0] }
 0x35b   :  { %6505 = vmatpush.bf16.msra.mxu2 %v11751_v50  ;;  %6471 = vmatmul.bf16.vlgmr.msrb.gmra.mxu3 %v15184_v29  ;;  %v13769_v50 = vld [vmem:[#allocation2 + $0x7ac] sm:$0xf]  ;;  %v12087_v39 = vor.u32 %v13713_v18, %v12084_v7  ;;  %v11754_v18 = vld [vmem:[#allocation2 + $0x350] sm:$0xf] }
 0x35c   :  { %6519 = vmatpush.bf16.msra.mxu3 %v11975_v36  ;;  %6485 = vmatmul.bf16.vlgmr.msrb.gmra.mxu0 %v15190_v59  ;;  %v12308_v36 = vld [vmem:[#allocation2 + $0x7c4] sm:$0xf0]  ;;  %v13633_v7 = vld [vmem:[#allocation2 + $0x368] sm:$0xf0] }
 0x35d   :  { %6533 = vmatpush.bf16.msra.mxu0 %v12199_v23  ;;  %6499 = vmatmul.bf16.vlgmr.msrb.gmra.mxu1 %v15150_v52  ;;  %v11639_v23 = vor.u32 %v13601_v4, %v11636_v38  ;;  %v12311_v33 = vor.u32 %v13769_v50, %v12308_v36  ;;  %v12868_v4 = vld [vmem:[#allocation2 + $0xc24] sm:$0xf0]  ;;  %v11530_v38 = vld [vmem:[#allocation2 + $0x190] sm:$0xf]  ;;  %v12227_v50 = vor.u32 %v13748_v17, %v12224_v32  ;;  %v13612_v17 = vld [vmem:[#allocation2 + $0x2c0] sm:$0xf0] }
 0x35e   :  { %6547 = vmatpush.bf16.msra.mxu1 %v12423_v14  ;;  %v11608_v14 = vld [vmem:[#allocation2 + $0x24c] sm:$0xf0] }
 0x35f   :  { %6506 = vmatpush.bf16.msra.mxu2 %v11723_v45  ;;  %v11611_v31 = vor.u32 %v13594_v8, %v11608_v14  ;;  %v11835_v45 = vor.u32 %v13650_v20, %v11832_v3  ;;  %v12616_v8 = vld [vmem:[#allocation2 + $0xa2c] sm:$0xf0]  ;;  %v13902_v14 = vld [vmem:[#allocation2 + $0xbd4] sm:$0xf]  ;;  %v11755_v20 = vor.u32 %v13633_v7, %v11754_v18  ;;  %v11502_v3 = vld [vmem:[#allocation2 + $0x158] sm:$0xf] }
 0x360   :  { %6520 = vmatpush.bf16.msra.mxu3 %v11947_v1  ;;  %v12059_v1 = vor.u32 %v13706_v41, %v12056_v16  ;;  %v13570_v41 = vld [vmem:[#allocation2 + $0x170] sm:$0xf0]  ;;  %v11726_v16 = vld [vmem:[#allocation2 + $0x318] sm:$0xf]  ;;  %v11642_v18 = vld [vmem:[#allocation2 + $0x270] sm:$0xf] }
 0x361   :  { %6534 = vmatpush.bf16.msra.mxu0 %v12171_v49  ;;  %v13587_v49 = vld [vmem:[#allocation2 + $0x1fc] sm:$0xf]  ;;  %v13605_v7 = vld [vmem:[#allocation2 + $0x288] sm:$0xf0] }
 0x362   :  { %6548 = vmatpush.bf16.msra.mxu1 %v12395_v28  ;;  %v11804_v28 = vld [vmem:[#allocation2 + $0x3d4] sm:$0xf0]  ;;  %v11583_v60 = vor.u32 %v13587_v49, %v11580_v40  ;;  %v13895_v40 = vld [vmem:[#allocation2 + $0xb9c] sm:$0xf] }
 0x363   :  { %6507 = vmatpush.bf16.msra.mxu2 %v11695_v6  ;;  %v13580_v6 = vld [vmem:[#allocation2 + $0x1c4] sm:$0xf]  ;;  %v12588_v49 = vld [vmem:[#allocation2 + $0x9f4] sm:$0xf0] }
 0x364   :  { %6521 = vmatpush.bf16.msra.mxu3 %v11919_v11  ;;  %v11552_v11 = vld [vmem:[#allocation2 + $0x1dc] sm:$0xf0] }
 0x365   :  { %6535 = vmatpush.bf16.msra.mxu0 %v12143_v63  ;;  %v11807_v63 = vor.u32 %v13643_v54, %v11804_v28  ;;  %v11727_v54 = vor.u32 %v13626_v9, %v11726_v16  ;;  %v11474_v28 = vld [vmem:[#allocation2 + $0x120] sm:$0xf]  ;;  %v13598_v16 = vld [vmem:[#allocation2 + $0x250] sm:$0xf0] }
 0x366   :  { %6549 = vmatpush.bf16.msra.mxu1 %v12367_v37  ;;  %v13692_v37 = vld [vmem:[#allocation2 + $0x544] sm:$0xf] }
 0x367   :  { %6508 = vmatpush.bf16.msra.mxu2 %v11667_v48  ;;  %v12644_v48 = vld [vmem:[#allocation2 + $0xa64] sm:$0xf0]  ;;  %v12003_v61 = vor.u32 %v13692_v37, %v12000_v56 }
 0x368   :  { %6522 = vmatpush.bf16.msra.mxu3 %v11891_v2  ;;  %v13909_v2 = vld [vmem:[#allocation2 + $0xc0c] sm:$0xf]  ;;  %v12647_v36 = vor.u32 %v13853_v26, %v12644_v48  ;;  %v11446_v37 = vld [vmem:[#allocation2 + $0xe8] sm:$0xf] }
 0x369   :  { %6536 = vmatpush.bf16.msra.mxu0 %v12115_v42  ;;  %v11555_v42 = vor.u32 %v13580_v6, %v11552_v11  ;;  %v11475_v6 = vor.u32 %v13563_v12, %v11474_v28  ;;  %v13832_v11 = vld [vmem:[#allocation2 + $0x9a4] sm:$0xf]  ;;  %v11670_v56 = vld [vmem:[#allocation2 + $0x2a8] sm:$0xf]  ;;  %v13535_v28 = vld [vmem:[#allocation2 + $0x58] sm:$0xf0] }
 0x36a   :  { %6550 = vmatpush.bf16.msra.mxu1 %v12339_v35  ;;  %v11779_v35 = vor.u32 %v13636_v58, %v11776_v22  ;;  %v11699_v58 = vor.u32 %v13619_v24, %v11698_v13  ;;  %v12784_v22 = vld [vmem:[#allocation2 + $0xb7c] sm:$0xf0]  ;;  %v13591_v13 = vld [vmem:[#allocation2 + $0x218] sm:$0xf0] }
 0x36b   :  { %6509 = vmatpush.bf16.msra.mxu2 %v11639_v23  ;;  %v12871_v23 = vor.u32 %v13909_v2, %v12868_v4  ;;  %v13825_v2 = vld [vmem:[#allocation2 + $0x96c] sm:$0xf]  ;;  %v11586_v12 = vld [vmem:[#allocation2 + $0x200] sm:$0xf] }
 0x36c   :  { %6523 = vmatpush.bf16.msra.mxu3 %v11863_v46  ;;  %v11531_v46 = vor.u32 %v13577_v5, %v11530_v38  ;;  %v13881_v4 = vld [vmem:[#allocation2 + $0xb2c] sm:$0xf]  ;;  %v11671_v38 = vor.u32 %v13612_v17, %v11670_v56  ;;  %v12756_v5 = vld [vmem:[#allocation2 + $0xb44] sm:$0xf0]  ;;  %v13584_v56 = vld [vmem:[#allocation2 + $0x1e0] sm:$0xf0] }
 0x36d   :  { %6537 = vmatpush.bf16.msra.mxu0 %v12087_v39  ;;  %v13846_v39 = vld [vmem:[#allocation2 + $0xa14] sm:$0xf]  ;;  %v11978_v17 = vld [vmem:[#allocation2 + $0x510] sm:$0xf] }
 0x36e   :  { %6551 = vmatpush.bf16.msra.mxu1 %v12311_v33  ;;  %v12840_v33 = vld [vmem:[#allocation2 + $0xbec] sm:$0xf0]  ;;  %v12619_v15 = vor.u32 %v13846_v39, %v12616_v8  ;;  %v13874_v8 = vld [vmem:[#allocation2 + $0xaf4] sm:$0xf] }
 0x36f   :  { %6510 = vmatpush.bf16.msra.mxu2 %v11611_v31  ;;  %v12843_v31 = vor.u32 %v13902_v14, %v12840_v33  ;;  %v12504_v39 = vld [vmem:[#allocation2 + $0x94c] sm:$0xf0]  ;;  %v11643_v14 = vor.u32 %v13605_v7, %v11642_v18  ;;  %v11390_v33 = vld [vmem:[#allocation2 + $0x78] sm:$0xf] }
 0x370   :  { %6524 = vmatpush.bf16.msra.mxu3 %v11835_v45  ;;  %v11503_v45 = vor.u32 %v13570_v41, %v11502_v3  ;;  %v13542_v3 = vld [vmem:[#allocation2 + $0x90] sm:$0xf0]  ;;  %v11614_v41 = vld [vmem:[#allocation2 + $0x238] sm:$0xf] }
 0x371   :  { %6538 = vmatpush.bf16.msra.mxu0 %v12059_v1  ;;  %v13839_v1 = vld [vmem:[#allocation2 + $0x9dc] sm:$0xf] }
 0x372   :  { %6552 = vmatpush.bf16.msra.mxu1 %v12283_v25  ;;  %v12812_v25 = vld [vmem:[#allocation2 + $0xbb4] sm:$0xf0]  ;;  %v12591_v51 = vor.u32 %v13839_v1, %v12588_v49  ;;  %v13867_v49 = vld [vmem:[#allocation2 + $0xabc] sm:$0xf] }
 0x373   :  { %6511 = vmatpush.bf16.msra.mxu2 %v11583_v60  ;;  %v12815_v60 = vor.u32 %v13895_v40, %v12812_v25  ;;  %v12476_v1 = vld [vmem:[#allocation2 + $0x914] sm:$0xf0]  ;;  %v11615_v40 = vor.u32 %v13598_v16, %v11614_v41  ;;  %v11362_v25 = vld [vmem:[#allocation2 + $0x40] sm:$0xf]  ;;  %v13850_v41 = vld [vmem:[#allocation2 + $0xa30] sm:$0xf0] }
 0x374   :  { %6525 = vmatpush.bf16.msra.mxu3 %v11807_v63  ;;  %v12560_v63 = vld [vmem:[#allocation2 + $0x9bc] sm:$0xf0] }
 0x375   :  { %6539 = vmatpush.bf16.msra.mxu0 %v12031_v55  ;;  %v13888_v55 = vld [vmem:[#allocation2 + $0xb64] sm:$0xf]  ;;  %v12563_v32 = vor.u32 %v13832_v11, %v12560_v63  ;;  %v11363_v11 = vor.u32 %v13535_v28, %v11362_v25  ;;  %v13787_v25 = vld [vmem:[#allocation2 + $0x838] sm:$0xf0]  ;;  %v12594_v28 = vld [vmem:[#allocation2 + $0x9e0] sm:$0xf] }
 0x376   :  { %6553 = vmatpush.bf16.msra.mxu1 %v12255_v57  ;;  %v13556_v57 = vld [vmem:[#allocation2 + $0x100] sm:$0xf0]  ;;  %v12787_v26 = vor.u32 %v13888_v55, %v12784_v22  ;;  %v12672_v55 = vld [vmem:[#allocation2 + $0xa9c] sm:$0xf0]  ;;  %v11587_v22 = vor.u32 %v13591_v13, %v11586_v12  ;;  %v13843_v12 = vld [vmem:[#allocation2 + $0x9f8] sm:$0xf0] }
 0x377   :  { %6512 = vmatpush.bf16.msra.mxu2 %v11555_v42  ;;  %v11447_v48 = vor.u32 %v13556_v57, %v11446_v37  ;;  %v12532_v42 = vld [vmem:[#allocation2 + $0x984] sm:$0xf0]  ;;  %v13860_v63 = vld [vmem:[#allocation2 + $0xa84] sm:$0xf] }
 0x378   :  { %6526 = vmatpush.bf16.msra.mxu3 %v11779_v35  ;;  %v11418_v35 = vld [vmem:[#allocation2 + $0xb0] sm:$0xf]  ;;  %v13528_v37 = vld [vmem:[#allocation2 + $0x20] sm:$0xf0]  ;;  %v11558_v57 = vld [vmem:[#allocation2 + $0x1c8] sm:$0xf] }
 0x379   :  { %6540 = vmatpush.bf16.msra.mxu0 %v12003_v61  ;;  %v13549_v61 = vld [vmem:[#allocation2 + $0xc8] sm:$0xf0]  ;;  %v11559_v18 = vor.u32 %v13584_v56, %v11558_v57  ;;  %v13836_v57 = vld [vmem:[#allocation2 + $0x9c0] sm:$0xf0] }
 0x37a   :  { %6554 = vmatpush.bf16.msra.mxu1 %v12227_v50  ;;  %6513 = vmatmul.bf16.vlgmr.msra.gmra.mxu2 %v15156_v30  ;;  %v12535_v50 = vor.u32 %v13825_v2, %v12532_v42  ;;  %v13745_v2 = vld [vmem:[#allocation2 + $0x6e8] sm:$0xf0]  ;;  %v12426_v42 = vld [vmem:[#allocation2 + $0x890] sm:$0xf] }
 0x37b   :  { %6561 = vmatpush.bf16.msrb.mxu2 %v12647_v36  ;;  %6527 = vmatmul.bf16.vlgmr.msra.gmra.mxu3 %v15162_v43  ;;  %v12759_v36 = vor.u32 %v13881_v4, %v12756_v5  ;;  %v13801_v4 = vld [vmem:[#allocation2 + $0x8a8] sm:$0xf0] }
 0x37c   :  { %6575 = vmatpush.bf16.msrb.mxu3 %v12871_v23  ;;  %6541 = vmatmul.bf16.vlgmr.msra.gmra.mxu0 %v15168_v19  ;;  %v11419_v23 = vor.u32 %v13549_v61, %v11418_v35  ;;  %v12650_v35 = vld [vmem:[#allocation2 + $0xa50] sm:$0xf]  ;;  %v13857_v61 = vld [vmem:[#allocation2 + $0xa68] sm:$0xf0] }
 0x37d   :  { %6589 = vmatpush.bf16.msrb.mxu0 %v11531_v46  ;;  %6555 = vmatmul.bf16.vlgmr.msra.gmra.mxu1 %v15178_v10  ;;  %v13818_v46 = vld [vmem:[#allocation2 + $0x934] sm:$0xf] }
 0x37e   :  { %6603 = vmatpush.bf16.msrb.mxu1 %v11755_v20  ;;  %v12728_v20 = vld [vmem:[#allocation2 + $0xb0c] sm:$0xf0]  ;;  %v12507_v9 = vor.u32 %v13818_v46, %v12504_v39  ;;  %v13682_v46 = vld [vmem:[#allocation2 + $0x4f0] sm:$0xf0]  ;;  %v12174_v39 = vld [vmem:[#allocation2 + $0x698] sm:$0xf] }
 0x37f   :  { %6562 = vmatpush.bf16.msrb.mxu2 %v12619_v15  ;;  %v12731_v15 = vor.u32 %v13874_v8, %v12728_v20  ;;  %v12651_v8 = vor.u32 %v13857_v61, %v12650_v35  ;;  %v12398_v20 = vld [vmem:[#allocation2 + $0x858] sm:$0xf]  ;;  %v12538_v35 = vld [vmem:[#allocation2 + $0x970] sm:$0xf]  ;;  %v13829_v61 = vld [vmem:[#allocation2 + $0x988] sm:$0xf0] }
 0x380   :  { %6576 = vmatpush.bf16.msrb.mxu3 %v12843_v31  ;;  %v11391_v31 = vor.u32 %v13542_v3, %v11390_v33  ;;  %v13794_v33 = vld [vmem:[#allocation2 + $0x870] sm:$0xf0]  ;;  %v12622_v3 = vld [vmem:[#allocation2 + $0xa18] sm:$0xf] }
 0x381   :  { %6590 = vmatpush.bf16.msrb.mxu0 %v11503_v45  ;;  %v13811_v45 = vld [vmem:[#allocation2 + $0x8fc] sm:$0xf] }
 0x382   :  { %6604 = vmatpush.bf16.msrb.mxu1 %v11727_v54  ;;  %v12700_v54 = vld [vmem:[#allocation2 + $0xad4] sm:$0xf0]  ;;  %v12479_v24 = vor.u32 %v13811_v45, %v12476_v1  ;;  %v13675_v45 = vld [vmem:[#allocation2 + $0x4b8] sm:$0xf0]  ;;  %v12146_v1 = vld [vmem:[#allocation2 + $0x660] sm:$0xf] }
 0x383   :  { %6563 = vmatpush.bf16.msrb.mxu2 %v12591_v51  ;;  %v13804_v51 = vld [vmem:[#allocation2 + $0x8c4] sm:$0xf] }
 0x384   :  { %6577 = vmatpush.bf16.msrb.mxu3 %v12815_v60  ;;  %v12448_v60 = vld [vmem:[#allocation2 + $0x8dc] sm:$0xf0] }
 0x385   :  { %6591 = vmatpush.bf16.msrb.mxu0 %v11475_v6  ;;  %v12703_v6 = vor.u32 %v13867_v49, %v12700_v54  ;;  %v12623_v49 = vor.u32 %v13850_v41, %v12622_v3  ;;  %v12370_v54 = vld [vmem:[#allocation2 + $0x820] sm:$0xf]  ;;  %v13822_v3 = vld [vmem:[#allocation2 + $0x950] sm:$0xf0] }
 0x386   :  { %6605 = vmatpush.bf16.msrb.mxu1 %v11699_v58  ;;  %v11334_v58 = vld [vmem:[#allocation2 + $0x8] sm:$0xf] }
 0x387   :  { %6564 = vmatpush.bf16.msrb.mxu2 %v12563_v32  ;;  %v13689_v32 = vld [vmem:[#allocation2 + $0x528] sm:$0xf0]  ;;  %v11335_v5 = vor.u32 %v13528_v37, %v11334_v58  ;;  %v12342_v58 = vld [vmem:[#allocation2 + $0x7e8] sm:$0xf] }
 0x388   :  { %6578 = vmatpush.bf16.msrb.mxu3 %v12787_v26  ;;  %v12202_v26 = vld [vmem:[#allocation2 + $0x6d0] sm:$0xf]  ;;  %v11979_v7 = vor.u32 %v13689_v32, %v11978_v17  ;;  %v12566_v37 = vld [vmem:[#allocation2 + $0x9a8] sm:$0xf] }
 0x389   :  { %6592 = vmatpush.bf16.msrb.mxu0 %v11447_v48  ;;  %v12451_v48 = vor.u32 %v13804_v51, %v12448_v60  ;;  %v12371_v51 = vor.u32 %v13787_v25, %v12370_v54  ;;  %v11894_v60 = vld [vmem:[#allocation2 + $0x468] sm:$0xf]  ;;  %v13759_v54 = vld [vmem:[#allocation2 + $0x758] sm:$0xf0]  ;;  %v12482_v25 = vld [vmem:[#allocation2 + $0x900] sm:$0xf] }
 0x38a   :  { %6606 = vmatpush.bf16.msrb.mxu1 %v11671_v38  ;;  %v12675_v38 = vor.u32 %v13860_v63, %v12672_v55  ;;  %v12595_v63 = vor.u32 %v13843_v12, %v12594_v28  ;;  %v13724_v55 = vld [vmem:[#allocation2 + $0x640] sm:$0xf0]  ;;  %v13815_v28 = vld [vmem:[#allocation2 + $0x918] sm:$0xf0] }
 0x38b   :  { %6565 = vmatpush.bf16.msrb.mxu2 %v12535_v50  ;;  %v12203_v50 = vor.u32 %v13745_v2, %v12202_v26  ;;  %v11866_v26 = vld [vmem:[#allocation2 + $0x430] sm:$0xf] }
 0x38c   :  { %6579 = vmatpush.bf16.msrb.mxu3 %v12759_v36  ;;  %v12427_v36 = vor.u32 %v13801_v4, %v12426_v42  ;;  %v12090_v2 = vld [vmem:[#allocation2 + $0x5f0] sm:$0xf]  ;;  %v12567_v42 = vor.u32 %v13836_v57, %v12566_v37  ;;  %v13717_v4 = vld [vmem:[#allocation2 + $0x608] sm:$0xf0]  ;;  %v13808_v37 = vld [vmem:[#allocation2 + $0x8e0] sm:$0xf0] }
 0x38d   :  { %6593 = vmatpush.bf16.msrb.mxu0 %v11419_v23  ;;  %v11950_v23 = vld [vmem:[#allocation2 + $0x4d8] sm:$0xf]  ;;  %v12874_v57 = vld [vmem:[#allocation2 + $0xc10] sm:$0xf] }
 0x38e   :  { %6607 = vmatpush.bf16.msrb.mxu1 %v11643_v14  ;;  %v13738_v14 = vld [vmem:[#allocation2 + $0x6b0] sm:$0xf0]  ;;  %v11951_v16 = vor.u32 %v13682_v46, %v11950_v23  ;;  %v12062_v46 = vld [vmem:[#allocation2 + $0x5b8] sm:$0xf] }
 0x38f   :  { %6566 = vmatpush.bf16.msrb.mxu2 %v12507_v9  ;;  %v12175_v9 = vor.u32 %v13738_v14, %v12174_v39  ;;  %v13654_v23 = vld [vmem:[#allocation2 + $0x410] sm:$0xf0]  ;;  %v12539_v39 = vor.u32 %v13829_v61, %v12538_v35  ;;  %v12286_v14 = vld [vmem:[#allocation2 + $0x778] sm:$0xf] }
 0x390   :  { %6580 = vmatpush.bf16.msrb.mxu3 %v12731_v15  ;;  %v12399_v15 = vor.u32 %v13794_v33, %v12398_v20  ;;  %v13766_v20 = vld [vmem:[#allocation2 + $0x790] sm:$0xf0]  ;;  %v12510_v33 = vld [vmem:[#allocation2 + $0x938] sm:$0xf] }
 0x391   :  { %6594 = vmatpush.bf16.msrb.mxu0 %v11391_v31  ;;  %v11922_v31 = vld [vmem:[#allocation2 + $0x4a0] sm:$0xf] }
 0x392   :  { %6608 = vmatpush.bf16.msrb.mxu1 %v11615_v40  ;;  %v13731_v40 = vld [vmem:[#allocation2 + $0x678] sm:$0xf0]  ;;  %v11923_v13 = vor.u32 %v13675_v45, %v11922_v31  ;;  %v12034_v45 = vld [vmem:[#allocation2 + $0x580] sm:$0xf] }
 0x393   :  { %6567 = vmatpush.bf16.msrb.mxu2 %v12479_v24  ;;  %v12147_v24 = vor.u32 %v13731_v40, %v12146_v1  ;;  %v13647_v31 = vld [vmem:[#allocation2 + $0x3d8] sm:$0xf0]  ;;  %v12511_v1 = vor.u32 %v13822_v3, %v12510_v33  ;;  %v12258_v40 = vld [vmem:[#allocation2 + $0x740] sm:$0xf]  ;;  %v11952_v33 = vld [vmem:[#allocation2 + $0x4f4] sm:$0xf0] }
 0x394   :  { %6581 = vmatpush.bf16.msrb.mxu3 %v12703_v6  ;;  %v13668_v6 = vld [vmem:[#allocation2 + $0x480] sm:$0xf0] }
 0x395   :  { %6595 = vmatpush.bf16.msrb.mxu0 %v11363_v11  ;;  %v12118_v11 = vld [vmem:[#allocation2 + $0x628] sm:$0xf]  ;;  %v11895_v56 = vor.u32 %v13668_v6, %v11894_v60  ;;  %v12259_v60 = vor.u32 %v13759_v54, %v12258_v40  ;;  %v11700_v40 = vld [vmem:[#allocation2 + $0x2fc] sm:$0xf0]  ;;  %v13672_v54 = vld [vmem:[#allocation2 + $0x4a4] sm:$0xf] }
 0x396   :  { %6609 = vmatpush.bf16.msrb.mxu1 %v11587_v22  ;;  %v13780_v22 = vld [vmem:[#allocation2 + $0x800] sm:$0xf0]  ;;  %v12119_v17 = vor.u32 %v13724_v55, %v12118_v11  ;;  %v12006_v6 = vld [vmem:[#allocation2 + $0x548] sm:$0xf]  ;;  %v12483_v55 = vor.u32 %v13815_v28, %v12482_v25  ;;  %v11924_v25 = vld [vmem:[#allocation2 + $0x4bc] sm:$0xf0] }
 0x397   :  { %6568 = vmatpush.bf16.msrb.mxu2 %v12451_v48  ;;  %v12343_v32 = vor.u32 %v13780_v22, %v12342_v58  ;;  %v13661_v48 = vld [vmem:[#allocation2 + $0x448] sm:$0xf0]  ;;  %v13696_v11 = vld [vmem:[#allocation2 + $0x560] sm:$0xf0]  ;;  %v12454_v22 = vld [vmem:[#allocation2 + $0x8c8] sm:$0xf] }
 0x398   :  { %6582 = vmatpush.bf16.msrb.mxu3 %v12675_v38  ;;  %v12314_v38 = vld [vmem:[#allocation2 + $0x7b0] sm:$0xf]  ;;  %v13752_v58 = vld [vmem:[#allocation2 + $0x720] sm:$0xf0]  ;;  %v12455_v35 = vor.u32 %v13808_v37, %v12454_v22  ;;  %v11896_v22 = vld [vmem:[#allocation2 + $0x484] sm:$0xf0] }
 0x399   :  { %6596 = vmatpush.bf16.msrb.mxu0 %v11335_v5  ;;  %v13773_v5 = vld [vmem:[#allocation2 + $0x7c8] sm:$0xf0] }
 0x39a   :  { %6610 = vmatpush.bf16.msrb.mxu1 %v11559_v18  ;;  %6569 = vmatmul.bf16.vlgmr.msrb.gmra.mxu2 %v15184_v29  ;;  %v11867_v18 = vor.u32 %v13661_v48, %v11866_v26  ;;  %v11532_v26 = vld [vmem:[#allocation2 + $0x1ac] sm:$0xf0]  ;;  %v13630_v48 = vld [vmem:[#allocation2 + $0x354] sm:$0xf] }
 0x39b   :  { %6617 = vmatpush.bf16.msra.mxu2 %v11979_v7  ;;  %6583 = vmatmul.bf16.vlgmr.msrb.gmra.mxu3 %v15190_v59  ;;  %v12091_v7 = vor.u32 %v13717_v4, %v12090_v2  ;;  %v11756_v2 = vld [vmem:[#allocation2 + $0x36c] sm:$0xf0] }
 0x39c   :  { %6631 = vmatpush.bf16.msra.mxu3 %v12203_v50  ;;  %6597 = vmatmul.bf16.vlgmr.msrb.gmra.mxu0 %v15150_v52  ;;  %v12315_v50 = vor.u32 %v13773_v5, %v12314_v38  ;;  %v13686_v38 = vld [vmem:[#allocation2 + $0x514] sm:$0xf]  ;;  %v11980_v5 = vld [vmem:[#allocation2 + $0x52c] sm:$0xf0] }
 0x39d   :  { %6645 = vmatpush.bf16.msra.mxu0 %v12427_v36  ;;  %6611 = vmatmul.bf16.vlgmr.msrb.gmra.mxu1 %v15156_v30  ;;  %v11838_v36 = vld [vmem:[#allocation2 + $0x3f8] sm:$0xf] }
 0x39e   :  { %6659 = vmatpush.bf16.msra.mxu1 %v12651_v8  ;;  %v13710_v8 = vld [vmem:[#allocation2 + $0x5d0] sm:$0xf0]  ;;  %v11839_v41 = vor.u32 %v13654_v23, %v11838_v36  ;;  %v13567_v23 = vld [vmem:[#allocation2 + $0x15c] sm:$0xf] }
 0x39f   :  { %6618 = vmatpush.bf16.msra.mxu2 %v11951_v16  ;;  %v12063_v16 = vor.u32 %v13710_v8, %v12062_v46  ;;  %v13906_v36 = vld [vmem:[#allocation2 + $0xbf0] sm:$0xf0]  ;;  %v11983_v46 = vor.u32 %v13686_v38, %v11980_v5  ;;  %v13623_v8 = vld [vmem:[#allocation2 + $0x31c] sm:$0xf]  ;;  %v11868_v5 = vld [vmem:[#allocation2 + $0x44c] sm:$0xf0] }
 0x3a0   :  { %6632 = vmatpush.bf16.msra.mxu3 %v12175_v9  ;;  %v12287_v9 = vor.u32 %v13766_v20, %v12286_v14  ;;  %v11728_v14 = vld [vmem:[#allocation2 + $0x334] sm:$0xf0]  ;;  %v13679_v20 = vld [vmem:[#allocation2 + $0x4dc] sm:$0xf]  ;;  %v13658_v38 = vld [vmem:[#allocation2 + $0x434] sm:$0xf] }
 0x3a1   :  { %6646 = vmatpush.bf16.msra.mxu0 %v12399_v15  ;;  %v11810_v15 = vld [vmem:[#allocation2 + $0x3c0] sm:$0xf] }
 0x3a2   :  { %6660 = vmatpush.bf16.msra.mxu1 %v12623_v49  ;;  %v13703_v49 = vld [vmem:[#allocation2 + $0x598] sm:$0xf0]  ;;  %v11811_v12 = vor.u32 %v13647_v31, %v11810_v15  ;;  %v13560_v31 = vld [vmem:[#allocation2 + $0x124] sm:$0xf] }
 0x3a3   :  { %6619 = vmatpush.bf16.msra.mxu2 %v11923_v13  ;;  %v11782_v13 = vld [vmem:[#allocation2 + $0x388] sm:$0xf]  ;;  %v13899_v15 = vld [vmem:[#allocation2 + $0xbb8] sm:$0xf0] }
 0x3a4   :  { %6633 = vmatpush.bf16.msra.mxu3 %v12147_v24  ;;  %v13640_v24 = vld [vmem:[#allocation2 + $0x3a0] sm:$0xf0] }
 0x3a5   :  { %6647 = vmatpush.bf16.msra.mxu0 %v12371_v51  ;;  %v12035_v51 = vor.u32 %v13703_v49, %v12034_v45  ;;  %v11955_v45 = vor.u32 %v13679_v20, %v11952_v33  ;;  %v13616_v49 = vld [vmem:[#allocation2 + $0x2e4] sm:$0xf]  ;;  %v11840_v20 = vld [vmem:[#allocation2 + $0x414] sm:$0xf0] }
 0x3a6   :  { %6661 = vmatpush.bf16.msra.mxu1 %v12595_v63  ;;  %v12230_v63 = vld [vmem:[#allocation2 + $0x708] sm:$0xf] }
 0x3a7   :  { %6620 = vmatpush.bf16.msra.mxu2 %v11895_v56  ;;  %v13913_v56 = vld [vmem:[#allocation2 + $0xc28] sm:$0xf0]  ;;  %v12231_v4 = vor.u32 %v13752_v58, %v12230_v63 }
 0x3a8   :  { %6634 = vmatpush.bf16.msra.mxu3 %v12119_v17  ;;  %v13574_v17 = vld [vmem:[#allocation2 + $0x194] sm:$0xf]  ;;  %v12875_v61 = vor.u32 %v13913_v56, %v12874_v57  ;;  %v13609_v63 = vld [vmem:[#allocation2 + $0x2ac] sm:$0xf] }
 0x3a9   :  { %6648 = vmatpush.bf16.msra.mxu0 %v12343_v32  ;;  %v11783_v32 = vor.u32 %v13640_v24, %v11782_v13  ;;  %v11703_v13 = vor.u32 %v13616_v49, %v11700_v40  ;;  %v12790_v24 = vld [vmem:[#allocation2 + $0xb68] sm:$0xf]  ;;  %v13665_v58 = vld [vmem:[#allocation2 + $0x46c] sm:$0xf]  ;;  %v11588_v49 = vld [vmem:[#allocation2 + $0x21c] sm:$0xf0] }
 0x3aa   :  { %6662 = vmatpush.bf16.msra.mxu1 %v12567_v42  ;;  %v12007_v42 = vor.u32 %v13696_v11, %v12006_v6  ;;  %v11927_v6 = vor.u32 %v13672_v54, %v11924_v25  ;;  %v11448_v11 = vld [vmem:[#allocation2 + $0x104] sm:$0xf0]  ;;  %v13644_v40 = vld [vmem:[#allocation2 + $0x3c4] sm:$0xf]  ;;  %v11812_v54 = vld [vmem:[#allocation2 + $0x3dc] sm:$0xf0] }
 0x3ab   :  { %6621 = vmatpush.bf16.msra.mxu2 %v11867_v18  ;;  %v11535_v18 = vor.u32 %v13574_v17, %v11532_v26  ;;  %v12762_v17 = vld [vmem:[#allocation2 + $0xb30] sm:$0xf]  ;;  %v13546_v26 = vld [vmem:[#allocation2 + $0xb4] sm:$0xf] }
 0x3ac   :  { %6635 = vmatpush.bf16.msra.mxu3 %v12091_v7  ;;  %v11759_v7 = vor.u32 %v13630_v48, %v11756_v2  ;;  %v11899_v48 = vor.u32 %v13665_v58, %v11896_v22  ;;  %v11420_v2 = vld [vmem:[#allocation2 + $0xcc] sm:$0xf0]  ;;  %v11784_v58 = vld [vmem:[#allocation2 + $0x3a4] sm:$0xf0]  ;;  %v13742_v22 = vld [vmem:[#allocation2 + $0x6d4] sm:$0xf] }
 0x3ad   :  { %6649 = vmatpush.bf16.msra.mxu0 %v12315_v50  ;;  %v12846_v50 = vld [vmem:[#allocation2 + $0xbd8] sm:$0xf] }
 0x3ae   :  { %6663 = vmatpush.bf16.msra.mxu1 %v12539_v39  ;;  %v11504_v39 = vld [vmem:[#allocation2 + $0x174] sm:$0xf0]  ;;  %v12847_v3 = vor.u32 %v13906_v36, %v12846_v50  ;;  %v13878_v50 = vld [vmem:[#allocation2 + $0xb10] sm:$0xf0]  ;;  %v13539_v36 = vld [vmem:[#allocation2 + $0x7c] sm:$0xf] }
 0x3af   :  { %6622 = vmatpush.bf16.msra.mxu2 %v11839_v41  ;;  %v11507_v41 = vor.u32 %v13567_v23, %v11504_v39  ;;  %v11871_v23 = vor.u32 %v13658_v38, %v11868_v5  ;;  %v13595_v39 = vld [vmem:[#allocation2 + $0x23c] sm:$0xf] }
 0x3b0   :  { %6636 = vmatpush.bf16.msra.mxu3 %v12063_v16  ;;  %v11731_v16 = vor.u32 %v13623_v8, %v11728_v14  ;;  %v11616_v8 = vld [vmem:[#allocation2 + $0x254] sm:$0xf0]  ;;  %v13651_v14 = vld [vmem:[#allocation2 + $0x3fc] sm:$0xf] }
 0x3b1   :  { %6650 = vmatpush.bf16.msra.mxu0 %v12287_v9  ;;  %v12818_v9 = vld [vmem:[#allocation2 + $0xba0] sm:$0xf] }
 0x3b2   :  { %6664 = vmatpush.bf16.msra.mxu1 %v12511_v1  ;;  %v11476_v1 = vld [vmem:[#allocation2 + $0x13c] sm:$0xf0]  ;;  %v12819_v28 = vor.u32 %v13899_v15, %v12818_v9  ;;  %v13871_v9 = vld [vmem:[#allocation2 + $0xad8] sm:$0xf0]  ;;  %v13532_v15 = vld [vmem:[#allocation2 + $0x44] sm:$0xf] }
 0x3b3   :  { %6623 = vmatpush.bf16.msra.mxu2 %v11811_v12  ;;  %v11479_v12 = vor.u32 %v13560_v31, %v11476_v1  ;;  %v11843_v31 = vor.u32 %v13651_v14, %v11840_v20  ;;  %v13588_v1 = vld [vmem:[#allocation2 + $0x204] sm:$0xf]  ;;  %v12848_v14 = vld [vmem:[#allocation2 + $0xbf4] sm:$0xf0] }
 0x3b4   :  { %6637 = vmatpush.bf16.msra.mxu3 %v12035_v51  ;;  %v13892_v51 = vld [vmem:[#allocation2 + $0xb80] sm:$0xf0] }
 0x3b5   :  { %6651 = vmatpush.bf16.msra.mxu0 %v12259_v60  ;;  %v13553_v60 = vld [vmem:[#allocation2 + $0xec] sm:$0xf]  ;;  %v12791_v37 = vor.u32 %v13892_v51, %v12790_v24  ;;  %v11591_v24 = vor.u32 %v13588_v1, %v11588_v49  ;;  %v12596_v1 = vld [vmem:[#allocation2 + $0x9fc] sm:$0xf0]  ;;  %v13896_v49 = vld [vmem:[#allocation2 + $0xba4] sm:$0xf] }
 0x3b6   :  { %6665 = vmatpush.bf16.msra.mxu1 %v12483_v55  ;;  %v11672_v55 = vld [vmem:[#allocation2 + $0x2c4] sm:$0xf0]  ;;  %v11451_v57 = vor.u32 %v13553_v60, %v11448_v11  ;;  %v13525_v51 = vld [vmem:[#allocation2 + $0xc] sm:$0xf]  ;;  %v11815_v11 = vor.u32 %v13644_v40, %v11812_v54  ;;  %v12820_v40 = vld [vmem:[#allocation2 + $0xbbc] sm:$0xf0] }
 0x3b7   :  { %6624 = vmatpush.bf16.msra.mxu2 %v11783_v32  ;;  %v11675_v56 = vor.u32 %v13609_v63, %v11672_v55  ;;  %v13885_v32 = vld [vmem:[#allocation2 + $0xb48] sm:$0xf0]  ;;  %v11336_v60 = vld [vmem:[#allocation2 + $0x24] sm:$0xf0] }
 0x3b8   :  { %6638 = vmatpush.bf16.msra.mxu3 %v12007_v42  ;;  %v13602_v42 = vld [vmem:[#allocation2 + $0x274] sm:$0xf]  ;;  %v11560_v63 = vld [vmem:[#allocation2 + $0x1e4] sm:$0xf0]  ;;  %v13637_v55 = vld [vmem:[#allocation2 + $0x38c] sm:$0xf] }
 0x3b9   :  { %6652 = vmatpush.bf16.msra.mxu0 %v12231_v4  ;;  %v11644_v4 = vld [vmem:[#allocation2 + $0x28c] sm:$0xf0]  ;;  %v11787_v38 = vor.u32 %v13637_v55, %v11784_v58  ;;  %v12792_v55 = vld [vmem:[#allocation2 + $0xb84] sm:$0xf0] }
 0x3ba   :  { %6666 = vmatpush.bf16.msra.mxu1 %v12455_v35  ;;  %6625 = vmatmul.bf16.vlgmr.msra.gmra.mxu2 %v15162_v43  ;;  %v12763_v35 = vor.u32 %v13885_v32, %v12762_v17  ;;  %v12428_v17 = vld [vmem:[#allocation2 + $0x8ac] sm:$0xf0]  ;;  %v13854_v32 = vld [vmem:[#allocation2 + $0xa54] sm:$0xf] }
 0x3bb   :  { %6673 = vmatpush.bf16.msrb.mxu2 %v12875_v61  ;;  %6639 = vmatmul.bf16.vlgmr.msra.gmra.mxu3 %v15168_v19  ;;  %v11423_v61 = vor.u32 %v13546_v26, %v11420_v2  ;;  %v12652_v26 = vld [vmem:[#allocation2 + $0xa6c] sm:$0xf0] }
 0x3bc   :  { %6687 = vmatpush.bf16.msrb.mxu3 %v11535_v18  ;;  %6653 = vmatmul.bf16.vlgmr.msra.gmra.mxu0 %v15178_v10  ;;  %v11647_v18 = vor.u32 %v13602_v42, %v11644_v4  ;;  %v13910_v42 = vld [vmem:[#allocation2 + $0xc14] sm:$0xf]  ;;  %v12876_v4 = vld [vmem:[#allocation2 + $0xc2c] sm:$0xf0] }
 0x3bd   :  { %6701 = vmatpush.bf16.msrb.mxu0 %v11759_v7  ;;  %6667 = vmatmul.bf16.vlgmr.msra.gmra.mxu1 %v15184_v29  ;;  %v12734_v7 = vld [vmem:[#allocation2 + $0xaf8] sm:$0xf] }
 0x3be   :  { %6715 = vmatpush.bf16.msrb.mxu1 %v11983_v46  ;;  %v11392_v46 = vld [vmem:[#allocation2 + $0x94] sm:$0xf0]  ;;  %v12735_v33 = vor.u32 %v13878_v50, %v12734_v7  ;;  %v13791_v50 = vld [vmem:[#allocation2 + $0x85c] sm:$0xf] }
 0x3bf   :  { %6674 = vmatpush.bf16.msrb.mxu2 %v12847_v3  ;;  %v11395_v3 = vor.u32 %v13539_v36, %v11392_v46  ;;  %v12176_v7 = vld [vmem:[#allocation2 + $0x6b4] sm:$0xf0]  ;;  %v12879_v36 = vor.u32 %v13910_v42, %v12876_v4  ;;  %v13847_v46 = vld [vmem:[#allocation2 + $0xa1c] sm:$0xf]  ;;  %v13882_v42 = vld [vmem:[#allocation2 + $0xb34] sm:$0xf] }
 0x3c0   :  { %6688 = vmatpush.bf16.msrb.mxu3 %v11507_v41  ;;  %v11619_v41 = vor.u32 %v13595_v39, %v11616_v8  ;;  %v12624_v39 = vld [vmem:[#allocation2 + $0xa34] sm:$0xf0]  ;;  %v13903_v8 = vld [vmem:[#allocation2 + $0xbdc] sm:$0xf]  ;;  %v12764_v4 = vld [vmem:[#allocation2 + $0xb4c] sm:$0xf0] }
 0x3c1   :  { %6702 = vmatpush.bf16.msrb.mxu0 %v11731_v16  ;;  %v12706_v16 = vld [vmem:[#allocation2 + $0xac0] sm:$0xf] }
 0x3c2   :  { %6716 = vmatpush.bf16.msrb.mxu1 %v11955_v45  ;;  %v11364_v45 = vld [vmem:[#allocation2 + $0x5c] sm:$0xf0]  ;;  %v12707_v25 = vor.u32 %v13871_v9, %v12706_v16  ;;  %v13784_v9 = vld [vmem:[#allocation2 + $0x824] sm:$0xf] }
 0x3c3   :  { %6675 = vmatpush.bf16.msrb.mxu2 %v12819_v28  ;;  %v12678_v28 = vld [vmem:[#allocation2 + $0xa88] sm:$0xf]  ;;  %v12148_v16 = vld [vmem:[#allocation2 + $0x67c] sm:$0xf0] }
 0x3c4   :  { %6689 = vmatpush.bf16.msrb.mxu3 %v11479_v12  ;;  %v13864_v12 = vld [vmem:[#allocation2 + $0xaa0] sm:$0xf0] }
 0x3c5   :  { %6703 = vmatpush.bf16.msrb.mxu0 %v11703_v13  ;;  %v11367_v13 = vor.u32 %v13532_v15, %v11364_v45  ;;  %v12851_v15 = vor.u32 %v13903_v8, %v12848_v14  ;;  %v13840_v45 = vld [vmem:[#allocation2 + $0x9e4] sm:$0xf]  ;;  %v12736_v8 = vld [vmem:[#allocation2 + $0xb14] sm:$0xf0] }
 0x3c6   :  { %6717 = vmatpush.bf16.msrb.mxu1 %v11927_v6  ;;  %v13581_v6 = vld [vmem:[#allocation2 + $0x1cc] sm:$0xf] }
 0x3c7   :  { %6676 = vmatpush.bf16.msrb.mxu2 %v12791_v37  ;;  %v12204_v37 = vld [vmem:[#allocation2 + $0x6ec] sm:$0xf0]  ;;  %v11563_v2 = vor.u32 %v13581_v6, %v11560_v63  ;;  %v13833_v6 = vld [vmem:[#allocation2 + $0x9ac] sm:$0xf] }
 0x3c8   :  { %6690 = vmatpush.bf16.msrb.mxu3 %v11451_v57  ;;  %v13798_v57 = vld [vmem:[#allocation2 + $0x894] sm:$0xf]  ;;  %v12207_v5 = vor.u32 %v13742_v22, %v12204_v37  ;;  %v13889_v63 = vld [vmem:[#allocation2 + $0xb6c] sm:$0xf] }
 0x3c9   :  { %6704 = vmatpush.bf16.msrb.mxu0 %v11675_v56  ;;  %v12679_v56 = vor.u32 %v13864_v12, %v12678_v28  ;;  %v12599_v28 = vor.u32 %v13840_v45, %v12596_v1  ;;  %v13721_v12 = vld [vmem:[#allocation2 + $0x62c] sm:$0xf]  ;;  %v12484_v45 = vld [vmem:[#allocation2 + $0x91c] sm:$0xf0]  ;;  %v13868_v1 = vld [vmem:[#allocation2 + $0xac4] sm:$0xf] }
 0x3ca   :  { %6718 = vmatpush.bf16.msrb.mxu1 %v11899_v48  ;;  %v11339_v48 = vor.u32 %v13525_v51, %v11336_v60  ;;  %v12823_v51 = vor.u32 %v13896_v49, %v12820_v40  ;;  %v12344_v60 = vld [vmem:[#allocation2 + $0x804] sm:$0xf0]  ;;  %v12708_v49 = vld [vmem:[#allocation2 + $0xadc] sm:$0xf0] }
 0x3cb   :  { %6677 = vmatpush.bf16.msrb.mxu2 %v12763_v35  ;;  %v12431_v35 = vor.u32 %v13798_v57, %v12428_v17  ;;  %v13714_v57 = vld [vmem:[#allocation2 + $0x5f4] sm:$0xf] }
 0x3cc   :  { %6691 = vmatpush.bf16.msrb.mxu3 %v11423_v61  ;;  %v12655_v61 = vor.u32 %v13854_v32, %v12652_v26  ;;  %v13770_v17 = vld [vmem:[#allocation2 + $0x7b4] sm:$0xf]  ;;  %v12795_v32 = vor.u32 %v13889_v63, %v12792_v55  ;;  %v12316_v26 = vld [vmem:[#allocation2 + $0x7cc] sm:$0xf0]  ;;  %v12680_v63 = vld [vmem:[#allocation2 + $0xaa4] sm:$0xf0] }
 0x3cd   :  { %6705 = vmatpush.bf16.msrb.mxu0 %v11647_v18  ;;  %v13735_v18 = vld [vmem:[#allocation2 + $0x69c] sm:$0xf]  ;;  %v11538_v55 = vld [vmem:[#allocation2 + $0x198] sm:$0xf] }
 0x3ce   :  { %6719 = vmatpush.bf16.msrb.mxu1 %v11871_v23  ;;  %v12400_v23 = vld [vmem:[#allocation2 + $0x874] sm:$0xf0]  ;;  %v12179_v20 = vor.u32 %v13735_v18, %v12176_v7  ;;  %v13763_v7 = vld [vmem:[#allocation2 + $0x77c] sm:$0xf] }
 0x3cf   :  { %6678 = vmatpush.bf16.msrb.mxu2 %v12735_v33  ;;  %v12403_v33 = vor.u32 %v13791_v50, %v12400_v23  ;;  %v12064_v18 = vld [vmem:[#allocation2 + $0x5d4] sm:$0xf0]  ;;  %v12767_v50 = vor.u32 %v13882_v42, %v12764_v4  ;;  %v13819_v23 = vld [vmem:[#allocation2 + $0x93c] sm:$0xf] }
 0x3d0   :  { %6692 = vmatpush.bf16.msrb.mxu3 %v11395_v3  ;;  %v12627_v3 = vor.u32 %v13847_v46, %v12624_v39  ;;  %v12512_v46 = vld [vmem:[#allocation2 + $0x954] sm:$0xf0]  ;;  %v13875_v39 = vld [vmem:[#allocation2 + $0xafc] sm:$0xf] }
 0x3d1   :  { %6706 = vmatpush.bf16.msrb.mxu0 %v11619_v41  ;;  %v13728_v41 = vld [vmem:[#allocation2 + $0x664] sm:$0xf] }
 0x3d2   :  { %6720 = vmatpush.bf16.msrb.mxu1 %v11843_v31  ;;  %v12372_v31 = vld [vmem:[#allocation2 + $0x83c] sm:$0xf0]  ;;  %v12151_v54 = vor.u32 %v13728_v41, %v12148_v16  ;;  %v13756_v16 = vld [vmem:[#allocation2 + $0x744] sm:$0xf] }
 0x3d3   :  { %6679 = vmatpush.bf16.msrb.mxu2 %v12707_v25  ;;  %v12375_v25 = vor.u32 %v13784_v9, %v12372_v31  ;;  %v12036_v41 = vld [vmem:[#allocation2 + $0x59c] sm:$0xf0]  ;;  %v12739_v9 = vor.u32 %v13875_v39, %v12736_v8  ;;  %v13812_v31 = vld [vmem:[#allocation2 + $0x904] sm:$0xf]  ;;  %v13739_v39 = vld [vmem:[#allocation2 + $0x6b8] sm:$0xf0] }
 0x3d4   :  { %6693 = vmatpush.bf16.msrb.mxu3 %v11367_v13  ;;  %v12120_v13 = vld [vmem:[#allocation2 + $0x644] sm:$0xf0] }
 0x3d5   :  { %6707 = vmatpush.bf16.msrb.mxu0 %v11591_v24  ;;  %v13777_v24 = vld [vmem:[#allocation2 + $0x7ec] sm:$0xf]  ;;  %v12123_v58 = vor.u32 %v13721_v12, %v12120_v13  ;;  %v12487_v12 = vor.u32 %v13812_v31, %v12484_v45  ;;  %v13676_v31 = vld [vmem:[#allocation2 + $0x4c0] sm:$0xf0]  ;;  %v12154_v45 = vld [vmem:[#allocation2 + $0x668] sm:$0xf] }
 0x3d6   :  { %6721 = vmatpush.bf16.msrb.mxu1 %v11815_v11  ;;  %v12568_v11 = vld [vmem:[#allocation2 + $0x9c4] sm:$0xf0]  ;;  %v12347_v22 = vor.u32 %v13777_v24, %v12344_v60  ;;  %v13749_v13 = vld [vmem:[#allocation2 + $0x70c] sm:$0xf]  ;;  %v12711_v60 = vor.u32 %v13868_v1, %v12708_v49  ;;  %v13732_v1 = vld [vmem:[#allocation2 + $0x680] sm:$0xf0] }
 0x3d7   :  { %6680 = vmatpush.bf16.msrb.mxu2 %v12679_v56  ;;  %v12571_v37 = vor.u32 %v13833_v6, %v12568_v11  ;;  %v12092_v56 = vld [vmem:[#allocation2 + $0x60c] sm:$0xf0]  ;;  %v12232_v24 = vld [vmem:[#allocation2 + $0x724] sm:$0xf0]  ;;  %v13861_v11 = vld [vmem:[#allocation2 + $0xa8c] sm:$0xf] }
 0x3d8   :  { %6694 = vmatpush.bf16.msrb.mxu3 %v11339_v48  ;;  %v13826_v48 = vld [vmem:[#allocation2 + $0x974] sm:$0xf]  ;;  %v12456_v6 = vld [vmem:[#allocation2 + $0x8e4] sm:$0xf0]  ;;  %v12683_v42 = vor.u32 %v13861_v11, %v12680_v63  ;;  %v13725_v11 = vld [vmem:[#allocation2 + $0x648] sm:$0xf0] }
 0x3d9   :  { %6708 = vmatpush.bf16.msrb.mxu0 %v11563_v2  ;;  %v12540_v2 = vld [vmem:[#allocation2 + $0x98c] sm:$0xf0] }
 0x3da   :  { %6722 = vmatpush.bf16.msrb.mxu1 %v11787_v38  ;;  %6681 = vmatmul.bf16.vlgmr.msrb.gmra.mxu2 %v15190_v59  ;;  %v12095_v38 = vor.u32 %v13714_v57, %v12092_v56  ;;  %v13634_v57 = vld [vmem:[#allocation2 + $0x370] sm:$0xf0]  ;;  %v11986_v56 = vld [vmem:[#allocation2 + $0x518] sm:$0xf] }
 0x3db   :  { %6729 = vmatpush.bf16.msra.mxu2 %v12207_v5  ;;  %6695 = vmatmul.bf16.vlgmr.msrb.gmra.mxu3 %v15150_v52  ;;  %v12319_v5 = vor.u32 %v13770_v17, %v12316_v26  ;;  %v13690_v17 = vld [vmem:[#allocation2 + $0x530] sm:$0xf0] }
 0x3dc   :  { %6743 = vmatpush.bf16.msra.mxu3 %v12431_v35  ;;  %6709 = vmatmul.bf16.vlgmr.msrb.gmra.mxu0 %v15156_v30  ;;  %v12543_v35 = vor.u32 %v13826_v48, %v12540_v2  ;;  %v12210_v48 = vld [vmem:[#allocation2 + $0x6d8] sm:$0xf]  ;;  %v13746_v2 = vld [vmem:[#allocation2 + $0x6f0] sm:$0xf0] }
 0x3dd   :  { %6757 = vmatpush.bf16.msra.mxu0 %v12655_v61  ;;  %6723 = vmatmul.bf16.vlgmr.msrb.gmra.mxu1 %v15162_v43  ;;  %v13707_v61 = vld [vmem:[#allocation2 + $0x5bc] sm:$0xf] }
 0x3de   :  { %6771 = vmatpush.bf16.msra.mxu1 %v12879_v36  ;;  %v12288_v36 = vld [vmem:[#allocation2 + $0x794] sm:$0xf0]  ;;  %v12067_v14 = vor.u32 %v13707_v61, %v12064_v18  ;;  %v13571_v61 = vld [vmem:[#allocation2 + $0x178] sm:$0xf0]  ;;  %v11734_v18 = vld [vmem:[#allocation2 + $0x320] sm:$0xf] }
 0x3df   :  { %6730 = vmatpush.bf16.msra.mxu2 %v12179_v20  ;;  %v12291_v20 = vor.u32 %v13763_v7, %v12288_v36  ;;  %v12211_v7 = vor.u32 %v13746_v2, %v12210_v48  ;;  %v11958_v36 = vld [vmem:[#allocation2 + $0x4e0] sm:$0xf]  ;;  %v12098_v48 = vld [vmem:[#allocation2 + $0x5f8] sm:$0xf]  ;;  %v13718_v2 = vld [vmem:[#allocation2 + $0x610] sm:$0xf0] }
 0x3e0   :  { %6744 = vmatpush.bf16.msra.mxu3 %v12403_v33  ;;  %v12515_v33 = vor.u32 %v13819_v23, %v12512_v46  ;;  %v13683_v23 = vld [vmem:[#allocation2 + $0x4f8] sm:$0xf0]  ;;  %v12182_v46 = vld [vmem:[#allocation2 + $0x6a0] sm:$0xf] }
 0x3e1   :  { %6758 = vmatpush.bf16.msra.mxu0 %v12627_v3  ;;  %v13700_v3 = vld [vmem:[#allocation2 + $0x584] sm:$0xf] }
 0x3e2   :  { %6772 = vmatpush.bf16.msra.mxu1 %v12851_v15  ;;  %v12260_v15 = vld [vmem:[#allocation2 + $0x75c] sm:$0xf0]  ;;  %v12039_v40 = vor.u32 %v13700_v3, %v12036_v41  ;;  %v13564_v3 = vld [vmem:[#allocation2 + $0x140] sm:$0xf0]  ;;  %v11706_v41 = vld [vmem:[#allocation2 + $0x2e8] sm:$0xf] }
 0x3e3   :  { %6731 = vmatpush.bf16.msra.mxu2 %v12151_v54  ;;  %v13693_v54 = vld [vmem:[#allocation2 + $0x54c] sm:$0xf] }
 0x3e4   :  { %6745 = vmatpush.bf16.msra.mxu3 %v12375_v25  ;;  %v12008_v25 = vld [vmem:[#allocation2 + $0x564] sm:$0xf0] }
 0x3e5   :  { %6759 = vmatpush.bf16.msra.mxu0 %v12599_v28  ;;  %v12263_v28 = vor.u32 %v13756_v16, %v12260_v15  ;;  %v12183_v16 = vor.u32 %v13739_v39, %v12182_v46  ;;  %v11930_v15 = vld [vmem:[#allocation2 + $0x4a8] sm:$0xf]  ;;  %v13711_v46 = vld [vmem:[#allocation2 + $0x5d8] sm:$0xf0] }
 0x3e6   :  { %6773 = vmatpush.bf16.msra.mxu1 %v12823_v51  ;;  %v13805_v51 = vld [vmem:[#allocation2 + $0x8cc] sm:$0xf] }
 0x3e7   :  { %6732 = vmatpush.bf16.msra.mxu2 %v12123_v58  ;;  %v13578_v58 = vld [vmem:[#allocation2 + $0x1b0] sm:$0xf0]  ;;  %v12459_v26 = vor.u32 %v13805_v51, %v12456_v6  ;;  %v11902_v51 = vld [vmem:[#allocation2 + $0x470] sm:$0xf] }
 0x3e8   :  { %6746 = vmatpush.bf16.msra.mxu3 %v12347_v22  ;;  %v11762_v22 = vld [vmem:[#allocation2 + $0x358] sm:$0xf]  ;;  %v11539_v4 = vor.u32 %v13578_v58, %v11538_v55  ;;  %v12126_v6 = vld [vmem:[#allocation2 + $0x630] sm:$0xf] }
 0x3e9   :  { %6760 = vmatpush.bf16.msra.mxu0 %v12571_v37  ;;  %v12011_v37 = vor.u32 %v13693_v54, %v12008_v25  ;;  %v11931_v54 = vor.u32 %v13676_v31, %v11930_v15  ;;  %v11454_v25 = vld [vmem:[#allocation2 + $0xf0] sm:$0xf]  ;;  %v13648_v15 = vld [vmem:[#allocation2 + $0x3e0] sm:$0xf0]  ;;  %v12042_v31 = vld [vmem:[#allocation2 + $0x588] sm:$0xf] }
 0x3ea   :  { %6774 = vmatpush.bf16.msra.mxu1 %v12795_v32  ;;  %v12235_v32 = vor.u32 %v13749_v13, %v12232_v24  ;;  %v12155_v13 = vor.u32 %v13732_v1, %v12154_v45  ;;  %v13613_v24 = vld [vmem:[#allocation2 + $0x2c8] sm:$0xf0]  ;;  %v13704_v45 = vld [vmem:[#allocation2 + $0x5a0] sm:$0xf0] }
 0x3eb   :  { %6733 = vmatpush.bf16.msra.mxu2 %v12095_v38  ;;  %v11763_v38 = vor.u32 %v13634_v57, %v11762_v22  ;;  %v11426_v22 = vld [vmem:[#allocation2 + $0xb8] sm:$0xf] }
 0x3ec   :  { %6747 = vmatpush.bf16.msra.mxu3 %v12319_v5  ;;  %v11987_v5 = vor.u32 %v13690_v17, %v11986_v56  ;;  %v11650_v57 = vld [vmem:[#allocation2 + $0x278] sm:$0xf]  ;;  %v12127_v56 = vor.u32 %v13725_v11, %v12126_v6  ;;  %v13606_v17 = vld [vmem:[#allocation2 + $0x290] sm:$0xf0]  ;;  %v13697_v6 = vld [vmem:[#allocation2 + $0x568] sm:$0xf0] }
 0x3ed   :  { %6761 = vmatpush.bf16.msra.mxu0 %v12543_v35  ;;  %v11510_v35 = vld [vmem:[#allocation2 + $0x160] sm:$0xf]  ;;  %v12434_v11 = vld [vmem:[#allocation2 + $0x898] sm:$0xf] }
 0x3ee   :  { %6775 = vmatpush.bf16.msra.mxu1 %v12767_v50  ;;  %v13627_v50 = vld [vmem:[#allocation2 + $0x338] sm:$0xf0]  ;;  %v11511_v8 = vor.u32 %v13571_v61, %v11510_v35  ;;  %v11622_v61 = vld [vmem:[#allocation2 + $0x240] sm:$0xf] }
 0x3ef   :  { %6734 = vmatpush.bf16.msra.mxu2 %v12067_v14  ;;  %v11735_v14 = vor.u32 %v13627_v50, %v11734_v18  ;;  %v13543_v35 = vld [vmem:[#allocation2 + $0x98] sm:$0xf0]  ;;  %v12099_v18 = vor.u32 %v13718_v2, %v12098_v48  ;;  %v11846_v50 = vld [vmem:[#allocation2 + $0x400] sm:$0xf] }
 0x3f0   :  { %6748 = vmatpush.bf16.msra.mxu3 %v12291_v20  ;;  %v11959_v20 = vor.u32 %v13683_v23, %v11958_v36  ;;  %v13655_v36 = vld [vmem:[#allocation2 + $0x418] sm:$0xf0]  ;;  %v12070_v23 = vld [vmem:[#allocation2 + $0x5c0] sm:$0xf] }
 0x3f1   :  { %6762 = vmatpush.bf16.msra.mxu0 %v12515_v33  ;;  %v11482_v33 = vld [vmem:[#allocation2 + $0x128] sm:$0xf] }
 0x3f2   :  { %6776 = vmatpush.bf16.msra.mxu1 %v12739_v9  ;;  %v13620_v9 = vld [vmem:[#allocation2 + $0x300] sm:$0xf0]  ;;  %v11483_v49 = vor.u32 %v13564_v3, %v11482_v33  ;;  %v11594_v3 = vld [vmem:[#allocation2 + $0x208] sm:$0xf] }
 0x3f3   :  { %6735 = vmatpush.bf16.msra.mxu2 %v12039_v40  ;;  %v11707_v40 = vor.u32 %v13620_v9, %v11706_v41  ;;  %v13536_v33 = vld [vmem:[#allocation2 + $0x60] sm:$0xf0]  ;;  %v12071_v41 = vor.u32 %v13711_v46, %v12070_v23  ;;  %v11818_v9 = vld [vmem:[#allocation2 + $0x3c8] sm:$0xf]  ;;  %v11512_v23 = vld [vmem:[#allocation2 + $0x17c] sm:$0xf0] }
 0x3f4   :  { %6749 = vmatpush.bf16.msra.mxu3 %v12263_v28  ;;  %v13557_v28 = vld [vmem:[#allocation2 + $0x108] sm:$0xf0] }
 0x3f5   :  { %6763 = vmatpush.bf16.msra.mxu0 %v12487_v12  ;;  %v11678_v12 = vld [vmem:[#allocation2 + $0x2b0] sm:$0xf]  ;;  %v11455_v63 = vor.u32 %v13557_v28, %v11454_v25  ;;  %v11819_v25 = vor.u32 %v13648_v15, %v11818_v9  ;;  %v13900_v9 = vld [vmem:[#allocation2 + $0xbc0] sm:$0xf0]  ;;  %v13561_v15 = vld [vmem:[#allocation2 + $0x12c] sm:$0xf] }
 0x3f6   :  { %6777 = vmatpush.bf16.msra.mxu1 %v12711_v60  ;;  %v13669_v60 = vld [vmem:[#allocation2 + $0x488] sm:$0xf0]  ;;  %v11679_v55 = vor.u32 %v13613_v24, %v11678_v12  ;;  %v11566_v28 = vld [vmem:[#allocation2 + $0x1d0] sm:$0xf]  ;;  %v12043_v24 = vor.u32 %v13704_v45, %v12042_v31  ;;  %v11484_v31 = vld [vmem:[#allocation2 + $0x144] sm:$0xf0] }
 0x3f7   :  { %6736 = vmatpush.bf16.msra.mxu2 %v12011_v37  ;;  %v11903_v58 = vor.u32 %v13669_v60, %v11902_v51  ;;  %v13550_v37 = vld [vmem:[#allocation2 + $0xd0] sm:$0xf0]  ;;  %v13585_v12 = vld [vmem:[#allocation2 + $0x1e8] sm:$0xf0]  ;;  %v12014_v60 = vld [vmem:[#allocation2 + $0x550] sm:$0xf] }
 0x3f8   :  { %6750 = vmatpush.bf16.msra.mxu3 %v12235_v32  ;;  %v11874_v32 = vld [vmem:[#allocation2 + $0x438] sm:$0xf]  ;;  %v13641_v51 = vld [vmem:[#allocation2 + $0x3a8] sm:$0xf0]  ;;  %v12015_v48 = vor.u32 %v13697_v6, %v12014_v60  ;;  %v11456_v60 = vld [vmem:[#allocation2 + $0x10c] sm:$0xf0] }
 0x3f9   :  { %6764 = vmatpush.bf16.msra.mxu0 %v12459_v26  ;;  %v13662_v26 = vld [vmem:[#allocation2 + $0x450] sm:$0xf0] }
 0x3fa   :  { %6778 = vmatpush.bf16.msra.mxu1 %v12683_v42  ;;  %6737 = vmatmul.bf16.vlgmr.msra.gmra.mxu2 %v15168_v19  ;;  %v11427_v42 = vor.u32 %v13550_v37, %v11426_v22  ;;  %v13858_v22 = vld [vmem:[#allocation2 + $0xa70] sm:$0xf0]  ;;  %v12882_v37 = vld [vmem:[#allocation2 + $0xc18] sm:$0xf] }
 0x3fb   :  { %6785 = vmatpush.bf16.msrb.mxu2 %v11539_v4  ;;  %6751 = vmatmul.bf16.vlgmr.msra.gmra.mxu3 %v15178_v10  ;;  %v11651_v4 = vor.u32 %v13606_v17, %v11650_v57  ;;  %v13914_v57 = vld [vmem:[#allocation2 + $0xc30] sm:$0xf0] }
 0x3fc   :  { %6799 = vmatpush.bf16.msrb.mxu3 %v11763_v38  ;;  %6765 = vmatmul.bf16.vlgmr.msra.gmra.mxu0 %v15184_v29  ;;  %v11875_v38 = vor.u32 %v13662_v26, %v11874_v32  ;;  %v13575_v32 = vld [vmem:[#allocation2 + $0x19c] sm:$0xf]  ;;  %v11540_v26 = vld [vmem:[#allocation2 + $0x1b4] sm:$0xf0] }
 0x3fd   :  { %6813 = vmatpush.bf16.msrb.mxu0 %v11987_v5  ;;  %6779 = vmatmul.bf16.vlgmr.msra.gmra.mxu1 %v15190_v59  ;;  %v11398_v5 = vld [vmem:[#allocation2 + $0x80] sm:$0xf] }
 0x3fe   :  { %6827 = vmatpush.bf16.msrb.mxu1 %v12211_v7  ;;  %v13599_v7 = vld [vmem:[#allocation2 + $0x258] sm:$0xf0]  ;;  %v11399_v39 = vor.u32 %v13543_v35, %v11398_v5  ;;  %v12630_v35 = vld [vmem:[#allocation2 + $0xa20] sm:$0xf] }
 0x3ff   :  { %6786 = vmatpush.bf16.msrb.mxu2 %v11511_v8  ;;  %v11623_v8 = vor.u32 %v13599_v7, %v11622_v61  ;;  %v13795_v5 = vld [vmem:[#allocation2 + $0x878] sm:$0xf0]  ;;  %v11543_v61 = vor.u32 %v13575_v32, %v11540_v26  ;;  %v12854_v7 = vld [vmem:[#allocation2 + $0xbe0] sm:$0xf]  ;;  %v13886_v32 = vld [vmem:[#allocation2 + $0xb50] sm:$0xf0]  ;;  %v15222_v26 = vpop.f32.mrf.mxu0 }
 0x400   :  { %6800 = vmatpush.bf16.msrb.mxu3 %v11735_v14  ;;  %v11847_v14 = vor.u32 %v13655_v36, %v11846_v50  ;;  %v13907_v50 = vld [vmem:[#allocation2 + $0xbf8] sm:$0xf0]  ;;  %v13568_v36 = vld [vmem:[#allocation2 + $0x164] sm:$0xf] }
 0x401   :  { %6814 = vmatpush.bf16.msrb.mxu0 %v11959_v20  ;;  %v11370_v20 = vld [vmem:[#allocation2 + $0x48] sm:$0xf] }
 0x402   :  { %6828 = vmatpush.bf16.msrb.mxu1 %v12183_v16  ;;  %v13592_v16 = vld [vmem:[#allocation2 + $0x220] sm:$0xf0]  ;;  %v11371_v1 = vor.u32 %v13536_v33, %v11370_v20  ;;  %v12602_v33 = vld [vmem:[#allocation2 + $0x9e8] sm:$0xf] }
 0x403   :  { %6787 = vmatpush.bf16.msrb.mxu2 %v11483_v49  ;;  %v11342_v49 = vld [vmem:[#allocation2 + $0x10] sm:$0xf]  ;;  %v13788_v20 = vld [vmem:[#allocation2 + $0x840] sm:$0xf0] }
 0x404   :  { %6801 = vmatpush.bf16.msrb.mxu3 %v11707_v40  ;;  %v13529_v40 = vld [vmem:[#allocation2 + $0x28] sm:$0xf0] }
 0x405   :  { %6815 = vmatpush.bf16.msrb.mxu0 %v11931_v54  ;;  %v11595_v54 = vor.u32 %v13592_v16, %v11594_v3  ;;  %v11515_v3 = vor.u32 %v13568_v36, %v11512_v23  ;;  %v12826_v16 = vld [vmem:[#allocation2 + $0xba8] sm:$0xf]  ;;  %v12742_v36 = vld [vmem:[#allocation2 + $0xb00] sm:$0xf]  ;;  %v13879_v23 = vld [vmem:[#allocation2 + $0xb18] sm:$0xf0] }
 0x406   :  { %6829 = vmatpush.bf16.msrb.mxu1 %v12155_v13  ;;  %v11790_v13 = vld [vmem:[#allocation2 + $0x390] sm:$0xf] }
 0x407   :  { %6788 = vmatpush.bf16.msrb.mxu2 %v11455_v63  ;;  %v13802_v63 = vld [vmem:[#allocation2 + $0x8b0] sm:$0xf0]  ;;  %v11791_v17 = vor.u32 %v13641_v51, %v11790_v13  ;;  %v12798_v13 = vld [vmem:[#allocation2 + $0xb70] sm:$0xf] }
 0x408   :  { %6802 = vmatpush.bf16.msrb.mxu3 %v11679_v55  ;;  %v12658_v55 = vld [vmem:[#allocation2 + $0xa58] sm:$0xf]  ;;  %v12435_v2 = vor.u32 %v13802_v63, %v12434_v11  ;;  %v13554_v51 = vld [vmem:[#allocation2 + $0xf4] sm:$0xf] }
 0x409   :  { %6816 = vmatpush.bf16.msrb.mxu0 %v11903_v58  ;;  %v11343_v58 = vor.u32 %v13529_v40, %v11342_v49  ;;  %v12827_v49 = vor.u32 %v13900_v9, %v12826_v16  ;;  %v12350_v40 = vld [vmem:[#allocation2 + $0x7f0] sm:$0xf]  ;;  %v13816_v9 = vld [vmem:[#allocation2 + $0x920] sm:$0xf0] }
 0x40a   :  { %6830 = vmatpush.bf16.msrb.mxu1 %v12127_v56  ;;  %v11567_v56 = vor.u32 %v13585_v12, %v11566_v28  ;;  %v11487_v28 = vor.u32 %v13561_v15, %v11484_v31  ;;  %v13837_v12 = vld [vmem:[#allocation2 + $0x9c8] sm:$0xf0]  ;;  %v12714_v15 = vld [vmem:[#allocation2 + $0xac8] sm:$0xf]  ;;  %v13872_v31 = vld [vmem:[#allocation2 + $0xae0] sm:$0xf0] }
 0x40b   :  { %6789 = vmatpush.bf16.msrb.mxu2 %v11427_v42  ;;  %v12659_v42 = vor.u32 %v13858_v22, %v12658_v55  ;;  %v12322_v55 = vld [vmem:[#allocation2 + $0x7b8] sm:$0xf] }
 0x40c   :  { %6803 = vmatpush.bf16.msrb.mxu3 %v11651_v4  ;;  %v12883_v4 = vor.u32 %v13914_v57, %v12882_v37  ;;  %v12546_v22 = vld [vmem:[#allocation2 + $0x978] sm:$0xf]  ;;  %v15220_v37 = vpop.f32.mrf.mxu2  ;;  %v11459_v57 = vor.u32 %v13554_v51, %v11456_v60  ;;  %v12462_v51 = vld [vmem:[#allocation2 + $0x8d0] sm:$0xf]  ;;  %v13809_v60 = vld [vmem:[#allocation2 + $0x8e8] sm:$0xf0] }
 0x40d   :  { %6817 = vmatpush.bf16.msrb.mxu0 %v11875_v38  ;;  %v12406_v38 = vld [vmem:[#allocation2 + $0x860] sm:$0xf] }
 0x40e   :  { %6831 = vmatpush.bf16.msrb.mxu1 %v12099_v18  ;;  %v13851_v18 = vld [vmem:[#allocation2 + $0xa38] sm:$0xf0]  ;;  %v12407_v46 = vor.u32 %v13795_v5, %v12406_v38 }
 0x40f   :  { %6790 = vmatpush.bf16.msrb.mxu2 %v11399_v39  ;;  %v12631_v39 = vor.u32 %v13851_v18, %v12630_v35  ;;  %v12294_v35 = vld [vmem:[#allocation2 + $0x780] sm:$0xf] }
 0x410   :  { %6804 = vmatpush.bf16.msrb.mxu3 %v11623_v8  ;;  %v12855_v8 = vor.u32 %v13907_v50, %v12854_v7  ;;  %v12518_v18 = vld [vmem:[#allocation2 + $0x940] sm:$0xf]  ;;  %v13823_v50 = vld [vmem:[#allocation2 + $0x958] sm:$0xf0] }
 0x411   :  { %6818 = vmatpush.bf16.msrb.mxu0 %v11847_v14  ;;  %v12378_v14 = vld [vmem:[#allocation2 + $0x828] sm:$0xf] }
 0x412   :  { %6832 = vmatpush.bf16.msrb.mxu1 %v12071_v41  ;;  %v13844_v41 = vld [vmem:[#allocation2 + $0xa00] sm:$0xf0]  ;;  %v12379_v45 = vor.u32 %v13788_v20, %v12378_v14  ;;  %v12519_v14 = vor.u32 %v13823_v50, %v12518_v18  ;;  %v12743_v20 = vor.u32 %v13879_v23, %v12742_v36 }
 0x413   :  { %6791 = vmatpush.bf16.msrb.mxu2 %v11371_v1  ;;  %v12603_v1 = vor.u32 %v13844_v41, %v12602_v33  ;;  %v12266_v33 = vld [vmem:[#allocation2 + $0x748] sm:$0xf]  ;;  %v13624_v23 = vld [vmem:[#allocation2 + $0x324] sm:$0xf] }
 0x414   :  { %6805 = vmatpush.bf16.msrb.mxu3 %v11595_v54  ;;  %v13781_v54 = vld [vmem:[#allocation2 + $0x808] sm:$0xf0]  ;;  %v12490_v41 = vld [vmem:[#allocation2 + $0x908] sm:$0xf] }
 0x415   :  { %6819 = vmatpush.bf16.msrb.mxu0 %v11819_v25  ;;  %v12574_v25 = vld [vmem:[#allocation2 + $0x9b0] sm:$0xf]  ;;  %v12351_v6 = vor.u32 %v13781_v54, %v12350_v40 }
 0x416   :  { %6833 = vmatpush.bf16.msrb.mxu1 %v12043_v24  ;;  %v13893_v24 = vld [vmem:[#allocation2 + $0xb88] sm:$0xf0]  ;;  %v12575_v11 = vor.u32 %v13837_v12, %v12574_v25  ;;  %v12238_v54 = vld [vmem:[#allocation2 + $0x710] sm:$0xf]  ;;  %v15230_v12 = vpop.f32.mrf.mxu1 }
 0x417   :  { %6792 = vmatpush.bf16.msrb.mxu2 %v11343_v58  ;;  %v12799_v63 = vor.u32 %v13893_v24, %v12798_v13  ;;  %v13774_v58 = vld [vmem:[#allocation2 + $0x7d0] sm:$0xf0]  ;;  %v13753_v25 = vld [vmem:[#allocation2 + $0x728] sm:$0xf0]  ;;  %v12491_v13 = vor.u32 %v13816_v9, %v12490_v41  ;;  %v12715_v24 = vor.u32 %v13872_v31, %v12714_v15  ;;  %v12408_v41 = vld [vmem:[#allocation2 + $0x87c] sm:$0xf0] }
 0x418   :  { %6806 = vmatpush.bf16.msrb.mxu3 %v11567_v56  ;;  %v13830_v56 = vld [vmem:[#allocation2 + $0x990] sm:$0xf0] }
 0x419   :  { %6820 = vmatpush.bf16.msrb.mxu0 %v11791_v17  ;;  %v12770_v17 = vld [vmem:[#allocation2 + $0xb38] sm:$0xf]  ;;  %v12547_v38 = vor.u32 %v13830_v56, %v12546_v22  ;;  %v11344_v22 = vld [vmem:[#allocation2 + $0x2c] sm:$0xf0] }
 0x41a   :  { %6834 = vmatpush.bf16.msrb.mxu1 %v12015_v48  ;;  %6793 = vmatmul.bf16.vlgmr.msrb.gmra.mxu2 %v15150_v52  ;;  %v13547_v48 = vld [vmem:[#allocation2 + $0xbc] sm:$0xf]  ;;  %v12771_v5 = vor.u32 %v13886_v32, %v12770_v17  ;;  %v11764_v56 = vld [vmem:[#allocation2 + $0x374] sm:$0xf0]  ;;  %v12239_v32 = vor.u32 %v13753_v25, %v12238_v54  ;;  %v11708_v54 = vld [vmem:[#allocation2 + $0x304] sm:$0xf0] }
 0x41b   :  { %6841 = vmatpush.bf16.msra.mxu2 %v12435_v2  ;;  %6807 = vmatmul.bf16.vlgmr.msrb.gmra.mxu3 %v15156_v30  ;;  %v11428_v2 = vld [vmem:[#allocation2 + $0xd4] sm:$0xf0]  ;;  %v13687_v17 = vld [vmem:[#allocation2 + $0x51c] sm:$0xf]  ;;  %v13673_v25 = vld [vmem:[#allocation2 + $0x4ac] sm:$0xf] }
 0x41c   :  { %6855 = vmatpush.bf16.msra.mxu3 %v12659_v42  ;;  %6821 = vmatmul.bf16.vlgmr.msrb.gmra.mxu0 %v15162_v43  ;;  %v15224_v42 = vpop.f32.mrf.mxu3  ;;  %v11431_v7 = vor.u32 %v13547_v48, %v11428_v2  ;;  %v11988_v48 = vld [vmem:[#allocation2 + $0x534] sm:$0xf0]  ;;  %v13743_v2 = vld [vmem:[#allocation2 + $0x6dc] sm:$0xf] }
 0x41d   :  { %6869 = vmatpush.bf16.msra.mxu0 %v12883_v4  ;;  %6835 = vmatmul.bf16.vlgmr.msrb.gmra.mxu1 %v15168_v19  ;;  %v12323_v4 = vor.u32 %v13774_v58, %v12322_v55  ;;  %v13865_v55 = vld [vmem:[#allocation2 + $0xaa8] sm:$0xf0]  ;;  %v13526_v58 = vld [vmem:[#allocation2 + $0x14] sm:$0xf]  ;;  %v11991_v50 = vor.u32 %v13687_v17, %v11988_v48  ;;  %v11680_v17 = vld [vmem:[#allocation2 + $0x2cc] sm:$0xf0] }
 0x41e   :  { %6883 = vmatpush.bf16.msra.mxu1 %v11543_v61  ;;  %v13767_v61 = vld [vmem:[#allocation2 + $0x798] sm:$0xf0]  ;;  %v11347_v18 = vor.u32 %v13526_v58, %v11344_v22  ;;  %v15236_v15 = vpop.f32.mrf.mxu1 }
 0x41f   :  { %6842 = vmatpush.bf16.msra.mxu2 %v12407_v46  ;;  %v13540_v46 = vld [vmem:[#allocation2 + $0x84] sm:$0xf] }
 0x420   :  { %6856 = vmatpush.bf16.msra.mxu3 %v12631_v39  ;;  %v11400_v39 = vld [vmem:[#allocation2 + $0x9c] sm:$0xf0] }
 0x421   :  { %6870 = vmatpush.bf16.msra.mxu0 %v12855_v8  ;;  %v12295_v8 = vor.u32 %v13767_v61, %v12294_v35  ;;  %v11403_v16 = vor.u32 %v13540_v46, %v11400_v39  ;;  %v13799_v35 = vld [vmem:[#allocation2 + $0x89c] sm:$0xf]  ;;  %v12436_v61 = vld [vmem:[#allocation2 + $0x8b4] sm:$0xf0]  ;;  %v11736_v46 = vld [vmem:[#allocation2 + $0x33c] sm:$0xf0] }
 0x422   :  { %6884 = vmatpush.bf16.msra.mxu1 %v11515_v3  ;;  %v13760_v3 = vld [vmem:[#allocation2 + $0x760] sm:$0xf0]  ;;  %v11739_v9 = vor.u32 %v13624_v23, %v11736_v46  ;;  %v11652_v23 = vld [vmem:[#allocation2 + $0x294] sm:$0xf0]  ;;  %v13659_v46 = vld [vmem:[#allocation2 + $0x43c] sm:$0xf] }
 0x423   :  { %6843 = vmatpush.bf16.msra.mxu2 %v12379_v45  ;;  %v13533_v45 = vld [vmem:[#allocation2 + $0x4c] sm:$0xf]  ;;  %v12267_v40 = vor.u32 %v13760_v3, %v12266_v33  ;;  %v13680_v39 = vld [vmem:[#allocation2 + $0x4e4] sm:$0xf]  ;;  %v12184_v33 = vld [vmem:[#allocation2 + $0x6bc] sm:$0xf0] }
 0x424   :  { %6857 = vmatpush.bf16.msra.mxu3 %v12603_v1  ;;  %v11372_v1 = vld [vmem:[#allocation2 + $0x64] sm:$0xf0]  ;;  %v13792_v3 = vld [vmem:[#allocation2 + $0x864] sm:$0xf] }
 0x425   :  { %6871 = vmatpush.bf16.msra.mxu0 %v12827_v49  ;;  %v15226_v49 = vpop.f32.mrf.mxu2 }
 0x426   :  { %6885 = vmatpush.bf16.msra.mxu1 %v11487_v28  ;;  %v15228_v28 = vpop.f32.mrf.mxu0 }
 0x427   :  { %6844 = vmatpush.bf16.msra.mxu2 %v12351_v6  ;;  %v12686_v6 = vld [vmem:[#allocation2 + $0xa90] sm:$0xf] }
 0x428   :  { %6858 = vmatpush.bf16.msra.mxu3 %v12575_v11  ;;  %v15232_v11 = vpop.f32.mrf.mxu3 }
 0x429   :  { %6872 = vmatpush.bf16.msra.mxu0 %v12799_v63  ;;  %v11375_v63 = vor.u32 %v13533_v45, %v11372_v1 }
 0x42a   :  { %6886 = vmatpush.bf16.msra.mxu1 %v11459_v57  ;;  %v13631_v57 = vld [vmem:[#allocation2 + $0x35c] sm:$0xf] }
 0x42b   :  { %6845 = vmatpush.bf16.msra.mxu2 %v12323_v4  ;;  %v12212_v4 = vld [vmem:[#allocation2 + $0x6f4] sm:$0xf0] }
 0x42c   :  { %6859 = vmatpush.bf16.msra.mxu3 %v12547_v38  ;;  %v12463_v38 = vor.u32 %v13809_v60, %v12462_v51  ;;  %v12215_v36 = vor.u32 %v13743_v2, %v12212_v4  ;;  %v11932_v51 = vld [vmem:[#allocation2 + $0x4c4] sm:$0xf0]  ;;  %v13729_v60 = vld [vmem:[#allocation2 + $0x66c] sm:$0xf]  ;;  %v11904_v2 = vld [vmem:[#allocation2 + $0x48c] sm:$0xf0] }
 0x42d   :  { %6873 = vmatpush.bf16.msra.mxu0 %v12771_v5  ;;  %v12687_v5 = vor.u32 %v13865_v55, %v12686_v6  ;;  %v12156_v6 = vld [vmem:[#allocation2 + $0x684] sm:$0xf0]  ;;  %v11935_v22 = vor.u32 %v13673_v25, %v11932_v51  ;;  %v13722_v4 = vld [vmem:[#allocation2 + $0x634] sm:$0xf]  ;;  %v13596_v25 = vld [vmem:[#allocation2 + $0x244] sm:$0xf] }
 0x42e   :  { %6887 = vmatpush.bf16.msra.mxu1 %v11431_v7  ;;  %v11767_v7 = vor.u32 %v13631_v57, %v11764_v56  ;;  %v15238_v31 = vpop.f32.mrf.mxu0  ;;  %v12380_v55 = vld [vmem:[#allocation2 + $0x844] sm:$0xf0]  ;;  %v12159_v57 = vor.u32 %v13729_v60, %v12156_v6  ;;  %v13610_v56 = vld [vmem:[#allocation2 + $0x2b4] sm:$0xf]  ;;  %v13652_v51 = vld [vmem:[#allocation2 + $0x404] sm:$0xf] }
 0x42f   :  { %6846 = vmatpush.bf16.msra.mxu2 %v12295_v8  ;;  %v12439_v8 = vor.u32 %v13799_v35, %v12436_v61  ;;  %v12352_v35 = vld [vmem:[#allocation2 + $0x80c] sm:$0xf0]  ;;  %v11683_v61 = vor.u32 %v13610_v56, %v11680_v17  ;;  %v11848_v6 = vld [vmem:[#allocation2 + $0x41c] sm:$0xf0] }
 0x430   :  { %6860 = vmatpush.bf16.msra.mxu3 %v12519_v14  ;;  %v11960_v14 = vld [vmem:[#allocation2 + $0x4fc] sm:$0xf0]  ;;  %v11851_v56 = vor.u32 %v13652_v51, %v11848_v6  ;;  %v12240_v51 = vld [vmem:[#allocation2 + $0x72c] sm:$0xf0]  ;;  %v12660_v6 = vld [vmem:[#allocation2 + $0xa74] sm:$0xf0] }
 0x431   :  { %6874 = vmatpush.bf16.msra.mxu0 %v12743_v20  ;;  %v13736_v20 = vld [vmem:[#allocation2 + $0x6a4] sm:$0xf]  ;;  %v11963_v45 = vor.u32 %v13680_v39, %v11960_v14  ;;  %v11876_v14 = vld [vmem:[#allocation2 + $0x454] sm:$0xf0] }
 0x432   :  { %6888 = vmatpush.bf16.msra.mxu1 %v11403_v16  ;;  %v15234_v16 = vpop.f32.mrf.mxu2  ;;  %v12187_v1 = vor.u32 %v13736_v20, %v12184_v33  ;;  %v13715_v20 = vld [vmem:[#allocation2 + $0x5fc] sm:$0xf]  ;;  %v12100_v33 = vld [vmem:[#allocation2 + $0x614] sm:$0xf0] }
 0x433   :  { %6847 = vmatpush.bf16.msra.mxu2 %v12267_v40  ;;  %v13617_v40 = vld [vmem:[#allocation2 + $0x2ec] sm:$0xf] }
 0x434   :  { %6861 = vmatpush.bf16.msra.mxu3 %v12491_v13  ;;  %v15240_v13 = vpop.f32.mrf.mxu3  ;;  %v11711_v58 = vor.u32 %v13617_v40, %v11708_v54  ;;  %v11879_v40 = vor.u32 %v13659_v46, %v11876_v14  ;;  %v12103_v54 = vor.u32 %v13715_v20, %v12100_v33  ;;  %v13582_v14 = vld [vmem:[#allocation2 + $0x1d4] sm:$0xf]  ;;  %v11568_v20 = vld [vmem:[#allocation2 + $0x1ec] sm:$0xf0] }
 0x435   :  { %6875 = vmatpush.bf16.msra.mxu0 %v12715_v24  ;;  %v12411_v24 = vor.u32 %v13792_v3, %v12408_v41  ;;  %v13771_v41 = vld [vmem:[#allocation2 + $0x7bc] sm:$0xf] }
 0x436   :  { %6889 = vmatpush.bf16.msra.mxu1 %v11375_v63  ;;  %v13785_v63 = vld [vmem:[#allocation2 + $0x82c] sm:$0xf]  ;;  %v15250_v3 = vpop.f32.mrf.mxu0 }
 0x437   :  { %6848 = vmatpush.bf16.msra.mxu2 %v12239_v32  ;;  %v13666_v32 = vld [vmem:[#allocation2 + $0x474] sm:$0xf]  ;;  %v12383_v48 = vor.u32 %v13785_v63, %v12380_v55  ;;  %v13708_v63 = vld [vmem:[#allocation2 + $0x5c4] sm:$0xf]  ;;  %v12072_v55 = vld [vmem:[#allocation2 + $0x5dc] sm:$0xf0] }
 0x438   :  { %6862 = vmatpush.bf16.msra.mxu3 %v12463_v38  ;;  %v12128_v38 = vld [vmem:[#allocation2 + $0x64c] sm:$0xf0]  ;;  %v12075_v17 = vor.u32 %v13708_v63, %v12072_v55  ;;  %v13911_v63 = vld [vmem:[#allocation2 + $0xc1c] sm:$0xf]  ;;  %v11571_v55 = vor.u32 %v13582_v14, %v11568_v20  ;;  %v12856_v14 = vld [vmem:[#allocation2 + $0xbfc] sm:$0xf0] }
 0x439   :  { %6876 = vmatpush.bf16.msra.mxu0 %v12687_v5  ;;  %v13778_v5 = vld [vmem:[#allocation2 + $0x7f4] sm:$0xf]  ;;  %v11518_v20 = vld [vmem:[#allocation2 + $0x168] sm:$0xf] }
 0x43a   :  { %6890 = vmatpush.bf16.msra.mxu1 %v11347_v18  ;;  %6849 = vmatmul.bf16.vlgmr.msra.gmra.mxu2 %v15178_v10  ;;  %v15246_v18 = vpop.f32.mrf.mxu1  ;;  %v15248_v39 = vpop.f32.mrf.mxu2 }
 0x43b   :  { %6897 = vmatpush.bf16.msrb.mxu2 %v11767_v7  ;;  %6863 = vmatmul.bf16.vlgmr.msra.gmra.mxu3 %v15184_v29  ;;  %v11907_v7 = vor.u32 %v13666_v32, %v11904_v2  ;;  %v13589_v32 = vld [vmem:[#allocation2 + $0x20c] sm:$0xf] }
 0x43c   :  { %6911 = vmatpush.bf16.msrb.mxu3 %v11991_v50  ;;  %6877 = vmatmul.bf16.vlgmr.msra.gmra.mxu0 %v15190_v59  ;;  %v12131_v50 = vor.u32 %v13722_v4, %v12128_v38  ;;  %v13645_v2 = vld [vmem:[#allocation2 + $0x3cc] sm:$0xf] }
 0x43d   :  { %6925 = vmatpush.bf16.msrb.mxu0 %v12215_v36  ;;  %6891 = vmatmul.bf16.vlgmr.msra.gmra.mxu1 %v15150_v52  ;;  %v13603_v36 = vld [vmem:[#allocation2 + $0x27c] sm:$0xf] }
 0x43e   :  { %6939 = vmatpush.bf16.msrb.mxu1 %v12439_v8  ;;  %v12355_v8 = vor.u32 %v13778_v5, %v12352_v35  ;;  %v11820_v5 = vld [vmem:[#allocation2 + $0x3e4] sm:$0xf0]  ;;  %v13701_v35 = vld [vmem:[#allocation2 + $0x58c] sm:$0xf] }
 0x43f   :  { %6898 = vmatpush.bf16.msrb.mxu2 %v11739_v9  ;;  %v12324_v9 = vld [vmem:[#allocation2 + $0x7d4] sm:$0xf0]  ;;  %v11823_v33 = vor.u32 %v13645_v2, %v11820_v5 }
 0x440   :  { %6912 = vmatpush.bf16.msrb.mxu3 %v11963_v45  ;;  %v15252_v45 = vpop.f32.mrf.mxu3  ;;  %v12327_v60 = vor.u32 %v13771_v41, %v12324_v9  ;;  %v13638_v9 = vld [vmem:[#allocation2 + $0x394] sm:$0xf] }
 0x441   :  { %6926 = vmatpush.bf16.msrb.mxu0 %v12187_v1  ;;  %v11655_v1 = vor.u32 %v13603_v36, %v11652_v23  ;;  %v13757_v36 = vld [vmem:[#allocation2 + $0x74c] sm:$0xf]  ;;  %v12268_v23 = vld [vmem:[#allocation2 + $0x764] sm:$0xf0] }
 0x442   :  { %6940 = vmatpush.bf16.msrb.mxu1 %v12411_v24  ;;  %v11624_v24 = vld [vmem:[#allocation2 + $0x25c] sm:$0xf0]  ;;  %v15254_v4 = vpop.f32.mrf.mxu2 }
 0x443   :  { %6899 = vmatpush.bf16.msrb.mxu2 %v11711_v58  ;;  %v13764_v58 = vld [vmem:[#allocation2 + $0x784] sm:$0xf] }
 0x444   :  { %6913 = vmatpush.bf16.msrb.mxu3 %v11935_v22  ;;  %v12296_v22 = vld [vmem:[#allocation2 + $0x79c] sm:$0xf0] }
 0x445   :  { %6927 = vmatpush.bf16.msrb.mxu0 %v12159_v57  ;;  %v11627_v57 = vor.u32 %v13596_v25, %v11624_v24  ;;  %v12299_v38 = vor.u32 %v13764_v58, %v12296_v22  ;;  %v12016_v25 = vld [vmem:[#allocation2 + $0x56c] sm:$0xf0]  ;;  %v13750_v24 = vld [vmem:[#allocation2 + $0x714] sm:$0xf]  ;;  %v12884_v58 = vld [vmem:[#allocation2 + $0xc34] sm:$0xf0] }
 0x446   :  { %6941 = vmatpush.bf16.msrb.mxu1 %v12383_v48  ;;  %v11596_v48 = vld [vmem:[#allocation2 + $0x224] sm:$0xf0]  ;;  %v11546_v22 = vld [vmem:[#allocation2 + $0x1a0] sm:$0xf]  ;;  %v12243_v2 = vor.u32 %v13750_v24, %v12240_v51  ;;  %v12887_v5 = vor.u32 %v13911_v63, %v12884_v58  ;;  %v13897_v63 = vld [vmem:[#allocation2 + $0xbac] sm:$0xf] }
 0x447   :  { %6900 = vmatpush.bf16.msrb.mxu2 %v11683_v61  ;;  %v12044_v61 = vld [vmem:[#allocation2 + $0x5a4] sm:$0xf0] }
 0x448   :  { %6914 = vmatpush.bf16.msrb.mxu3 %v11907_v7  ;;  %v15256_v7 = vpop.f32.mrf.mxu1  ;;  %v15260_v46 = vpop.f32.mrf.mxu3  ;;  %v12047_v41 = vor.u32 %v13701_v35, %v12044_v61  ;;  %v13848_v61 = vld [vmem:[#allocation2 + $0xa24] sm:$0xf]  ;;  %v12828_v58 = vld [vmem:[#allocation2 + $0xbc4] sm:$0xf0] }
 0x449   :  { %6928 = vmatpush.bf16.msrb.mxu0 %v12131_v50  ;;  %v15258_v50 = vpop.f32.mrf.mxu0 }
 0x44a   :  { %6942 = vmatpush.bf16.msrb.mxu1 %v12355_v8  ;;  %v11599_v8 = vor.u32 %v13589_v32, %v11596_v48  ;;  %v11770_v32 = vld [vmem:[#allocation2 + $0x360] sm:$0xf]  ;;  %v13635_v48 = vld [vmem:[#allocation2 + $0x378] sm:$0xf0]  ;;  %v15262_v34 = vpop.f32.mrf.mxu2 }
 0x44b   :  { %6901 = vmatpush.bf16.msrb.mxu2 %v11655_v1  ;;  %v11792_v1 = vld [vmem:[#allocation2 + $0x3ac] sm:$0xf0] }
 0x44c   :  { %6915 = vmatpush.bf16.msrb.mxu3 %v11879_v40  ;;  %v13694_v40 = vld [vmem:[#allocation2 + $0x554] sm:$0xf] }
 0x44d   :  { %6929 = vmatpush.bf16.msrb.mxu0 %v12103_v54  ;;  %v12271_v54 = vor.u32 %v13757_v36, %v12268_v23  ;;  %v12632_v36 = vld [vmem:[#allocation2 + $0xa3c] sm:$0xf0]  ;;  %v13904_v23 = vld [vmem:[#allocation2 + $0xbe4] sm:$0xf] }
 0x44e   :  { %6943 = vmatpush.bf16.msrb.mxu1 %v12327_v60  ;;  %v13855_v60 = vld [vmem:[#allocation2 + $0xa5c] sm:$0xf]  ;;  %v12859_v24 = vor.u32 %v13904_v23, %v12856_v14  ;;  %v11462_v23 = vld [vmem:[#allocation2 + $0xf8] sm:$0xf] }
 0x44f   :  { %6902 = vmatpush.bf16.msrb.mxu2 %v11627_v57  ;;  %v13579_v57 = vld [vmem:[#allocation2 + $0x1b8] sm:$0xf0] }
 0x450   :  { %6916 = vmatpush.bf16.msrb.mxu3 %v11851_v56  ;;  %v11795_v56 = vor.u32 %v13638_v9, %v11792_v1  ;;  %v11547_v35 = vor.u32 %v13579_v57, %v11546_v22  ;;  %v11742_v1 = vld [vmem:[#allocation2 + $0x328] sm:$0xf]  ;;  %v11490_v22 = vld [vmem:[#allocation2 + $0x130] sm:$0xf]  ;;  %v13565_v57 = vld [vmem:[#allocation2 + $0x148] sm:$0xf0] }
 0x451   :  { %6930 = vmatpush.bf16.msrb.mxu0 %v12075_v17  ;;  %v12019_v17 = vor.u32 %v13694_v40, %v12016_v25  ;;  %v15266_v9 = vpop.f32.mrf.mxu0  ;;  %v13628_v40 = vld [vmem:[#allocation2 + $0x340] sm:$0xf0]  ;;  %v12635_v25 = vor.u32 %v13848_v61, %v12632_v36  ;;  %v12800_v36 = vld [vmem:[#allocation2 + $0xb8c] sm:$0xf0] }
 0x452   :  { %6944 = vmatpush.bf16.msrb.mxu1 %v12299_v38  ;;  %v12663_v38 = vor.u32 %v13855_v60, %v12660_v6  ;;  %v13841_v60 = vld [vmem:[#allocation2 + $0x9ec] sm:$0xf]  ;;  %v12604_v6 = vld [vmem:[#allocation2 + $0xa04] sm:$0xf0] }
 0x453   :  { %6903 = vmatpush.bf16.msrb.mxu2 %v11599_v8  ;;  %v11771_v8 = vor.u32 %v13635_v48, %v11770_v32  ;;  %v12607_v32 = vor.u32 %v13841_v60, %v12604_v6  ;;  %v12831_v48 = vor.u32 %v13897_v63, %v12828_v58  ;;  %v13827_v60 = vld [vmem:[#allocation2 + $0x97c] sm:$0xf]  ;;  %v12548_v6 = vld [vmem:[#allocation2 + $0x994] sm:$0xf0] }
 0x454   :  { %6917 = vmatpush.bf16.msrb.mxu3 %v11823_v33  ;;  %v13572_v33 = vld [vmem:[#allocation2 + $0x180] sm:$0xf0]  ;;  %v13883_v63 = vld [vmem:[#allocation2 + $0xb3c] sm:$0xf] }
 0x455   :  { %6931 = vmatpush.bf16.msrb.mxu0 %v12047_v41  ;;  %v15264_v41 = vpop.f32.mrf.mxu1  ;;  %v11519_v51 = vor.u32 %v13572_v33, %v11518_v20  ;;  %v11686_v20 = vld [vmem:[#allocation2 + $0x2b8] sm:$0xf]  ;;  %v13614_v33 = vld [vmem:[#allocation2 + $0x2d0] sm:$0xf0] }
 0x456   :  { %6945 = vmatpush.bf16.msrb.mxu1 %v12271_v54  ;;  %v15268_v54 = vpop.f32.mrf.mxu3  ;;  %v11687_v58 = vor.u32 %v13614_v33, %v11686_v20  ;;  %v11630_v20 = vld [vmem:[#allocation2 + $0x248] sm:$0xf]  ;;  %v13600_v33 = vld [vmem:[#allocation2 + $0x260] sm:$0xf0] }
 0x457   :  { %6904 = vmatpush.bf16.msrb.mxu2 %v11571_v55  ;;  %v11743_v55 = vor.u32 %v13628_v40, %v11742_v1  ;;  %v15276_v1 = vpop.f32.mrf.mxu2 }
 0x458   :  { %6918 = vmatpush.bf16.msrb.mxu3 %v11795_v56  ;;  %v11714_v56 = vld [vmem:[#allocation2 + $0x2f0] sm:$0xf] }
 0x459   :  { %6932 = vmatpush.bf16.msrb.mxu0 %v12019_v17  ;;  %v13621_v17 = vld [vmem:[#allocation2 + $0x308] sm:$0xf0]  ;;  %v15274_v14 = vpop.f32.mrf.mxu0 }
 0x45a   :  { %6946 = vmatpush.bf16.msrb.mxu1 %v12243_v2  ;;  %6905 = vmatmul.bf16.vlgmr.msrb.gmra.mxu2 %v15156_v30  ;;  %v11491_v2 = vor.u32 %v13565_v57, %v11490_v22  ;;  %v11715_v61 = vor.u32 %v13621_v17, %v11714_v56  ;;  %v12772_v22 = vld [vmem:[#allocation2 + $0xb54] sm:$0xf0]  ;;  %v11434_v57 = vld [vmem:[#allocation2 + $0xc0] sm:$0xf]  ;;  %v13551_v56 = vld [vmem:[#allocation2 + $0xd8] sm:$0xf0] }
 0x45b   :  { %6953 = vmatpush.bf16.msra.mxu2 %v12663_v38  ;;  %6919 = vmatmul.bf16.vlgmr.msrb.gmra.mxu3 %v15162_v43  ;;  %v13834_v38 = vld [vmem:[#allocation2 + $0x9b4] sm:$0xf]  ;;  %v11658_v17 = vld [vmem:[#allocation2 + $0x280] sm:$0xf] }
 0x45c   :  { %6967 = vmatpush.bf16.msra.mxu3 %v12887_v5  ;;  %6933 = vmatmul.bf16.vlgmr.msrb.gmra.mxu0 %v15168_v19  ;;  %v12576_v5 = vld [vmem:[#allocation2 + $0x9cc] sm:$0xf0]  ;;  %v13586_v19 = vld [vmem:[#allocation2 + $0x1f0] sm:$0xf0] }
 0x45d   :  { %6981 = vmatpush.bf16.msra.mxu0 %v11547_v35  ;;  %6947 = vmatmul.bf16.vlgmr.msrb.gmra.mxu1 %v15178_v10  ;;  %v13890_v35 = vld [vmem:[#allocation2 + $0xb74] sm:$0xf]  ;;  %v12579_v40 = vor.u32 %v13834_v38, %v12576_v5  ;;  %v13820_v38 = vld [vmem:[#allocation2 + $0x944] sm:$0xf]  ;;  %v12520_v5 = vld [vmem:[#allocation2 + $0x95c] sm:$0xf0] }
 0x45e   :  { %6995 = vmatpush.bf16.msra.mxu1 %v11771_v8  ;;  %v13558_v8 = vld [vmem:[#allocation2 + $0x110] sm:$0xf0]  ;;  %v12523_v27 = vor.u32 %v13820_v38, %v12520_v5  ;;  %v11602_v38 = vld [vmem:[#allocation2 + $0x210] sm:$0xf]  ;;  %v13593_v5 = vld [vmem:[#allocation2 + $0x228] sm:$0xf0] }
 0x45f   :  { %6954 = vmatpush.bf16.msra.mxu2 %v12635_v25  ;;  %v15278_v25 = vpop.f32.mrf.mxu1  ;;  %v11603_v43 = vor.u32 %v13593_v5, %v11602_v38  ;;  %v11574_v10 = vld [vmem:[#allocation2 + $0x1d8] sm:$0xf] }
 0x460   :  { %6968 = vmatpush.bf16.msra.mxu3 %v12859_v24  ;;  %v12803_v24 = vor.u32 %v13890_v35, %v12800_v36  ;;  %v13876_v35 = vld [vmem:[#allocation2 + $0xb04] sm:$0xf]  ;;  %v11659_v36 = vor.u32 %v13607_v62, %v11658_v17  ;;  %v13869_v62 = vld [vmem:[#allocation2 + $0xacc] sm:$0xf] }
 0x461   :  { %6982 = vmatpush.bf16.msra.mxu0 %v11519_v51  ;;  %v11463_v51 = vor.u32 %v13558_v8, %v11462_v23  ;;  %v12744_v23 = vld [vmem:[#allocation2 + $0xb1c] sm:$0xf0]  ;;  %v11406_v8 = vld [vmem:[#allocation2 + $0x88] sm:$0xf]  ;;  %v13537_v17 = vld [vmem:[#allocation2 + $0x68] sm:$0xf0] }
 0x462   :  { %6996 = vmatpush.bf16.msra.mxu1 %v11743_v55  ;;  %v15280_v55 = vpop.f32.mrf.mxu3 }
 0x463   :  { %6955 = vmatpush.bf16.msra.mxu2 %v12607_v32  ;;  %16161 = vst [vmem:[#allocation46_spill] sm:$0xff] %v15280_v55  ;;  %v12551_v32 = vor.u32 %v13827_v60, %v12548_v6  ;;  %v13813_v6 = vld [vmem:[#allocation2 + $0x90c] sm:$0xf] }
 0x464   :  { %6969 = vmatpush.bf16.msra.mxu3 %v12831_v48  ;;  %v12775_v48 = vor.u32 %v13883_v63, %v12772_v22  ;;  %v12492_v63 = vld [vmem:[#allocation2 + $0x924] sm:$0xf0]  ;;  %v11631_v22 = vor.u32 %v13600_v33, %v11630_v20  ;;  %v12688_v20 = vld [vmem:[#allocation2 + $0xaac] sm:$0xf0]  ;;  %v11350_v33 = vld [vmem:[#allocation2 + $0x18] sm:$0xf] }
 0x465   :  { %6983 = vmatpush.bf16.msra.mxu0 %v11491_v2  ;;  %v11435_v2 = vor.u32 %v13551_v56, %v11434_v57  ;;  %v12716_v57 = vld [vmem:[#allocation2 + $0xae4] sm:$0xf0]  ;;  %v11378_v56 = vld [vmem:[#allocation2 + $0x50] sm:$0xf] }
 0x466   :  { %6997 = vmatpush.bf16.msra.mxu1 %v11715_v61  ;;  %v13544_v61 = vld [vmem:[#allocation2 + $0xa0] sm:$0xf0] }
 0x467   :  { %6956 = vmatpush.bf16.msra.mxu2 %v12579_v40  ;;  %v15283_v40 = vpop.f32.mrf.mxu1  ;;  %v11407_v60 = vor.u32 %v13544_v61, %v11406_v8  ;;  %v12719_v8 = vor.u32 %v13869_v62, %v12716_v57  ;;  %v13862_v61 = vld [vmem:[#allocation2 + $0xa94] sm:$0xf]  ;;  %v12666_v57 = vld [vmem:[#allocation2 + $0xa60] sm:$0xf] }
 0x468   :  { %6970 = vmatpush.bf16.msra.mxu3 %v12803_v24  ;;  %v15285_v24 = vpop.f32.mrf.mxu0  ;;  %v12691_v62 = vor.u32 %v13862_v61, %v12688_v20  ;;  %v13740_v20 = vld [vmem:[#allocation2 + $0x6c0] sm:$0xf0] }
 0x469   :  { %6984 = vmatpush.bf16.msra.mxu0 %v11463_v51  ;;  %v12747_v51 = vor.u32 %v13876_v35, %v12744_v23  ;;  %v12464_v35 = vld [vmem:[#allocation2 + $0x8ec] sm:$0xf0]  ;;  %v6403_v23 = vadd.f32 %v15220_v37, %v4370_v53  ;;  %v12442_v37 = vld [vmem:[#allocation2 + $0x8a0] sm:$0xf] }
 0x46a   :  { %6998 = vmatpush.bf16.msra.mxu1 %v11687_v58  ;;  %v15287_v58 = vpop.f32.mrf.mxu2  ;;  %v15290_v44 = vpop.f32.mrf.mxu3 }
 0x46b   :  { %6957 = vmatpush.bf16.msra.mxu2 %v12551_v32  ;;  %v6405_v32 = vadd.f32 %v15226_v49, %v4370_v53  ;;  %v13530_v49 = vld [vmem:[#allocation2 + $0x30] sm:$0xf0]  ;;  %v13747_v53 = vld [vmem:[#allocation2 + $0x6f8] sm:$0xf0] }
 0x46c   :  { %6971 = vmatpush.bf16.msra.mxu3 %v12775_v48  ;;  %v12495_v48 = vor.u32 %v13813_v6, %v12492_v63  ;;  %v13691_v6 = vld [vmem:[#allocation2 + $0x538] sm:$0xf0]  ;;  %v12218_v63 = vld [vmem:[#allocation2 + $0x6e0] sm:$0xf] }
 0x46d   :  { %6985 = vmatpush.bf16.msra.mxu0 %v11435_v2  ;;  %v13806_v2 = vld [vmem:[#allocation2 + $0x8d4] sm:$0xf]  ;;  %v6419_v55 = vadd.f32 %v15232_v11, %v6405_v32  ;;  %v11575_v11 = vor.u32 %v13586_v19, %v11574_v10  ;;  %v12638_v10 = vld [vmem:[#allocation2 + $0xa28] sm:$0xf] }
 0x46e   :  { %6999 = vmatpush.bf16.msra.mxu1 %v11659_v36  ;;  %v11379_v36 = vor.u32 %v13537_v17, %v11378_v56  ;;  %v12467_v21 = vor.u32 %v13806_v2, %v12464_v35  ;;  %v13859_v56 = vld [vmem:[#allocation2 + $0xa78] sm:$0xf0]  ;;  %v12219_v2 = vor.u32 %v13747_v53, %v12218_v63  ;;  %v13677_v63 = vld [vmem:[#allocation2 + $0x4c8] sm:$0xf0]  ;;  %v12162_v53 = vld [vmem:[#allocation2 + $0x670] sm:$0xf] }
 0x46f   :  { %6958 = vmatpush.bf16.msra.mxu2 %v12523_v27  ;;  %v11994_v27 = vld [vmem:[#allocation2 + $0x520] sm:$0xf]  ;;  %v6433_v38 = vadd.f32 %v15228_v28, %v6419_v55  ;;  %v15298_v5 = vpop.f32.mrf.mxu1  ;;  %v12667_v61 = vor.u32 %v13859_v56, %v12666_v57  ;;  %v13852_v28 = vld [vmem:[#allocation2 + $0xa40] sm:$0xf0]  ;;  %v13845_v57 = vld [vmem:[#allocation2 + $0xa08] sm:$0xf0] }
 0x470   :  { %6972 = vmatpush.bf16.msra.mxu3 %v12747_v51  ;;  %v13803_v51 = vld [vmem:[#allocation2 + $0x8b8] sm:$0xf0]  ;;  %v11995_v32 = vor.u32 %v13691_v6, %v11994_v27  ;;  %v4371_v56 = vperm.slane %v14467_v47, 4 }
 0x471   :  { %6986 = vmatpush.bf16.msra.mxu0 %v11407_v60  ;;  %v6417_v60 = vadd.f32 %v15224_v42, %v6403_v23  ;;  %v12443_v35 = vor.u32 %v13803_v51, %v12442_v37  ;;  %v11966_v42 = vld [vmem:[#allocation2 + $0x4e8] sm:$0xf]  ;;  %v13684_v23 = vld [vmem:[#allocation2 + $0x500] sm:$0xf0]  ;;  %v13733_v37 = vld [vmem:[#allocation2 + $0x688] sm:$0xf0] }
 0x472   :  { %7000 = vmatpush.bf16.msra.mxu1 %v11631_v22  ;;  %v11351_v22 = vor.u32 %v13530_v49, %v11350_v33  ;;  %v15295_v17 = vpop.f32.mrf.mxu2  ;;  %v12414_v33 = vld [vmem:[#allocation2 + $0x868] sm:$0xf]  ;;  %v11967_v55 = vor.u32 %v13684_v23, %v11966_v42  ;;  %v6447_v49 = vadd.f32 %v15236_v15, %v6433_v38  ;;  %v12386_v51 = vld [vmem:[#allocation2 + $0x830] sm:$0xf]  ;;  %v13726_v23 = vld [vmem:[#allocation2 + $0x650] sm:$0xf0] }
 0x473   :  { %6959 = vmatpush.bf16.msra.mxu2 %v12495_v48  ;;  %v15300_v48 = vpop.f32.mrf.mxu0  ;;  %v6431_v19 = vadd.f32 %v15222_v26, %v6417_v60  ;;  %v12639_v26 = vor.u32 %v13852_v28, %v12638_v10  ;;  %v13789_v60 = vld [vmem:[#allocation2 + $0x848] sm:$0xf0]  ;;  %v12610_v15 = vld [vmem:[#allocation2 + $0x9f0] sm:$0xf]  ;;  %v6501_v10 = vadd.f32 %v15246_v18, %v4371_v56  ;;  %v6503_v28 = vadd.f32 %v15256_v7, %v4371_v56 }
 0x474   :  { %6973 = vmatpush.bf16.msra.mxu3 %v12719_v8  ;;  %v12190_v8 = vld [vmem:[#allocation2 + $0x6a8] sm:$0xf]  ;;  %v12387_v38 = vor.u32 %v13789_v60, %v12386_v51  ;;  %v12611_v42 = vor.u32 %v13845_v57, %v12610_v15  ;;  %v12554_v51 = vld [vmem:[#allocation2 + $0x980] sm:$0xf]  ;;  %v13831_v60 = vld [vmem:[#allocation2 + $0x998] sm:$0xf0] }
 0x475   :  { %6987 = vmatpush.bf16.msra.mxu0 %v11379_v36  ;;  %v15302_v36 = vpop.f32.mrf.mxu3  ;;  %v12191_v27 = vor.u32 %v13740_v20, %v12190_v8  ;;  %v12358_v8 = vld [vmem:[#allocation2 + $0x7f8] sm:$0xf]  ;;  %v4372_v15 = vperm.slane %v14479_v0, 4 }
 0x476   :  { %7001 = vmatpush.bf16.msra.mxu1 %v11603_v43  ;;  %v13796_v43 = vld [vmem:[#allocation2 + $0x880] sm:$0xf0] }
 0x477   :  { %6960 = vmatpush.bf16.msra.mxu2 %v12467_v21  ;;  %v12415_v6 = vor.u32 %v13796_v43, %v12414_v33  ;;  %v11938_v21 = vld [vmem:[#allocation2 + $0x4b0] sm:$0xf]  ;;  %v15317_v33 = vpop.f32.mrf.mxu1  ;;  %v12582_v43 = vld [vmem:[#allocation2 + $0x9b8] sm:$0xf] }
 0x478   :  { %6974 = vmatpush.bf16.msra.mxu3 %v12691_v62  ;;  %v6445_v62 = vadd.f32 %v15230_v12, %v6431_v19  ;;  %v13670_v12 = vld [vmem:[#allocation2 + $0x490] sm:$0xf0] }
 0x479   :  { %6988 = vmatpush.bf16.msra.mxu0 %v11351_v22  ;;  %v6461_v22 = vadd.f32 %v15248_v39, %v6447_v49  ;;  %v13838_v19 = vld [vmem:[#allocation2 + $0x9d0] sm:$0xf0] }
 0x47a   :  { %7002 = vmatpush.bf16.msra.mxu1 %v11575_v11  ;;  %6961 = vmatmul.bf16.vlgmr.msra.gmra.mxu2 %v15184_v29  ;;  %v11939_v11 = vor.u32 %v13677_v63, %v11938_v21  ;;  %v15313_v39 = vpop.f32.mrf.mxu2  ;;  %v12106_v21 = vld [vmem:[#allocation2 + $0x600] sm:$0xf]  ;;  %v12583_v63 = vor.u32 %v13838_v19, %v12582_v43  ;;  %v6599_v43 = vadd.f32 %v15274_v14, %v4372_v15  ;;  %v13761_v14 = vld [vmem:[#allocation2 + $0x768] sm:$0xf0] }
 0x47b   :  { %7009 = vmatpush.bf16.msrb.mxu2 %v11995_v32  ;;  %6975 = vmatmul.bf16.vlgmr.msra.gmra.mxu3 %v15190_v59  ;;  %v12163_v32 = vor.u32 %v13733_v37, %v12162_v53  ;;  %v6475_v20 = vadd.f32 %v15252_v45, %v6461_v22  ;;  %v13663_v45 = vld [vmem:[#allocation2 + $0x458] sm:$0xf0]  ;;  %v6517_v22 = vadd.f32 %v15262_v34, %v6503_v28 }
 0x47c   :  { %7023 = vmatpush.bf16.msrb.mxu3 %v12219_v2  ;;  %6989 = vmatmul.bf16.vlgmr.msra.gmra.mxu0 %v15150_v52  ;;  %v11910_v2 = vld [vmem:[#allocation2 + $0x478] sm:$0xf]  ;;  %v13782_v52 = vld [vmem:[#allocation2 + $0x810] sm:$0xf0]  ;;  %v13719_v53 = vld [vmem:[#allocation2 + $0x618] sm:$0xf0]  ;;  %v6601_v34 = vadd.f32 %v15285_v24, %v4372_v15 }
 0x47d   :  { %7037 = vmatpush.bf16.msrb.mxu0 %v12443_v35  ;;  %7003 = vmatmul.bf16.vlgmr.msra.gmra.mxu1 %v15156_v30  ;;  %v12134_v35 = vld [vmem:[#allocation2 + $0x638] sm:$0xf]  ;;  %v15319_v30 = vpop.f32.mrf.mxu0  ;;  %v11911_v49 = vor.u32 %v13670_v12, %v11910_v2  ;;  %v13775_v37 = vld [vmem:[#allocation2 + $0x7d8] sm:$0xf0]  ;;  %v15327_v7 = vadd.f32 %v15250_v3, %v6475_v20  ;;  %v12107_v56 = vor.u32 %v13719_v53, %v12106_v21  ;;  %v13712_v2 = vld [vmem:[#allocation2 + $0x5e0] sm:$0xf0] }
 0x47e   :  { %7051 = vmatpush.bf16.msrb.mxu1 %v12667_v61  ;;  %v6459_v61 = vadd.f32 %v15234_v16, %v6445_v62  ;;  %v12359_v16 = vor.u32 %v13782_v52, %v12358_v8  ;;  %v6515_v62 = vadd.f32 %v15254_v4, %v6501_v10  ;;  %v12555_v3 = vor.u32 %v13831_v60, %v12554_v51  ;;  %v12302_v12 = vld [vmem:[#allocation2 + $0x788] sm:$0xf]  ;;  %v13824_v8 = vld [vmem:[#allocation2 + $0x960] sm:$0xf0]  ;;  %v13817_v53 = vld [vmem:[#allocation2 + $0x928] sm:$0xf0] }
 0x47f   :  { %7010 = vmatpush.bf16.msrb.mxu2 %v11967_v55  ;;  %v15323_v55 = vpop.f32.mrf.mxu3  ;;  %v15339_v52 = vand.u32 4294901760, %v15327_v7  ;;  %v6531_v20 = vadd.f32 %v15268_v54, %v6517_v22  ;;  %v15348_v24 = vpop.f32.mrf.mxu1  ;;  %v13705_v54 = vld [vmem:[#allocation2 + $0x5a8] sm:$0xf0]  ;;  %v6615_v21 = vadd.f32 %v15298_v5, %v6601_v34  ;;  %v6613_v51 = vadd.f32 %v15283_v40, %v6599_v43  ;;  %v12022_v5 = vld [vmem:[#allocation2 + $0x558] sm:$0xf] }
 0x480   :  { %7024 = vmatpush.bf16.msrb.mxu3 %v12191_v27  ;;  %v12135_v27 = vor.u32 %v13726_v23, %v12134_v35  ;;  %v6473_v18 = vadd.f32 %v15240_v13, %v6459_v61  ;;  %v12078_v13 = vld [vmem:[#allocation2 + $0x5c8] sm:$0xf]  ;;  %v13768_v35 = vld [vmem:[#allocation2 + $0x7a0] sm:$0xf0]  ;;  %v6529_v61 = vadd.f32 %v15260_v46, %v6515_v62  ;;  %v11798_v62 = vld [vmem:[#allocation2 + $0x398] sm:$0xf] }
 0x481   :  { %7038 = vmatpush.bf16.msrb.mxu0 %v12415_v6  ;;  %v11882_v6 = vld [vmem:[#allocation2 + $0x440] sm:$0xf]  ;;  %v12526_v23 = vld [vmem:[#allocation2 + $0x948] sm:$0xf]  ;;  %v12079_v28 = vor.u32 %v13712_v2, %v12078_v13  ;;  %v6629_v40 = vadd.f32 %v15313_v39, %v6615_v21  ;;  %v13810_v13 = vld [vmem:[#allocation2 + $0x8f0] sm:$0xf0] }
 0x482   :  { %7052 = vmatpush.bf16.msrb.mxu1 %v12639_v26  ;;  %v12330_v26 = vld [vmem:[#allocation2 + $0x7c0] sm:$0xf]  ;;  %v11883_v57 = vor.u32 %v13663_v45, %v11882_v6  ;;  %v15333_v4 = vadd.f32 %v15238_v31, %v6473_v18  ;;  %v15344_v19 = vpop.f32.mrf.mxu2  ;;  %v12050_v6 = vld [vmem:[#allocation2 + $0x590] sm:$0xf]  ;;  %v12527_v46 = vor.u32 %v13824_v8, %v12526_v23  ;;  %v6545_v18 = vadd.f32 %v15266_v9, %v6531_v20  ;;  %v13754_v9 = vld [vmem:[#allocation2 + $0x730] sm:$0xf0] }
 0x483   :  { %7011 = vmatpush.bf16.msrb.mxu2 %v11939_v11  ;;  %v12331_v11 = vor.u32 %v13775_v37, %v12330_v26  ;;  %v12274_v45 = vld [vmem:[#allocation2 + $0x750] sm:$0xf]  ;;  %v6543_v37 = vadd.f32 %v15258_v50, %v6529_v61  ;;  %v12051_v22 = vor.u32 %v13705_v54, %v12050_v6  ;;  %v13915_v2 = vld [vmem:[#allocation2 + $0xc38] sm:$0xf0]  ;;  %v6627_v23 = vadd.f32 %v15295_v17, %v6613_v51 }
 0x484   :  { %7025 = vmatpush.bf16.msrb.mxu3 %v12163_v32  ;;  %v11854_v32 = vld [vmem:[#allocation2 + $0x408] sm:$0xf]  ;;  %v15352_v26 = vand.u32 4294901760, %v15333_v4  ;;  %v12275_v15 = vor.u32 %v13761_v14, %v12274_v45  ;;  %v6559_v34 = vadd.f32 %v15278_v25, %v6545_v18  ;;  %v6643_v17 = vadd.f32 %v15323_v55, %v6629_v40  ;;  %v13908_v55 = vld [vmem:[#allocation2 + $0xc00] sm:$0xf0]  ;;  %v16162_v21 = vld [vmem:[#allocation36_spill] sm:$0xff] }
 0x485   :  { %7039 = vmatpush.bf16.msrb.mxu0 %v12387_v38  ;;  %v13656_v38 = vld [vmem:[#allocation2 + $0x420] sm:$0xf0]  ;;  %v12862_v45 = vld [vmem:[#allocation2 + $0xbe8] sm:$0xf] }
 0x486   :  { %7053 = vmatpush.bf16.msrb.mxu1 %v12611_v42  ;;  %v15336_v42 = vpop.f32.mrf.mxu0  ;;  %v11855_v10 = vor.u32 %v13656_v38, %v11854_v32  ;;  %v12246_v32 = vld [vmem:[#allocation2 + $0x718] sm:$0xf]  ;;  %v6657_v14 = vadd.f32 %v15319_v30, %v6643_v17  ;;  %v12863_v51 = vor.u32 %v13908_v55, %v12862_v45  ;;  %v13880_v17 = vld [vmem:[#allocation2 + $0xb20] sm:$0xf0] }
 0x487   :  { %7012 = vmatpush.bf16.msrb.mxu2 %v11911_v49  ;;  %v15346_v31 = vpop.f32.mrf.mxu3  ;;  %v12303_v49 = vor.u32 %v13768_v35, %v12302_v12  ;;  %v12470_v38 = vld [vmem:[#allocation2 + $0x8d8] sm:$0xf]  ;;  %v15364_v12 = vsub.f32 %v15333_v4, %v15352_v26  ;;  %v6557_v35 = vadd.f32 %v15264_v41, %v6543_v37  ;;  %v15369_v61 = vpop.f32.mrf.mxu1  ;;  %v12247_v43 = vor.u32 %v13754_v9, %v12246_v32  ;;  %v16164_v37 = vld [vmem:[#allocation44_spill] sm:$0xff] }
 0x488   :  { %7026 = vmatpush.bf16.msrb.mxu3 %v12135_v27  ;;  %v11826_v27 = vld [vmem:[#allocation2 + $0x3d0] sm:$0xf]  ;;  %v12471_v25 = vor.u32 %v13810_v13, %v12470_v38  ;;  %v16165_v30 = vld [vmem:[#allocation45_spill] sm:$0xff] }
 0x489   :  { %7040 = vmatpush.bf16.msrb.mxu0 %v12359_v16  ;;  %v13649_v16 = vld [vmem:[#allocation2 + $0x3e8] sm:$0xf0]  ;;  %v6571_v6 = vadd.f32 %v15276_v1, %v6557_v35  ;;  %v4373_v1 = vperm.slane %v16162_v21, 4  ;;  %v13894_v13 = vld [vmem:[#allocation2 + $0xb90] sm:$0xf0] }
 0x48a   :  { %7054 = vmatpush.bf16.msrb.mxu1 %v12583_v63  ;;  %v12498_v63 = vld [vmem:[#allocation2 + $0x910] sm:$0xf]  ;;  %v11827_v60 = vor.u32 %v13649_v16, %v11826_v27  ;;  %v7142_v16 = vand.u32 4294901760, %v15364_v12 }
 0x48b   :  { %7013 = vmatpush.bf16.msrb.mxu2 %v11883_v57  ;;  %v13642_v57 = vld [vmem:[#allocation2 + $0x3b0] sm:$0xf0]  ;;  %v12499_v50 = vor.u32 %v13817_v53, %v12498_v63  ;;  %v16163_v63 = vld [vmem:[#allocation46_spill] sm:$0xff] }
 0x48c   :  { %7027 = vmatpush.bf16.msrb.mxu3 %v12107_v56  ;;  %v13698_v56 = vld [vmem:[#allocation2 + $0x570] sm:$0xf0]  ;;  %v11799_v8 = vor.u32 %v13642_v57, %v11798_v62  ;;  %v15393_v53 = vadd.f32 %v16163_v63, %v6571_v6  ;;  %v16169_v63 = vld [vmem:[#allocation35_spill] sm:$0xff] }
 0x48d   :  { %7041 = vmatpush.bf16.msrb.mxu0 %v12331_v11  ;;  %v15359_v11 = vsub.f32 %v15327_v7, %v15339_v52  ;;  %v12023_v20 = vor.u32 %v13698_v56, %v12022_v5 }
 0x48e   :  { %7055 = vmatpush.bf16.msrb.mxu1 %v12555_v3  ;;  %v12890_v3 = vld [vmem:[#allocation2 + $0xc20] sm:$0xf]  ;;  %v15371_v39 = vpop.f32.mrf.mxu0  ;;  %v15413_v9 = vand.u32 4294901760, %v15393_v53 }
 0x48f   :  { %7014 = vmatpush.bf16.msrb.mxu2 %v11855_v10  ;;  %v7136_v10 = vand.u32 4294901760, %v15359_v11  ;;  %v6698_v41 = vpop.f32.mrf.mxu3  ;;  %v12891_v27 = vor.u32 %v13915_v2, %v12890_v3  ;;  %v16166_v3 = vld [vmem:[#allocation43_spill] sm:$0xff] }
 0x490   :  { %7028 = vmatpush.bf16.msrb.mxu3 %v12079_v28  ;;  %v6573_v28 = vadd.f32 %v15287_v58, %v6559_v34  ;;  %v6699_v57 = vadd.f32 %v6698_v41, %v4373_v1  ;;  %v15443_v6 = vsub.f32 %v15393_v53, %v15413_v9 }
 0x491   :  { %7042 = vmatpush.bf16.msrb.mxu0 %v12303_v49  ;;  %v6684_v49 = vpop.f32.mrf.mxu2  ;;  %v7137_v58 = vsub.f32 %v15359_v11, %v7136_v10 }
 0x492   :  { %7056 = vmatpush.bf16.msrb.mxu1 %v12527_v46  ;;  %v6641_v46 = vadd.f32 %v15302_v36, %v6627_v23  ;;  %v15383_v54 = vadd.f32 %v15290_v44, %v6573_v28  ;;  %v7143_v36 = vsub.f32 %v15364_v12, %v7142_v16  ;;  %v12778_v23 = vld [vmem:[#allocation2 + $0xb40] sm:$0xf] }
 0x493   :  { %7015 = vmatpush.bf16.msrb.mxu2 %v11827_v60  ;;  %v7138_v18 = vand.u32 4294901760, %v7137_v58  ;;  %v16167_v58 = vld [vmem:[#allocation37_spill] sm:$0xff] }
 0x494   :  { %7029 = vmatpush.bf16.msrb.mxu3 %v12051_v22  ;;  %v6655_v44 = vadd.f32 %v15300_v48, %v6641_v46  ;;  %v15403_v62 = vand.u32 4294901760, %v15383_v54  ;;  %v12834_v22 = vld [vmem:[#allocation2 + $0xbb0] sm:$0xf]  ;;  %v13901_v48 = vld [vmem:[#allocation2 + $0xbc8] sm:$0xf0]  ;;  %v7144_v5 = vand.u32 4294901760, %v7143_v36 }
 0x495   :  { %7043 = vmatpush.bf16.msrb.mxu0 %v12275_v15  ;;  %v6671_v15 = vadd.f32 %v15348_v24, %v6657_v14  ;;  %v6697_v24 = vadd.f32 %v15346_v31, %v4373_v1  ;;  %v12835_v40 = vor.u32 %v13901_v48, %v12834_v22  ;;  %v16168_v14 = vld [vmem:[#allocation34_spill] sm:$0xff] }
 0x496   :  { %7057 = vmatpush.bf16.msrb.mxu1 %v12499_v50  ;;  %v6669_v56 = vadd.f32 %v15317_v33, %v6655_v44  ;;  %v6726_v50 = vpop.f32.mrf.mxu1  ;;  %v12806_v33 = vld [vmem:[#allocation2 + $0xb78] sm:$0xf]  ;;  %v12722_v44 = vld [vmem:[#allocation2 + $0xad0] sm:$0xf] }
 0x497   :  { %7016 = vmatpush.bf16.msrb.mxu2 %v11799_v8  ;;  %v6752_v32 = vpop.f32.mrf.mxu3  ;;  %v15415_v38 = vadd.f32 %v6684_v49, %v6671_v15  ;;  %v6711_v35 = vadd.f32 %v15336_v42, %v6697_v24  ;;  %v12807_v31 = vor.u32 %v13894_v13, %v12806_v33 }
 0x498   :  { %7030 = vmatpush.bf16.msrb.mxu3 %v12023_v20  ;;  %v15423_v2 = vadd.f32 %v15344_v19, %v6669_v56 }
 0x499   :  { %7044 = vmatpush.bf16.msrb.mxu0 %v12247_v43  ;;  %v6738_v60 = vpop.f32.mrf.mxu2  ;;  %v15427_v34 = vand.u32 4294901760, %v15415_v38  ;;  %v15431_v43 = vsub.f32 %v15383_v54, %v15403_v62  ;;  %v6725_v19 = vadd.f32 %v15369_v61, %v6711_v35 }
 0x49a   :  { %7058 = vmatpush.bf16.msrb.mxu1 %v12471_v25  ;;  %7017 = vmatmul.bf16.vlgmr.msrb.gmra.mxu2 %v16166_v3 }
 0x49b   :  { %7065 = vmatpush.bf16.msra.mxu2 %v12891_v27  ;;  %7031 = vmatmul.bf16.vlgmr.msrb.gmra.mxu3 %v16164_v37  ;;  %v15439_v49 = vsub.f32 %v15415_v38, %v15427_v34  ;;  %v12750_v27 = vld [vmem:[#allocation2 + $0xb08] sm:$0xf]  ;;  %v7295_v61 = vand.u32 4294901760, %v15431_v43  ;;  %v6739_v55 = vadd.f32 %v6738_v60, %v6725_v19  ;;  %v13873_v37 = vld [vmem:[#allocation2 + $0xae8] sm:$0xf0] }
 0x49c   :  { %7108 = vmatpush.msra.mxu3 %v15339_v52  ;;  %7045 = vmatmul.bf16.vlgmr.msrb.gmra.mxu0 %v16165_v30  ;;  %v12751_v1 = vor.u32 %v13880_v17, %v12750_v27  ;;  %v7301_v30 = vand.u32 4294901760, %v15443_v6 }
 0x49d   :  { %7167 = vmatpush.msra.mxu0 %v15359_v11  ;;  %7059 = vmatmul.bf16.vlgmr.msrb.gmra.mxu1 %v15184_v29  ;;  %v15407_v29 = vpop.f32.mrf.mxu0  ;;  %v7454_v36 = vand.u32 4294901760, %v15439_v49  ;;  %v6753_v22 = vadd.f32 %v6752_v32, %v6739_v55  ;;  %v12723_v11 = vor.u32 %v13873_v37, %v12722_v44  ;;  %v16171_v32 = vld [vmem:[#allocation33_spill] sm:$0xff] }
 0x49e   :  { %7192 = vmatpush.msra.mxu1 %v15339_v52  ;;  %7110 = vmatpush.msra.mxu3 %v15352_v26  ;;  %v6780_v41 = vpop.f32.mrf.mxu1 }
 0x49f   :  { %7170 = vmatpush.msra.mxu0 %v15364_v12  ;;  %7066 = vmatpush.bf16.msra.mxu2 %v12863_v51  ;;  %v6754_v25 = vpop.f32.mrf.mxu3  ;;  %v7296_v51 = vsub.f32 %v15431_v43, %v7295_v61  ;;  %v7302_v12 = vsub.f32 %v15443_v6, %v7301_v30 }
 0x4a0   :  { %7194 = vmatpush.msra.mxu1 %v15352_v26  ;;  %7139 = vmatpush.msrb.mxu3 %v7138_v18 }
 0x4a1   :  { %7244 = vmatpush.msrb.mxu0 %v15339_v52  ;;  %v6713_v52 = vadd.f32 %v15371_v39, %v6699_v57  ;;  %v6740_v20 = vpop.f32.mrf.mxu2  ;;  %v15434_v39 = vand.u32 4294901760, %v15423_v2  ;;  %v12694_v57 = vld [vmem:[#allocation2 + $0xa98] sm:$0xf]  ;;  %v7297_v33 = vand.u32 4294901760, %v7296_v51 }
 0x4a2   :  { %7267 = vmatpush.msrb.mxu1 %v15403_v62  ;;  %7145 = vmatpush.msrb.mxu3 %v7144_v5  ;;  %v13866_v5 = vld [vmem:[#allocation2 + $0xab0] sm:$0xf0] }
 0x4a3   :  { %7246 = vmatpush.msrb.mxu0 %v15352_v26  ;;  %7067 = vmatpush.bf16.msra.mxu2 %v12835_v40  ;;  %v13887_v26 = vld [vmem:[#allocation2 + $0xb58] sm:$0xf0]  ;;  %v6727_v8 = vadd.f32 %v6726_v50, %v6713_v52  ;;  %v15449_v45 = vsub.f32 %v15423_v2, %v15434_v39  ;;  %v6767_v52 = vadd.f32 %v15407_v29, %v6753_v22 }
 0x4a4   :  { %7269 = vmatpush.msrb.mxu1 %v15413_v9  ;;  %v12779_v28 = vor.u32 %v13887_v26, %v12778_v23  ;;  %v12695_v35 = vor.u32 %v13866_v5, %v12694_v57 }
 0x4a5   :  { %v6768_v42 = vpop.f32.mrf.mxu0  ;;  %v6741_v46 = vadd.f32 %v6740_v20, %v6727_v8  ;;  %v7460_v60 = vand.u32 4294901760, %v15449_v45  ;;  %v15478_v20 = vadd.f32 %v6780_v41, %v6767_v52 }
 0x4a6   :  { %v6782_v40 = vpop.f32.mrf.mxu1 }
 0x4a7   :  { %7068 = vmatpush.bf16.msra.mxu2 %v12807_v31  ;;  %v6755_v18 = vadd.f32 %v6754_v25, %v6741_v46  ;;  %v6808_v50 = vpop.f32.mrf.mxu3  ;;  %v7461_v13 = vsub.f32 %v15449_v45, %v7460_v60  ;;  %v7303_v31 = vand.u32 4294901760, %v7302_v12  ;;  %v15488_v41 = vand.u32 4294901760, %v15478_v20 }
 0x4a9   :  { %v6794_v48 = vpop.f32.mrf.mxu2  ;;  %v6769_v24 = vadd.f32 %v6768_v42, %v6755_v18  ;;  %v7462_v8 = vand.u32 4294901760, %v7461_v13 }
 0x4ab   :  { %7116 = vmatmul.f32.vlgmr.msra.gmra.mxu3 %v16167_v58  ;;  %7069 = vmatpush.bf16.msra.mxu2 %v12779_v28  ;;  %v15475_v26 = vadd.f32 %v6782_v40, %v6769_v24 }
 0x4ac   :  { %7173 = vmatmul.f32.vlgmr.msra.gmra.mxu0 %v16168_v14  ;;  %7219 = vmatpush.msra.mxu3 %v7136_v10  ;;  %v7455_v10 = vsub.f32 %v15439_v49, %v7454_v36 }
 0x4ad   :  { %7198 = vmatmul.f32.vlgmr.msra.gmra.mxu1 %v16169_v63  ;;  %7326 = vmatpush.msra.mxu0 %v15431_v43  ;;  %v6822_v15 = vpop.f32.mrf.mxu0  ;;  %v15482_v43 = vand.u32 4294901760, %v15475_v26 }
 0x4ae   :  { %7351 = vmatpush.msra.mxu1 %v15403_v62  ;;  %7223 = vmatpush.msra.mxu3 %v7142_v16  ;;  %v16170_v16 = vld [vmem:[#allocation38_spill] sm:$0xff]  ;;  %v7456_v3 = vand.u32 4294901760, %v7455_v10  ;;  %v6836_v27 = vpop.f32.mrf.mxu1 }
 0x4af   :  { %7070 = vmatpush.bf16.msra.mxu2 %v12751_v1  ;;  %7329 = vmatpush.msra.mxu0 %v15443_v6  ;;  %v4374_v56 = vperm.slane %v16170_v16, 4  ;;  %v6810_v28 = vpop.f32.mrf.mxu3 }
 0x4b0   :  { %7353 = vmatpush.msra.mxu1 %v15413_v9 }
 0x4b1   :  { %v6795_v23 = vadd.f32 %v6794_v48, %v4374_v56  ;;  %v6796_v19 = vpop.f32.mrf.mxu2 }
 0x4b2   :  { %v6797_v17 = vadd.f32 %v6796_v19, %v4374_v56 }
 0x4b3   :  { %12892 = vmatmul.msk.f32.vlgmr.msrb.gmra.mxu3 %vm1163_vm3, %v16171_v32  ;;  %7071 = vmatpush.bf16.msra.mxu2 %v12723_v11  ;;  %v6809_v29 = vadd.f32 %v6808_v50, %v6795_v23 }
 0x4b4   :  { %12894 = vmatmul.msk.f32.vlgmr.msrb.gmra.mxu0 %vm1163_vm3, %v16171_v32  ;;  %7298 = vmatpush.msrb.mxu3 %v7297_v33  ;;  %v6811_v46 = vadd.f32 %v6810_v28, %v6797_v17 }
 0x4b5   :  { %7275 = vmatmul.f32.vlgmr.msrb.gmra.mxu1 %v16167_v58  ;;  %7426 = vmatpush.msrb.mxu0 %v15427_v34  ;;  %v6824_v42 = vpop.f32.mrf.mxu0  ;;  %v6823_v25 = vadd.f32 %v6822_v15, %v6809_v29 }
 0x4b6   :  { %7457 = vmatpush.msrb.mxu1 %v7456_v3  ;;  %7304 = vmatpush.msrb.mxu3 %v7303_v31  ;;  %v6825_v44 = vadd.f32 %v6824_v42, %v6811_v46  ;;  %v16172_v31 = vld [vmem:[#allocation39_spill] sm:$0xff] }
 0x4b7   :  { %7072 = vmatpush.bf16.msra.mxu2 %v12695_v35  ;;  %7428 = vmatpush.msrb.mxu0 %v15434_v39  ;;  %v6837_v6 = vadd.f32 %v6836_v27, %v6823_v25  ;;  %v4375_v23 = vperm.slane %v16172_v31, 4 }
 0x4b8   :  { %7463 = vmatpush.msrb.mxu1 %v7462_v8 }
 0x4ba   :  { %7073 = vmatmul.bf16.vlgmr.msra.gmra.mxu2 %v15190_v59  ;;  %v7612_v59 = vsub.f32 %v15475_v26, %v15482_v43 }
 0x4bb   :  { %7378 = vmatpush.msrb.mxu2 %v7295_v61  ;;  %12893 = vmatmul.msk.f32.vlgmr.msra.gmra.mxu3 %vm1163_vm3, %v16171_v32 }
 0x4bc   :  { %7332 = vmatmul.f32.vlgmr.msra.gmra.mxu0 %v16168_v14  ;;  %7403 = vmatpush.msra.mxu3 %v15403_v62  ;;  %v7613_v62 = vand.u32 4294901760, %v7612_v59 }
 0x4bd   :  { %7382 = vmatpush.msrb.mxu2 %v7301_v30  ;;  %7357 = vmatmul.f32.vlgmr.msra.gmra.mxu1 %v16169_v63  ;;  %v6850_v61 = vpop.f32.mrf.mxu2 }
 0x4be   :  { %7537 = vmatpush.msra.mxu0 %v7454_v36  ;;  %7562 = vmatpush.msra.mxu1 %v15427_v34  ;;  %v6864_v1 = vpop.f32.mrf.mxu3  ;;  %v7614_v36 = vsub.f32 %v7612_v59, %v7613_v62 }
 0x4bf   :  { %7485 = vmatpush.msra.mxu2 %v15439_v49  ;;  %7405 = vmatpush.msra.mxu3 %v15413_v9  ;;  %v7618_v49 = vsub.f32 %v15478_v20, %v15488_v41  ;;  %v6851_v9 = vadd.f32 %v6850_v61, %v6837_v6 }
 0x4c0   :  { %7541 = vmatpush.msra.mxu0 %v7460_v60  ;;  %7564 = vmatpush.msra.mxu1 %v15434_v39  ;;  %v7615_v51 = vand.u32 4294901760, %v7614_v36 }
 0x4c1   :  { %7488 = vmatpush.msra.mxu2 %v15449_v45  ;;  %v6878_v45 = vpop.f32.mrf.mxu0  ;;  %v7619_v55 = vand.u32 4294901760, %v7618_v49  ;;  %v6865_v37 = vadd.f32 %v6864_v1, %v6851_v9 }
 0x4c3   :  { %12895 = vmatmul.msk.f32.vlgmr.msrb.gmra.mxu3 %vm1163_vm3, %v16171_v32  ;;  %v7620_v30 = vsub.f32 %v7618_v49, %v7619_v55  ;;  %v15511_v18 = vadd.f32 %v6878_v45, %v6865_v37 }
 0x4c4   :  { %7434 = vmatmul.f32.vlgmr.msrb.gmra.mxu0 %v16167_v58  ;;  %7510 = vmatpush.msrb.mxu3 %v15427_v34  ;;  %v6838_v34 = vpop.f32.mrf.mxu1 }
 0x4c5   :  { %12898 = vmatmul.msk.f32.vlgmr.msrb.gmra.mxu1 %vm1163_vm3, %v16171_v32  ;;  %7644 = vmatpush.msrb.mxu0 %v7612_v59  ;;  %v6839_v60 = vadd.f32 %v6838_v34, %v6825_v44  ;;  %v6852_v22 = vpop.f32.mrf.mxu2  ;;  %v7745_v48 = vand.u32 4294901760, %v15511_v18 }
 0x4c6   :  { %7669 = vmatpush.msrb.mxu1 %v15482_v43  ;;  %7512 = vmatpush.msrb.mxu3 %v15434_v39  ;;  %v7621_v39 = vand.u32 4294901760, %v7620_v30  ;;  %v6866_v10 = vpop.f32.mrf.mxu3 }
 0x4c7   :  { %7647 = vmatpush.msrb.mxu0 %v7618_v49  ;;  %v6853_v11 = vadd.f32 %v6852_v22, %v6839_v60  ;;  %v7777_v12 = vsub.f32 %v15511_v18, %v7745_v48 }
 0x4c8   :  { %7671 = vmatpush.msrb.mxu1 %v15488_v41 }
 0x4c9   :  { %v6880_v15 = vpop.f32.mrf.mxu0  ;;  %v6867_v57 = vadd.f32 %v6866_v10, %v6853_v11  ;;  %v7778_v24 = vand.u32 4294901760, %v7777_v12 }
 0x4ca   :  { %12896 = vmatmul.msk.f32.vlgmr.msrb.gmra.mxu2 %vm1163_vm3, %v16171_v32 }
 0x4cb   :  { %12897 = vmatmul.msk.f32.vlgmr.msra.gmra.mxu3 %vm1163_vm3, %v16171_v32  ;;  %7585 = vmatpush.msrb.mxu2 %v15482_v43  ;;  %v15524_v5 = vadd.f32 %v6880_v15, %v6867_v57  ;;  %v7779_v13 = vsub.f32 %v7777_v12, %v7778_v24 }
 0x4cc   :  { %7616 = vmatpush.msra.mxu3 %v7615_v51  ;;  %12899 = vmatmul.msk.f32.vlgmr.msra.gmra.mxu0 %vm1163_vm3, %v16171_v32  ;;  %v6892_v35 = vpop.f32.mrf.mxu1 }
 0x4cd   :  { %12900 = vmatmul.msk.f32.vlgmr.msra.gmra.mxu1 %vm1163_vm3, %v16171_v32  ;;  %7587 = vmatpush.msrb.mxu2 %v15488_v41  ;;  %v7743_v56 = vand.u32 4294901760, %v15524_v5  ;;  %v7780_v3 = vand.u32 4294901760, %v7779_v13  ;;  %v6893_v29 = vadd.f32 %v6892_v35, %v4375_v23 }
 0x4ce   :  { %7622 = vmatpush.msra.mxu3 %v7621_v39 }
 0x4cf   :  { %7744 = vmatpush.msra.mxu0 %v7743_v56  ;;  %v7771_v50 = vsub.f32 %v15524_v5, %v7743_v56 }
 0x4d1   :  { %7746 = vmatpush.msra.mxu0 %v7745_v48  ;;  %v7772_v40 = vand.u32 4294901760, %v7771_v50 }
 0x4d2   :  { %7491 = vmatmul.f32.vlgmr.msra.gmra.mxu2 %v16168_v14 }
 0x4d3   :  { %7516 = vmatmul.f32.vlgmr.msrb.gmra.mxu3 %v16169_v63  ;;  %7696 = vmatpush.msra.mxu2 %v7613_v62  ;;  %v7773_v33 = vsub.f32 %v7771_v50, %v7772_v40 }
 0x4d4   :  { %7721 = vmatpush.msrb.mxu3 %v15482_v43  ;;  %7650 = vmatmul.f32.vlgmr.msrb.gmra.mxu0 %v16168_v14  ;;  %v6894_v19 = vpop.f32.mrf.mxu1 }
 0x4d5   :  { %7675 = vmatmul.f32.vlgmr.msrb.gmra.mxu1 %v16169_v63  ;;  %7700 = vmatpush.msra.mxu2 %v7619_v55  ;;  %v7774_v52 = vand.u32 4294901760, %v7773_v33  ;;  %v6895_v27 = vadd.f32 %v6894_v19, %v4375_v23  ;;  %v16173_v33 = vld [vmem:[#allocation40_spill] sm:$0xff] }
 0x4d6   :  { %7723 = vmatpush.msrb.mxu3 %v15488_v41  ;;  %7855 = vmatpush.msrb.mxu0 %v7772_v40  ;;  %v4376_v13 = vperm.slane %v16173_v33, 4 }
 0x4d7   :  { %7775 = vmatpush.msra.mxu1 %v7774_v52 }
 0x4d8   :  { %7859 = vmatpush.msrb.mxu0 %v7778_v24 }
 0x4d9   :  { %7781 = vmatpush.msra.mxu1 %v7780_v3  ;;  %v6934_v25 = vpop.f32.mrf.mxu0 }
 0x4da   :  { %7593 = vmatmul.f32.vlgmr.msrb.gmra.mxu2 %v16167_v58 }
 0x4db   :  { %12901 = vmatmul.msk.f32.vlgmr.msra.gmra.mxu3 %vm1163_vm3, %v16171_v32  ;;  %7803 = vmatpush.msrb.mxu2 %v7771_v50 }
 0x4dc   :  { %7828 = vmatpush.msra.mxu3 %v7743_v56  ;;  %7880 = vmatpush.msrb.mxu1 %v7743_v56  ;;  %v6948_v49 = vpop.f32.mrf.mxu1 }
 0x4dd   :  { %7806 = vmatpush.msrb.mxu2 %v7777_v12  ;;  %7752 = vmatmul.f32.vlgmr.msra.gmra.mxu0 %v16167_v58  ;;  %v6906_v8 = vpop.f32.mrf.mxu2 }
 0x4de   :  { %7830 = vmatpush.msra.mxu3 %v7745_v48  ;;  %12904 = vmatmul.msk.f32.vlgmr.msra.gmra.mxu1 %vm1163_vm3, %v16171_v32  ;;  %v6920_v43 = vpop.f32.mrf.mxu3  ;;  %v6907_v42 = vadd.f32 %v6906_v8, %v6893_v29 }
 0x4df   :  { %7882 = vmatpush.msrb.mxu1 %v7745_v48 }
 0x4e0   :  { %v6921_v28 = vadd.f32 %v6920_v43, %v6907_v42 }
 0x4e1   :  { %v6936_v45 = vpop.f32.mrf.mxu0 }
 0x4e2   :  { %12902 = vmatmul.msk.f32.vlgmr.msra.gmra.mxu2 %vm1163_vm3, %v16171_v32  ;;  %v6935_v17 = vadd.f32 %v6934_v25, %v6921_v28 }
 0x4e3   :  { %12903 = vmatmul.msk.f32.vlgmr.msrb.gmra.mxu3 %vm1163_vm3, %v16171_v32 }
 0x4e4   :  { %v6949_v62 = vadd.f32 %v6948_v49, %v6935_v17  ;;  %v6950_v44 = vpop.f32.mrf.mxu1  ;;  %v7086_v17 = vmul.f32 %v15327_v7, %v15327_v7 }
 0x4e5   :  { %12905 = vmatmul.msk.f32.vlgmr.msrb.gmra.mxu0 %vm1163_vm3, %v16171_v32  ;;  %v6908_v41 = vpop.f32.mrf.mxu2 }
 0x4e6   :  { %12906 = vmatmul.msk.f32.vlgmr.msrb.gmra.mxu1 %vm1163_vm3, %v16171_v32  ;;  %v6922_v59 = vpop.f32.mrf.mxu3  ;;  %v6909_v6 = vadd.f32 %v6908_v41, %v6895_v27 }
 0x4e8   :  { %v6923_v46 = vadd.f32 %v6922_v59, %v6909_v6 }
 0x4ea   :  { %7809 = vmatmul.f32.vlgmr.msrb.gmra.mxu2 %v16168_v14  ;;  %v6937_v1 = vadd.f32 %v6936_v45, %v6923_v46 }
 0x4eb   :  { %7834 = vmatmul.f32.vlgmr.msra.gmra.mxu3 %v16169_v63 }
 0x4ec   :  { %v6951_v37 = vadd.f32 %v6950_v44, %v6937_v1 }
 0x4f9   :  { %v6990_v24 = vpop.f32.mrf.mxu0 }
 0x4fa   :  { %v7004_v40 = vpop.f32.mrf.mxu1  ;;  %v6991_v3 = vadd.f32 %v6990_v24, %v4376_v13  ;;  %v7087_v24 = vmul.f32 %v15383_v54, %v15383_v54 }
 0x4fc   :  { %v7005_v8 = vadd.f32 %v7004_v40, %v6991_v3  ;;  %v7088_v40 = vmul.f32 %v15415_v38, %v15415_v38 }
 0x4fd   :  { %v6962_v61 = vpop.f32.mrf.mxu2 }
 0x4fe   :  { %v6963_v55 = vadd.f32 %v6962_v61, %v6949_v62  ;;  %v6976_v9 = vpop.f32.mrf.mxu3  ;;  %v7079_v62 = vmul.f32 %v15333_v4, %v15333_v4  ;;  %v15574_v61 = vand.u32 4294901760, %v7086_v17 }
 0x500   :  { %v15552_v36 = vadd.f32 %v6976_v9, %v6963_v55  ;;  %v15576_v1 = vand.u32 4294901760, %v7079_v62 }
 0x501   :  { %v6992_v52 = vpop.f32.mrf.mxu0 }
 0x502   :  { %v7904_v34 = vand.u32 4294901760, %v15552_v36  ;;  %v7006_v23 = vpop.f32.mrf.mxu1  ;;  %v6993_v43 = vadd.f32 %v6992_v52, %v4376_v13 }
 0x504   :  { %v7936_v22 = vsub.f32 %v15552_v36, %v7904_v34  ;;  %v7007_v28 = vadd.f32 %v7006_v23, %v6993_v43  ;;  %v15598_v43 = vand.u32 4294901760, %v7087_v24 }
 0x505   :  { %v6964_v30 = vpop.f32.mrf.mxu2 }
 0x506   :  { %v6965_v51 = vadd.f32 %v6964_v30, %v6951_v37  ;;  %v6978_v60 = vpop.f32.mrf.mxu3  ;;  %v7937_v48 = vand.u32 4294901760, %v7936_v22 }
 0x508   :  { %v15555_v39 = vadd.f32 %v6978_v60, %v6965_v51  ;;  %v7938_v12 = vsub.f32 %v7936_v22, %v7937_v48  ;;  %v8254_v51 = vsub.f32 %v7079_v62, %v15576_v1 }
 0x50a   :  { %v7902_v11 = vand.u32 4294901760, %v15555_v39  ;;  %v7939_v50 = vand.u32 4294901760, %v7938_v12 }
 0x50c   :  { %7903 = vmatpush.msra.mxu2 %v7902_v11  ;;  %7987 = vmatpush.msra.mxu1 %v7902_v11  ;;  %v7930_v10 = vsub.f32 %v15555_v39, %v7902_v11 }
 0x50e   :  { %7905 = vmatpush.msra.mxu2 %v7904_v34  ;;  %7962 = vmatpush.msra.mxu0 %v7930_v10  ;;  %v7931_v15 = vand.u32 4294901760, %v7930_v10 }
 0x50f   :  { %7989 = vmatpush.msra.mxu1 %v7904_v34  ;;  %7911 = vmatmul.f32.vlgmr.msra.gmra.mxu2 %v16167_v58 }
 0x510   :  { %7965 = vmatpush.msra.mxu0 %v7936_v22  ;;  %8014 = vmatpush.msrb.mxu2 %v7931_v15  ;;  %v7932_v57 = vsub.f32 %v7930_v10, %v7931_v15  ;;  %v8255_v15 = vand.u32 4294901760, %v8254_v51 }
 0x511   :  { %7968 = vmatmul.f32.vlgmr.msra.gmra.mxu0 %v16168_v14  ;;  %7993 = vmatmul.f32.vlgmr.msra.gmra.mxu1 %v16169_v63 }
 0x512   :  { %8018 = vmatpush.msrb.mxu2 %v7937_v48  ;;  %v7933_v56 = vand.u32 4294901760, %v7932_v57  ;;  %v8256_v13 = vsub.f32 %v8254_v51, %v8255_v15 }
 0x514   :  { %7934 = vmatpush.msrb.mxu3 %v7933_v56 }
 0x516   :  { %7940 = vmatpush.msrb.mxu3 %v7939_v50 }
 0x517   :  { %12908 = vmatmul.msk.f32.vlgmr.msrb.gmra.mxu2 %vm1163_vm3, %v16171_v32  ;;  %12907 = vmatmul.msk.f32.vlgmr.msrb.gmra.mxu3 %vm1163_vm3, %v16171_v32 }
 0x518   :  { %8039 = vmatpush.msra.mxu3 %v7902_v11 }
 0x519   :  { %v7046_v42 = vpop.f32.mrf.mxu0 }
 0x51a   :  { %8041 = vmatpush.msra.mxu3 %v7904_v34  ;;  %v7060_v27 = vpop.f32.mrf.mxu1  ;;  %v8248_v34 = vsub.f32 %v7086_v17, %v15574_v61 }
 0x51c   :  { %v8249_v10 = vand.u32 4294901760, %v8248_v34 }
 0x51d   :  { %v7018_v35 = vpop.f32.mrf.mxu2 }
 0x51e   :  { %v7032_v29 = vpop.f32.mrf.mxu3  ;;  %v7019_v19 = vadd.f32 %v7018_v35, %v7005_v8  ;;  %v8250_v56 = vsub.f32 %v8248_v34, %v8249_v10  ;;  %v7080_v35 = vmul.f32 %v15393_v53, %v15393_v53  ;;  %v7081_v8 = vmul.f32 %v15423_v2, %v15423_v2 }
 0x51f   :  { %12909 = vmatmul.msk.f32.vlgmr.msra.gmra.mxu3 %vm1163_vm3, %v16171_v32 }
 0x520   :  { %v7033_v25 = vadd.f32 %v7032_v29, %v7019_v19  ;;  %v8251_v23 = vand.u32 4294901760, %v8250_v56  ;;  %v15600_v19 = vand.u32 4294901760, %v7088_v40  ;;  %v7083_v56 = vmul.f32 %v15511_v18, %v15511_v18 }
 0x521   :  { %v7048_v45 = vpop.f32.mrf.mxu0 }
 0x522   :  { %v7047_v6 = vadd.f32 %v7046_v42, %v7033_v25  ;;  %v7062_v30 = vpop.f32.mrf.mxu1  ;;  %v8257_v42 = vand.u32 4294901760, %v8256_v13  ;;  %v15603_v25 = vand.u32 4294901760, %v7080_v35  ;;  %v15611_v17 = vsub.f32 %v7088_v40, %v15600_v19 }
 0x524   :  { %v7061_v9 = vadd.f32 %v7060_v27, %v7047_v6  ;;  %v15606_v27 = vand.u32 4294901760, %v7081_v8  ;;  %v8413_v6 = vsub.f32 %v7080_v35, %v15603_v25 }
 0x525   :  { %v7020_v41 = vpop.f32.mrf.mxu2 }
 0x526   :  { %v7021_v59 = vadd.f32 %v7020_v41, %v7007_v28  ;;  %v7034_v49 = vpop.f32.mrf.mxu3 }
 0x528   :  { %v7035_v46 = vadd.f32 %v7034_v49, %v7021_v59  ;;  %v8407_v59 = vsub.f32 %v7087_v24, %v15598_v43 }
 0x529   :  { %v15659_v24 = vpop.f32.mrf.mxu0 }
 0x52a   :  { %v7049_v44 = vadd.f32 %v7048_v45, %v7035_v46  ;;  %v8408_v62 = vand.u32 4294901760, %v8407_v59  ;;  %v15617_v46 = vsub.f32 %v7081_v8, %v15606_v27  ;;  %v8567_v45 = vand.u32 4294901760, %v15611_v17 }
 0x52c   :  { %v7063_v60 = vadd.f32 %v7062_v30, %v7049_v44  ;;  %v8409_v44 = vsub.f32 %v8407_v59, %v8408_v62  ;;  %v8568_v30 = vsub.f32 %v15611_v17, %v8567_v45 }
 0x53d   :  { %v7074_v55 = vpop.f32.mrf.mxu2 }
 0x53e   :  { %v15578_v37 = vadd.f32 %v7074_v55, %v7061_v9  ;;  %v8414_v55 = vand.u32 4294901760, %v8413_v6  ;;  %v15628_v9 = vpop.f32.mrf.mxu3 }
 0x540   :  { %v8063_v22 = vand.u32 4294901760, %v15578_v37 }
 0x542   :  { %v8095_v12 = vsub.f32 %v15578_v37, %v8063_v22 }
 0x544   :  { %v8096_v3 = vand.u32 4294901760, %v8095_v12 }
 0x545   :  { %v7076_v11 = vpop.f32.mrf.mxu2 }
 0x546   :  { %v15583_v48 = vadd.f32 %v7076_v11, %v7063_v60  ;;  %v8097_v41 = vsub.f32 %v8095_v12, %v8096_v3  ;;  %v8410_v60 = vand.u32 4294901760, %v8409_v44  ;;  %v8569_v11 = vand.u32 4294901760, %v8568_v30 }
 0x547   :  { %v7091_v30 = vmul.f32 %v15555_v39, %v15555_v39 }
 0x548   :  { %v8061_v57 = vand.u32 4294901760, %v15583_v48  ;;  %v8098_v49 = vand.u32 4294901760, %v8097_v41 }
 0x54a   :  { %8062 = vmatpush.msrb.mxu0 %v8061_v57  ;;  %8146 = vmatpush.msrb.mxu3 %v8061_v57  ;;  %v8089_v50 = vsub.f32 %v15583_v48, %v8061_v57 }
 0x54c   :  { %8064 = vmatpush.msrb.mxu0 %v8063_v22  ;;  %8121 = vmatpush.msra.mxu2 %v8089_v50  ;;  %v8090_v52 = vand.u32 4294901760, %v8089_v50 }
 0x54d   :  { %8148 = vmatpush.msrb.mxu3 %v8063_v22  ;;  %8070 = vmatmul.f32.vlgmr.msrb.gmra.mxu0 %v16167_v58 }
 0x54e   :  { %8152 = vmatmul.f32.vlgmr.msrb.gmra.mxu3 %v16169_v63  ;;  %8124 = vmatpush.msra.mxu2 %v8095_v12  ;;  %v8091_v29 = vsub.f32 %v8089_v50, %v8090_v52  ;;  %v7082_v12 = vmul.f32 %v15478_v20, %v15478_v20 }
 0x54f   :  { %8252 = vmatpush.msra.mxu3 %v8251_v23  ;;  %8173 = vmatpush.msra.mxu0 %v8090_v52  ;;  %v15671_v52 = vpop.f32.mrf.mxu1 }
 0x550   :  { %8127 = vmatmul.f32.vlgmr.msra.gmra.mxu2 %v16168_v14  ;;  %v8092_v28 = vand.u32 4294901760, %v8091_v29  ;;  %v15667_v13 = vand.u32 4294901760, %v7082_v12 }
 0x551   :  { %8221 = vmatpush.msrb.mxu2 %v15574_v61  ;;  %8258 = vmatpush.msra.mxu3 %v8257_v42 }
 0x552   :  { %8177 = vmatpush.msra.mxu0 %v8096_v3  ;;  %8093 = vmatpush.msrb.mxu1 %v8092_v28  ;;  %v15673_v3 = vand.u32 4294901760, %v7083_v56  ;;  %v8731_v8 = vsub.f32 %v7082_v12, %v15667_v13 }
 0x553   :  { %8357 = vmatpush.msrb.mxu3 %v15574_v61  ;;  %8223 = vmatpush.msrb.mxu2 %v15576_v1 }
 0x554   :  { %8280 = vmatpush.msrb.mxu0 %v8248_v34  ;;  %8099 = vmatpush.msrb.mxu1 %v8098_v49  ;;  %v8573_v34 = vand.u32 4294901760, %v15617_v46  ;;  %v15687_v42 = vsub.f32 %v7083_v56, %v15673_v3  ;;  %v8732_v41 = vand.u32 4294901760, %v8731_v8 }
 0x555   :  { %8332 = vmatpush.msra.mxu2 %v8249_v10  ;;  %8359 = vmatpush.msrb.mxu3 %v15576_v1 }
 0x556   :  { %8283 = vmatpush.msrb.mxu0 %v8254_v51  ;;  %12910 = vmatmul.msk.f32.vlgmr.msrb.gmra.mxu1 %vm1163_vm3, %v16171_v32  ;;  %v8415_v51 = vsub.f32 %v8413_v6, %v8414_v55  ;;  %v8891_v49 = vand.u32 4294901760, %v15687_v42 }
 0x557   :  { %8336 = vmatpush.msra.mxu2 %v8255_v15  ;;  %12911 = vmatmul.msk.f32.vlgmr.msra.gmra.mxu0 %vm1163_vm3, %v16171_v32  ;;  %v7090_v15 = vmul.f32 %v15524_v5, %v15524_v5 }
 0x558   :  { %8198 = vmatpush.msra.mxu1 %v8061_v57  ;;  %12913 = vmatmul.msk.f32.vlgmr.msra.gmra.mxu3 %vm1163_vm3, %v16171_v32  ;;  %v8416_v10 = vand.u32 4294901760, %v8415_v51  ;;  %v15650_v57 = vpop.f32.mrf.mxu3 }
 0x559   :  { %8380 = vmatpush.msra.mxu0 %v15598_v43  ;;  %8464 = vmatpush.msra.mxu3 %v15598_v43  ;;  %v15661_v40 = vand.u32 4294901760, %v7090_v15 }
 0x55a   :  { %8200 = vmatpush.msra.mxu1 %v8063_v22  ;;  %8229 = vmatmul.f32.vlgmr.msrb.gmra.mxu2 %v16167_v58  ;;  %v8574_v22 = vsub.f32 %v15617_v46, %v8573_v34 }
 0x55b   :  { %8382 = vmatpush.msra.mxu0 %v15603_v25  ;;  %8439 = vmatpush.msrb.mxu2 %v8407_v59  ;;  %v15679_v23 = vsub.f32 %v7090_v15, %v15661_v40  ;;  %v15701_v59 = vpop.f32.mrf.mxu1 }
 0x55c   :  { %8466 = vmatpush.msra.mxu3 %v15603_v25  ;;  %8305 = vmatpush.msrb.mxu1 %v15574_v61  ;;  %v8575_v61 = vand.u32 4294901760, %v8574_v22  ;;  %v7084_v22 = vmul.f32 %v15552_v36, %v15552_v36 }
 0x55d   :  { %8442 = vmatpush.msrb.mxu2 %v8413_v6  ;;  %v8885_v28 = vand.u32 4294901760, %v15679_v23  ;;  %v8733_v6 = vsub.f32 %v8731_v8, %v8732_v41 }
 0x55e   :  { %8307 = vmatpush.msrb.mxu1 %v15576_v1  ;;  %v7089_v1 = vmul.f32 %v15475_v26, %v15475_v26  ;;  %v15745_v12 = vand.u32 4294901760, %v7084_v22 }
 0x55f   :  { %12912 = vmatmul.msk.f32.vlgmr.msra.gmra.mxu1 %vm1163_vm3, %v16171_v32  ;;  %8286 = vmatmul.f32.vlgmr.msrb.gmra.mxu0 %v16168_v14 }
 0x560   :  { %12915 = vmatmul.msk.f32.vlgmr.msrb.gmra.mxu3 %vm1163_vm3, %v16171_v32  ;;  %8411 = vmatpush.msra.mxu1 %v8410_v60  ;;  %v15657_v50 = vand.u32 4294901760, %v7089_v1  ;;  %v15684_v29 = vpop.f32.mrf.mxu3  ;;  %v7092_v60 = vmul.f32 %v15583_v48, %v15583_v48 }
 0x561   :  { %8491 = vmatpush.msrb.mxu0 %v8408_v62  ;;  %8570 = vmatpush.msrb.mxu3 %v8569_v11  ;;  %v15730_v11 = vpop.f32.mrf.mxu2 }
 0x562   :  { %12914 = vmatmul.msk.f32.vlgmr.msra.gmra.mxu2 %vm1163_vm3, %v16171_v32  ;;  %8417 = vmatpush.msra.mxu1 %v8416_v10  ;;  %v8725_v35 = vsub.f32 %v7089_v1, %v15657_v50  ;;  %v15737_v1 = vand.u32 4294901760, %v7091_v30  ;;  %v15739_v15 = vand.u32 4294901760, %v7092_v60 }
 0x563   :  { %8495 = vmatpush.msrb.mxu0 %v8414_v55  ;;  %8539 = vmatpush.msra.mxu2 %v15600_v19  ;;  %v8734_v55 = vand.u32 4294901760, %v8733_v6  ;;  %v15723_v51 = vpop.f32.mrf.mxu1 }
 0x564   :  { %8576 = vmatpush.msrb.mxu3 %v8575_v61  ;;  %v7085_v61 = vmul.f32 %v15578_v37, %v15578_v37 }
 0x565   :  { %8541 = vmatpush.msra.mxu2 %v15606_v27 }
 0x567   :  { %8311 = vmatmul.f32.vlgmr.msrb.gmra.mxu1 %v16169_v63  ;;  %8388 = vmatmul.f32.vlgmr.msra.gmra.mxu0 %v16167_v58 }
 0x568   :  { %8470 = vmatmul.f32.vlgmr.msra.gmra.mxu3 %v16169_v63  ;;  %8516 = vmatpush.msrb.mxu1 %v15598_v43  ;;  %v8726_v43 = vand.u32 4294901760, %v8725_v35  ;;  %v15709_v62 = vpop.f32.mrf.mxu3 }
 0x569   :  { %8598 = vmatpush.msra.mxu0 %v15611_v17  ;;  %8675 = vmatpush.msra.mxu3 %v15600_v19 }
 0x56a   :  { %8445 = vmatmul.f32.vlgmr.msrb.gmra.mxu2 %v16168_v14  ;;  %8518 = vmatpush.msrb.mxu1 %v15603_v25  ;;  %v15697_v25 = vpop.f32.mrf.mxu0  ;;  %v8727_v17 = vsub.f32 %v8725_v35, %v8726_v43 }
 0x56b   :  { %8601 = vmatpush.msra.mxu0 %v15617_v46  ;;  %8650 = vmatpush.msrb.mxu2 %v8567_v45  ;;  %v8892_v45 = vsub.f32 %v15687_v42, %v8891_v49 }
 0x56c   :  { %8677 = vmatpush.msra.mxu3 %v15606_v27  ;;  %v8728_v46 = vand.u32 4294901760, %v8727_v17  ;;  %v7492_v17 = vpop.f32.mrf.mxu2 }
 0x56d   :  { %8654 = vmatpush.msrb.mxu2 %v8573_v34  ;;  %v8893_v34 = vand.u32 4294901760, %v8892_v45 }
 0x56f   :  { %12916 = vmatmul.msk.f32.vlgmr.msra.gmra.mxu1 %vm1163_vm3, %v16171_v32  ;;  %12917 = vmatmul.msk.f32.vlgmr.msrb.gmra.mxu0 %vm1163_vm3, %v16171_v32 }
 0x570   :  { %12919 = vmatmul.msk.f32.vlgmr.msrb.gmra.mxu3 %vm1163_vm3, %v16171_v32  ;;  %8623 = vmatpush.msra.mxu1 %v15600_v19  ;;  %v8886_v19 = vsub.f32 %v15679_v23, %v8885_v28  ;;  %v15733_v10 = vpop.f32.mrf.mxu3 }
 0x571   :  { %8698 = vmatpush.msrb.mxu0 %v15657_v50  ;;  %8782 = vmatpush.msrb.mxu3 %v15657_v50 }
 0x572   :  { %8547 = vmatmul.f32.vlgmr.msra.gmra.mxu2 %v16167_v58  ;;  %8625 = vmatpush.msra.mxu1 %v15606_v27  ;;  %v8887_v27 = vand.u32 4294901760, %v8886_v19  ;;  %v15717_v44 = vpop.f32.mrf.mxu0 }
 0x573   :  { %8700 = vmatpush.msrb.mxu0 %v15667_v13  ;;  %8757 = vmatpush.msra.mxu2 %v8725_v35  ;;  %v15749_v35 = vand.u32 4294901760, %v7085_v61 }
 0x574   :  { %8784 = vmatpush.msrb.mxu3 %v15667_v13 }
 0x575   :  { %8760 = vmatpush.msra.mxu2 %v8731_v8  ;;  %v9043_v8 = vsub.f32 %v7091_v30, %v15737_v1 }
 0x577   :  { %12918 = vmatmul.msk.f32.vlgmr.msrb.gmra.mxu1 %vm1163_vm3, %v16171_v32  ;;  %8604 = vmatmul.f32.vlgmr.msra.gmra.mxu0 %v16168_v14 }
 0x578   :  { %12921 = vmatmul.msk.f32.vlgmr.msra.gmra.mxu3 %vm1163_vm3, %v16171_v32  ;;  %8729 = vmatpush.msrb.mxu1 %v8728_v46  ;;  %v7517_v6 = vpop.f32.mrf.mxu3  ;;  %v9044_v46 = vand.u32 4294901760, %v9043_v8 }
 0x579   :  { %8809 = vmatpush.msra.mxu0 %v8726_v43  ;;  %8888 = vmatpush.msra.mxu3 %v8887_v27  ;;  %v7466_v43 = vpop.f32.mrf.mxu1 }
 0x57a   :  { %12920 = vmatmul.msk.f32.vlgmr.msrb.gmra.mxu2 %vm1163_vm3, %v16171_v32  ;;  %8735 = vmatpush.msrb.mxu1 %v8734_v55  ;;  %v7435_v56 = vpop.f32.mrf.mxu0  ;;  %v9045_v27 = vsub.f32 %v9043_v8, %v9044_v46 }
 0x57b   :  { %8813 = vmatpush.msra.mxu0 %v8732_v41  ;;  %8857 = vmatpush.msrb.mxu2 %v15661_v40  ;;  %v15755_v41 = vsub.f32 %v7092_v60, %v15739_v15  ;;  %v7594_v60 = vpop.f32.mrf.mxu2 }
 0x57c   :  { %8894 = vmatpush.msra.mxu3 %v8893_v34 }
 0x57d   :  { %8859 = vmatpush.msrb.mxu2 %v15673_v3 }
 0x57f   :  { %8629 = vmatmul.f32.vlgmr.msra.gmra.mxu1 %v16169_v63  ;;  %8706 = vmatmul.f32.vlgmr.msrb.gmra.mxu0 %v16167_v58 }
 0x580   :  { %8788 = vmatmul.f32.vlgmr.msrb.gmra.mxu3 %v16169_v63  ;;  %8834 = vmatpush.msra.mxu1 %v15657_v50  ;;  %v7467_v50 = vadd.f32 %v7466_v43, %v7435_v56 }
 0x581   :  { %8916 = vmatpush.msrb.mxu0 %v15679_v23  ;;  %8993 = vmatpush.msrb.mxu3 %v15661_v40  ;;  %v9049_v23 = vsub.f32 %v7084_v22, %v15745_v12  ;;  %v15780_v34 = vpop.f32.mrf.mxu1  ;;  %v7625_v22 = vpop.f32.mrf.mxu3 }
 0x582   :  { %8763 = vmatmul.f32.vlgmr.msra.gmra.mxu2 %v16168_v14  ;;  %8836 = vmatpush.msra.mxu1 %v15667_v13  ;;  %v7493_v19 = vadd.f32 %v7492_v17, %v7467_v50  ;;  %v15761_v13 = vsub.f32 %v7085_v61, %v15749_v35  ;;  %v15773_v45 = vpop.f32.mrf.mxu0  ;;  %v9046_v61 = vand.u32 4294901760, %v9045_v27 }
 0x583   :  { %8919 = vmatpush.msrb.mxu0 %v15687_v42  ;;  %8968 = vmatpush.msra.mxu2 %v8885_v28  ;;  %v9203_v42 = vand.u32 4294901760, %v15755_v41  ;;  %v7703_v27 = vpop.f32.mrf.mxu2 }
 0x584   :  { %8995 = vmatpush.msrb.mxu3 %v15673_v3  ;;  %v15768_v28 = vadd.f32 %v7517_v6, %v7493_v19  ;;  %v9209_v55 = vand.u32 4294901760, %v15761_v13 }
 0x585   :  { %8972 = vmatpush.msra.mxu2 %v8891_v49  ;;  %v9050_v49 = vand.u32 4294901760, %v9049_v23 }
 0x586   :  { %v9210_v56 = vsub.f32 %v15761_v13, %v9209_v55 }
 0x587   :  { %12922 = vmatmul.msk.f32.vlgmr.msrb.gmra.mxu1 %vm1163_vm3, %v16171_v32  ;;  %12923 = vmatmul.msk.f32.vlgmr.msra.gmra.mxu0 %vm1163_vm3, %v16171_v32  ;;  %v9051_v30 = vsub.f32 %v9049_v23, %v9050_v49 }
 0x588   :  { %12925 = vmatmul.msk.f32.vlgmr.msra.gmra.mxu3 %vm1163_vm3, %v16171_v32  ;;  %8941 = vmatpush.msrb.mxu1 %v15661_v40  ;;  %v9204_v40 = vsub.f32 %v15755_v41, %v9203_v42  ;;  %v9211_v17 = vand.u32 4294901760, %v9210_v56 }
 0x589   :  { %9016 = vmatpush.msra.mxu0 %v15737_v1  ;;  %9100 = vmatpush.msra.mxu3 %v15737_v1  ;;  %v7676_v19 = vpop.f32.mrf.mxu1 }
 0x58a   :  { %8865 = vmatmul.f32.vlgmr.msrb.gmra.mxu2 %v16167_v58  ;;  %8943 = vmatpush.msrb.mxu1 %v15673_v3  ;;  %v7626_v3 = vadd.f32 %v7625_v22, %v7594_v60  ;;  %v9205_v43 = vand.u32 4294901760, %v9204_v40  ;;  %v7651_v50 = vpop.f32.mrf.mxu0 }
 0x58b   :  { %9018 = vmatpush.msra.mxu0 %v15745_v12  ;;  %9075 = vmatpush.msrb.mxu2 %v9043_v8  ;;  %v9052_v8 = vand.u32 4294901760, %v9051_v30  ;;  %v7726_v30 = vpop.f32.mrf.mxu3 }
 0x58c   :  { %9102 = vmatpush.msra.mxu3 %v15745_v12 }
 0x58d   :  { %9078 = vmatpush.msrb.mxu2 %v9049_v23  ;;  %v7652_v23 = vadd.f32 %v7651_v50, %v7626_v3 }
 0x58f   :  { %12924 = vmatmul.msk.f32.vlgmr.msra.gmra.mxu1 %vm1163_vm3, %v16171_v32  ;;  %8922 = vmatmul.f32.vlgmr.msrb.gmra.mxu0 %v16168_v14  ;;  %v7677_v6 = vadd.f32 %v7676_v19, %v7652_v23 }
 0x590   :  { %12927 = vmatmul.msk.f32.vlgmr.msrb.gmra.mxu3 %vm1163_vm3, %v16171_v32  ;;  %9047 = vmatpush.msra.mxu1 %v9046_v61  ;;  %v7810_v61 = vpop.f32.mrf.mxu2 }
 0x591   :  { %9127 = vmatpush.msrb.mxu0 %v9044_v46  ;;  %9206 = vmatpush.msrb.mxu3 %v9205_v43  ;;  %v7704_v40 = vadd.f32 %v7703_v27, %v7677_v6  ;;  %v7784_v60 = vpop.f32.mrf.mxu1 }
 0x592   :  { %12926 = vmatmul.msk.f32.vlgmr.msra.gmra.mxu2 %vm1163_vm3, %v16171_v32  ;;  %9053 = vmatpush.msra.mxu1 %v9052_v8 }
 0x593   :  { %9131 = vmatpush.msrb.mxu0 %v9050_v49  ;;  %9175 = vmatpush.msra.mxu2 %v15739_v15  ;;  %v15797_v46 = vadd.f32 %v7726_v30, %v7704_v40  ;;  %v7753_v49 = vpop.f32.mrf.mxu0 }
 0x594   :  { %9212 = vmatpush.msrb.mxu3 %v9211_v17  ;;  %v7785_v22 = vadd.f32 %v7784_v60, %v7753_v49 }
 0x595   :  { %9177 = vmatpush.msra.mxu2 %v15749_v35 }
 0x596   :  { %v7811_v56 = vadd.f32 %v7810_v61, %v7785_v22 }
 0x597   :  { %8947 = vmatmul.f32.vlgmr.msrb.gmra.mxu1 %v16169_v63  ;;  %9024 = vmatmul.f32.vlgmr.msra.gmra.mxu0 %v16167_v58 }
 0x598   :  { %9106 = vmatmul.f32.vlgmr.msra.gmra.mxu3 %v16169_v63  ;;  %9152 = vmatpush.msrb.mxu1 %v15737_v1  ;;  %v7835_v1 = vpop.f32.mrf.mxu3  ;;  %v7912_v3 = vpop.f32.mrf.mxu2 }
 0x599   :  { %9234 = vmatpush.msra.mxu0 %v15755_v41  ;;  %9311 = vmatpush.msra.mxu3 %v15739_v15  ;;  %v7836_v41 = vadd.f32 %v7835_v1, %v7811_v56 }
 0x59a   :  { %9081 = vmatmul.f32.vlgmr.msrb.gmra.mxu2 %v16168_v14  ;;  %9154 = vmatpush.msrb.mxu1 %v15745_v12 }
 0x59b   :  { %9237 = vmatpush.msra.mxu0 %v15761_v13  ;;  %9286 = vmatpush.msrb.mxu2 %v9203_v42  ;;  %v7862_v12 = vpop.f32.mrf.mxu0  ;;  %v7885_v42 = vpop.f32.mrf.mxu1 }
 0x59c   :  { %9313 = vmatpush.msra.mxu3 %v15749_v35  ;;  %v7863_v13 = vadd.f32 %v7862_v12, %v7836_v41 }
 0x59d   :  { %9290 = vmatpush.msrb.mxu2 %v9209_v55 }
 0x59e   :  { %v15816_v55 = vadd.f32 %v7885_v42, %v7863_v13 }
 0x59f   :  { %12928 = vmatmul.msk.f32.vlgmr.msra.gmra.mxu1 %vm1163_vm3, %v16171_v32  ;;  %12929 = vmatmul.msk.f32.vlgmr.msrb.gmra.mxu0 %vm1163_vm3, %v16171_v32 }
 0x5a0   :  { %9259 = vmatpush.msra.mxu1 %v15739_v15  ;;  %12931 = vmatmul.msk.f32.vlgmr.msrb.gmra.mxu3 %vm1163_vm3, %v16171_v32  ;;  %v7943_v43 = vpop.f32.mrf.mxu3  ;;  %v8021_v23 = vpop.f32.mrf.mxu2 }
 0x5a1   :  { %v7944_v8 = vadd.f32 %v7943_v43, %v7912_v3 }
 0x5a2   :  { %9261 = vmatpush.msra.mxu1 %v15749_v35  ;;  %9183 = vmatmul.f32.vlgmr.msra.gmra.mxu2 %v16167_v58 }
 0x5a3   :  { %v7969_v15 = vpop.f32.mrf.mxu0  ;;  %v7994_v58 = vpop.f32.mrf.mxu1 }
 0x5a4   :  { %v7970_v50 = vadd.f32 %v7969_v15, %v7944_v8 }
 0x5a6   :  { %v7995_v35 = vadd.f32 %v7994_v58, %v7970_v50 }
 0x5a7   :  { %12930 = vmatmul.msk.f32.vlgmr.msrb.gmra.mxu1 %vm1163_vm3, %v16171_v32  ;;  %9240 = vmatmul.f32.vlgmr.msra.gmra.mxu0 %v16168_v14  ;;  %v7149_v14 = vadd.f32 %v15650_v57, %v15628_v9  ;;  %v7308_v9 = vadd.f32 %v15709_v62, %v15701_v59 }
 0x5a8   :  { %12933 = vmatmul.msk.f32.vlgmr.msra.gmra.mxu3 %vm1163_vm3, %v16171_v32  ;;  %v8022_v17 = vadd.f32 %v8021_v23, %v7995_v35  ;;  %v8044_v19 = vpop.f32.mrf.mxu3 }
 0x5aa   :  { %12932 = vmatmul.msk.f32.vlgmr.msrb.gmra.mxu2 %vm1163_vm3, %v16171_v32  ;;  %v15826_v6 = vadd.f32 %v8044_v19, %v8022_v17  ;;  %v7175_v32 = vadd.f32 %v15659_v24, %v7149_v14  ;;  %v7334_v24 = vadd.f32 %v15717_v44, %v7308_v9  ;;  %v7545_v9 = vadd.f32 %v15773_v45, %v15768_v28 }
 0x5ac   :  { %v7200_v1 = vadd.f32 %v15671_v52, %v7175_v32  ;;  %v7359_v19 = vadd.f32 %v15723_v51, %v7334_v24 }
 0x5ae   :  { %v7227_v43 = vadd.f32 %v15684_v29, %v7200_v1  ;;  %v7386_v62 = vadd.f32 %v15730_v11, %v7359_v19 }
 0x5af   :  { %9265 = vmatmul.f32.vlgmr.msra.gmra.mxu1 %v16169_v63 }
 0x5b0   :  { %v7250_v8 = vadd.f32 %v15697_v25, %v7227_v43 }
 0x5b2   :  { %v15839_v17 = vmul.f32 0.5, %v7250_v8 }
 0x5b4   :  { %v9333_v59 = vmul.f32 %v15839_v17, %v15839_v17 }
 0x5ca   :  { %v8071_v27 = vpop.f32.mrf.mxu0 }
 0x5d1   :  { %v8153_v40 = vpop.f32.mrf.mxu3 }
 0x5d3   :  { %v8128_v30 = vpop.f32.mrf.mxu2  ;;  %v8102_v49 = vpop.f32.mrf.mxu1 }
 0x5d4   :  { %v8180_v60 = vpop.f32.mrf.mxu0  ;;  %v8103_v22 = vadd.f32 %v8102_v49, %v8071_v27 }
 0x5d6   :  { %v8129_v61 = vadd.f32 %v8128_v30, %v8103_v22  ;;  %v7409_v22 = vadd.f32 %v15733_v10, %v7386_v62 }
 0x5d8   :  { %v8154_v56 = vadd.f32 %v8153_v40, %v8129_v61  ;;  %v15846_v1 = vmul.f32 0.5, %v7409_v22 }
 0x5da   :  { %v8181_v41 = vadd.f32 %v8180_v60, %v8154_v56  ;;  %v9334_v43 = vmul.f32 %v15846_v1, %v15846_v1 }
 0x5db   :  { %v8261_v12 = vpop.f32.mrf.mxu3 }
 0x5dc   :  { %v8203_v63 = vpop.f32.mrf.mxu1  ;;  %v8287_v13 = vpop.f32.mrf.mxu0 }
 0x5dd   :  { %v15832_v42 = vadd.f32 %v8203_v63, %v8181_v41  ;;  %v8230_v3 = vpop.f32.mrf.mxu2 }
 0x5de   :  { %v8262_v57 = vadd.f32 %v8261_v12, %v8230_v3 }
 0x5e0   :  { %v8288_v15 = vadd.f32 %v8287_v13, %v8262_v57 }
 0x5e3   :  { %v8362_v50 = vpop.f32.mrf.mxu3 }
 0x5e4   :  { %v8312_v52 = vpop.f32.mrf.mxu1  ;;  %v8389_v58 = vpop.f32.mrf.mxu0 }
 0x5e5   :  { %v8313_v35 = vadd.f32 %v8312_v52, %v8288_v15  ;;  %v8339_v23 = vpop.f32.mrf.mxu2 }
 0x5e7   :  { %v8340_v27 = vadd.f32 %v8339_v23, %v8313_v35 }
 0x5e9   :  { %v8363_v29 = vadd.f32 %v8362_v50, %v8340_v27  ;;  %v7568_v50 = vadd.f32 %v15780_v34, %v7545_v9 }
 0x5eb   :  { %v9326_v25 = vmul.f32 0.5, %v8363_v29  ;;  %v8471_v40 = vpop.f32.mrf.mxu3 }
 0x5ec   :  { %v8420_v44 = vpop.f32.mrf.mxu1  ;;  %v8498_v14 = vpop.f32.mrf.mxu0 }
 0x5ed   :  { %v9340_v30 = vsub.f32 %v9326_v25, %v9333_v59  ;;  %v8421_v49 = vadd.f32 %v8420_v44, %v8389_v58  ;;  %v8446_v60 = vpop.f32.mrf.mxu2 }
 0x5ef   :  { %v9347_v32 = vmax.f32 %v9340_v30, 0.0  ;;  %v8447_v61 = vadd.f32 %v8446_v60, %v8421_v49 }
 0x5f1   :  { %v9354_v56 = vadd.f32 1e-05, %v9347_v32  ;;  %v8472_v51 = vadd.f32 %v8471_v40, %v8447_v61  ;;  %v15853_v40 = vmul.f32 0.5, %v7568_v50 }
 0x5f3   :  { %14071 = vrsqrt.f32 %v9354_v56  ;;  %v8499_v41 = vadd.f32 %v8498_v14, %v8472_v51  ;;  %v8579_v12 = vpop.f32.mrf.mxu3  ;;  %v16174_v14 = vld [vmem:[#allocation32_spill] sm:$0xff]  ;;  %vm9367_vm2 = vweird.f32 %v9354_v56  ;;  %v9335_v49 = vmul.f32 %v15853_v40, %v15853_v40 }
 0x5f4   :  { %v8521_v63 = vpop.f32.mrf.mxu1  ;;  %v8605_v11 = vpop.f32.mrf.mxu0  ;;  %v9431_v30 = vperm.slane %v16174_v14, 5 }
 0x5f5   :  { %v8522_v13 = vadd.f32 %v8521_v63, %v8499_v41  ;;  %v8548_v3 = vpop.f32.mrf.mxu2 }
 0x5f6   :  { %v8580_v57 = vadd.f32 %v8579_v12, %v8548_v3 }
 0x5f7   :  { %v9327_v10 = vmul.f32 0.5, %v8522_v13 }
 0x5f8   :  { %v8606_v58 = vadd.f32 %v8605_v11, %v8580_v57 }
 0x5f9   :  { %v14072_v8 = vpop.eup %14071  ;;  %v9341_v24 = vsub.f32 %v9327_v10, %v9334_v43  ;;  %v16175_v10 = vld [vmem:[#allocation41_spill] sm:$0xff] }
 0x5fa   :  { %v9362_v15 = vmul.f32 %v14072_v8, %v9354_v56  ;;  %vm9368_vm3 = vweird.f32 %v14072_v8 }
 0x5fb   :  { %v9348_v52 = vmax.f32 %v9341_v24, 0.0  ;;  %v8680_v35 = vpop.f32.mrf.mxu3  ;;  %vm9369_vm4 = vmor %vm9367_vm2, %vm9368_vm3 }
 0x5fc   :  { %v9363_v23 = vmul.f32 %v14072_v8, %v9362_v15  ;;  %v8630_v19 = vpop.f32.mrf.mxu1  ;;  %v8707_v27 = vpop.f32.mrf.mxu0 }
 0x5fd   :  { %v9355_v29 = vadd.f32 1e-05, %v9348_v52  ;;  %v8631_v59 = vadd.f32 %v8630_v19, %v8606_v58  ;;  %v8657_v62 = vpop.f32.mrf.mxu2 }
 0x5fe   :  { %v9364_v25 = vmul.f32 0.5, %v9363_v23 }
 0x5ff   :  { %14073 = vrsqrt.f32 %v9355_v29  ;;  %v8658_v28 = vadd.f32 %v8657_v62, %v8631_v59  ;;  %v9432_v59 = vperm.slane %v14467_v47, 5  ;;  %vm9377_vm6 = vweird.f32 %v9355_v29 }
 0x600   :  { %v9365_v45 = vsub.f32 1.5, %v9364_v25 }
 0x601   :  { %v8681_v44 = vadd.f32 %v8680_v35, %v8658_v28 }
 0x602   :  { %v9366_v34 = vmul.f32 %v14072_v8, %v9365_v45  ;;  %v16176_v45 = vld [vmem:[#allocation42_spill] sm:$0xff] }
 0x603   :  { %v9328_v60 = vmul.f32 0.5, %v8681_v44  ;;  %v8789_v22 = vpop.f32.mrf.mxu3 }
 0x604   :  { %v8738_v32 = vpop.f32.mrf.mxu1  ;;  %v9370_v61 = vsel %vm9369_vm4, %v14072_v8, %v9366_v34  ;;  %v8816_v51 = vpop.f32.mrf.mxu0  ;;  %v15864_v8 = vmul.f32 0.5, %v15797_v46 }
 0x605   :  { %v14074_v41 = vpop.eup %14073  ;;  %v9342_v12 = vsub.f32 %v9328_v60, %v9335_v49  ;;  %v8739_v63 = vadd.f32 %v8738_v32, %v8707_v27  ;;  %v8764_v11 = vpop.f32.mrf.mxu2  ;;  %v15858_v13 = vmul.f32 %v9431_v30, %v9370_v61 }
 0x606   :  { %v9372_v3 = vmul.f32 %v14074_v41, %v9355_v29  ;;  %vm9378_vm5 = vweird.f32 %v14074_v41  ;;  %v9336_v25 = vmul.f32 %v15864_v8, %v15864_v8 }
 0x607   :  { %v9349_v43 = vmax.f32 %v9342_v12, 0.0  ;;  %v8765_v9 = vadd.f32 %v8764_v11, %v8739_v63  ;;  %9481 = vmatpush.msrb.mxu0 %v15858_v13  ;;  %vm9379_vm7 = vmor %vm9377_vm6, %vm9378_vm5 }
 0x608   :  { %v9373_v56 = vmul.f32 %v14074_v41, %v9372_v3  ;;  %12934 = vmatmul.msk.f32.vlgmr.msrb.gmra.mxu0 %vm3540_vm10, %v16175_v10 }
 0x609   :  { %v9356_v57 = vadd.f32 1e-05, %v9349_v43  ;;  %v8790_v24 = vadd.f32 %v8789_v22, %v8765_v9  ;;  %v15877_v43 = vmul.f32 0.5, %v15816_v55 }
 0x60a   :  { %v9374_v15 = vmul.f32 0.5, %v9373_v56 }
 0x60b   :  { %14075 = vrsqrt.f32 %v9356_v57  ;;  %v8817_v50 = vadd.f32 %v8816_v51, %v8790_v24  ;;  %v8897_v52 = vpop.f32.mrf.mxu3  ;;  %vm9387_vm9 = vweird.f32 %v9356_v57 }
 0x60c   :  { %v9375_v58 = vsub.f32 1.5, %v9374_v15  ;;  %v8839_v35 = vpop.f32.mrf.mxu1  ;;  %v8923_v23 = vpop.f32.mrf.mxu0  ;;  %v9433_v15 = vperm.slane %v14479_v0, 5 }
 0x60d   :  { %v8840_v19 = vadd.f32 %v8839_v35, %v8817_v50  ;;  %v8866_v27 = vpop.f32.mrf.mxu2 }
 0x60e   :  { %v9376_v62 = vmul.f32 %v14074_v41, %v9375_v58  ;;  %v8898_v46 = vadd.f32 %v8897_v52, %v8866_v27  ;;  %v9337_v52 = vmul.f32 %v15877_v43, %v15877_v43 }
 0x60f   :  { %v9329_v28 = vmul.f32 0.5, %v8840_v19 }
 0x610   :  { %12935 = vmatmul.msk.f32.gmra.mxu0 %vm3540_vm10, %v16176_v45  ;;  %v9380_v44 = vsel %vm9379_vm7, %v14074_v41, %v9376_v62  ;;  %v8924_v32 = vadd.f32 %v8923_v23, %v8898_v46 }
 0x611   :  { %v14076_v30 = vpop.eup %14075  ;;  %v9343_v34 = vsub.f32 %v9329_v28, %v9336_v25  ;;  %v15871_v49 = vmul.f32 %v9432_v59, %v9380_v44 }
 0x612   :  { %v9382_v60 = vmul.f32 %v14076_v30, %v9356_v57  ;;  %vm9388_vm8 = vweird.f32 %v14076_v30 }
 0x613   :  { %v9350_v22 = vmax.f32 %v9343_v34, 0.0  ;;  %9504 = vmatpush.msrb.mxu1 %v15871_v49  ;;  %v8998_v29 = vpop.f32.mrf.mxu3  ;;  %vm9389_vm11 = vmor %vm9387_vm9, %vm9388_vm8 }
 0x614   :  { %v9383_v61 = vmul.f32 %v14076_v30, %v9382_v60  ;;  %v8948_v51 = vpop.f32.mrf.mxu1  ;;  %12936 = vmatmul.msk.f32.vlgmr.msrb.gmra.mxu1 %vm3540_vm10, %v16175_v10  ;;  %v9025_v12 = vpop.f32.mrf.mxu0 }
 0x615   :  { %v9357_v63 = vadd.f32 1e-05, %v9350_v22  ;;  %v8949_v11 = vadd.f32 %v8948_v51, %v8924_v32  ;;  %v8975_v3 = vpop.f32.mrf.mxu2 }
 0x616   :  { %v9384_v41 = vmul.f32 0.5, %v9383_v61 }
 0x617   :  { %14077 = vrsqrt.f32 %v9357_v63  ;;  %v8976_v9 = vadd.f32 %v8975_v3, %v8949_v11  ;;  %vm9397_vm13 = vweird.f32 %v9357_v63 }
 0x618   :  { %v9385_v56 = vsub.f32 1.5, %v9384_v41  ;;  %v9434_v41 = vperm.slane %v16162_v21, 5 }
 0x619   :  { %v8999_v24 = vadd.f32 %v8998_v29, %v8976_v9 }
 0x61a   :  { %v9386_v50 = vmul.f32 %v14076_v30, %v9385_v56 }
 0x61b   :  { %v9330_v58 = vmul.f32 0.5, %v8999_v24  ;;  %v9107_v35 = vpop.f32.mrf.mxu3 }
 0x61c   :  { %v9056_v23 = vpop.f32.mrf.mxu1  ;;  %12937 = vmatmul.msk.f32.gmra.mxu1 %vm3540_vm10, %v16176_v45  ;;  %v9390_v55 = vsel %vm9389_vm11, %v14076_v30, %v9386_v50  ;;  %v9134_v57 = vpop.f32.mrf.mxu0  ;;  %v15890_v30 = vmul.f32 0.5, %v15826_v6  ;;  %v9452_v50 = vperm.slane %v16174_v14, 6 }
 0x61d   :  { %v14078_v19 = vpop.eup %14077  ;;  %v9344_v27 = vsub.f32 %v9330_v58, %v9337_v52  ;;  %v9057_v59 = vadd.f32 %v9056_v23, %v9025_v12  ;;  %v9082_v62 = vpop.f32.mrf.mxu2  ;;  %v15884_v25 = vmul.f32 %v9433_v15, %v9390_v55  ;;  %v9445_v15 = vmul.f32 %v15858_v13, %v15839_v17 }
 0x61e   :  { %v9392_v28 = vmul.f32 %v14078_v19, %v9357_v63  ;;  %vm9398_vm12 = vweird.f32 %v14078_v19  ;;  %v9338_v9 = vmul.f32 %v15890_v30, %v15890_v30 }
 0x61f   :  { %v9351_v46 = vmax.f32 %v9344_v27, 0.0  ;;  %v9083_v44 = vadd.f32 %v9082_v62, %v9057_v59  ;;  %9527 = vmatpush.msra.mxu2 %v15884_v25  ;;  %vm9399_vm14 = vmor %vm9397_vm13, %vm9398_vm12  ;;  %v9459_v62 = vsub.f32 %v9452_v50, %v9445_v15 }
 0x620   :  { %v9393_v34 = vmul.f32 %v14078_v19, %v9392_v28  ;;  %12938 = vmatmul.msk.f32.vlgmr.msra.gmra.mxu2 %vm3540_vm10, %v16175_v10 }
 0x621   :  { %v9358_v60 = vadd.f32 1e-05, %v9351_v46  ;;  %v9108_v22 = vadd.f32 %v9107_v35, %v9083_v44 }
 0x622   :  { %v9394_v32 = vmul.f32 0.5, %v9393_v34  ;;  %v15906_v34 = vmul.f32 0.5, %v15832_v42  ;;  %v9453_v42 = vperm.slane %v14467_v47, 6 }
 0x623   :  { %14079 = vrsqrt.f32 %v9358_v60  ;;  %v9135_v29 = vadd.f32 %v9134_v57, %v9108_v22  ;;  %v9215_v12 = vpop.f32.mrf.mxu3  ;;  %vm9407_vm0 = vweird.f32 %v9358_v60 }
 0x624   :  { %v9395_v61 = vsub.f32 1.5, %v9394_v32  ;;  %v9157_v51 = vpop.f32.mrf.mxu1  ;;  %v9241_v52 = vpop.f32.mrf.mxu0 }
 0x625   :  { %v9158_v11 = vadd.f32 %v9157_v51, %v9135_v29  ;;  %v9184_v3 = vpop.f32.mrf.mxu2 }
 0x626   :  { %v9396_v56 = vmul.f32 %v14078_v19, %v9395_v61  ;;  %v9216_v6 = vadd.f32 %v9215_v12, %v9184_v3  ;;  %v9435_v61 = vperm.slane %v16170_v16, 5  ;;  %v9339_v12 = vmul.f32 %v15906_v34, %v15906_v34 }
 0x627   :  { %v9331_v24 = vmul.f32 0.5, %v9158_v11  ;;  %v9446_v3 = vmul.f32 %v15871_v49, %v15846_v1 }
 0x628   :  { %12939 = vmatmul.msk.f32.gmra.mxu2 %vm3540_vm10, %v16176_v45  ;;  %v9400_v58 = vsel %vm9399_vm14, %v14078_v19, %v9396_v56  ;;  %v9242_v59 = vadd.f32 %v9241_v52, %v9216_v6 }
 0x629   :  { %v14080_v35 = vpop.eup %14079  ;;  %v9345_v23 = vsub.f32 %v9331_v24, %v9338_v9  ;;  %v15900_v55 = vmul.f32 %v9434_v41, %v9400_v58  ;;  %v9460_v50 = vsub.f32 %v9453_v42, %v9446_v3 }
 0x62a   :  { %v9402_v27 = vmul.f32 %v14080_v35, %v9358_v60  ;;  %vm9408_vm15 = vweird.f32 %v14080_v35  ;;  %v9456_v60 = vperm.slane %v16170_v16, 6  ;;  %v9436_v16 = vperm.slane %v16172_v31, 5 }
 0x62b   :  { %v9352_v63 = vmax.f32 %v9345_v23, 0.0  ;;  %9550 = vmatpush.msrb.mxu3 %v15900_v55  ;;  %v9316_v44 = vpop.f32.mrf.mxu3  ;;  %vm9409_vm1 = vmor %vm9407_vm0, %vm9408_vm15 }
 0x62c   :  { %v9403_v28 = vmul.f32 %v14080_v35, %v9402_v27  ;;  %v9266_v57 = vpop.f32.mrf.mxu1  ;;  %12940 = vmatmul.msk.f32.vlgmr.msrb.gmra.mxu3 %vm3540_vm10, %v16175_v10 }
 0x62d   :  { %v9359_v17 = vadd.f32 1e-05, %v9352_v63  ;;  %v9267_v13 = vadd.f32 %v9266_v57, %v9242_v59  ;;  %9642 = vmatpush.msra.mxu3 %v9459_v62  ;;  %v9293_v46 = vpop.f32.mrf.mxu2  ;;  %v9454_v63 = vperm.slane %v14479_v0, 6  ;;  %v9457_v57 = vperm.slane %v16172_v31, 6 }
 0x62e   :  { %v9404_v19 = vmul.f32 0.5, %v9403_v28  ;;  %v9437_v31 = vperm.slane %v16173_v33, 5 }
 0x62f   :  { %14081 = vrsqrt.f32 %v9359_v17  ;;  %v9294_v22 = vadd.f32 %v9293_v46, %v9267_v13  ;;  %vm9417_vm2 = vweird.f32 %v9359_v17 }
 0x630   :  { %v9405_v32 = vsub.f32 1.5, %v9404_v19 }
 0x631   :  { %v9317_v29 = vadd.f32 %v9316_v44, %v9294_v22  ;;  %v9448_v44 = vmul.f32 %v15900_v55, %v15864_v8  ;;  %v9455_v22 = vperm.slane %v16162_v21, 6 }
 0x632   :  { %v9406_v51 = vmul.f32 %v14080_v35, %v9405_v32 }
 0x633   :  { %v9332_v11 = vmul.f32 0.5, %v9317_v29 }
 0x634   :  { %12941 = vmatmul.msk.f32.gmra.mxu3 %vm3540_vm10, %v16176_v45  ;;  %v9410_v41 = vsel %vm9409_vm1, %v14080_v35, %v9406_v51  ;;  %v9462_v51 = vsub.f32 %v9455_v22, %v9448_v44 }
 0x635   :  { %v14082_v9 = vpop.eup %14081  ;;  %v9346_v56 = vsub.f32 %v9332_v11, %v9339_v12  ;;  %v9442_v24 = vmul.f32 %v9435_v61, %v9410_v41  ;;  %v9458_v61 = vperm.slane %v16173_v33, 6 }
 0x636   :  { %v9412_v6 = vmul.f32 %v14082_v9, %v9359_v17  ;;  %vm9418_vm3 = vweird.f32 %v14082_v9 }
 0x637   :  { %v9353_v15 = vmax.f32 %v9346_v56, 0.0  ;;  %9573 = vmatpush.msra.mxu0 %v9442_v24  ;;  %v9449_v52 = vmul.f32 %v9442_v24, %v15877_v43  ;;  %vm9419_vm4 = vmor %vm9417_vm2, %vm9418_vm3  ;;  %v9447_v43 = vmul.f32 %v15884_v25, %v15853_v40 }
 0x638   :  { %v9413_v58 = vmul.f32 %v14082_v9, %v9412_v6  ;;  %12942 = vmatmul.msk.f32.vlgmr.msra.gmra.mxu0 %vm3540_vm10, %v16175_v10 }
 0x639   :  { %v9360_v1 = vadd.f32 1e-05, %v9353_v15  ;;  %9665 = vmatpush.msrb.mxu0 %v9460_v50  ;;  %v9463_v49 = vsub.f32 %v9456_v60, %v9449_v52  ;;  %v9461_v46 = vsub.f32 %v9454_v63, %v9447_v43 }
 0x63a   :  { %v9414_v23 = vmul.f32 0.5, %v9413_v58 }
 0x63b   :  { %14083 = vrsqrt.f32 %v9360_v1  ;;  %9734 = vmatpush.msrb.mxu3 %v9463_v49  ;;  %vm9427_vm6 = vweird.f32 %v9360_v1 }
 0x63c   :  { %v9415_v35 = vsub.f32 1.5, %v9414_v23  ;;  %12948 = vmatmul.msk.f32.vlgmr.msra.gmra.mxu3 %vm3540_vm10, %v16175_v10 }
 0x63e   :  { %v9416_v27 = vmul.f32 %v14082_v9, %v9415_v35 }
 0x640   :  { %12943 = vmatmul.msk.f32.gmra.mxu0 %vm3540_vm10, %v16176_v45  ;;  %v9420_v59 = vsel %vm9419_vm4, %v14082_v9, %v9416_v27 }
 0x641   :  { %v14084_v62 = vpop.eup %14083  ;;  %v9443_v28 = vmul.f32 %v9436_v16, %v9420_v59 }
 0x642   :  { %v9422_v13 = vmul.f32 %v14084_v62, %v9360_v1  ;;  %vm9428_vm5 = vweird.f32 %v14084_v62 }
 0x643   :  { %9596 = vmatpush.msra.mxu1 %v9443_v28  ;;  %v9450_v17 = vmul.f32 %v9443_v28, %v15890_v30  ;;  %vm9429_vm7 = vmor %vm9427_vm6, %vm9428_vm5 }
 0x644   :  { %v9423_v19 = vmul.f32 %v14084_v62, %v9422_v13  ;;  %12944 = vmatmul.msk.f32.vlgmr.msra.gmra.mxu1 %vm3540_vm10, %v16175_v10  ;;  %12949 = vmatmul.msk.f32.gmra.mxu3 %vm3540_vm10, %v16176_v45 }
 0x645   :  { %9688 = vmatpush.msrb.mxu1 %v9461_v46  ;;  %v9464_v0 = vsub.f32 %v9457_v57, %v9450_v17 }
 0x646   :  { %v9424_v40 = vmul.f32 0.5, %v9423_v19 }
 0x647   :  { %9757 = vmatpush.msra.mxu0 %v9464_v0 }
 0x648   :  { %v9425_v25 = vsub.f32 1.5, %v9424_v40  ;;  %12950 = vmatmul.msk.f32.vlgmr.msrb.gmra.mxu0 %vm3540_vm10, %v16175_v10 }
 0x64a   :  { %v9426_v30 = vmul.f32 %v14084_v62, %v9425_v25 }
 0x64c   :  { %12945 = vmatmul.msk.f32.gmra.mxu1 %vm3540_vm10, %v16176_v45  ;;  %12956 = vmatmul.msk.f32.vlgmr.msrb.gmra.mxu3 %vm3540_vm10, %v16175_v10  ;;  %v9430_v32 = vsel %vm9429_vm7, %v14084_v62, %v9426_v30 }
 0x64d   :  { %v9444_v29 = vmul.f32 %v9437_v31, %v9430_v32 }
 0x64f   :  { %9619 = vmatpush.msrb.mxu2 %v9444_v29  ;;  %v9451_v12 = vmul.f32 %v9444_v29, %v15906_v34 }
 0x650   :  { %12946 = vmatmul.msk.f32.vlgmr.msrb.gmra.mxu2 %vm3540_vm10, %v16175_v10  ;;  %12951 = vmatmul.msk.f32.gmra.mxu0 %vm3540_vm10, %v16176_v45 }
 0x651   :  { %9711 = vmatpush.msra.mxu2 %v9462_v51  ;;  %v9465_v21 = vsub.f32 %v9458_v61, %v9451_v12 }
 0x653   :  { %9780 = vmatpush.msra.mxu1 %v9465_v21 }
 0x654   :  { %12952 = vmatmul.msk.f32.vlgmr.msrb.gmra.mxu1 %vm3540_vm10, %v16175_v10  ;;  %12957 = vmatmul.msk.f32.gmra.mxu3 %vm3540_vm10, %v16176_v45 }
 0x658   :  { %12947 = vmatmul.msk.f32.gmra.mxu2 %vm3540_vm10, %v16176_v45  ;;  %12958 = vmatmul.msk.f32.vlgmr.msra.gmra.mxu0 %vm3540_vm10, %v16175_v10 }
 0x65c   :  { %12953 = vmatmul.msk.f32.gmra.mxu1 %vm3540_vm10, %v16176_v45 }
 0x660   :  { %12954 = vmatmul.msk.f32.vlgmr.msra.gmra.mxu2 %vm3540_vm10, %v16175_v10  ;;  %12959 = vmatmul.msk.f32.gmra.mxu0 %vm3540_vm10, %v16176_v45 }
 0x664   :  { %12960 = vmatmul.msk.f32.vlgmr.msra.gmra.mxu1 %vm3540_vm10, %v16175_v10 }
 0x668   :  { %12955 = vmatmul.msk.f32.gmra.mxu2 %vm3540_vm10, %v16176_v45 }
 0x66c   :  { %12961 = vmatmul.msk.f32.gmra.mxu1 %vm3540_vm10, %v16176_v45 }
 0x685   :  { %v9483_v33 = vpop.f32.mrf.mxu0 }
 0x686   :  { %v9788_v9 = vmul.f32 %v9483_v33, %v15333_v4 }
 0x68d   :  { %v9486_v8 = vpop.f32.mrf.mxu0 }
 0x68e   :  { %v9795_v50 = vmul.f32 %v9486_v8, %v15327_v7 }
 0x691   :  { %v9506_v55 = vpop.f32.mrf.mxu1 }
 0x692   :  { %v9789_v15 = vmul.f32 %v9506_v55, %v15393_v53 }
 0x699   :  { %v9509_v42 = vpop.f32.mrf.mxu1 }
 0x69a   :  { %v9796_v16 = vmul.f32 %v9509_v42, %v15383_v54 }
 0x6a3   :  { %v9529_v10 = vpop.f32.mrf.mxu2 }
 0x6a4   :  { %v9790_v7 = vmul.f32 %v9529_v10, %v15423_v2 }
 0x6ab   :  { %v9532_v35 = vpop.f32.mrf.mxu2 }
 0x6ac   :  { %v9797_v40 = vmul.f32 %v9532_v35, %v15415_v38 }
 0x6af   :  { %v9552_v34 = vpop.f32.mrf.mxu3 }
 0x6b0   :  { %v9791_v21 = vmul.f32 %v9552_v34, %v15478_v20 }
 0x6b5   :  { %v9575_v11 = vpop.f32.mrf.mxu0 }
 0x6b6   :  { %v9792_v43 = vmul.f32 %v9575_v11, %v15511_v18 }
 0x6b7   :  { %v9555_v3 = vpop.f32.mrf.mxu3 }
 0x6bd   :  { %v9578_v41 = vpop.f32.mrf.mxu0 }
 0x6be   :  { %v9799_v19 = vmul.f32 %v9578_v41, %v15524_v5 }
 0x6bf   :  { %v9644_v56 = vpop.f32.mrf.mxu3 }
 0x6c0   :  { %v15971_v24 = vadd.f32 %v9788_v9, %v9644_v56  ;;  %v9798_v9 = vmul.f32 %v9555_v3, %v15475_v26 }
 0x6c1   :  { %v9598_v60 = vpop.f32.mrf.mxu1 }
 0x6c2   :  { %v9816_v6 = vmax.f32 %v15971_v24, 0.0  ;;  %v9793_v54 = vmul.f32 %v9598_v60, %v15552_v36 }
 0x6c5   :  { %v9667_v45 = vpop.f32.mrf.mxu0 }
 0x6c6   :  { %v15976_v52 = vadd.f32 %v9789_v15, %v9667_v45 }
 0x6c7   :  { %v9647_v58 = vpop.f32.mrf.mxu3 }
 0x6c8   :  { %v9817_v1 = vmax.f32 %v15976_v52, 0.0  ;;  %v15979_v49 = vadd.f32 %v9795_v50, %v9647_v58 }
 0x6c9   :  { %v9601_v4 = vpop.f32.mrf.mxu1 }
 0x6ca   :  { %v9823_v23 = vmax.f32 %v15979_v49, 0.0  ;;  %v9800_v32 = vmul.f32 %v9601_v4, %v15555_v39 }
 0x6cd   :  { %v9670_v27 = vpop.f32.mrf.mxu0 }
 0x6ce   :  { %v15984_v53 = vadd.f32 %v9796_v16, %v9670_v27 }
 0x6cf   :  { %v9736_v63 = vpop.f32.mrf.mxu3 }
 0x6d0   :  { %v9824_v59 = vmax.f32 %v15984_v53, 0.0  ;;  %v15988_v62 = vadd.f32 %v9792_v43, %v9736_v63 }
 0x6d1   :  { %v9690_v28 = vpop.f32.mrf.mxu1 }
 0x6d2   :  { %v9820_v57 = vmax.f32 %v15988_v62, 0.0  ;;  %v15991_v13 = vadd.f32 %v9790_v7, %v9690_v28 }
 0x6d3   :  { %v9621_v46 = vpop.f32.mrf.mxu2 }
 0x6d4   :  { %v9818_v17 = vmax.f32 %v15991_v13, 0.0  ;;  %v9794_v51 = vmul.f32 %v9621_v46, %v15578_v37 }
 0x6d5   :  { %v9759_v18 = vpop.f32.mrf.mxu0 }
 0x6d6   :  { %v15996_v0 = vadd.f32 %v9793_v54, %v9759_v18 }
 0x6d7   :  { %v9739_v2 = vpop.f32.mrf.mxu3 }
 0x6d8   :  { %v9821_v25 = vmax.f32 %v15996_v0, 0.0  ;;  %v16000_v31 = vadd.f32 %v9799_v19, %v9739_v2 }
 0x6d9   :  { %v9693_v30 = vpop.f32.mrf.mxu1 }
 0x6da   :  { %v9827_v44 = vmax.f32 %v16000_v31, 0.0  ;;  %v16003_v22 = vadd.f32 %v9797_v40, %v9693_v30 }
 0x6db   :  { %v9624_v36 = vpop.f32.mrf.mxu2 }
 0x6dc   :  { %v9825_v29 = vmax.f32 %v16003_v22, 0.0  ;;  %v9801_v42 = vmul.f32 %v9624_v36, %v15583_v48 }
 0x6dd   :  { %v9762_v5 = vpop.f32.mrf.mxu0 }
 0x6de   :  { %v16007_v61 = vadd.f32 %v9800_v32, %v9762_v5 }
 0x6e0   :  { %v9828_v38 = vmax.f32 %v16007_v61, 0.0 }
 0x6e1   :  { %v9782_v12 = vpop.f32.mrf.mxu1 }
 0x6e2   :  { %v16012_v33 = vadd.f32 %v9794_v51, %v9782_v12 }
 0x6e3   :  { %v9713_v8 = vpop.f32.mrf.mxu2 }
 0x6e4   :  { %v9822_v55 = vmax.f32 %v16012_v33, 0.0  ;;  %v16015_v11 = vadd.f32 %v9791_v21, %v9713_v8 }
 0x6e6   :  { %v9819_v39 = vmax.f32 %v16015_v11, 0.0 }
 0x6e9   :  { %v9785_v41 = vpop.f32.mrf.mxu1 }
 0x6ea   :  { %v16020_v37 = vadd.f32 %v9801_v42, %v9785_v41 }
 0x6eb   :  { %v9716_v56 = vpop.f32.mrf.mxu2 }
 0x6ec   :  { %v9829_v10 = vmax.f32 %v16020_v37, 0.0  ;;  %v16023_v20 = vadd.f32 %v9798_v9, %v9716_v56 }
 0x6ee   :  { %v9826_v34 = vmax.f32 %v16023_v20, 0.0 }
 0x6ef   :  { %14236 = dma.done.wait [#allocation4 + $0x1], 14336 }
 0x6f0   :  { %14237 = vsyncadd [#allocation4 + $0x1], 4294952960  ;;  %v13020_v60 = vld [vmem:[#allocation3 + $0x70] sm:$0xf]  ;;  %v13931_v15 = vld [vmem:[#allocation3 + $0x74] sm:$0xf0] }
 0x6f1   :  { %v13084_v45 = vld [vmem:[#allocation3 + $0xf0] sm:$0xf]  ;;  %v13021_v50 = vor.u32 %v13931_v15, %v13020_v60  ;;  %v13947_v58 = vld [vmem:[#allocation3 + $0xf4] sm:$0xf0]  ;;  %v13012_v48 = vld [vmem:[#allocation3 + $0x60] sm:$0xf] }
 0x6f2   :  { %v13929_v4 = vld [vmem:[#allocation3 + $0x64] sm:$0xf0]  ;;  %v13085_v35 = vor.u32 %v13947_v58, %v13084_v45  ;;  %v13076_v26 = vld [vmem:[#allocation3 + $0xe0] sm:$0xf]  ;;  %v13004_v27 = vld [vmem:[#allocation3 + $0x50] sm:$0xf] }
 0x6f3   :  { %v13945_v3 = vld [vmem:[#allocation3 + $0xe4] sm:$0xf0]  ;;  %10514 = vmatpush.bf16.msrb.mxu2 %v13021_v50  ;;  %v13013_v16 = vor.u32 %v13929_v4, %v13012_v48  ;;  %v13927_v63 = vld [vmem:[#allocation3 + $0x54] sm:$0xf0]  ;;  %v13148_v7 = vld [vmem:[#allocation3 + $0x170] sm:$0xf] }
 0x6f4   :  { %10528 = vmatpush.bf16.msra.mxu3 %v13085_v35  ;;  %v13077_v43 = vor.u32 %v13945_v3, %v13076_v26  ;;  %v13963_v28 = vld [vmem:[#allocation3 + $0x174] sm:$0xf0]  ;;  %v13068_v46 = vld [vmem:[#allocation3 + $0xd0] sm:$0xf]  ;;  %v13140_v19 = vld [vmem:[#allocation3 + $0x160] sm:$0xf]  ;;  %v13005_v40 = vor.u32 %v13927_v63, %v13004_v27 }
 0x6f5   :  { %v13943_v54 = vld [vmem:[#allocation3 + $0xd4] sm:$0xf0]  ;;  %v13149_v18 = vor.u32 %v13963_v28, %v13148_v7  ;;  %v13961_v2 = vld [vmem:[#allocation3 + $0x164] sm:$0xf0]  ;;  %v12996_v30 = vld [vmem:[#allocation3 + $0x40] sm:$0xf] }
 0x6f6   :  { %v13925_v36 = vld [vmem:[#allocation3 + $0x44] sm:$0xf0]  ;;  %v13141_v32 = vor.u32 %v13961_v2, %v13140_v19  ;;  %v13069_v5 = vor.u32 %v13943_v54, %v13068_v46  ;;  %v13212_v51 = vld [vmem:[#allocation3 + $0x1f0] sm:$0xf]  ;;  %v13979_v12 = vld [vmem:[#allocation3 + $0x1f4] sm:$0xf0] }
 0x6f7   :  { %10515 = vmatpush.bf16.msrb.mxu2 %v13013_v16  ;;  %10542 = vmatpush.bf16.msrb.mxu0 %v13149_v18  ;;  %v13132_v21 = vld [vmem:[#allocation3 + $0x150] sm:$0xf]  ;;  %v13060_v8 = vld [vmem:[#allocation3 + $0xc0] sm:$0xf]  ;;  %v13941_v42 = vld [vmem:[#allocation3 + $0xc4] sm:$0xf0]  ;;  %v13213_v41 = vor.u32 %v13979_v12, %v13212_v51  ;;  %v12997_v60 = vor.u32 %v13925_v36, %v12996_v30 }
 0x6f8   :  { %10529 = vmatpush.bf16.msra.mxu3 %v13077_v43  ;;  %v13959_v9 = vld [vmem:[#allocation3 + $0x154] sm:$0xf0]  ;;  %v13204_v56 = vld [vmem:[#allocation3 + $0x1e0] sm:$0xf]  ;;  %v12988_v15 = vld [vmem:[#allocation3 + $0x30] sm:$0xf]  ;;  %v13061_v48 = vor.u32 %v13941_v42, %v13060_v8 }
 0x6f9   :  { %v13923_v45 = vld [vmem:[#allocation3 + $0x34] sm:$0xf0]  ;;  %v13133_v50 = vor.u32 %v13959_v9, %v13132_v21  ;;  %v13977_v58 = vld [vmem:[#allocation3 + $0x1e4] sm:$0xf0]  ;;  %v13052_v4 = vld [vmem:[#allocation3 + $0xb0] sm:$0xf]  ;;  %10556 = vmatpush.bf16.msrb.mxu1 %v13213_v41 }
 0x6fa   :  { %v13205_v35 = vor.u32 %v13977_v58, %v13204_v56  ;;  %v13124_v26 = vld [vmem:[#allocation3 + $0x140] sm:$0xf]  ;;  %v13957_v3 = vld [vmem:[#allocation3 + $0x144] sm:$0xf0]  ;;  %v13939_v16 = vld [vmem:[#allocation3 + $0xb4] sm:$0xf0]  ;;  %v12989_v63 = vor.u32 %v13923_v45, %v12988_v15 }
 0x6fb   :  { %10516 = vmatpush.bf16.msrb.mxu2 %v13005_v40  ;;  %10543 = vmatpush.bf16.msrb.mxu0 %v13141_v32  ;;  %v13196_v27 = vld [vmem:[#allocation3 + $0x1d0] sm:$0xf]  ;;  %v13975_v43 = vld [vmem:[#allocation3 + $0x1d4] sm:$0xf0]  ;;  %v12980_v7 = vld [vmem:[#allocation3 + $0x20] sm:$0xf]  ;;  %v13125_v46 = vor.u32 %v13957_v3, %v13124_v26  ;;  %v13053_v54 = vor.u32 %v13939_v16, %v13052_v4 }
 0x6fc   :  { %10530 = vmatpush.bf16.msra.mxu3 %v13069_v5  ;;  %v13921_v28 = vld [vmem:[#allocation3 + $0x24] sm:$0xf0]  ;;  %v13044_v18 = vld [vmem:[#allocation3 + $0xa0] sm:$0xf]  ;;  %v13197_v19 = vor.u32 %v13975_v43, %v13196_v27  ;;  %v13116_v2 = vld [vmem:[#allocation3 + $0x130] sm:$0xf] }
 0x6fd   :  { %10557 = vmatpush.bf16.msrb.mxu1 %v13205_v35  ;;  %v13955_v40 = vld [vmem:[#allocation3 + $0x134] sm:$0xf0]  ;;  %v13937_v30 = vld [vmem:[#allocation3 + $0xa4] sm:$0xf0]  ;;  %v13188_v36 = vld [vmem:[#allocation3 + $0x1c0] sm:$0xf]  ;;  %v12981_v5 = vor.u32 %v13921_v28, %v12980_v7 }
 0x6fe   :  { %v13973_v32 = vld [vmem:[#allocation3 + $0x1c4] sm:$0xf0]  ;;  %v12972_v51 = vld [vmem:[#allocation3 + $0x10] sm:$0xf]  ;;  %v13919_v12 = vld [vmem:[#allocation3 + $0x14] sm:$0xf0]  ;;  %v13117_v21 = vor.u32 %v13955_v40, %v13116_v2  ;;  %v13045_v8 = vor.u32 %v13937_v30, %v13044_v18 }
 0x6ff   :  { %10517 = vmatpush.bf16.msrb.mxu2 %v12997_v60  ;;  %10544 = vmatpush.bf16.msrb.mxu0 %v13133_v50  ;;  %v13036_v42 = vld [vmem:[#allocation3 + $0x90] sm:$0xf]  ;;  %v13189_v41 = vor.u32 %v13973_v32, %v13188_v36  ;;  %v13108_v9 = vld [vmem:[#allocation3 + $0x120] sm:$0xf]  ;;  %v13953_v56 = vld [vmem:[#allocation3 + $0x124] sm:$0xf0]  ;;  %v12973_v50 = vor.u32 %v13919_v12, %v12972_v51 }
 0x700   :  { %10531 = vmatpush.bf16.msra.mxu3 %v13061_v48  ;;  %v13935_v60 = vld [vmem:[#allocation3 + $0x94] sm:$0xf0]  ;;  %v13180_v15 = vld [vmem:[#allocation3 + $0x1b0] sm:$0xf]  ;;  %v12964_v58 = vld [vmem:[#allocation3] sm:$0xf]  ;;  %v13109_v35 = vor.u32 %v13953_v56, %v13108_v9 }
 0x701   :  { %10558 = vmatpush.bf16.msrb.mxu1 %v13197_v19  ;;  %v13971_v45 = vld [vmem:[#allocation3 + $0x1b4] sm:$0xf0]  ;;  %v13917_v48 = vld [vmem:[#allocation3 + $0x4] sm:$0xf0]  ;;  %v13028_v4 = vld [vmem:[#allocation3 + $0x80] sm:$0xf]  ;;  %v13037_v26 = vor.u32 %v13935_v60, %v13036_v42 }
 0x702   :  { %v13933_v3 = vld [vmem:[#allocation3 + $0x84] sm:$0xf0]  ;;  %v13181_v16 = vor.u32 %v13971_v45, %v13180_v15  ;;  %v13100_v27 = vld [vmem:[#allocation3 + $0x110] sm:$0xf]  ;;  %v13951_v43 = vld [vmem:[#allocation3 + $0x114] sm:$0xf0]  ;;  %v12965_v19 = vor.u32 %v13917_v48, %v12964_v58  ;;  %v16030_v15 = vpack.c.bf16 %v9823_v23, %v9816_v6 }
 0x703   :  { %10518 = vmatpush.bf16.msrb.mxu2 %v12989_v63  ;;  %10545 = vmatpush.bf16.msrb.mxu0 %v13125_v46  ;;  %v13276_v63 = vld [vmem:[#allocation3 + $0x270] sm:$0xf]  ;;  %v13995_v7 = vld [vmem:[#allocation3 + $0x274] sm:$0xf0]  ;;  %v13969_v18 = vld [vmem:[#allocation3 + $0x1a4] sm:$0xf0]  ;;  %v13101_v40 = vor.u32 %v13951_v43, %v13100_v27  ;;  %v13029_v30 = vor.u32 %v13933_v3, %v13028_v4 }
 0x704   :  { %10532 = vmatpush.bf16.msra.mxu3 %v13053_v54  ;;  %v13340_v28 = vld [vmem:[#allocation3 + $0x2f0] sm:$0xf]  ;;  %v14011_v46 = vld [vmem:[#allocation3 + $0x2f4] sm:$0xf0]  ;;  %v13172_v54 = vld [vmem:[#allocation3 + $0x1a0] sm:$0xf]  ;;  %v13277_v36 = vor.u32 %v13995_v7, %v13276_v63 }
 0x705   :  { %10559 = vmatpush.bf16.msrb.mxu1 %v13189_v41  ;;  %v13268_v2 = vld [vmem:[#allocation3 + $0x260] sm:$0xf]  ;;  %v13993_v32 = vld [vmem:[#allocation3 + $0x264] sm:$0xf0]  ;;  %v13341_v12 = vor.u32 %v14011_v46, %v13340_v28  ;;  %v13404_v42 = vld [vmem:[#allocation3 + $0x370] sm:$0xf] }
 0x706   :  { %v13949_v51 = vld [vmem:[#allocation3 + $0x104] sm:$0xf0]  ;;  %v14027_v41 = vld [vmem:[#allocation3 + $0x374] sm:$0xf0]  ;;  %v13164_v56 = vld [vmem:[#allocation3 + $0x190] sm:$0xf]  ;;  %v13269_v58 = vor.u32 %v13993_v32, %v13268_v2 }
 0x707   :  { %10519 = vmatpush.bf16.msrb.mxu2 %v12981_v5  ;;  %10546 = vmatpush.bf16.msrb.mxu0 %v13117_v21  ;;  %v13092_v5 = vld [vmem:[#allocation3 + $0x100] sm:$0xf]  ;;  %v14009_v9 = vld [vmem:[#allocation3 + $0x2e4] sm:$0xf0]  ;;  %v13967_v60 = vld [vmem:[#allocation3 + $0x194] sm:$0xf0] }
 0x708   :  { %10533 = vmatpush.bf16.msra.mxu3 %v13045_v8  ;;  %v13332_v21 = vld [vmem:[#allocation3 + $0x2e0] sm:$0xf]  ;;  %v13173_v8 = vor.u32 %v13969_v18, %v13172_v54  ;;  %v13093_v45 = vor.u32 %v13949_v51, %v13092_v5  ;;  %v13260_v48 = vld [vmem:[#allocation3 + $0x250] sm:$0xf]  ;;  %v13991_v4 = vld [vmem:[#allocation3 + $0x254] sm:$0xf0]  ;;  %v13165_v49 = vor.u32 %v13967_v60, %v13164_v56 }
 0x709   :  { %10560 = vmatpush.bf16.msrb.mxu1 %v13181_v16  ;;  %v13333_v24 = vor.u32 %v14009_v9, %v13332_v21  ;;  %v13324_v6 = vld [vmem:[#allocation3 + $0x2d0] sm:$0xf]  ;;  %v13396_v23 = vld [vmem:[#allocation3 + $0x360] sm:$0xf]  ;;  %v14007_v3 = vld [vmem:[#allocation3 + $0x2d4] sm:$0xf0]  ;;  %v13261_v27 = vor.u32 %v13991_v4, %v13260_v48 }
 0x70a   :  { %v13156_v52 = vld [vmem:[#allocation3 + $0x180] sm:$0xf]  ;;  %v13965_v53 = vld [vmem:[#allocation3 + $0x184] sm:$0xf0]  ;;  %v13022_v16 = vld [vmem:[#allocation3 + $0x78] sm:$0xf0]  ;;  %v13325_v7 = vor.u32 %v14007_v3, %v13324_v6 }
 0x70b   :  { %10520 = vmatpush.bf16.msrb.mxu2 %v12973_v50  ;;  %10547 = vmatpush.bf16.msrb.mxu0 %v13109_v35  ;;  %v16036_v50 = vpack.c.bf16 %v9824_v59, %v9817_v1  ;;  %v13405_v35 = vor.u32 %v14027_v41, %v13404_v42  ;;  %v16043_v1 = vpack.c.bf16 %v9825_v29, %v9818_v17  ;;  %v13930_v59 = vld [vmem:[#allocation3 + $0x74] sm:$0xf]  ;;  %v13252_v43 = vld [vmem:[#allocation3 + $0x240] sm:$0xf]  ;;  %v13989_v28 = vld [vmem:[#allocation3 + $0x244] sm:$0xf0] }
 0x70c   :  { %10534 = vmatpush.bf16.msra.mxu3 %v13037_v26  ;;  %v14025_v26 = vld [vmem:[#allocation3 + $0x364] sm:$0xf0]  ;;  %v13157_v46 = vor.u32 %v13965_v53, %v13156_v52  ;;  %v13388_v13 = vld [vmem:[#allocation3 + $0x350] sm:$0xf]  ;;  %v14023_v54 = vld [vmem:[#allocation3 + $0x354] sm:$0xf0]  ;;  %v13025_v29 = vor.u32 %v13930_v59, %v13022_v16  ;;  %v13253_v2 = vor.u32 %v13989_v28, %v13252_v43 }
 0x70d   :  { %10561 = vmatpush.bf16.msrb.mxu1 %v13173_v8  ;;  %v13397_v63 = vor.u32 %v14025_v26, %v13396_v23  ;;  %v13316_v22 = vld [vmem:[#allocation3 + $0x2c0] sm:$0xf]  ;;  %v14005_v17 = vld [vmem:[#allocation3 + $0x2c4] sm:$0xf0]  ;;  %v13928_v18 = vld [vmem:[#allocation3 + $0x64] sm:$0xf] }
 0x70e   :  { %v13987_v32 = vld [vmem:[#allocation3 + $0x234] sm:$0xf0]  ;;  %v13380_v5 = vld [vmem:[#allocation3 + $0x340] sm:$0xf]  ;;  %v14021_v51 = vld [vmem:[#allocation3 + $0x344] sm:$0xf0] }
 0x70f   :  { %10521 = vmatpush.bf16.msrb.mxu2 %v12965_v19  ;;  %10548 = vmatpush.bf16.msrb.mxu0 %v13101_v40  ;;  %v13014_v19 = vld [vmem:[#allocation3 + $0x68] sm:$0xf0]  ;;  %v13244_v40 = vld [vmem:[#allocation3 + $0x230] sm:$0xf]  ;;  %v14003_v8 = vld [vmem:[#allocation3 + $0x2b4] sm:$0xf0] }
 0x710   :  { %10535 = vmatpush.bf16.msra.mxu3 %v13029_v30  ;;  %v13389_v30 = vor.u32 %v14023_v54, %v13388_v13  ;;  %v13308_v21 = vld [vmem:[#allocation3 + $0x2b0] sm:$0xf]  ;;  %v13017_v42 = vor.u32 %v13928_v18, %v13014_v19  ;;  %v13926_v41 = vld [vmem:[#allocation3 + $0x54] sm:$0xf]  ;;  %v13006_v9 = vld [vmem:[#allocation3 + $0x58] sm:$0xf0]  ;;  %v13245_v56 = vor.u32 %v13987_v32, %v13244_v40 }
 0x711   :  { %10562 = vmatpush.bf16.msrb.mxu1 %v13165_v49  ;;  %v13236_v60 = vld [vmem:[#allocation3 + $0x220] sm:$0xf]  ;;  %v13985_v48 = vld [vmem:[#allocation3 + $0x224] sm:$0xf0]  ;;  %v13372_v4 = vld [vmem:[#allocation3 + $0x330] sm:$0xf] }
 0x712   :  { %10522 = vmatmul.bf16.vlgmr.msrb.gmra.mxu2 %v16030_v15  ;;  %v14019_v11 = vld [vmem:[#allocation3 + $0x334] sm:$0xf0]  ;;  %v14001_v20 = vld [vmem:[#allocation3 + $0x2a4] sm:$0xf0]  ;;  %v13237_v6 = vor.u32 %v13985_v48, %v13236_v60  ;;  %v13228_v49 = vld [vmem:[#allocation3 + $0x210] sm:$0xf] }
 0x713   :  { %10570 = vmatpush.bf16.msra.mxu2 %v13277_v36  ;;  %10549 = vmatpush.bf16.msrb.mxu0 %v13093_v45  ;;  %v13317_v36 = vor.u32 %v14005_v17, %v13316_v22  ;;  %v13381_v45 = vor.u32 %v14021_v51, %v13380_v5  ;;  %v13373_v23 = vor.u32 %v14019_v11, %v13372_v4  ;;  %v13983_v3 = vld [vmem:[#allocation3 + $0x214] sm:$0xf0]  ;;  %v13364_v52 = vld [vmem:[#allocation3 + $0x320] sm:$0xf]  ;;  %v14017_v53 = vld [vmem:[#allocation3 + $0x324] sm:$0xf0] }
 0x714   :  { %10584 = vmatpush.bf16.msrb.mxu3 %v13341_v12  ;;  %v16051_v12 = vpack.c.bf16 %v9826_v34, %v9819_v39  ;;  %v13300_v39 = vld [vmem:[#allocation3 + $0x2a0] sm:$0xf]  ;;  %v13009_v34 = vor.u32 %v13926_v41, %v13006_v9  ;;  %v13292_v59 = vld [vmem:[#allocation3 + $0x290] sm:$0xf]  ;;  %v13999_v16 = vld [vmem:[#allocation3 + $0x294] sm:$0xf0]  ;;  %v13365_v54 = vor.u32 %v14017_v53, %v13364_v52 }
 0x715   :  { %10536 = vmatmul.bf16.vlgmr.msra.gmra.mxu3 %v16036_v50  ;;  %10563 = vmatpush.bf16.msrb.mxu1 %v13157_v46  ;;  %v13301_v26 = vor.u32 %v14001_v20, %v13300_v39  ;;  %v13922_v43 = vld [vmem:[#allocation3 + $0x34] sm:$0xf]  ;;  %v13220_v28 = vld [vmem:[#allocation3 + $0x200] sm:$0xf]  ;;  %v13981_v46 = vld [vmem:[#allocation3 + $0x204] sm:$0xf0]  ;;  %v13293_v22 = vor.u32 %v13999_v16, %v13292_v59 }
 0x716   :  { %10550 = vmatmul.bf16.vlgmr.msrb.gmra.mxu0 %v16043_v1  ;;  %v13284_v13 = vld [vmem:[#allocation3 + $0x280] sm:$0xf]  ;;  %v13997_v17 = vld [vmem:[#allocation3 + $0x284] sm:$0xf0]  ;;  %v14015_v18 = vld [vmem:[#allocation3 + $0x314] sm:$0xf0]  ;;  %v13221_v51 = vor.u32 %v13981_v46, %v13220_v28 }
 0x717   :  { %10571 = vmatpush.bf16.msra.mxu2 %v13269_v58  ;;  %10598 = vmatpush.bf16.msra.mxu0 %v13405_v35  ;;  %v13309_v58 = vor.u32 %v14003_v8, %v13308_v21  ;;  %v13924_v35 = vld [vmem:[#allocation3 + $0x44] sm:$0xf]  ;;  %v13946_v19 = vld [vmem:[#allocation3 + $0xf4] sm:$0xf]  ;;  %v12982_v5 = vld [vmem:[#allocation3 + $0x28] sm:$0xf0] }
 0x718   :  { %10585 = vmatpush.bf16.msrb.mxu3 %v13333_v24  ;;  %10564 = vmatmul.bf16.vlgmr.msrb.gmra.mxu1 %v16051_v12  ;;  %v12998_v24 = vld [vmem:[#allocation3 + $0x48] sm:$0xf0]  ;;  %v13962_v40 = vld [vmem:[#allocation3 + $0x174] sm:$0xf]  ;;  %v13920_v32 = vld [vmem:[#allocation3 + $0x24] sm:$0xf] }
 0x719   :  { %10612 = vmatpush.bf16.msra.mxu1 %v13025_v29  ;;  %v13356_v29 = vld [vmem:[#allocation3 + $0x310] sm:$0xf]  ;;  %v13944_v21 = vld [vmem:[#allocation3 + $0xe4] sm:$0xf]  ;;  %v13078_v9 = vld [vmem:[#allocation3 + $0xe8] sm:$0xf0]  ;;  %v12985_v4 = vor.u32 %v13920_v32, %v12982_v5 }
 0x71a   :  { %v13357_v8 = vor.u32 %v14015_v18, %v13356_v29  ;;  %v14013_v60 = vld [vmem:[#allocation3 + $0x304] sm:$0xf0]  ;;  %v13960_v48 = vld [vmem:[#allocation3 + $0x164] sm:$0xf]  ;;  %v13978_v11 = vld [vmem:[#allocation3 + $0x1f4] sm:$0xf] }
 0x71b   :  { %10572 = vmatpush.bf16.msra.mxu2 %v13261_v27  ;;  %10599 = vmatpush.bf16.msra.mxu0 %v13397_v63  ;;  %v13001_v27 = vor.u32 %v13924_v35, %v12998_v24  ;;  %v12990_v63 = vld [vmem:[#allocation3 + $0x38] sm:$0xf0]  ;;  %v13142_v35 = vld [vmem:[#allocation3 + $0x168] sm:$0xf0]  ;;  %v13918_v24 = vld [vmem:[#allocation3 + $0x14] sm:$0xf] }
 0x71c   :  { %10586 = vmatpush.bf16.msrb.mxu3 %v13325_v7  ;;  %v13229_v7 = vor.u32 %v13983_v3, %v13228_v49  ;;  %v13214_v39 = vld [vmem:[#allocation3 + $0x1f8] sm:$0xf0]  ;;  %v16065_v49 = vpack.c.bf16 %v9828_v38, %v9821_v25  ;;  %v13942_v62 = vld [vmem:[#allocation3 + $0xd4] sm:$0xf]  ;;  %v13976_v53 = vld [vmem:[#allocation3 + $0x1e4] sm:$0xf]  ;;  %v16072_v25 = vpack.c.bf16 %v9829_v10, %v9822_v55 }
 0x71d   :  { %10613 = vmatpush.bf16.msra.mxu1 %v13017_v42  ;;  %v13285_v42 = vor.u32 %v13997_v17, %v13284_v13  ;;  %v16177_v20 = vld [vmem:[#allocation26_spill] sm:$0xff]  ;;  %v13217_v31 = vor.u32 %v13978_v11, %v13214_v39  ;;  %v13206_v59 = vld [vmem:[#allocation3 + $0x1e8] sm:$0xf0]  ;;  %v13994_v16 = vld [vmem:[#allocation3 + $0x274] sm:$0xf]  ;;  %s10763_s27 = sshll.u32 %s16106_s10, 4  ;;  %s10764_s27 = int_to_ptr.hbm [resolvable:$true] %s10763_s27 }
 0x71e   :  { %v13070_v3 = vld [vmem:[#allocation3 + $0xd8] sm:$0xf0]  ;;  %v13916_v61 = vld [vmem:[#allocation3 + $0x4] sm:$0xf]  ;;  %v12966_v38 = vld [vmem:[#allocation3 + $0x8] sm:$0xf0] }
 0x71f   :  { %10573 = vmatpush.bf16.msra.mxu2 %v13253_v2  ;;  %10600 = vmatpush.bf16.msra.mxu0 %v13389_v30  ;;  %v13086_v2 = vld [vmem:[#allocation3 + $0xf8] sm:$0xf0]  ;;  %v12993_v30 = vor.u32 %v13922_v43, %v12990_v63  ;;  %v13073_v43 = vor.u32 %v13942_v62, %v13070_v3  ;;  %v13940_v63 = vld [vmem:[#allocation3 + $0xc4] sm:$0xf]  ;;  %v13062_v33 = vld [vmem:[#allocation3 + $0xc8] sm:$0xf0]  ;;  %v12969_v46 = vor.u32 %v13916_v61, %v12966_v38 }
 0x720   :  { %10587 = vmatpush.bf16.msrb.mxu3 %v13317_v36  ;;  %v13150_v36 = vld [vmem:[#allocation3 + $0x178] sm:$0xf0]  ;;  %v13089_v41 = vor.u32 %v13946_v19, %v13086_v2  ;;  %v13974_v37 = vld [vmem:[#allocation3 + $0x1d4] sm:$0xf]  ;;  %v13956_v10 = vld [vmem:[#allocation3 + $0x144] sm:$0xf]  ;;  %v13065_v18 = vor.u32 %v13940_v63, %v13062_v33 }
 0x721   :  { %10614 = vmatpush.bf16.msra.mxu1 %v13009_v34  ;;  %v16059_v34 = vpack.c.bf16 %v9827_v44, %v9820_v57  ;;  %v13145_v57 = vor.u32 %v13960_v48, %v13142_v35  ;;  %v13958_v44 = vld [vmem:[#allocation3 + $0x154] sm:$0xf]  ;;  %v13134_v0 = vld [vmem:[#allocation3 + $0x158] sm:$0xf0]  ;;  %v13126_v13 = vld [vmem:[#allocation3 + $0x148] sm:$0xf0] }
 0x722   :  { %v13137_v28 = vor.u32 %v13958_v44, %v13134_v0  ;;  %v13198_v55 = vld [vmem:[#allocation3 + $0x1d8] sm:$0xf0]  ;;  %v13992_v17 = vld [vmem:[#allocation3 + $0x264] sm:$0xf]  ;;  %v13270_v29 = vld [vmem:[#allocation3 + $0x268] sm:$0xf0] }
 0x723   :  { %10574 = vmatpush.bf16.msra.mxu2 %v13245_v56  ;;  %10601 = vmatpush.bf16.msra.mxu0 %v13381_v45  ;;  %v13348_v56 = vld [vmem:[#allocation3 + $0x300] sm:$0xf]  ;;  %v14253_v45 = vmov 3   ;;  %v13938_v19 = vld [vmem:[#allocation3 + $0xb4] sm:$0xf]  ;;  %v13201_v2 = vor.u32 %v13974_v37, %v13198_v55  ;;  %s14254_s28 = smov [#allocation11]  }
 0x724   :  { %10588 = vmatpush.bf16.msrb.mxu3 %v13309_v58  ;;  %14085 = vset.pattern.permute.xlu0 %v14253_v45  ;;  %v13153_v58 = vor.u32 %v13962_v40, %v13150_v36  ;;  %v13129_v40 = vor.u32 %v13956_v10, %v13126_v13  ;;  %v13972_v36 = vld [vmem:[#allocation3 + $0x1c4] sm:$0xf]  ;;  %v13190_v32 = vld [vmem:[#allocation3 + $0x1c8] sm:$0xf0]  ;;  %v13954_v5 = vld [vmem:[#allocation3 + $0x134] sm:$0xf] }
 0x725   :  { %10615 = vmatpush.bf16.msra.mxu1 %v13001_v27  ;;  %10724 = vperm.xlu0 %14085, %v16177_v20   ;;  %v13278_v27 = vld [vmem:[#allocation3 + $0x278] sm:$0xf0]  ;;  %v13046_v45 = vld [vmem:[#allocation3 + $0xa8] sm:$0xf0]  ;;  %v13988_v20 = vld [vmem:[#allocation3 + $0x244] sm:$0xf] }
 0x726   :  { %v13182_v48 = vld [vmem:[#allocation3 + $0x1b8] sm:$0xf0]  ;;  %v13110_v11 = vld [vmem:[#allocation3 + $0x128] sm:$0xf0]  ;;  %v13968_v3 = vld [vmem:[#allocation3 + $0x1a4] sm:$0xf] }
 0x727   :  { %10575 = vmatpush.bf16.msra.mxu2 %v13237_v6  ;;  %10602 = vmatpush.bf16.msra.mxu0 %v13373_v23  ;;  %v12974_v6 = vld [vmem:[#allocation3 + $0x18] sm:$0xf0]  ;;  %v13349_v23 = vor.u32 %v14013_v60, %v13348_v56  ;;  %v13193_v56 = vor.u32 %v13972_v36, %v13190_v32  ;;  %v13254_v35 = vld [vmem:[#allocation3 + $0x248] sm:$0xf0]  ;;  %v13932_v0 = vld [vmem:[#allocation3 + $0x84] sm:$0xf] }
 0x728   :  { %10589 = vmatpush.bf16.msrb.mxu3 %v13301_v26  ;;  %v13081_v26 = vor.u32 %v13944_v21, %v13078_v9  ;;  %v12977_v52 = vor.u32 %v13918_v24, %v12974_v6  ;;  %v13273_v21 = vor.u32 %v13992_v17, %v13270_v29  ;;  %v13936_v9 = vld [vmem:[#allocation3 + $0xa4] sm:$0xf]  ;;  %v13934_v6 = vld [vmem:[#allocation3 + $0x94] sm:$0xf]  ;;  %v13038_v62 = vld [vmem:[#allocation3 + $0x98] sm:$0xf0] }
 0x729   :  { %10616 = vmatpush.bf16.msra.mxu1 %v12993_v30  ;;  %v13054_v30 = vld [vmem:[#allocation3 + $0xb8] sm:$0xf0]  ;;  %v13049_v24 = vor.u32 %v13936_v9, %v13046_v45  ;;  %v13030_v61 = vld [vmem:[#allocation3 + $0x88] sm:$0xf0]  ;;  %v13948_v38 = vld [vmem:[#allocation3 + $0x104] sm:$0xf] }
 0x72a   :  { %v13102_v44 = vld [vmem:[#allocation3 + $0x118] sm:$0xf0]  ;;  %v13966_v63 = vld [vmem:[#allocation3 + $0x194] sm:$0xf]  ;;  %v13984_v10 = vld [vmem:[#allocation3 + $0x224] sm:$0xf] }
 0x72b   :  { %10576 = vmatpush.bf16.msra.mxu2 %v13229_v7  ;;  %10603 = vmatpush.bf16.msra.mxu0 %v13365_v54  ;;  %v13209_v7 = vor.u32 %v13976_v53, %v13206_v59  ;;  %v13281_v54 = vor.u32 %v13994_v16, %v13278_v27  ;;  %v13246_v53 = vld [vmem:[#allocation3 + $0x238] sm:$0xf0]  ;;  %v13041_v59 = vor.u32 %v13934_v6, %v13038_v62  ;;  %v13238_v13 = vld [vmem:[#allocation3 + $0x228] sm:$0xf0]  ;;  %v14024_v36 = vld [vmem:[#allocation3 + $0x364] sm:$0xf] }
 0x72c   :  { %10590 = vmatpush.bf16.msrb.mxu3 %v13293_v22  ;;  %v16178_v22 = vld [vmem:[#allocation27_spill] sm:$0xff]  ;;  %v13342_v33 = vld [vmem:[#allocation3 + $0x2f8] sm:$0xf0]  ;;  %v13241_v32 = vor.u32 %v13984_v10, %v13238_v13  ;;  %v14006_v9 = vld [vmem:[#allocation3 + $0x2d4] sm:$0xf]  ;;  %s10761_s5 = sshll.u32 %s14254_s28, 4  ;;  %s10762_s5 = int_to_ptr.vmem [resolvable:$true] %s10761_s5 }
 0x72d   :  { %10617 = vmatpush.bf16.msra.mxu1 %v12985_v4  ;;  %10728 = vperm.xlu0 %14085, %v16178_v22   ;;  %v13952_v4 = vld [vmem:[#allocation3 + $0x124] sm:$0xf]  ;;  %v13406_v55 = vld [vmem:[#allocation3 + $0x378] sm:$0xf0]  ;;  %v14002_v62 = vld [vmem:[#allocation3 + $0x2b4] sm:$0xf] }
 0x72e   :  { %v14020_v6 = vld [vmem:[#allocation3 + $0x344] sm:$0xf]  ;;  %s14255_s6 = smov [#allocation12]   ;;  %s10774_s12 = sshll.u32 %s16107_s11, 4  ;;  %vm10754_vm10 = vcmask 0   ;;  %s10775_s12 = int_to_ptr.hbm [resolvable:$true] %s10774_s12 }
 0x72f   :  { %10577 = vmatpush.bf16.msra.mxu2 %v13221_v51  ;;  %10604 = vmatpush.bf16.msra.mxu0 %v13357_v8  ;;  %v13118_v51 = vld [vmem:[#allocation3 + $0x138] sm:$0xf0]  ;;  %v13990_v8 = vld [vmem:[#allocation3 + $0x254] sm:$0xf]  ;;  %s10772_s30 = sshll.u32 %s14255_s6, 4  ;;  %s10773_s30 = int_to_ptr.vmem [resolvable:$true] %s10772_s30 }
 0x730   :  { %10591 = vmatpush.bf16.msrb.mxu3 %v13285_v42  ;;  %v13262_v42 = vld [vmem:[#allocation3 + $0x258] sm:$0xf0]  ;;  %v13121_v60 = vor.u32 %v13954_v5, %v13118_v51  ;;  %v13398_v5 = vld [vmem:[#allocation3 + $0x368] sm:$0xf0]  ;;  %v13982_v51 = vld [vmem:[#allocation3 + $0x214] sm:$0xf] }
 0x731   :  { %10618 = vmatpush.bf16.msra.mxu1 %v12977_v52  ;;  %v13265_v39 = vor.u32 %v13990_v8, %v13262_v42  ;;  %v13986_v52 = vld [vmem:[#allocation3 + $0x234] sm:$0xf] }
 0x732   :  { %10578 = vmatmul.bf16.vlgmr.msra.gmra.mxu2 %v16059_v34  ;;  %v13249_v37 = vor.u32 %v13986_v52, %v13246_v53  ;;  %v13302_v52 = vld [vmem:[#allocation3 + $0x2a8] sm:$0xf0]  ;;  %v14016_v53 = vld [vmem:[#allocation3 + $0x324] sm:$0xf] }
 0x733   :  { %10626 = vmatpush.bf16.msrb.mxu2 %v13089_v41  ;;  %10592 = vmatmul.bf16.vlgmr.msrb.gmra.mxu3 %v16065_v49  ;;  %v13057_v41 = vor.u32 %v13938_v19, %v13054_v30  ;;  %v13158_v19 = vld [vmem:[#allocation3 + $0x188] sm:$0xf0] }
 0x734   :  { %10640 = vmatpush.bf16.msra.mxu3 %v13153_v58  ;;  %10605 = vmatpush.bf16.msra.mxu0 %v13349_v23  ;;  %v13970_v58 = vld [vmem:[#allocation3 + $0x1b4] sm:$0xf]  ;;  %v13334_v30 = vld [vmem:[#allocation3 + $0x2e8] sm:$0xf0] }
 0x735   :  { %10619 = vmatpush.bf16.msra.mxu1 %v12969_v46  ;;  %v13185_v23 = vor.u32 %v13970_v58, %v13182_v48  ;;  %v14026_v46 = vld [vmem:[#allocation3 + $0x374] sm:$0xf]  ;;  %v13390_v58 = vld [vmem:[#allocation3 + $0x358] sm:$0xf0]  ;;  %v13980_v48 = vld [vmem:[#allocation3 + $0x204] sm:$0xf] }
 0x737   :  { %10627 = vmatpush.bf16.msrb.mxu2 %v13081_v26  ;;  %10606 = vmatmul.bf16.vlgmr.msra.gmra.mxu0 %v16072_v25  ;;  %v13113_v26 = vor.u32 %v13952_v4, %v13110_v11  ;;  %v13222_v4 = vld [vmem:[#allocation3 + $0x208] sm:$0xf0] }
 0x738   :  { %10654 = vmatpush.bf16.msrb.mxu0 %v13217_v31  ;;  %10641 = vmatpush.bf16.msra.mxu3 %v13145_v57  ;;  %v13174_v31 = vld [vmem:[#allocation3 + $0x1a8] sm:$0xf0]  ;;  %v13950_v57 = vld [vmem:[#allocation3 + $0x114] sm:$0xf] }
 0x739   :  { %10668 = vmatpush.bf16.msrb.mxu1 %v13281_v54  ;;  %v13177_v16 = vor.u32 %v13968_v3, %v13174_v31  ;;  %v13105_v27 = vor.u32 %v13950_v57, %v13102_v44  ;;  %v13033_v54 = vor.u32 %v13932_v0, %v13030_v61  ;;  %v14018_v3 = vld [vmem:[#allocation3 + $0x334] sm:$0xf]  ;;  %v13374_v31 = vld [vmem:[#allocation3 + $0x338] sm:$0xf0] }
 0x73a   :  { %10620 = vmatmul.bf16.vlgmr.msra.gmra.mxu1 %v16030_v15  ;;  %v13257_v15 = vor.u32 %v13988_v20, %v13254_v35  ;;  %v14004_v20 = vld [vmem:[#allocation3 + $0x2c4] sm:$0xf]  ;;  %v13318_v35 = vld [vmem:[#allocation3 + $0x2c8] sm:$0xf0]  ;;  %v13377_v44 = vor.u32 %v14018_v3, %v13374_v31  ;;  %v13998_v61 = vld [vmem:[#allocation3 + $0x294] sm:$0xf] }
 0x73b   :  { %10628 = vmatpush.bf16.msrb.mxu2 %v13073_v43  ;;  %v13094_v43 = vld [vmem:[#allocation3 + $0x108] sm:$0xf0] }
 0x73c   :  { %10655 = vmatpush.bf16.msrb.mxu0 %v13209_v7  ;;  %10642 = vmatpush.bf16.msra.mxu3 %v13137_v28  ;;  %v13166_v7 = vld [vmem:[#allocation3 + $0x198] sm:$0xf0]  ;;  %v14010_v28 = vld [vmem:[#allocation3 + $0x2f4] sm:$0xf]  ;;  %v13097_v17 = vor.u32 %v13948_v38, %v13094_v43 }
 0x73d   :  { %10669 = vmatpush.bf16.msrb.mxu1 %v13273_v21  ;;  %v13169_v22 = vor.u32 %v13966_v63, %v13166_v7  ;;  %v13345_v29 = vor.u32 %v14010_v28, %v13342_v33  ;;  %v13230_v21 = vld [vmem:[#allocation3 + $0x218] sm:$0xf0]  ;;  %v13996_v7 = vld [vmem:[#allocation3 + $0x284] sm:$0xf]  ;;  %v13350_v33 = vld [vmem:[#allocation3 + $0x308] sm:$0xf0] }
 0x73e   :  { %v13233_v45 = vor.u32 %v13982_v51, %v13230_v21  ;;  %v13294_v38 = vld [vmem:[#allocation3 + $0x298] sm:$0xf0]  ;;  %v14012_v28 = vld [vmem:[#allocation3 + $0x304] sm:$0xf] }
 0x73f   :  { %10629 = vmatpush.bf16.msrb.mxu2 %v13065_v18  ;;  %v13964_v18 = vld [vmem:[#allocation3 + $0x184] sm:$0xf]  ;;  %v13297_v43 = vor.u32 %v13998_v61, %v13294_v38 }
 0x740   :  { %10656 = vmatpush.bf16.msrb.mxu0 %v13201_v2  ;;  %10643 = vmatpush.bf16.msra.mxu3 %v13129_v40  ;;  %v13409_v2 = vor.u32 %v14026_v46, %v13406_v55  ;;  %v14008_v40 = vld [vmem:[#allocation3 + $0x2e4] sm:$0xf]  ;;  %v13161_v8 = vor.u32 %v13964_v18, %v13158_v19  ;;  %v9952_v55 = vperm.slane %v16174_v14, 7 }
 0x741   :  { %10670 = vmatpush.bf16.msrb.mxu1 %v13265_v39  ;;  %v13337_v42 = vor.u32 %v14008_v40, %v13334_v30 }
 0x743   :  { %10630 = vmatpush.bf16.msrb.mxu2 %v13057_v41  ;;  %v13401_v41 = vor.u32 %v14024_v36, %v13398_v5 }
 0x744   :  { %10657 = vmatpush.bf16.msrb.mxu0 %v13193_v56  ;;  %10644 = vmatpush.bf16.msra.mxu3 %v13121_v60  ;;  %v13326_v56 = vld [vmem:[#allocation3 + $0x2d8] sm:$0xf0]  ;;  %v14022_v60 = vld [vmem:[#allocation3 + $0x354] sm:$0xf] }
 0x745   :  { %10671 = vmatpush.bf16.msrb.mxu1 %v13257_v15  ;;  %v13329_v11 = vor.u32 %v14006_v9, %v13326_v56  ;;  %v13393_v39 = vor.u32 %v14022_v60, %v13390_v58  ;;  %v14000_v15 = vld [vmem:[#allocation3 + $0x2a4] sm:$0xf] }
 0x747   :  { %10631 = vmatpush.bf16.msrb.mxu2 %v13049_v24  ;;  %v13225_v24 = vor.u32 %v13980_v48, %v13222_v4 }
 0x748   :  { %10658 = vmatpush.bf16.msrb.mxu0 %v13185_v23  ;;  %10645 = vmatpush.bf16.msra.mxu3 %v13113_v26  ;;  %v13382_v23 = vld [vmem:[#allocation3 + $0x348] sm:$0xf0] }
 0x749   :  { %10672 = vmatpush.bf16.msrb.mxu1 %v13249_v37  ;;  %v13385_v26 = vor.u32 %v14020_v6, %v13382_v23  ;;  %v13353_v37 = vor.u32 %v14012_v28, %v13350_v33 }
 0x74b   :  { %10632 = vmatpush.bf16.msrb.mxu2 %v13041_v59  ;;  %v13366_v59 = vld [vmem:[#allocation3 + $0x328] sm:$0xf0] }
 0x74c   :  { %10659 = vmatpush.bf16.msrb.mxu0 %v13177_v16  ;;  %10646 = vmatpush.bf16.msra.mxu3 %v13105_v27  ;;  %v13369_v0 = vor.u32 %v14016_v53, %v13366_v59  ;;  %v14014_v16 = vld [vmem:[#allocation3 + $0x314] sm:$0xf]  ;;  %v13358_v27 = vld [vmem:[#allocation3 + $0x318] sm:$0xf0] }
 0x74d   :  { %10673 = vmatpush.bf16.msrb.mxu1 %v13241_v32  ;;  %v13361_v63 = vor.u32 %v14014_v16, %v13358_v27 }
 0x74f   :  { %10633 = vmatpush.bf16.msrb.mxu2 %v13033_v54 }
 0x750   :  { %10660 = vmatpush.bf16.msrb.mxu0 %v13169_v22  ;;  %10647 = vmatpush.bf16.msra.mxu3 %v13097_v17 }
 0x751   :  { %10674 = vmatpush.bf16.msrb.mxu1 %v13233_v45  ;;  %v9953_v45 = vperm.slane %v14467_v47, 7 }
 0x752   :  { %10634 = vmatmul.bf16.vlgmr.msrb.gmra.mxu2 %v16036_v50  ;;  %v13321_v50 = vor.u32 %v14004_v20, %v13318_v35 }
 0x753   :  { %10682 = vmatpush.bf16.msra.mxu2 %v13345_v29  ;;  %10648 = vmatmul.bf16.vlgmr.msra.gmra.mxu3 %v16043_v1  ;;  %v13310_v1 = vld [vmem:[#allocation3 + $0x2b8] sm:$0xf0] }
 0x754   :  { %10696 = vmatpush.bf16.msrb.mxu3 %v13409_v2  ;;  %10661 = vmatpush.bf16.msrb.mxu0 %v13161_v8  ;;  %v13313_v57 = vor.u32 %v14002_v62, %v13310_v1 }
 0x755   :  { %10675 = vmatpush.bf16.msrb.mxu1 %v13225_v24 }
 0x757   :  { %10683 = vmatpush.bf16.msra.mxu2 %v13337_v42  ;;  %10662 = vmatmul.bf16.vlgmr.msrb.gmra.mxu0 %v16051_v12  ;;  %v13305_v12 = vor.u32 %v14000_v15, %v13302_v52 }
 0x758   :  { %10697 = vmatpush.bf16.msrb.mxu3 %v13401_v41  ;;  %10676 = vmatmul.bf16.vlgmr.msrb.gmra.mxu1 %v16059_v34  ;;  %v13286_v34 = vld [vmem:[#allocation3 + $0x288] sm:$0xf0] }
 0x759   :  { %v13289_v46 = vor.u32 %v13996_v7, %v13286_v34  ;;  %v16181_v34 = vld [vmem:[#allocation28_spill] sm:$0xff] }
 0x75b   :  { %10684 = vmatpush.bf16.msra.mxu2 %v13329_v11 }
 0x75c   :  { %10698 = vmatpush.bf16.msrb.mxu3 %v13393_v39 }
 0x75f   :  { %10685 = vmatpush.bf16.msra.mxu2 %v13321_v50 }
 0x760   :  { %10699 = vmatpush.bf16.msrb.mxu3 %v13385_v26 }
 0x763   :  { %10686 = vmatpush.bf16.msra.mxu2 %v13313_v57 }
 0x764   :  { %10700 = vmatpush.bf16.msrb.mxu3 %v13377_v44 }
 0x767   :  { %10687 = vmatpush.bf16.msra.mxu2 %v13305_v12 }
 0x768   :  { %10701 = vmatpush.bf16.msrb.mxu3 %v13369_v0  ;;  %v16179_v0 = vld [vmem:[#allocation30_spill] sm:$0xff] }
 0x76b   :  { %10688 = vmatpush.bf16.msra.mxu2 %v13297_v43  ;;  %v16180_v43 = vld [vmem:[#allocation31_spill] sm:$0xff] }
 0x76c   :  { %10702 = vmatpush.bf16.msrb.mxu3 %v13361_v63 }
 0x76f   :  { %10689 = vmatpush.bf16.msra.mxu2 %v13289_v46 }
 0x770   :  { %10703 = vmatpush.bf16.msrb.mxu3 %v13353_v37 }
 0x772   :  { %10690 = vmatmul.bf16.vlgmr.msra.gmra.mxu2 %v16065_v49 }
 0x773   :  { %10704 = vmatmul.bf16.vlgmr.msrb.gmra.mxu3 %v16072_v25 }
 0x793   :  { %v10551_v17 = vpop.f32.mrf.mxu0 }
 0x795   :  { %v10523_v10 = vpop.f32.mrf.mxu2  ;;  %v10565_v40 = vpop.f32.mrf.mxu1 }
 0x796   :  { %v10524_v13 = vadd.f32 %v10523_v10, %v9952_v55 }
 0x797   :  { %v10725_v57 = vpop.permute.xlu0 %10724 }
 0x798   :  { %v10537_v54 = vpop.f32.mrf.mxu3 }
 0x799   :  { %v10538_v22 = vadd.f32 %v10537_v54, %v10524_v13 }
 0x79b   :  { %v10552_v29 = vadd.f32 %v10551_v17, %v10538_v22  ;;  %v10553_v19 = vpop.f32.mrf.mxu0 }
 0x79d   :  { %v10525_v18 = vpop.f32.mrf.mxu2  ;;  %v10567_v21 = vpop.f32.mrf.mxu1  ;;  %v10566_v39 = vadd.f32 %v10565_v40, %v10552_v29 }
 0x79e   :  { %v10526_v30 = vadd.f32 %v10525_v18, %v9952_v55  ;;  %v16182_v18 = vld [vmem:[#allocation29_spill] sm:$0xff] }
 0x79f   :  { %v10729_v37 = vpop.permute.xlu0 %10728 }
 0x7a0   :  { %v10539_v2 = vpop.f32.mrf.mxu3 }
 0x7a1   :  { %v10540_v36 = vadd.f32 %v10539_v2, %v10526_v30 }
 0x7a3   :  { %v10554_v49 = vadd.f32 %v10553_v19, %v10540_v36 }
 0x7a5   :  { %v10568_v25 = vadd.f32 %v10567_v21, %v10554_v49 }
 0x7b4   :  { %v10607_v5 = vpop.f32.mrf.mxu0 }
 0x7b5   :  { %v10579_v32 = vpop.f32.mrf.mxu2 }
 0x7b6   :  { %v10593_v51 = vpop.f32.mrf.mxu3  ;;  %v10580_v24 = vadd.f32 %v10579_v32, %v10566_v39 }
 0x7b7   :  { %v10621_v60 = vpop.f32.mrf.mxu1 }
 0x7b8   :  { %v10622_v48 = vadd.f32 %v10621_v60, %v9953_v45  ;;  %v10594_v1 = vadd.f32 %v10593_v51, %v10580_v24 }
 0x7ba   :  { %v10608_v44 = vadd.f32 %v10607_v5, %v10594_v1 }
 0x7bc   :  { %v10609_v41 = vpop.f32.mrf.mxu0  ;;  %v10718_v61 = vsub.f32 %v10608_v44, %v16179_v0 }
 0x7bd   :  { %v10581_v8 = vpop.f32.mrf.mxu2 }
 0x7be   :  { %v10582_v14 = vadd.f32 %v10581_v8, %v10568_v25  ;;  %v10595_v42 = vpop.f32.mrf.mxu3  ;;  %v10731_v7 = vmul.f32 %v10725_v57, %v10718_v61 }
 0x7bf   :  { %v10623_v11 = vpop.f32.mrf.mxu1 }
 0x7c0   :  { %v10596_v9 = vadd.f32 %v10595_v42, %v10582_v14  ;;  %v10624_v6 = vadd.f32 %v10623_v11, %v9953_v45  ;;  %v10735_v22 = vmul.f32 %v10731_v7, %v10718_v61 }
 0x7c2   :  { %v10610_v56 = vadd.f32 %v10609_v41, %v10596_v9  ;;  %v10722_v9 = vld [vmem:[#allocation5] sm:$0x1] }
 0x7c4   :  { %10712 = vst.sshfl [vmem:[#allocation1] sm:$0xff pattern:$0x73625140] %v10610_v56  ;;  %v10720_v28 = vsub.f32 %v10610_v56, %v16181_v34 }
 0x7c6   :  { %v10733_v17 = vmul.f32 %v10729_v37, %v10720_v28 }
 0x7c8   :  { %v10737_v40 = vmul.f32 %v10733_v17, %v10720_v28 }
 0x7d4   :  { %v10663_v35 = vpop.f32.mrf.mxu0 }
 0x7d5   :  { %v10635_v58 = vpop.f32.mrf.mxu2  ;;  %v10677_v62 = vpop.f32.mrf.mxu1 }
 0x7d6   :  { %v10649_v4 = vpop.f32.mrf.mxu3  ;;  %v10636_v20 = vadd.f32 %v10635_v58, %v10622_v48 }
 0x7d8   :  { %v10650_v23 = vadd.f32 %v10649_v4, %v10636_v20 }
 0x7da   :  { %v10664_v3 = vadd.f32 %v10663_v35, %v10650_v23 }
 0x7dc   :  { %v10678_v15 = vadd.f32 %v10677_v62, %v10664_v3  ;;  %v10665_v52 = vpop.f32.mrf.mxu0 }
 0x7dd   :  { %v10637_v50 = vpop.f32.mrf.mxu2  ;;  %v10679_v27 = vpop.f32.mrf.mxu1 }
 0x7de   :  { %v10651_v26 = vpop.f32.mrf.mxu3  ;;  %v10638_v31 = vadd.f32 %v10637_v50, %v10624_v6 }
 0x7e0   :  { %v10652_v47 = vadd.f32 %v10651_v26, %v10638_v31 }
 0x7e2   :  { %v10666_v38 = vadd.f32 %v10665_v52, %v10652_v47 }
 0x7e4   :  { %v10680_v33 = vadd.f32 %v10679_v27, %v10666_v38 }
 0x7f5   :  { %v10691_v53 = vpop.f32.mrf.mxu2 }
 0x7f6   :  { %v10692_v59 = vadd.f32 %v10691_v53, %v10678_v15  ;;  %v10705_v12 = vpop.f32.mrf.mxu3 }
 0x7f8   :  { %v10706_v16 = vadd.f32 %v10705_v12, %v10692_v59 }
 0x7fa   :  { %v10719_v63 = vsub.f32 %v10706_v16, %v16180_v43 }
 0x7fc   :  { %v10732_v46 = vmul.f32 %v10725_v57, %v10719_v63 }
 0x7fd   :  { %v10693_v55 = vpop.f32.mrf.mxu2 }
 0x7fe   :  { %v10736_v10 = vmul.f32 %v10732_v46, %v10719_v63  ;;  %v10694_v13 = vadd.f32 %v10693_v55, %v10680_v33  ;;  %v10707_v54 = vpop.f32.mrf.mxu3 }
 0x800   :  { %v10708_v29 = vadd.f32 %v10707_v54, %v10694_v13  ;;  %v10739_v2 = vadd.f32 %v10736_v10, %v10735_v22 }
 0x802   :  { %10713 = vst.sshfl [vmem:[#allocation1 + $0x8] sm:$0xff pattern:$0x73625140] %v10708_v29  ;;  %v10721_v19 = vsub.f32 %v10708_v29, %v16182_v18  ;;  %v10740_v32 = vadd.f32 %v10739_v2, %v10737_v40 }
 0x804   :  { %v10734_v30 = vmul.f32 %v10729_v37, %v10721_v19 }
 0x806   :  { %v10738_v36 = vmul.f32 %v10734_v30, %v10721_v19 }
 0x808   :  { %v10741_v5 = vadd.f32 %v10740_v32, %v10738_v36 }
 0x809   :  { %v10715_v51 = vld [vmem:[#allocation1 + $0x3] ss:$4 sm:$0xff] }
 0x80a   :  { %10742 = vadd.xlane.f32.xlu1 %v10741_v5  ;;  %10717 = vst [vmem:[#allocation11] sm:$0xf] %v10715_v51 }
 0x80b   :  { %10766 = dma.vmem_to_hbm [thread:$0]  %s10762_s5, 64, %s10764_s27, [#allocation8]  }
 0x87d   :  { %v10743_v49 = vpop.xlane.xlu1 %10742 }
 0x87e   :  { %v10744_v21 = vrot.slane %v10743_v49, 4 }
 0x880   :  { %v10745_v25 = vadd.f32 %v10744_v21, %v10743_v49 }
 0x882   :  { %v10746_v8 = vrot.slane %v10745_v25, 2 }
 0x884   :  { %v10747_v14 = vadd.f32 %v10746_v8, %v10745_v25 }
 0x886   :  { %v10748_v42 = vrot.slane %v10747_v14, 1 }
 0x888   :  { %v10749_v41 = vadd.f32 %v10748_v42, %v10747_v14 }
 0x88a   :  { %14028 = vpush %v10749_v41 }
 0x8bb   :  { %s14029_s29 = spop %14028 }
 0x8bc   :  { %v10751_v56 = vstv %s14029_s29 }
 0x8bd   :  { %v10752_v60 = vmul.f32 0.001953125, %v10751_v56 }
 0x8bf   :  { %v10753_v45 = vadd.f32 %v10752_v60, %v10722_v9 }
 0x8c1   :  { %10755 = vst.msk [vmem:[#allocation12] sm:$0x1] %vm10754_vm10, %v10753_v45 }
 0x8c2   :  { %10777 = dma.vmem_to_hbm [thread:$0]  %s10773_s30, 16, %s10775_s12, [#allocation13]  }
 0x8c3   :  { %14238 = dma.done.wait [#allocation8], 64  }
 0x8c4   :  { %14239 = vsyncadd [#allocation8], 4294967232 }
 0x8c5   :  { %14240 = dma.done.wait [#allocation13], 16  }
 0x8c6   :  { %14241 = vsyncadd [#allocation13], 4294967280 }
 0x8c7   :  { %10786 = vsyncpa [#allocation7], 1 }
 0x8c8   :  { %10787 = vsyncpa [#allocation10], 1 }
 0x8c9   :  { %10788 = vsyncpa [#allocation8], 1 }
 0x8ca   :  { %10789 = vsyncpa [#allocation13], 1 }
 0x8cb   :  { %10790 = vsyncmov [#allocation4] }
 0x8ce   :  { %s10791_s4 = vpop.sfrf %10790 }
 0x8cf   :  { %p13410_p0 = scmp.ne.s32.totalorder %s10791_s4, 0 }
 0x8d1   :  { %10795 = shalt.err (%p13410_p0)  }
 0x8d2   :  { %10797 = vsyncmov [#allocation4 + $0x1] }
 0x8d5   :  { %s10798_s11 = vpop.sfrf %10797 }
 0x8d6   :  { %p13411_p1 = scmp.ne.s32.totalorder %s10798_s11, 0 }
 0x8d8   :  { %10802 = shalt.err (%p13411_p1)  }

</bundles_post_ra>
